<compile_context>
chip_gen: v5e
topology: v5e:2x2
jax: 0.10.0
libtpu: 0.0.40
codegen_flags: <defaults>
</compile_context>

<pallas_src>
import functools
import math

import jax
import jax.numpy as jnp
from jax import lax
from jax.experimental import pallas as pl
from jax.experimental.pallas import tpu as pltpu


# ----------------------------------------------------------------------------- #
# Fused decoder-layer kernel
# ----------------------------------------------------------------------------- #
def _decoder_layer_kernel(
        # per-step activation slabs (rows flattened across NB batches)
        tgt_ref, mem_ref, qpos_ref, pos_ref,
        # self-attention params (lane-dense; softmax scale folded into wq/bq)
        wq1_ref, wk1_ref, wv1_ref, wo1_ref, bq1_ref, bk1_ref, bv1_ref, bo1_ref,
        # cross-attention params
        wq2_ref, wk2_ref, wv2_ref, wo2_ref, bq2_ref, bk2_ref, bv2_ref, bo2_ref,
        # FFN + layer norms
        w1_ref, b1_ref, w2_ref, b2_ref, lng_ref, lnb_ref,
        # output slab (NB*T, d)
        out_ref,
        *, nb, nhead, compute_dtype):
    f32 = jnp.float32
    cd = compute_dtype

    tgt = tgt_ref[...].astype(f32)     # (NB*T, d)
    mem = mem_ref[...].astype(f32)     # (NB*S, d)
    qpos = qpos_ref[...].astype(f32)   # (NB*T, d)
    pos = pos_ref[...].astype(f32)     # (NB*S, d)

    def attention(q_in, k_in, v_in, wq, wk, wv, wo, bq, bk, bv, bo):
        """MHA on flattened row slabs: q_in (NB*Lq, d), k_in/v_in (NB*Lk, d)."""
        rows_q, d = q_in.shape
        rows_k = k_in.shape[0]
        lq = rows_q // nb
        lk = rows_k // nb
        dh = d // nhead

        # Dense, lane-wide in-projections: full-d contraction and output width.
        q = jnp.dot(q_in.astype(cd), wq[...], preferred_element_type=f32) + bq[...]
        k = jnp.dot(k_in.astype(cd), wk[...], preferred_element_type=f32) + bk[...]
        v = jnp.dot(v_in.astype(cd), wv[...], preferred_element_type=f32) + bv[...]
        q = q.reshape(nb, lq, d)
        k = k.reshape(nb, lk, d)
        v = v.reshape(nb, lk, d)

        heads = []
        for h in range(nhead):          # static loop over heads (nhead is small)
            sl = slice(h * dh, (h + 1) * dh)
            s = jnp.einsum('bqd,bkd->bqk', q[:, :, sl].astype(cd),
                           k[:, :, sl].astype(cd),
                           preferred_element_type=f32)              # (nb, lq, lk)
            s = s - jnp.max(s, axis=-1, keepdims=True)
            p = jnp.exp(s)
            # Softmax denominator via the EUP approximate reciprocal (free slot).
            p = p * pl.reciprocal(jnp.sum(p, axis=-1, keepdims=True), approx=True)
            heads.append(jnp.einsum('bqk,bkd->bqd', p.astype(cd),
                                    v[:, :, sl].astype(cd),
                                    preferred_element_type=f32))     # (nb, lq, dh)
        # Concatenate heads -> (rows, d), then ONE dense out-projection
        # (contraction = d, near-full MXU) instead of nhead dh-contractions.
        o = jnp.concatenate(heads, axis=-1).reshape(rows_q, d)
        return jnp.dot(o.astype(cd), wo[...], preferred_element_type=f32) + bo[...]

    def layer_norm(x, idx, eps=1e-5):
        g = lng_ref[idx:idx + 1, :]
        b = lnb_ref[idx:idx + 1, :]
        mu = jnp.mean(x, axis=-1, keepdims=True)
        xc = x - mu
        var = jnp.mean(xc * xc, axis=-1, keepdims=True)
        return xc * lax.rsqrt(var + eps) * g + b

    # ---- self-attention block (q = k = tgt + query_pos, v = tgt) ----
    qk_in = tgt + qpos
    sa = attention(qk_in, qk_in, tgt,
                   wq1_ref, wk1_ref, wv1_ref, wo1_ref,
                   bq1_ref, bk1_ref, bv1_ref, bo1_ref)
    x = layer_norm(tgt + sa, 0)

    # ---- cross-attention block (q = x + query_pos, k = memory + pos, v = memory) ----
    ca = attention(x + qpos, mem + pos, mem,
                   wq2_ref, wk2_ref, wv2_ref, wo2_ref,
                   bq2_ref, bk2_ref, bv2_ref, bo2_ref)
    x = layer_norm(x + ca, 1)

    # ---- feed-forward block: linear2(relu(linear1(x))) ----
    # TODO(synk): gelu/glu activation variants not implemented (default is relu).
    h = jnp.dot(x.astype(cd), w1_ref[...], preferred_element_type=f32) + b1_ref[...]
    h = jnp.maximum(h, 0.0)
    y = jnp.dot(h.astype(cd), w2_ref[...], preferred_element_type=f32) + b2_ref[...]
    x = layer_norm(x + y, 2)

    out_ref[...] = x.astype(out_ref.dtype)


# ----------------------------------------------------------------------------- #
# Host wrapper
# ----------------------------------------------------------------------------- #
def _default_batch_block(n, t, s):
    """Largest batch block that (a) divides N, (b) keeps >= 2 grid steps when
    N >= 2 (v7x: 2 TensorCores share the 'parallel' batch axis), (c) keeps the
    per-step query-row count around <= 128, (d) keeps rows 8-sublane aligned."""
    best = 1
    for cand in range(1, n + 1):
        if n % cand:
            continue
        if n >= 2 and n // cand < 2:
            continue
        if cand * t > 128:
            continue
        if cand != n and ((cand * t) % 8 or (cand * s) % 8):
            continue
        best = cand
    return best


def decoder_layer_forward(kernel_params, tgt, memory, query_pos, pos, *,
                          nhead, batch_block=None, weight_buffer_count=None):
    """Batch-first layout: tgt/query_pos (N, T, d), memory/pos (N, S, d)."""
    N, T, d = tgt.shape
    S = memory.shape[1]
    dff = kernel_params[16].shape[1]     # w1: (d, dff)

    NB = batch_block if batch_block is not None else _default_batch_block(N, T, S)
    assert N % NB == 0, (N, NB)
    assert NB == N or ((NB * T) % 8 == 0 and (NB * S) % 8 == 0), (
        "batch block must keep per-step row counts 8-aligned")
    grid = (N // NB,)

    # Flatten rows host-side (free, contiguous reshape) so every block is a
    # dense 2-D (rows, d) slab -> sublane-dense loads and a dense output store.
    tgt2 = tgt.reshape(N * T, d)
    qpos2 = query_pos.reshape(N * T, d)
    mem2 = memory.reshape(N * S, d)
    pos2 = pos.reshape(N * S, d)

    def row_spec(rows):
        return pl.BlockSpec((rows, d), lambda b: (b, 0))

    wkw = {}
    if weight_buffer_count is not None:
        # Weight block indices never change; single-buffering (pl.Buffered(1))
        # halves resident-weight VMEM on v7x for large production weights.
        wkw["pipeline_mode"] = pl.Buffered(weight_buffer_count)

    def weight_spec(w):
        return pl.BlockSpec(w.shape, lambda b: (0, 0), **wkw)

    in_specs = ([row_spec(NB * T), row_spec(NB * S),
                 row_spec(NB * T), row_spec(NB * S)]
                + [weight_spec(w) for w in kernel_params])
    out_spec = row_spec(NB * T)

    # ---- advisory cost estimate (helps XLA overlap neighbours) ----
    flops_per_batch = (
        4 * 2 * T * d * d          # self-attn q,k,v,out projections
        + 2 * 2 * T * T * d        # self-attn scores + p@v
        + 2 * 2 * T * d * d        # cross-attn q + out projections
        + 2 * 2 * S * d * d        # cross-attn k,v projections
        + 2 * 2 * T * S * d        # cross-attn scores + p@v
        + 2 * 2 * T * d * dff)     # FFN
    transcendentals = N * (nhead * (T * T + T * S) + 3 * T)
    data_args = (tgt2, mem2, qpos2, pos2)
    bytes_accessed = sum(int(x.size) * x.dtype.itemsize
                         for x in data_args + tuple(kernel_params))
    bytes_accessed += int(tgt2.size) * tgt2.dtype.itemsize   # output

    # ---- explicit VMEM budget (v7x has 64 MiB physical VMEM) ----
    act_itemsize = tgt.dtype.itemsize
    weight_bytes = sum(int(w.size) * w.dtype.itemsize for w in kernel_params)
    wbuf = 2 if weight_buffer_count is None else max(int(weight_buffer_count), 1)
    block_bytes = (2 * NB * T + 2 * NB * S + NB * T) * d * act_itemsize
    interm_bytes = 4 * NB * (3 * (T + S) * d + nhead * T * max(S, T)
                             + T * dff + 8 * T * d)
    est = wbuf * weight_bytes + 2 * block_bytes + interm_bytes
    vmem_limit = int(min(max(2 * est, 32 << 20), 64 << 20))

    out2 = pl.pallas_call(
        functools.partial(_decoder_layer_kernel, nb=NB, nhead=nhead,
                          compute_dtype=kernel_params[0].dtype),
        out_shape=jax.ShapeDtypeStruct((N * T, d), tgt.dtype),
        grid_spec=pltpu.PrefetchScalarGridSpec(
            num_scalar_prefetch=0,
            grid=grid,
            in_specs=in_specs,
            out_specs=out_spec),
        compiler_params=pltpu.CompilerParams(
            dimension_semantics=("parallel",),
            vmem_limit_bytes=vmem_limit),
        cost_estimate=pl.CostEstimate(
            flops=int(N * flops_per_batch),
            transcendentals=int(transcendentals),
            bytes_accessed=int(bytes_accessed)),
    )(tgt2, mem2, qpos2, pos2, *kernel_params)
    return out2.reshape(N, T, d)


# ----------------------------------------------------------------------------- #
# Parameters (torch-equivalent flat layout) + kernel packing (lane-dense)
# ----------------------------------------------------------------------------- #
def init_params(key, d_model, nhead, dim_feedforward, dtype=jnp.float32):
    """Flat params with x @ W + b semantics (== torch x @ W_torch.T + b)."""
    del nhead
    ks = list(jax.random.split(key, 26))
    s_attn = 1.0 / math.sqrt(d_model)
    s_ffn1 = 1.0 / math.sqrt(d_model)
    s_ffn2 = 1.0 / math.sqrt(dim_feedforward)

    def w(k, shape, scale):
        return jax.random.normal(k, shape, dtype) * scale

    p = {}
    for i, pref in enumerate(("1", "2")):          # self-attn, cross-attn
        o = i * 8
        p[f"wq{pref}"] = w(ks[o + 0], (d_model, d_model), s_attn)
        p[f"wk{pref}"] = w(ks[o + 1], (d_model, d_model), s_attn)
        p[f"wv{pref}"] = w(ks[o + 2], (d_model, d_model), s_attn)
        p[f"wo{pref}"] = w(ks[o + 3], (d_model, d_model), s_attn)
        p[f"bq{pref}"] = w(ks[o + 4], (d_model,), 0.02)
        p[f"bk{pref}"] = w(ks[o + 5], (d_model,), 0.02)
        p[f"bv{pref}"] = w(ks[o + 6], (d_model,), 0.02)
        p[f"bo{pref}"] = w(ks[o + 7], (d_model,), 0.02)
    p["w1"] = w(ks[16], (d_model, dim_feedforward), s_ffn1)
    p["b1"] = w(ks[17], (dim_feedforward,), 0.02)
    p["w2"] = w(ks[18], (dim_feedforward, d_model), s_ffn2)
    p["b2"] = w(ks[19], (d_model,), 0.02)
    for j in range(3):
        p[f"ln{j + 1}_g"] = 1.0 + 0.1 * jax.random.normal(ks[20 + 2 * j], (d_model,), dtype)
        p[f"ln{j + 1}_b"] = 0.1 * jax.random.normal(ks[21 + 2 * j], (d_model,), dtype)
    return p


def pack_for_kernel(p, nhead, compute_dtype=None):
    """Kernel packing: lane-dense matmul weights ((d,d)/(d,dff)/(dff,d)),
    softmax scale folded into wq/bq, biases & LayerNorm params in f32,
    matmul weights optionally cast to bf16 (compute_dtype) for the MXU."""
    d, dff = p["w1"].shape
    dh = d // nhead
    scale = 1.0 / math.sqrt(dh)
    f32 = jnp.float32
    wd = jnp.dtype(compute_dtype) if compute_dtype is not None else p["w1"].dtype

    def attn(sfx):
        return (
            (p[f"wq{sfx}"] * scale).astype(wd),
            p[f"wk{sfx}"].astype(wd),
            p[f"wv{sfx}"].astype(wd),
            p[f"wo{sfx}"].astype(wd),
            (p[f"bq{sfx}"] * scale).reshape(1, d).astype(f32),
            p[f"bk{sfx}"].reshape(1, d).astype(f32),
            p[f"bv{sfx}"].reshape(1, d).astype(f32),
            p[f"bo{sfx}"].reshape(1, d).astype(f32),
        )

    ffn = (p["w1"].astype(wd), p["b1"].reshape(1, dff).astype(f32),
           p["w2"].astype(wd), p["b2"].reshape(1, d).astype(f32))
    norms = (jnp.stack([p["ln1_g"], p["ln2_g"], p["ln3_g"]], axis=0).astype(f32),
             jnp.stack([p["ln1_b"], p["ln2_b"], p["ln3_b"]], axis=0).astype(f32))
    return attn("1") + attn("2") + ffn + norms


class TransformerDecoderLayerPallas:
    """forward_post of the reference TransformerDecoderLayer (eval mode).

    Layout is batch-first (N, L, d_model); torch uses (L, N, E) — identical
    per-element semantics, chosen to avoid host-side transposes.
    """

    def __init__(self, key, d_model, nhead, dim_feedforward=2048,
                 normalize_before=False, compute_dtype=None,
                 batch_block=None, weight_buffer_count=None):
        assert d_model % nhead == 0
        # TODO(synk): forward_pre (normalize_before=True) path not implemented.
        assert not normalize_before
        self.d_model = d_model
        self.nhead = nhead
        self.batch_block = batch_block
        self.weight_buffer_count = weight_buffer_count
        self.params = init_params(key, d_model, nhead, dim_feedforward)
        self._kernel_params = pack_for_kernel(self.params, nhead, compute_dtype)

    def forward(self, tgt, memory, tgt_mask=None, memory_mask=None,
                tgt_key_padding_mask=None, memory_key_padding_mask=None,
                pos=None, query_pos=None):
        # TODO(synk): attn_mask / key_padding_mask and dropout are unimplemented.
        assert tgt_mask is None and memory_mask is None
        assert tgt_key_padding_mask is None and memory_key_padding_mask is None
        if pos is None:
            pos = jnp.zeros_like(memory)
        if query_pos is None:
            query_pos = jnp.zeros_like(tgt)
        return decoder_layer_forward(
            self._kernel_params, tgt, memory, query_pos, pos,
            nhead=self.nhead, batch_block=self.batch_block,
            weight_buffer_count=self.weight_buffer_count)


# ----------------------------------------------------------------------------- #
# Independent plain-JAX reference (PyTorch forward_post semantics, eval mode)
# ----------------------------------------------------------------------------- #
def _ref_ln(x, g, b, eps=1e-5):
    mu = jnp.mean(x, axis=-1, keepdims=True)
    var = jnp.mean((x - mu) ** 2, axis=-1, keepdims=True)
    return (x - mu) / jnp.sqrt(var + eps) * g + b


def _ref_mha(q_in, k_in, v_in, wq, wk, wv, wo, bq, bk, bv, bo, nhead):
    N, Lq, d = q_in.shape
    Lk = k_in.shape[1]
    dh = d // nhead
    q = (q_in @ wq + bq) / math.sqrt(dh)
    k = k_in @ wk + bk
    v = v_in @ wv + bv
    q = q.reshape(N, Lq, nhead, dh)
    k = k.reshape(N, Lk, nhead, dh)
    v = v.reshape(N, Lk, nhead, dh)
    s = jnp.einsum("nqhd,nkhd->nhqk", q, k)
    a = jax.nn.softmax(s, axis=-1)
    o = jnp.einsum("nhqk,nkhd->nqhd", a, v).reshape(N, Lq, d)
    return o @ wo + bo


def ref_decoder_layer(p, tgt, memory, query_pos, pos, nhead):
    qk = tgt + query_pos
    sa = _ref_mha(qk, qk, tgt, p["wq1"], p["wk1"], p["wv1"], p["wo1"],
                  p["bq1"], p["bk1"], p["bv1"], p["bo1"], nhead)
    x = _ref_ln(tgt + sa, p["ln1_g"], p["ln1_b"])
    ca = _ref_mha(x + query_pos, memory + pos, memory,
                  p["wq2"], p["wk2"], p["wv2"], p["wo2"],
                  p["bq2"], p["bk2"], p["bv2"], p["bo2"], nhead)
    x = _ref_ln(x + ca, p["ln2_g"], p["ln2_b"])
    y = jax.nn.relu(x @ p["w1"] + p["b1"]) @ p["w2"] + p["b2"]
    x = _ref_ln(x + y, p["ln3_g"], p["ln3_b"])
    return x


if __name__ == "__main__":
    # Accurate f32 matmuls for the reference so the check is tight.
    jax.config.update("jax_default_matmul_precision", "float32")

    key = jax.random.PRNGKey(0)
    k_param, k_tgt, k_mem, k_qpos, k_pos = jax.random.split(key, 5)

    # Small, forward-consistent shapes (batch-first).
    N = 4            # batch (-> grid of 2 steps x 2 batches/step by default)
    T = 8            # number of decoder queries (tgt length)
    S = 64           # memory length (e.g. 8x8 spatial tokens)
    d_model = 32
    nhead = 4
    dim_feedforward = 64

    tgt = jax.random.normal(k_tgt, (N, T, d_model), jnp.float32)
    memory = jax.random.normal(k_mem, (N, S, d_model), jnp.float32)
    query_pos = jax.random.normal(k_qpos, (N, T, d_model), jnp.float32)
    pos = jax.random.normal(k_pos, (N, S, d_model), jnp.float32)

    # f32 weights (default): tight check against the f32 reference.
    layer = TransformerDecoderLayerPallas(k_param, d_model, nhead, dim_feedforward)
    out = layer.forward(tgt, memory, pos=pos, query_pos=query_pos)
    jax.block_until_ready(out)

    ref = ref_decoder_layer(layer.params, tgt, memory, query_pos, pos, nhead)
    assert out.shape == (N, T, d_model), out.shape
    max_diff = float(jnp.max(jnp.abs(out - ref)))
    # Tolerance allows for the EUP approximate reciprocal in the softmax.
    assert jnp.allclose(out, ref, atol=1e-2, rtol=1e-2), f"max abs diff {max_diff}"

    # bf16 MXU-operand path (production config): same params, looser tolerance.
    layer_bf16 = TransformerDecoderLayerPallas(
        k_param, d_model, nhead, dim_feedforward, compute_dtype=jnp.bfloat16)
    out_bf16 = layer_bf16.forward(tgt, memory, pos=pos, query_pos=query_pos)
    jax.block_until_ready(out_bf16)
    max_diff_bf16 = float(jnp.max(jnp.abs(out_bf16 - ref)))
    assert jnp.allclose(out_bf16, ref, atol=1e-1, rtol=1e-1), (
        f"max abs diff (bf16) {max_diff_bf16}")

    print("KERNEL_OK")
</pallas_src>

<mosaic_0001>
module attributes {stable_mosaic.version = 11 : i64} {
  func.func @_decoder_layer_kernel(%arg0: i32, %arg1: memref<16x32xf32, #tpu.memory_space<vmem>>, %arg2: memref<128x32xf32, #tpu.memory_space<vmem>>, %arg3: memref<16x32xf32, #tpu.memory_space<vmem>>, %arg4: memref<128x32xf32, #tpu.memory_space<vmem>>, %arg5: memref<32x32xf32, #tpu.memory_space<vmem>>, %arg6: memref<32x32xf32, #tpu.memory_space<vmem>>, %arg7: memref<32x32xf32, #tpu.memory_space<vmem>>, %arg8: memref<32x32xf32, #tpu.memory_space<vmem>>, %arg9: memref<1x32xf32, #tpu.memory_space<vmem>>, %arg10: memref<1x32xf32, #tpu.memory_space<vmem>>, %arg11: memref<1x32xf32, #tpu.memory_space<vmem>>, %arg12: memref<1x32xf32, #tpu.memory_space<vmem>>, %arg13: memref<32x32xf32, #tpu.memory_space<vmem>>, %arg14: memref<32x32xf32, #tpu.memory_space<vmem>>, %arg15: memref<32x32xf32, #tpu.memory_space<vmem>>, %arg16: memref<32x32xf32, #tpu.memory_space<vmem>>, %arg17: memref<1x32xf32, #tpu.memory_space<vmem>>, %arg18: memref<1x32xf32, #tpu.memory_space<vmem>>, %arg19: memref<1x32xf32, #tpu.memory_space<vmem>>, %arg20: memref<1x32xf32, #tpu.memory_space<vmem>>, %arg21: memref<32x64xf32, #tpu.memory_space<vmem>>, %arg22: memref<1x64xf32, #tpu.memory_space<vmem>>, %arg23: memref<64x32xf32, #tpu.memory_space<vmem>>, %arg24: memref<1x32xf32, #tpu.memory_space<vmem>>, %arg25: memref<3x32xf32, #tpu.memory_space<vmem>>, %arg26: memref<3x32xf32, #tpu.memory_space<vmem>>, %arg27: memref<16x32xf32, #tpu.memory_space<vmem>>) attributes {dimension_semantics = [#tpu.dimension_semantics<parallel>], iteration_bounds = array<i64: 2>, scalar_prefetch = 0 : i64, scratch_operands = 0 : i64, tpu.core_type = #tpu.core_type<tc>, window_params = [{transform_indices = @transform_0, window_bounds = array<i64: 16, 32>}, {transform_indices = @transform_1, window_bounds = array<i64: 128, 32>}, {transform_indices = @transform_2, window_bounds = array<i64: 16, 32>}, {transform_indices = @transform_3, window_bounds = array<i64: 128, 32>}, {pipeline_mode = #tpu.pipeline_mode<synchronous>, transform_indices = @transform_4, window_bounds = array<i64: 32, 32>}, {pipeline_mode = #tpu.pipeline_mode<synchronous>, transform_indices = @transform_5, window_bounds = array<i64: 32, 32>}, {pipeline_mode = #tpu.pipeline_mode<synchronous>, transform_indices = @transform_6, window_bounds = array<i64: 32, 32>}, {pipeline_mode = #tpu.pipeline_mode<synchronous>, transform_indices = @transform_7, window_bounds = array<i64: 32, 32>}, {pipeline_mode = #tpu.pipeline_mode<synchronous>, transform_indices = @transform_8, window_bounds = array<i64: 1, 32>}, {pipeline_mode = #tpu.pipeline_mode<synchronous>, transform_indices = @transform_9, window_bounds = array<i64: 1, 32>}, {pipeline_mode = #tpu.pipeline_mode<synchronous>, transform_indices = @transform_10, window_bounds = array<i64: 1, 32>}, {pipeline_mode = #tpu.pipeline_mode<synchronous>, transform_indices = @transform_11, window_bounds = array<i64: 1, 32>}, {pipeline_mode = #tpu.pipeline_mode<synchronous>, transform_indices = @transform_12, window_bounds = array<i64: 32, 32>}, {pipeline_mode = #tpu.pipeline_mode<synchronous>, transform_indices = @transform_13, window_bounds = array<i64: 32, 32>}, {pipeline_mode = #tpu.pipeline_mode<synchronous>, transform_indices = @transform_14, window_bounds = array<i64: 32, 32>}, {pipeline_mode = #tpu.pipeline_mode<synchronous>, transform_indices = @transform_15, window_bounds = array<i64: 32, 32>}, {pipeline_mode = #tpu.pipeline_mode<synchronous>, transform_indices = @transform_16, window_bounds = array<i64: 1, 32>}, {pipeline_mode = #tpu.pipeline_mode<synchronous>, transform_indices = @transform_17, window_bounds = array<i64: 1, 32>}, {pipeline_mode = #tpu.pipeline_mode<synchronous>, transform_indices = @transform_18, window_bounds = array<i64: 1, 32>}, {pipeline_mode = #tpu.pipeline_mode<synchronous>, transform_indices = @transform_19, window_bounds = array<i64: 1, 32>}, {pipeline_mode = #tpu.pipeline_mode<synchronous>, transform_indices = @transform_20, window_bounds = array<i64: 32, 64>}, {pipeline_mode = #tpu.pipeline_mode<synchronous>, transform_indices = @transform_21, window_bounds = array<i64: 1, 64>}, {pipeline_mode = #tpu.pipeline_mode<synchronous>, transform_indices = @transform_22, window_bounds = array<i64: 64, 32>}, {pipeline_mode = #tpu.pipeline_mode<synchronous>, transform_indices = @transform_23, window_bounds = array<i64: 1, 32>}, {pipeline_mode = #tpu.pipeline_mode<synchronous>, transform_indices = @transform_24, window_bounds = array<i64: 3, 32>}, {pipeline_mode = #tpu.pipeline_mode<synchronous>, transform_indices = @transform_25, window_bounds = array<i64: 3, 32>}, {transform_indices = @transform_26, window_bounds = array<i64: 16, 32>}]} {
    %c0 = arith.constant 0 : index
    %c0_0 = arith.constant 0 : index
    %0 = vector.load %arg1[%c0, %c0_0] : memref<16x32xf32, #tpu.memory_space<vmem>>, vector<16x32xf32>
    %c0_1 = arith.constant 0 : index
    %c0_2 = arith.constant 0 : index
    %1 = vector.load %arg2[%c0_1, %c0_2] : memref<128x32xf32, #tpu.memory_space<vmem>>, vector<128x32xf32>
    %c0_3 = arith.constant 0 : index
    %c0_4 = arith.constant 0 : index
    %2 = vector.load %arg3[%c0_3, %c0_4] : memref<16x32xf32, #tpu.memory_space<vmem>>, vector<16x32xf32>
    %c0_5 = arith.constant 0 : index
    %c0_6 = arith.constant 0 : index
    %3 = vector.load %arg4[%c0_5, %c0_6] : memref<128x32xf32, #tpu.memory_space<vmem>>, vector<128x32xf32>
    %4 = arith.addf %0, %2 : vector<16x32xf32>
    %c0_7 = arith.constant 0 : index
    %c0_8 = arith.constant 0 : index
    %5 = vector.load %arg5[%c0_7, %c0_8] : memref<32x32xf32, #tpu.memory_space<vmem>>, vector<32x32xf32>
    %cst = arith.constant dense<0.000000e+00> : vector<16x32xf32>
    %6 = tpu.matmul %4, %5, %cst {dimension_numbers = #tpu.dot_dimension_numbers<[1], [0], [0], [1], [0, 0, 1, 1], [], []>, precision = #tpu.contract_precision<fp32>} : vector<16x32xf32>, vector<32x32xf32>, vector<16x32xf32> -> vector<16x32xf32>
    %c0_9 = arith.constant 0 : index
    %c0_10 = arith.constant 0 : index
    %7 = vector.load %arg9[%c0_9, %c0_10] : memref<1x32xf32, #tpu.memory_space<vmem>>, vector<1x32xf32>
    %8 = vector.broadcast %7 : vector<1x32xf32> to vector<16x32xf32>
    %9 = arith.addf %6, %8 : vector<16x32xf32>
    %c0_11 = arith.constant 0 : index
    %c0_12 = arith.constant 0 : index
    %10 = vector.load %arg6[%c0_11, %c0_12] : memref<32x32xf32, #tpu.memory_space<vmem>>, vector<32x32xf32>
    %cst_13 = arith.constant dense<0.000000e+00> : vector<16x32xf32>
    %11 = tpu.matmul %4, %10, %cst_13 {dimension_numbers = #tpu.dot_dimension_numbers<[1], [0], [0], [1], [0, 0, 1, 1], [], []>, precision = #tpu.contract_precision<fp32>} : vector<16x32xf32>, vector<32x32xf32>, vector<16x32xf32> -> vector<16x32xf32>
    %c0_14 = arith.constant 0 : index
    %c0_15 = arith.constant 0 : index
    %12 = vector.load %arg10[%c0_14, %c0_15] : memref<1x32xf32, #tpu.memory_space<vmem>>, vector<1x32xf32>
    %13 = vector.broadcast %12 : vector<1x32xf32> to vector<16x32xf32>
    %14 = arith.addf %11, %13 : vector<16x32xf32>
    %c0_16 = arith.constant 0 : index
    %c0_17 = arith.constant 0 : index
    %15 = vector.load %arg7[%c0_16, %c0_17] : memref<32x32xf32, #tpu.memory_space<vmem>>, vector<32x32xf32>
    %cst_18 = arith.constant dense<0.000000e+00> : vector<16x32xf32>
    %16 = tpu.matmul %0, %15, %cst_18 {dimension_numbers = #tpu.dot_dimension_numbers<[1], [0], [0], [1], [0, 0, 1, 1], [], []>, precision = #tpu.contract_precision<fp32>} : vector<16x32xf32>, vector<32x32xf32>, vector<16x32xf32> -> vector<16x32xf32>
    %c0_19 = arith.constant 0 : index
    %c0_20 = arith.constant 0 : index
    %17 = vector.load %arg11[%c0_19, %c0_20] : memref<1x32xf32, #tpu.memory_space<vmem>>, vector<1x32xf32>
    %18 = vector.broadcast %17 : vector<1x32xf32> to vector<16x32xf32>
    %19 = arith.addf %16, %18 : vector<16x32xf32>
    %20 = vector.shape_cast %9 : vector<16x32xf32> to vector<2x8x32xf32>
    %21 = vector.shape_cast %14 : vector<16x32xf32> to vector<2x8x32xf32>
    %22 = vector.shape_cast %19 : vector<16x32xf32> to vector<2x8x32xf32>
    %23 = vector.extract_strided_slice %20 {offsets = [0, 0, 0], sizes = [2, 8, 8], strides = [1, 1, 1]} : vector<2x8x32xf32> to vector<2x8x8xf32>
    %24 = vector.extract_strided_slice %21 {offsets = [0, 0, 0], sizes = [2, 8, 8], strides = [1, 1, 1]} : vector<2x8x32xf32> to vector<2x8x8xf32>
    "tpu.trace_start"() <{level = 10 : i32, message = "bqd,bkd->bqk"}> : () -> ()
    %cst_21 = arith.constant dense<0.000000e+00> : vector<2x8x8xf32>
    %25 = tpu.matmul %23, %24, %cst_21 {dimension_numbers = #tpu.dot_dimension_numbers<[2], [2], [1], [1], [0, 0, 0, 1, 1, 1], [0], [0]>, precision = #tpu.contract_precision<fp32>} : vector<2x8x8xf32>, vector<2x8x8xf32>, vector<2x8x8xf32> -> vector<2x8x8xf32>
    "tpu.trace_stop"() : () -> ()
    %cst_22 = arith.constant dense<0xFF800000> : vector<2x8xf32>
    %26 = vector.multi_reduction <maximumf>, %25, %cst_22 [2] : vector<2x8x8xf32> to vector<2x8xf32>
    %27 = vector.shape_cast %26 : vector<2x8xf32> to vector<2x8x1xf32>
    %28 = vector.broadcast %27 : vector<2x8x1xf32> to vector<2x8x8xf32>
    %29 = arith.subf %25, %28 : vector<2x8x8xf32>
    %30 = math.exp %29 : vector<2x8x8xf32>
    %cst_23 = arith.constant dense<0.000000e+00> : vector<2x8xf32>
    %31 = vector.multi_reduction <add>, %30, %cst_23 [2] : vector<2x8x8xf32> to vector<2x8xf32>
    %32 = vector.shape_cast %31 : vector<2x8xf32> to vector<2x8x1xf32>
    %33 = tpu.reciprocal %32 {approx = true} : vector<2x8x1xf32> -> vector<2x8x1xf32>
    %34 = vector.broadcast %33 : vector<2x8x1xf32> to vector<2x8x8xf32>
    %35 = arith.mulf %30, %34 : vector<2x8x8xf32>
    %36 = vector.extract_strided_slice %22 {offsets = [0, 0, 0], sizes = [2, 8, 8], strides = [1, 1, 1]} : vector<2x8x32xf32> to vector<2x8x8xf32>
    "tpu.trace_start"() <{level = 10 : i32, message = "bqk,bkd->bqd"}> : () -> ()
    %cst_24 = arith.constant dense<0.000000e+00> : vector<2x8x8xf32>
    %37 = tpu.matmul %35, %36, %cst_24 {dimension_numbers = #tpu.dot_dimension_numbers<[2], [1], [1], [2], [0, 0, 0, 1, 1, 2], [0], [0]>, precision = #tpu.contract_precision<fp32>} : vector<2x8x8xf32>, vector<2x8x8xf32>, vector<2x8x8xf32> -> vector<2x8x8xf32>
    "tpu.trace_stop"() : () -> ()
    %38 = vector.extract_strided_slice %20 {offsets = [0, 0, 8], sizes = [2, 8, 8], strides = [1, 1, 1]} : vector<2x8x32xf32> to vector<2x8x8xf32>
    %39 = vector.extract_strided_slice %21 {offsets = [0, 0, 8], sizes = [2, 8, 8], strides = [1, 1, 1]} : vector<2x8x32xf32> to vector<2x8x8xf32>
    "tpu.trace_start"() <{level = 10 : i32, message = "bqd,bkd->bqk"}> : () -> ()
    %cst_25 = arith.constant dense<0.000000e+00> : vector<2x8x8xf32>
    %40 = tpu.matmul %38, %39, %cst_25 {dimension_numbers = #tpu.dot_dimension_numbers<[2], [2], [1], [1], [0, 0, 0, 1, 1, 1], [0], [0]>, precision = #tpu.contract_precision<fp32>} : vector<2x8x8xf32>, vector<2x8x8xf32>, vector<2x8x8xf32> -> vector<2x8x8xf32>
    "tpu.trace_stop"() : () -> ()
    %cst_26 = arith.constant dense<0xFF800000> : vector<2x8xf32>
    %41 = vector.multi_reduction <maximumf>, %40, %cst_26 [2] : vector<2x8x8xf32> to vector<2x8xf32>
    %42 = vector.shape_cast %41 : vector<2x8xf32> to vector<2x8x1xf32>
    %43 = vector.broadcast %42 : vector<2x8x1xf32> to vector<2x8x8xf32>
    %44 = arith.subf %40, %43 : vector<2x8x8xf32>
    %45 = math.exp %44 : vector<2x8x8xf32>
    %cst_27 = arith.constant dense<0.000000e+00> : vector<2x8xf32>
    %46 = vector.multi_reduction <add>, %45, %cst_27 [2] : vector<2x8x8xf32> to vector<2x8xf32>
    %47 = vector.shape_cast %46 : vector<2x8xf32> to vector<2x8x1xf32>
    %48 = tpu.reciprocal %47 {approx = true} : vector<2x8x1xf32> -> vector<2x8x1xf32>
    %49 = vector.broadcast %48 : vector<2x8x1xf32> to vector<2x8x8xf32>
    %50 = arith.mulf %45, %49 : vector<2x8x8xf32>
    %51 = vector.extract_strided_slice %22 {offsets = [0, 0, 8], sizes = [2, 8, 8], strides = [1, 1, 1]} : vector<2x8x32xf32> to vector<2x8x8xf32>
    "tpu.trace_start"() <{level = 10 : i32, message = "bqk,bkd->bqd"}> : () -> ()
    %cst_28 = arith.constant dense<0.000000e+00> : vector<2x8x8xf32>
    %52 = tpu.matmul %50, %51, %cst_28 {dimension_numbers = #tpu.dot_dimension_numbers<[2], [1], [1], [2], [0, 0, 0, 1, 1, 2], [0], [0]>, precision = #tpu.contract_precision<fp32>} : vector<2x8x8xf32>, vector<2x8x8xf32>, vector<2x8x8xf32> -> vector<2x8x8xf32>
    "tpu.trace_stop"() : () -> ()
    %53 = vector.extract_strided_slice %20 {offsets = [0, 0, 16], sizes = [2, 8, 8], strides = [1, 1, 1]} : vector<2x8x32xf32> to vector<2x8x8xf32>
    %54 = vector.extract_strided_slice %21 {offsets = [0, 0, 16], sizes = [2, 8, 8], strides = [1, 1, 1]} : vector<2x8x32xf32> to vector<2x8x8xf32>
    "tpu.trace_start"() <{level = 10 : i32, message = "bqd,bkd->bqk"}> : () -> ()
    %cst_29 = arith.constant dense<0.000000e+00> : vector<2x8x8xf32>
    %55 = tpu.matmul %53, %54, %cst_29 {dimension_numbers = #tpu.dot_dimension_numbers<[2], [2], [1], [1], [0, 0, 0, 1, 1, 1], [0], [0]>, precision = #tpu.contract_precision<fp32>} : vector<2x8x8xf32>, vector<2x8x8xf32>, vector<2x8x8xf32> -> vector<2x8x8xf32>
    "tpu.trace_stop"() : () -> ()
    %cst_30 = arith.constant dense<0xFF800000> : vector<2x8xf32>
    %56 = vector.multi_reduction <maximumf>, %55, %cst_30 [2] : vector<2x8x8xf32> to vector<2x8xf32>
    %57 = vector.shape_cast %56 : vector<2x8xf32> to vector<2x8x1xf32>
    %58 = vector.broadcast %57 : vector<2x8x1xf32> to vector<2x8x8xf32>
    %59 = arith.subf %55, %58 : vector<2x8x8xf32>
    %60 = math.exp %59 : vector<2x8x8xf32>
    %cst_31 = arith.constant dense<0.000000e+00> : vector<2x8xf32>
    %61 = vector.multi_reduction <add>, %60, %cst_31 [2] : vector<2x8x8xf32> to vector<2x8xf32>
    %62 = vector.shape_cast %61 : vector<2x8xf32> to vector<2x8x1xf32>
    %63 = tpu.reciprocal %62 {approx = true} : vector<2x8x1xf32> -> vector<2x8x1xf32>
    %64 = vector.broadcast %63 : vector<2x8x1xf32> to vector<2x8x8xf32>
    %65 = arith.mulf %60, %64 : vector<2x8x8xf32>
    %66 = vector.extract_strided_slice %22 {offsets = [0, 0, 16], sizes = [2, 8, 8], strides = [1, 1, 1]} : vector<2x8x32xf32> to vector<2x8x8xf32>
    "tpu.trace_start"() <{level = 10 : i32, message = "bqk,bkd->bqd"}> : () -> ()
    %cst_32 = arith.constant dense<0.000000e+00> : vector<2x8x8xf32>
    %67 = tpu.matmul %65, %66, %cst_32 {dimension_numbers = #tpu.dot_dimension_numbers<[2], [1], [1], [2], [0, 0, 0, 1, 1, 2], [0], [0]>, precision = #tpu.contract_precision<fp32>} : vector<2x8x8xf32>, vector<2x8x8xf32>, vector<2x8x8xf32> -> vector<2x8x8xf32>
    "tpu.trace_stop"() : () -> ()
    %68 = vector.extract_strided_slice %20 {offsets = [0, 0, 24], sizes = [2, 8, 8], strides = [1, 1, 1]} : vector<2x8x32xf32> to vector<2x8x8xf32>
    %69 = vector.extract_strided_slice %21 {offsets = [0, 0, 24], sizes = [2, 8, 8], strides = [1, 1, 1]} : vector<2x8x32xf32> to vector<2x8x8xf32>
    "tpu.trace_start"() <{level = 10 : i32, message = "bqd,bkd->bqk"}> : () -> ()
    %cst_33 = arith.constant dense<0.000000e+00> : vector<2x8x8xf32>
    %70 = tpu.matmul %68, %69, %cst_33 {dimension_numbers = #tpu.dot_dimension_numbers<[2], [2], [1], [1], [0, 0, 0, 1, 1, 1], [0], [0]>, precision = #tpu.contract_precision<fp32>} : vector<2x8x8xf32>, vector<2x8x8xf32>, vector<2x8x8xf32> -> vector<2x8x8xf32>
    "tpu.trace_stop"() : () -> ()
    %cst_34 = arith.constant dense<0xFF800000> : vector<2x8xf32>
    %71 = vector.multi_reduction <maximumf>, %70, %cst_34 [2] : vector<2x8x8xf32> to vector<2x8xf32>
    %72 = vector.shape_cast %71 : vector<2x8xf32> to vector<2x8x1xf32>
    %73 = vector.broadcast %72 : vector<2x8x1xf32> to vector<2x8x8xf32>
    %74 = arith.subf %70, %73 : vector<2x8x8xf32>
    %75 = math.exp %74 : vector<2x8x8xf32>
    %cst_35 = arith.constant dense<0.000000e+00> : vector<2x8xf32>
    %76 = vector.multi_reduction <add>, %75, %cst_35 [2] : vector<2x8x8xf32> to vector<2x8xf32>
    %77 = vector.shape_cast %76 : vector<2x8xf32> to vector<2x8x1xf32>
    %78 = tpu.reciprocal %77 {approx = true} : vector<2x8x1xf32> -> vector<2x8x1xf32>
    %79 = vector.broadcast %78 : vector<2x8x1xf32> to vector<2x8x8xf32>
    %80 = arith.mulf %75, %79 : vector<2x8x8xf32>
    %81 = vector.extract_strided_slice %22 {offsets = [0, 0, 24], sizes = [2, 8, 8], strides = [1, 1, 1]} : vector<2x8x32xf32> to vector<2x8x8xf32>
    "tpu.trace_start"() <{level = 10 : i32, message = "bqk,bkd->bqd"}> : () -> ()
    %cst_36 = arith.constant dense<0.000000e+00> : vector<2x8x8xf32>
    %82 = tpu.matmul %80, %81, %cst_36 {dimension_numbers = #tpu.dot_dimension_numbers<[2], [1], [1], [2], [0, 0, 0, 1, 1, 2], [0], [0]>, precision = #tpu.contract_precision<fp32>} : vector<2x8x8xf32>, vector<2x8x8xf32>, vector<2x8x8xf32> -> vector<2x8x8xf32>
    "tpu.trace_stop"() : () -> ()
    %83 = tpu.concatenate %37, %52, %67, %82 in 2 : vector<2x8x8xf32>, vector<2x8x8xf32>, vector<2x8x8xf32>, vector<2x8x8xf32> -> vector<2x8x32xf32>
    %84 = vector.shape_cast %83 : vector<2x8x32xf32> to vector<16x32xf32>
    %c0_37 = arith.constant 0 : index
    %c0_38 = arith.constant 0 : index
    %85 = vector.load %arg8[%c0_37, %c0_38] : memref<32x32xf32, #tpu.memory_space<vmem>>, vector<32x32xf32>
    %cst_39 = arith.constant dense<0.000000e+00> : vector<16x32xf32>
    %86 = tpu.matmul %84, %85, %cst_39 {dimension_numbers = #tpu.dot_dimension_numbers<[1], [0], [0], [1], [0, 0, 1, 1], [], []>, precision = #tpu.contract_precision<fp32>} : vector<16x32xf32>, vector<32x32xf32>, vector<16x32xf32> -> vector<16x32xf32>
    %c0_40 = arith.constant 0 : index
    %c0_41 = arith.constant 0 : index
    %87 = vector.load %arg12[%c0_40, %c0_41] : memref<1x32xf32, #tpu.memory_space<vmem>>, vector<1x32xf32>
    %88 = vector.broadcast %87 : vector<1x32xf32> to vector<16x32xf32>
    %89 = arith.addf %86, %88 : vector<16x32xf32>
    %90 = arith.addf %0, %89 : vector<16x32xf32>
    %c0_42 = arith.constant 0 : index
    %c0_43 = arith.constant 0 : index
    %91 = vector.load %arg25[%c0_42, %c0_43] : memref<3x32xf32, #tpu.memory_space<vmem>>, vector<1x32xf32>
    %c0_44 = arith.constant 0 : index
    %c0_45 = arith.constant 0 : index
    %92 = vector.load %arg26[%c0_44, %c0_45] : memref<3x32xf32, #tpu.memory_space<vmem>>, vector<1x32xf32>
    %cst_46 = arith.constant dense<0.000000e+00> : vector<16xf32>
    %93 = vector.multi_reduction <add>, %90, %cst_46 [1] : vector<16x32xf32> to vector<16xf32>
    %94 = vector.shape_cast %93 : vector<16xf32> to vector<16x1xf32>
    %cst_47 = arith.constant 3.200000e+01 : f32
    %95 = vector.broadcast %cst_47 : f32 to vector<16x1xf32>
    %96 = arith.divf %94, %95 : vector<16x1xf32>
    %97 = vector.broadcast %96 : vector<16x1xf32> to vector<16x32xf32>
    %98 = arith.subf %90, %97 : vector<16x32xf32>
    %99 = arith.mulf %98, %98 : vector<16x32xf32>
    %cst_48 = arith.constant dense<0.000000e+00> : vector<16xf32>
    %100 = vector.multi_reduction <add>, %99, %cst_48 [1] : vector<16x32xf32> to vector<16xf32>
    %101 = vector.shape_cast %100 : vector<16xf32> to vector<16x1xf32>
    %cst_49 = arith.constant 3.200000e+01 : f32
    %102 = vector.broadcast %cst_49 : f32 to vector<16x1xf32>
    %103 = arith.divf %101, %102 : vector<16x1xf32>
    %cst_50 = arith.constant 9.99999974E-6 : f32
    %104 = vector.broadcast %cst_50 : f32 to vector<16x1xf32>
    %105 = arith.addf %103, %104 : vector<16x1xf32>
    %106 = math.rsqrt %105 : vector<16x1xf32>
    %107 = vector.broadcast %106 : vector<16x1xf32> to vector<16x32xf32>
    %108 = arith.mulf %98, %107 : vector<16x32xf32>
    %109 = vector.broadcast %91 : vector<1x32xf32> to vector<16x32xf32>
    %110 = arith.mulf %108, %109 : vector<16x32xf32>
    %111 = vector.broadcast %92 : vector<1x32xf32> to vector<16x32xf32>
    %112 = arith.addf %110, %111 : vector<16x32xf32>
    %113 = arith.addf %112, %2 : vector<16x32xf32>
    %114 = arith.addf %1, %3 : vector<128x32xf32>
    %c0_51 = arith.constant 0 : index
    %c0_52 = arith.constant 0 : index
    %115 = vector.load %arg13[%c0_51, %c0_52] : memref<32x32xf32, #tpu.memory_space<vmem>>, vector<32x32xf32>
    %cst_53 = arith.constant dense<0.000000e+00> : vector<16x32xf32>
    %116 = tpu.matmul %113, %115, %cst_53 {dimension_numbers = #tpu.dot_dimension_numbers<[1], [0], [0], [1], [0, 0, 1, 1], [], []>, precision = #tpu.contract_precision<fp32>} : vector<16x32xf32>, vector<32x32xf32>, vector<16x32xf32> -> vector<16x32xf32>
    %c0_54 = arith.constant 0 : index
    %c0_55 = arith.constant 0 : index
    %117 = vector.load %arg17[%c0_54, %c0_55] : memref<1x32xf32, #tpu.memory_space<vmem>>, vector<1x32xf32>
    %118 = vector.broadcast %117 : vector<1x32xf32> to vector<16x32xf32>
    %119 = arith.addf %116, %118 : vector<16x32xf32>
    %c0_56 = arith.constant 0 : index
    %c0_57 = arith.constant 0 : index
    %120 = vector.load %arg14[%c0_56, %c0_57] : memref<32x32xf32, #tpu.memory_space<vmem>>, vector<32x32xf32>
    %cst_58 = arith.constant dense<0.000000e+00> : vector<128x32xf32>
    %121 = tpu.matmul %114, %120, %cst_58 {dimension_numbers = #tpu.dot_dimension_numbers<[1], [0], [0], [1], [0, 0, 1, 1], [], []>, precision = #tpu.contract_precision<fp32>} : vector<128x32xf32>, vector<32x32xf32>, vector<128x32xf32> -> vector<128x32xf32>
    %c0_59 = arith.constant 0 : index
    %c0_60 = arith.constant 0 : index
    %122 = vector.load %arg18[%c0_59, %c0_60] : memref<1x32xf32, #tpu.memory_space<vmem>>, vector<1x32xf32>
    %123 = vector.broadcast %122 : vector<1x32xf32> to vector<128x32xf32>
    %124 = arith.addf %121, %123 : vector<128x32xf32>
    %c0_61 = arith.constant 0 : index
    %c0_62 = arith.constant 0 : index
    %125 = vector.load %arg15[%c0_61, %c0_62] : memref<32x32xf32, #tpu.memory_space<vmem>>, vector<32x32xf32>
    %cst_63 = arith.constant dense<0.000000e+00> : vector<128x32xf32>
    %126 = tpu.matmul %1, %125, %cst_63 {dimension_numbers = #tpu.dot_dimension_numbers<[1], [0], [0], [1], [0, 0, 1, 1], [], []>, precision = #tpu.contract_precision<fp32>} : vector<128x32xf32>, vector<32x32xf32>, vector<128x32xf32> -> vector<128x32xf32>
    %c0_64 = arith.constant 0 : index
    %c0_65 = arith.constant 0 : index
    %127 = vector.load %arg19[%c0_64, %c0_65] : memref<1x32xf32, #tpu.memory_space<vmem>>, vector<1x32xf32>
    %128 = vector.broadcast %127 : vector<1x32xf32> to vector<128x32xf32>
    %129 = arith.addf %126, %128 : vector<128x32xf32>
    %130 = vector.shape_cast %119 : vector<16x32xf32> to vector<2x8x32xf32>
    %131 = vector.shape_cast %124 : vector<128x32xf32> to vector<2x64x32xf32>
    %132 = vector.shape_cast %129 : vector<128x32xf32> to vector<2x64x32xf32>
    %133 = vector.extract_strided_slice %130 {offsets = [0, 0, 0], sizes = [2, 8, 8], strides = [1, 1, 1]} : vector<2x8x32xf32> to vector<2x8x8xf32>
    %134 = vector.extract_strided_slice %131 {offsets = [0, 0, 0], sizes = [2, 64, 8], strides = [1, 1, 1]} : vector<2x64x32xf32> to vector<2x64x8xf32>
    "tpu.trace_start"() <{level = 10 : i32, message = "bqd,bkd->bqk"}> : () -> ()
    %cst_66 = arith.constant dense<0.000000e+00> : vector<2x8x64xf32>
    %135 = tpu.matmul %133, %134, %cst_66 {dimension_numbers = #tpu.dot_dimension_numbers<[2], [2], [1], [1], [0, 0, 0, 1, 1, 1], [0], [0]>, precision = #tpu.contract_precision<fp32>} : vector<2x8x8xf32>, vector<2x64x8xf32>, vector<2x8x64xf32> -> vector<2x8x64xf32>
    "tpu.trace_stop"() : () -> ()
    %cst_67 = arith.constant dense<0xFF800000> : vector<2x8xf32>
    %136 = vector.multi_reduction <maximumf>, %135, %cst_67 [2] : vector<2x8x64xf32> to vector<2x8xf32>
    %137 = vector.shape_cast %136 : vector<2x8xf32> to vector<2x8x1xf32>
    %138 = vector.broadcast %137 : vector<2x8x1xf32> to vector<2x8x64xf32>
    %139 = arith.subf %135, %138 : vector<2x8x64xf32>
    %140 = math.exp %139 : vector<2x8x64xf32>
    %cst_68 = arith.constant dense<0.000000e+00> : vector<2x8xf32>
    %141 = vector.multi_reduction <add>, %140, %cst_68 [2] : vector<2x8x64xf32> to vector<2x8xf32>
    %142 = vector.shape_cast %141 : vector<2x8xf32> to vector<2x8x1xf32>
    %143 = tpu.reciprocal %142 {approx = true} : vector<2x8x1xf32> -> vector<2x8x1xf32>
    %144 = vector.broadcast %143 : vector<2x8x1xf32> to vector<2x8x64xf32>
    %145 = arith.mulf %140, %144 : vector<2x8x64xf32>
    %146 = vector.extract_strided_slice %132 {offsets = [0, 0, 0], sizes = [2, 64, 8], strides = [1, 1, 1]} : vector<2x64x32xf32> to vector<2x64x8xf32>
    "tpu.trace_start"() <{level = 10 : i32, message = "bqk,bkd->bqd"}> : () -> ()
    %cst_69 = arith.constant dense<0.000000e+00> : vector<2x8x8xf32>
    %147 = tpu.matmul %145, %146, %cst_69 {dimension_numbers = #tpu.dot_dimension_numbers<[2], [1], [1], [2], [0, 0, 0, 1, 1, 2], [0], [0]>, precision = #tpu.contract_precision<fp32>} : vector<2x8x64xf32>, vector<2x64x8xf32>, vector<2x8x8xf32> -> vector<2x8x8xf32>
    "tpu.trace_stop"() : () -> ()
    %148 = vector.extract_strided_slice %130 {offsets = [0, 0, 8], sizes = [2, 8, 8], strides = [1, 1, 1]} : vector<2x8x32xf32> to vector<2x8x8xf32>
    %149 = vector.extract_strided_slice %131 {offsets = [0, 0, 8], sizes = [2, 64, 8], strides = [1, 1, 1]} : vector<2x64x32xf32> to vector<2x64x8xf32>
    "tpu.trace_start"() <{level = 10 : i32, message = "bqd,bkd->bqk"}> : () -> ()
    %cst_70 = arith.constant dense<0.000000e+00> : vector<2x8x64xf32>
    %150 = tpu.matmul %148, %149, %cst_70 {dimension_numbers = #tpu.dot_dimension_numbers<[2], [2], [1], [1], [0, 0, 0, 1, 1, 1], [0], [0]>, precision = #tpu.contract_precision<fp32>} : vector<2x8x8xf32>, vector<2x64x8xf32>, vector<2x8x64xf32> -> vector<2x8x64xf32>
    "tpu.trace_stop"() : () -> ()
    %cst_71 = arith.constant dense<0xFF800000> : vector<2x8xf32>
    %151 = vector.multi_reduction <maximumf>, %150, %cst_71 [2] : vector<2x8x64xf32> to vector<2x8xf32>
    %152 = vector.shape_cast %151 : vector<2x8xf32> to vector<2x8x1xf32>
    %153 = vector.broadcast %152 : vector<2x8x1xf32> to vector<2x8x64xf32>
    %154 = arith.subf %150, %153 : vector<2x8x64xf32>
    %155 = math.exp %154 : vector<2x8x64xf32>
    %cst_72 = arith.constant dense<0.000000e+00> : vector<2x8xf32>
    %156 = vector.multi_reduction <add>, %155, %cst_72 [2] : vector<2x8x64xf32> to vector<2x8xf32>
    %157 = vector.shape_cast %156 : vector<2x8xf32> to vector<2x8x1xf32>
    %158 = tpu.reciprocal %157 {approx = true} : vector<2x8x1xf32> -> vector<2x8x1xf32>
    %159 = vector.broadcast %158 : vector<2x8x1xf32> to vector<2x8x64xf32>
    %160 = arith.mulf %155, %159 : vector<2x8x64xf32>
    %161 = vector.extract_strided_slice %132 {offsets = [0, 0, 8], sizes = [2, 64, 8], strides = [1, 1, 1]} : vector<2x64x32xf32> to vector<2x64x8xf32>
    "tpu.trace_start"() <{level = 10 : i32, message = "bqk,bkd->bqd"}> : () -> ()
    %cst_73 = arith.constant dense<0.000000e+00> : vector<2x8x8xf32>
    %162 = tpu.matmul %160, %161, %cst_73 {dimension_numbers = #tpu.dot_dimension_numbers<[2], [1], [1], [2], [0, 0, 0, 1, 1, 2], [0], [0]>, precision = #tpu.contract_precision<fp32>} : vector<2x8x64xf32>, vector<2x64x8xf32>, vector<2x8x8xf32> -> vector<2x8x8xf32>
    "tpu.trace_stop"() : () -> ()
    %163 = vector.extract_strided_slice %130 {offsets = [0, 0, 16], sizes = [2, 8, 8], strides = [1, 1, 1]} : vector<2x8x32xf32> to vector<2x8x8xf32>
    %164 = vector.extract_strided_slice %131 {offsets = [0, 0, 16], sizes = [2, 64, 8], strides = [1, 1, 1]} : vector<2x64x32xf32> to vector<2x64x8xf32>
    "tpu.trace_start"() <{level = 10 : i32, message = "bqd,bkd->bqk"}> : () -> ()
    %cst_74 = arith.constant dense<0.000000e+00> : vector<2x8x64xf32>
    %165 = tpu.matmul %163, %164, %cst_74 {dimension_numbers = #tpu.dot_dimension_numbers<[2], [2], [1], [1], [0, 0, 0, 1, 1, 1], [0], [0]>, precision = #tpu.contract_precision<fp32>} : vector<2x8x8xf32>, vector<2x64x8xf32>, vector<2x8x64xf32> -> vector<2x8x64xf32>
    "tpu.trace_stop"() : () -> ()
    %cst_75 = arith.constant dense<0xFF800000> : vector<2x8xf32>
    %166 = vector.multi_reduction <maximumf>, %165, %cst_75 [2] : vector<2x8x64xf32> to vector<2x8xf32>
    %167 = vector.shape_cast %166 : vector<2x8xf32> to vector<2x8x1xf32>
    %168 = vector.broadcast %167 : vector<2x8x1xf32> to vector<2x8x64xf32>
    %169 = arith.subf %165, %168 : vector<2x8x64xf32>
    %170 = math.exp %169 : vector<2x8x64xf32>
    %cst_76 = arith.constant dense<0.000000e+00> : vector<2x8xf32>
    %171 = vector.multi_reduction <add>, %170, %cst_76 [2] : vector<2x8x64xf32> to vector<2x8xf32>
    %172 = vector.shape_cast %171 : vector<2x8xf32> to vector<2x8x1xf32>
    %173 = tpu.reciprocal %172 {approx = true} : vector<2x8x1xf32> -> vector<2x8x1xf32>
    %174 = vector.broadcast %173 : vector<2x8x1xf32> to vector<2x8x64xf32>
    %175 = arith.mulf %170, %174 : vector<2x8x64xf32>
    %176 = vector.extract_strided_slice %132 {offsets = [0, 0, 16], sizes = [2, 64, 8], strides = [1, 1, 1]} : vector<2x64x32xf32> to vector<2x64x8xf32>
    "tpu.trace_start"() <{level = 10 : i32, message = "bqk,bkd->bqd"}> : () -> ()
    %cst_77 = arith.constant dense<0.000000e+00> : vector<2x8x8xf32>
    %177 = tpu.matmul %175, %176, %cst_77 {dimension_numbers = #tpu.dot_dimension_numbers<[2], [1], [1], [2], [0, 0, 0, 1, 1, 2], [0], [0]>, precision = #tpu.contract_precision<fp32>} : vector<2x8x64xf32>, vector<2x64x8xf32>, vector<2x8x8xf32> -> vector<2x8x8xf32>
    "tpu.trace_stop"() : () -> ()
    %178 = vector.extract_strided_slice %130 {offsets = [0, 0, 24], sizes = [2, 8, 8], strides = [1, 1, 1]} : vector<2x8x32xf32> to vector<2x8x8xf32>
    %179 = vector.extract_strided_slice %131 {offsets = [0, 0, 24], sizes = [2, 64, 8], strides = [1, 1, 1]} : vector<2x64x32xf32> to vector<2x64x8xf32>
    "tpu.trace_start"() <{level = 10 : i32, message = "bqd,bkd->bqk"}> : () -> ()
    %cst_78 = arith.constant dense<0.000000e+00> : vector<2x8x64xf32>
    %180 = tpu.matmul %178, %179, %cst_78 {dimension_numbers = #tpu.dot_dimension_numbers<[2], [2], [1], [1], [0, 0, 0, 1, 1, 1], [0], [0]>, precision = #tpu.contract_precision<fp32>} : vector<2x8x8xf32>, vector<2x64x8xf32>, vector<2x8x64xf32> -> vector<2x8x64xf32>
    "tpu.trace_stop"() : () -> ()
    %cst_79 = arith.constant dense<0xFF800000> : vector<2x8xf32>
    %181 = vector.multi_reduction <maximumf>, %180, %cst_79 [2] : vector<2x8x64xf32> to vector<2x8xf32>
    %182 = vector.shape_cast %181 : vector<2x8xf32> to vector<2x8x1xf32>
    %183 = vector.broadcast %182 : vector<2x8x1xf32> to vector<2x8x64xf32>
    %184 = arith.subf %180, %183 : vector<2x8x64xf32>
    %185 = math.exp %184 : vector<2x8x64xf32>
    %cst_80 = arith.constant dense<0.000000e+00> : vector<2x8xf32>
    %186 = vector.multi_reduction <add>, %185, %cst_80 [2] : vector<2x8x64xf32> to vector<2x8xf32>
    %187 = vector.shape_cast %186 : vector<2x8xf32> to vector<2x8x1xf32>
    %188 = tpu.reciprocal %187 {approx = true} : vector<2x8x1xf32> -> vector<2x8x1xf32>
    %189 = vector.broadcast %188 : vector<2x8x1xf32> to vector<2x8x64xf32>
    %190 = arith.mulf %185, %189 : vector<2x8x64xf32>
    %191 = vector.extract_strided_slice %132 {offsets = [0, 0, 24], sizes = [2, 64, 8], strides = [1, 1, 1]} : vector<2x64x32xf32> to vector<2x64x8xf32>
    "tpu.trace_start"() <{level = 10 : i32, message = "bqk,bkd->bqd"}> : () -> ()
    %cst_81 = arith.constant dense<0.000000e+00> : vector<2x8x8xf32>
    %192 = tpu.matmul %190, %191, %cst_81 {dimension_numbers = #tpu.dot_dimension_numbers<[2], [1], [1], [2], [0, 0, 0, 1, 1, 2], [0], [0]>, precision = #tpu.contract_precision<fp32>} : vector<2x8x64xf32>, vector<2x64x8xf32>, vector<2x8x8xf32> -> vector<2x8x8xf32>
    "tpu.trace_stop"() : () -> ()
    %193 = tpu.concatenate %147, %162, %177, %192 in 2 : vector<2x8x8xf32>, vector<2x8x8xf32>, vector<2x8x8xf32>, vector<2x8x8xf32> -> vector<2x8x32xf32>
    %194 = vector.shape_cast %193 : vector<2x8x32xf32> to vector<16x32xf32>
    %c0_82 = arith.constant 0 : index
    %c0_83 = arith.constant 0 : index
    %195 = vector.load %arg16[%c0_82, %c0_83] : memref<32x32xf32, #tpu.memory_space<vmem>>, vector<32x32xf32>
    %cst_84 = arith.constant dense<0.000000e+00> : vector<16x32xf32>
    %196 = tpu.matmul %194, %195, %cst_84 {dimension_numbers = #tpu.dot_dimension_numbers<[1], [0], [0], [1], [0, 0, 1, 1], [], []>, precision = #tpu.contract_precision<fp32>} : vector<16x32xf32>, vector<32x32xf32>, vector<16x32xf32> -> vector<16x32xf32>
    %c0_85 = arith.constant 0 : index
    %c0_86 = arith.constant 0 : index
    %197 = vector.load %arg20[%c0_85, %c0_86] : memref<1x32xf32, #tpu.memory_space<vmem>>, vector<1x32xf32>
    %198 = vector.broadcast %197 : vector<1x32xf32> to vector<16x32xf32>
    %199 = arith.addf %196, %198 : vector<16x32xf32>
    %200 = arith.addf %112, %199 : vector<16x32xf32>
    %c1 = arith.constant 1 : index
    %c0_87 = arith.constant 0 : index
    %201 = vector.load %arg25[%c1, %c0_87] : memref<3x32xf32, #tpu.memory_space<vmem>>, vector<1x32xf32>
    %c1_88 = arith.constant 1 : index
    %c0_89 = arith.constant 0 : index
    %202 = vector.load %arg26[%c1_88, %c0_89] : memref<3x32xf32, #tpu.memory_space<vmem>>, vector<1x32xf32>
    %cst_90 = arith.constant dense<0.000000e+00> : vector<16xf32>
    %203 = vector.multi_reduction <add>, %200, %cst_90 [1] : vector<16x32xf32> to vector<16xf32>
    %204 = vector.shape_cast %203 : vector<16xf32> to vector<16x1xf32>
    %cst_91 = arith.constant 3.200000e+01 : f32
    %205 = vector.broadcast %cst_91 : f32 to vector<16x1xf32>
    %206 = arith.divf %204, %205 : vector<16x1xf32>
    %207 = vector.broadcast %206 : vector<16x1xf32> to vector<16x32xf32>
    %208 = arith.subf %200, %207 : vector<16x32xf32>
    %209 = arith.mulf %208, %208 : vector<16x32xf32>
    %cst_92 = arith.constant dense<0.000000e+00> : vector<16xf32>
    %210 = vector.multi_reduction <add>, %209, %cst_92 [1] : vector<16x32xf32> to vector<16xf32>
    %211 = vector.shape_cast %210 : vector<16xf32> to vector<16x1xf32>
    %cst_93 = arith.constant 3.200000e+01 : f32
    %212 = vector.broadcast %cst_93 : f32 to vector<16x1xf32>
    %213 = arith.divf %211, %212 : vector<16x1xf32>
    %cst_94 = arith.constant 9.99999974E-6 : f32
    %214 = vector.broadcast %cst_94 : f32 to vector<16x1xf32>
    %215 = arith.addf %213, %214 : vector<16x1xf32>
    %216 = math.rsqrt %215 : vector<16x1xf32>
    %217 = vector.broadcast %216 : vector<16x1xf32> to vector<16x32xf32>
    %218 = arith.mulf %208, %217 : vector<16x32xf32>
    %219 = vector.broadcast %201 : vector<1x32xf32> to vector<16x32xf32>
    %220 = arith.mulf %218, %219 : vector<16x32xf32>
    %221 = vector.broadcast %202 : vector<1x32xf32> to vector<16x32xf32>
    %222 = arith.addf %220, %221 : vector<16x32xf32>
    %c0_95 = arith.constant 0 : index
    %c0_96 = arith.constant 0 : index
    %223 = vector.load %arg21[%c0_95, %c0_96] : memref<32x64xf32, #tpu.memory_space<vmem>>, vector<32x64xf32>
    %cst_97 = arith.constant dense<0.000000e+00> : vector<16x64xf32>
    %224 = tpu.matmul %222, %223, %cst_97 {dimension_numbers = #tpu.dot_dimension_numbers<[1], [0], [0], [1], [0, 0, 1, 1], [], []>, precision = #tpu.contract_precision<fp32>} : vector<16x32xf32>, vector<32x64xf32>, vector<16x64xf32> -> vector<16x64xf32>
    %c0_98 = arith.constant 0 : index
    %c0_99 = arith.constant 0 : index
    %225 = vector.load %arg22[%c0_98, %c0_99] : memref<1x64xf32, #tpu.memory_space<vmem>>, vector<1x64xf32>
    %226 = vector.broadcast %225 : vector<1x64xf32> to vector<16x64xf32>
    %227 = arith.addf %224, %226 : vector<16x64xf32>
    %cst_100 = arith.constant 0.000000e+00 : f32
    %228 = vector.broadcast %cst_100 : f32 to vector<16x64xf32>
    %229 = arith.maximumf %227, %228 : vector<16x64xf32>
    %c0_101 = arith.constant 0 : index
    %c0_102 = arith.constant 0 : index
    %230 = vector.load %arg23[%c0_101, %c0_102] : memref<64x32xf32, #tpu.memory_space<vmem>>, vector<64x32xf32>
    %cst_103 = arith.constant dense<0.000000e+00> : vector<16x32xf32>
    %231 = tpu.matmul %229, %230, %cst_103 {dimension_numbers = #tpu.dot_dimension_numbers<[1], [0], [0], [1], [0, 0, 1, 1], [], []>, precision = #tpu.contract_precision<fp32>} : vector<16x64xf32>, vector<64x32xf32>, vector<16x32xf32> -> vector<16x32xf32>
    %c0_104 = arith.constant 0 : index
    %c0_105 = arith.constant 0 : index
    %232 = vector.load %arg24[%c0_104, %c0_105] : memref<1x32xf32, #tpu.memory_space<vmem>>, vector<1x32xf32>
    %233 = vector.broadcast %232 : vector<1x32xf32> to vector<16x32xf32>
    %234 = arith.addf %231, %233 : vector<16x32xf32>
    %235 = arith.addf %222, %234 : vector<16x32xf32>
    %c2 = arith.constant 2 : index
    %c0_106 = arith.constant 0 : index
    %236 = vector.load %arg25[%c2, %c0_106] : memref<3x32xf32, #tpu.memory_space<vmem>>, vector<1x32xf32>
    %c2_107 = arith.constant 2 : index
    %c0_108 = arith.constant 0 : index
    %237 = vector.load %arg26[%c2_107, %c0_108] : memref<3x32xf32, #tpu.memory_space<vmem>>, vector<1x32xf32>
    %cst_109 = arith.constant dense<0.000000e+00> : vector<16xf32>
    %238 = vector.multi_reduction <add>, %235, %cst_109 [1] : vector<16x32xf32> to vector<16xf32>
    %239 = vector.shape_cast %238 : vector<16xf32> to vector<16x1xf32>
    %cst_110 = arith.constant 3.200000e+01 : f32
    %240 = vector.broadcast %cst_110 : f32 to vector<16x1xf32>
    %241 = arith.divf %239, %240 : vector<16x1xf32>
    %242 = vector.broadcast %241 : vector<16x1xf32> to vector<16x32xf32>
    %243 = arith.subf %235, %242 : vector<16x32xf32>
    %244 = arith.mulf %243, %243 : vector<16x32xf32>
    %cst_111 = arith.constant dense<0.000000e+00> : vector<16xf32>
    %245 = vector.multi_reduction <add>, %244, %cst_111 [1] : vector<16x32xf32> to vector<16xf32>
    %246 = vector.shape_cast %245 : vector<16xf32> to vector<16x1xf32>
    %cst_112 = arith.constant 3.200000e+01 : f32
    %247 = vector.broadcast %cst_112 : f32 to vector<16x1xf32>
    %248 = arith.divf %246, %247 : vector<16x1xf32>
    %cst_113 = arith.constant 9.99999974E-6 : f32
    %249 = vector.broadcast %cst_113 : f32 to vector<16x1xf32>
    %250 = arith.addf %248, %249 : vector<16x1xf32>
    %251 = math.rsqrt %250 : vector<16x1xf32>
    %252 = vector.broadcast %251 : vector<16x1xf32> to vector<16x32xf32>
    %253 = arith.mulf %243, %252 : vector<16x32xf32>
    %254 = vector.broadcast %236 : vector<1x32xf32> to vector<16x32xf32>
    %255 = arith.mulf %253, %254 : vector<16x32xf32>
    %256 = vector.broadcast %237 : vector<1x32xf32> to vector<16x32xf32>
    %257 = arith.addf %255, %256 : vector<16x32xf32>
    %c0_114 = arith.constant 0 : index
    %c0_115 = arith.constant 0 : index
    %258 = vector.load %arg27[%c0_114, %c0_115] : memref<16x32xf32, #tpu.memory_space<vmem>>, vector<16x32xf32>
    tpu.vector_store %arg27[%c0_114, %c0_115], %257 {strides = array<i32>} : memref<16x32xf32, #tpu.memory_space<vmem>>, vector<16x32xf32>,
    return
  }
  func.func @transform_0(%arg0: i32) -> (i32, i32) {
    %c0_i32 = arith.constant 0 : i32
    %c0_i32_0 = arith.constant 0 : i32
    return %arg0, %c0_i32 : i32, i32
  }
  func.func @transform_1(%arg0: i32) -> (i32, i32) {
    %c0_i32 = arith.constant 0 : i32
    %c0_i32_0 = arith.constant 0 : i32
    return %arg0, %c0_i32 : i32, i32
  }
  func.func @transform_2(%arg0: i32) -> (i32, i32) {
    %c0_i32 = arith.constant 0 : i32
    %c0_i32_0 = arith.constant 0 : i32
    return %arg0, %c0_i32 : i32, i32
  }
  func.func @transform_3(%arg0: i32) -> (i32, i32) {
    %c0_i32 = arith.constant 0 : i32
    %c0_i32_0 = arith.constant 0 : i32
    return %arg0, %c0_i32 : i32, i32
  }
  func.func @transform_4(%arg0: i32) -> (i32, i32) {
    %c0_i32 = arith.constant 0 : i32
    %c0_i32_0 = arith.constant 0 : i32
    %c0_i32_1 = arith.constant 0 : i32
    return %c0_i32, %c0_i32_0 : i32, i32
  }
  func.func @transform_5(%arg0: i32) -> (i32, i32) {
    %c0_i32 = arith.constant 0 : i32
    %c0_i32_0 = arith.constant 0 : i32
    %c0_i32_1 = arith.constant 0 : i32
    return %c0_i32, %c0_i32_0 : i32, i32
  }
  func.func @transform_6(%arg0: i32) -> (i32, i32) {
    %c0_i32 = arith.constant 0 : i32
    %c0_i32_0 = arith.constant 0 : i32
    %c0_i32_1 = arith.constant 0 : i32
    return %c0_i32, %c0_i32_0 : i32, i32
  }
  func.func @transform_7(%arg0: i32) -> (i32, i32) {
    %c0_i32 = arith.constant 0 : i32
    %c0_i32_0 = arith.constant 0 : i32
    %c0_i32_1 = arith.constant 0 : i32
    return %c0_i32, %c0_i32_0 : i32, i32
  }
  func.func @transform_8(%arg0: i32) -> (i32, i32) {
    %c0_i32 = arith.constant 0 : i32
    %c0_i32_0 = arith.constant 0 : i32
    %c0_i32_1 = arith.constant 0 : i32
    return %c0_i32, %c0_i32_0 : i32, i32
  }
  func.func @transform_9(%arg0: i32) -> (i32, i32) {
    %c0_i32 = arith.constant 0 : i32
    %c0_i32_0 = arith.constant 0 : i32
    %c0_i32_1 = arith.constant 0 : i32
    return %c0_i32, %c0_i32_0 : i32, i32
  }
  func.func @transform_10(%arg0: i32) -> (i32, i32) {
    %c0_i32 = arith.constant 0 : i32
    %c0_i32_0 = arith.constant 0 : i32
    %c0_i32_1 = arith.constant 0 : i32
    return %c0_i32, %c0_i32_0 : i32, i32
  }
  func.func @transform_11(%arg0: i32) -> (i32, i32) {
    %c0_i32 = arith.constant 0 : i32
    %c0_i32_0 = arith.constant 0 : i32
    %c0_i32_1 = arith.constant 0 : i32
    return %c0_i32, %c0_i32_0 : i32, i32
  }
  func.func @transform_12(%arg0: i32) -> (i32, i32) {
    %c0_i32 = arith.constant 0 : i32
    %c0_i32_0 = arith.constant 0 : i32
    %c0_i32_1 = arith.constant 0 : i32
    return %c0_i32, %c0_i32_0 : i32, i32
  }
  func.func @transform_13(%arg0: i32) -> (i32, i32) {
    %c0_i32 = arith.constant 0 : i32
    %c0_i32_0 = arith.constant 0 : i32
    %c0_i32_1 = arith.constant 0 : i32
    return %c0_i32, %c0_i32_0 : i32, i32
  }
  func.func @transform_14(%arg0: i32) -> (i32, i32) {
    %c0_i32 = arith.constant 0 : i32
    %c0_i32_0 = arith.constant 0 : i32
    %c0_i32_1 = arith.constant 0 : i32
    return %c0_i32, %c0_i32_0 : i32, i32
  }
  func.func @transform_15(%arg0: i32) -> (i32, i32) {
    %c0_i32 = arith.constant 0 : i32
    %c0_i32_0 = arith.constant 0 : i32
    %c0_i32_1 = arith.constant 0 : i32
    return %c0_i32, %c0_i32_0 : i32, i32
  }
  func.func @transform_16(%arg0: i32) -> (i32, i32) {
    %c0_i32 = arith.constant 0 : i32
    %c0_i32_0 = arith.constant 0 : i32
    %c0_i32_1 = arith.constant 0 : i32
    return %c0_i32, %c0_i32_0 : i32, i32
  }
  func.func @transform_17(%arg0: i32) -> (i32, i32) {
    %c0_i32 = arith.constant 0 : i32
    %c0_i32_0 = arith.constant 0 : i32
    %c0_i32_1 = arith.constant 0 : i32
    return %c0_i32, %c0_i32_0 : i32, i32
  }
  func.func @transform_18(%arg0: i32) -> (i32, i32) {
    %c0_i32 = arith.constant 0 : i32
    %c0_i32_0 = arith.constant 0 : i32
    %c0_i32_1 = arith.constant 0 : i32
    return %c0_i32, %c0_i32_0 : i32, i32
  }
  func.func @transform_19(%arg0: i32) -> (i32, i32) {
    %c0_i32 = arith.constant 0 : i32
    %c0_i32_0 = arith.constant 0 : i32
    %c0_i32_1 = arith.constant 0 : i32
    return %c0_i32, %c0_i32_0 : i32, i32
  }
  func.func @transform_20(%arg0: i32) -> (i32, i32) {
    %c0_i32 = arith.constant 0 : i32
    %c0_i32_0 = arith.constant 0 : i32
    %c0_i32_1 = arith.constant 0 : i32
    return %c0_i32, %c0_i32_0 : i32, i32
  }
  func.func @transform_21(%arg0: i32) -> (i32, i32) {
    %c0_i32 = arith.constant 0 : i32
    %c0_i32_0 = arith.constant 0 : i32
    %c0_i32_1 = arith.constant 0 : i32
    return %c0_i32, %c0_i32_0 : i32, i32
  }
  func.func @transform_22(%arg0: i32) -> (i32, i32) {
    %c0_i32 = arith.constant 0 : i32
    %c0_i32_0 = arith.constant 0 : i32
    %c0_i32_1 = arith.constant 0 : i32
    return %c0_i32, %c0_i32_0 : i32, i32
  }
  func.func @transform_23(%arg0: i32) -> (i32, i32) {
    %c0_i32 = arith.constant 0 : i32
    %c0_i32_0 = arith.constant 0 : i32
    %c0_i32_1 = arith.constant 0 : i32
    return %c0_i32, %c0_i32_0 : i32, i32
  }
  func.func @transform_24(%arg0: i32) -> (i32, i32) {
    %c0_i32 = arith.constant 0 : i32
    %c0_i32_0 = arith.constant 0 : i32
    %c0_i32_1 = arith.constant 0 : i32
    return %c0_i32, %c0_i32_0 : i32, i32
  }
  func.func @transform_25(%arg0: i32) -> (i32, i32) {
    %c0_i32 = arith.constant 0 : i32
    %c0_i32_0 = arith.constant 0 : i32
    %c0_i32_1 = arith.constant 0 : i32
    return %c0_i32, %c0_i32_0 : i32, i32
  }
  func.func @transform_26(%arg0: i32) -> (i32, i32) {
    %c0_i32 = arith.constant 0 : i32
    %c0_i32_0 = arith.constant 0 : i32
    return %arg0, %c0_i32 : i32, i32
  }
}

</mosaic_0001>

<bundles_post_ra>
// kernel: tpu_custom_call.1
= control target key start
LH: loop header
LB: loop body
LE: loop exit
PB: predicated region body
PF: predicated region fallthrough
CT: control target
= control target key end

     0   :  { %s15826_s0 = inlined_call_operand.vmem [shape: f32[32,32], index: 0, kind: input, shape index: {}]   ;;  %s15827_s1 = inlined_call_operand.vmem [shape: f32[256,32], index: 1, kind: input, shape index: {}]   ;;  %s15828_s2 = inlined_call_operand.vmem [shape: f32[32,32], index: 2, kind: input, shape index: {}]   ;;  %s15829_s3 = inlined_call_operand.vmem [shape: f32[256,32], index: 3, kind: input, shape index: {}]   ;;  %s15830_s4 = inlined_call_operand.vmem [shape: f32[32,32], index: 4, kind: input, shape index: {}]   ;;  %s15831_s5 = inlined_call_operand.vmem [shape: f32[32,32], index: 5, kind: input, shape index: {}]   ;;  %s15832_s6 = inlined_call_operand.vmem [shape: f32[32,32], index: 6, kind: input, shape index: {}]   ;;  %s15833_s7 = inlined_call_operand.vmem [shape: f32[32,32], index: 7, kind: input, shape index: {}]   ;;  %s15834_s8 = inlined_call_operand.vmem [shape: f32[1,32], index: 8, kind: input, shape index: {}]   ;;  %s15835_s9 = inlined_call_operand.vmem [shape: f32[1,32], index: 9, kind: input, shape index: {}]   ;;  %s15836_s10 = inlined_call_operand.vmem [shape: f32[1,32], index: 10, kind: input, shape index: {}]   ;;  %s15837_s11 = inlined_call_operand.vmem [shape: f32[1,32], index: 11, kind: input, shape index: {}]   ;;  %s15838_s12 = inlined_call_operand.vmem [shape: f32[32,32], index: 12, kind: input, shape index: {}]   ;;  %s15839_s13 = inlined_call_operand.vmem [shape: f32[32,32], index: 13, kind: input, shape index: {}]   ;;  %s15840_s14 = inlined_call_operand.vmem [shape: f32[32,32], index: 14, kind: input, shape index: {}]   ;;  %s15841_s15 = inlined_call_operand.vmem [shape: f32[32,32], index: 15, kind: input, shape index: {}]   ;;  %s15842_s16 = inlined_call_operand.vmem [shape: f32[1,32], index: 16, kind: input, shape index: {}]   ;;  %s15843_s17 = inlined_call_operand.vmem [shape: f32[1,32], index: 17, kind: input, shape index: {}]   ;;  %s15844_s18 = inlined_call_operand.vmem [shape: f32[1,32], index: 18, kind: input, shape index: {}]   ;;  %s15845_s19 = inlined_call_operand.vmem [shape: f32[1,32], index: 19, kind: input, shape index: {}]   ;;  %s15846_s20 = inlined_call_operand.vmem [shape: f32[32,64], index: 20, kind: input, shape index: {}]   ;;  %s15847_s21 = inlined_call_operand.vmem [shape: f32[1,64], index: 21, kind: input, shape index: {}]   ;;  %s15848_s22 = inlined_call_operand.vmem [shape: f32[64,32], index: 22, kind: input, shape index: {}]   ;;  %s15849_s23 = inlined_call_operand.vmem [shape: f32[1,32], index: 23, kind: input, shape index: {}]   ;;  %s15850_s24 = inlined_call_operand.vmem [shape: f32[3,32], index: 24, kind: input, shape index: {}]   ;;  %s15851_s25 = inlined_call_operand.vmem [shape: f32[3,32], index: 25, kind: input, shape index: {}]   ;;  %s15852_s26 = inlined_call_operand.hbm [shape: f32[32,32], index: 26, kind: output, shape index: {}]  }
   0x1   :  { %15994 = sst [smem:[#allocation41_spill]] %s15826_s0 }
   0x2   :  { %15995 = sst [smem:[#allocation42_spill]] %s15827_s1 }
   0x3   :  { %15996 = sst [smem:[#allocation43_spill]] %s15828_s2 }
   0x4   :  { %15997 = sst [smem:[#allocation44_spill]] %s15829_s3 }
   0x5   :  { %15998 = sst [smem:[#allocation45_spill]] %s15830_s4 }
   0x6   :  { %15999 = sst [smem:[#allocation46_spill]] %s15831_s5 }
   0x7   :  { %16000 = sst [smem:[#allocation47_spill]] %s15832_s6 }
   0x8   :  { %16001 = sst [smem:[#allocation48_spill]] %s15833_s7 }
   0x9   :  { %16002 = sst [smem:[#allocation49_spill]] %s15834_s8 }
   0xa   :  { %16003 = sst [smem:[#allocation50_spill]] %s15835_s9 }
   0xb   :  { %16004 = sst [smem:[#allocation51_spill]] %s15836_s10 }
   0xc   :  { %16005 = sst [smem:[#allocation52_spill]] %s15837_s11 }
   0xd   :  { %16006 = sst [smem:[#allocation53_spill]] %s15838_s12 }
   0xe   :  { %31 = vsyncpa [#allocation3], 0 }
   0xf   :  { %33 = vsyncpa [#allocation3 + $0x1], 0  ;;  %s11811_s27 = smov 0   ;;  %s11813_s3 = smov 0  }
  0x10   :  { %s11815_s7 = smov 0   ;;  %s11817_s28 = smov 0  }
  0x11 LB: > { %16007 = sst [smem:[#allocation5_spill]] %s11654_s27  ;;  %s11832_s8 = sadd.s32 4294967295, %s11666_s28   ;;  %s11666_s28 = sphi %s11817_s28, %s16213_s28   ;;  %s11662_s7 = sphi %s11815_s7, %s16215_s7   ;;  %s11658_s3 = sphi %s11813_s3, %s16217_s3   ;;  %s11654_s27 = sphi %s11811_s27, %s16216_s27  }
  0x12   : > { %16008 = sst [smem:[#allocation6_spill]] %s11662_s7  ;;  %s11431_s4 = sadd.s32 4294967294, %s11666_s28  }
  0x13   : > { %16009 = sst [smem:[#allocation7_spill]] %s11666_s28  ;;  %s11836_s29 = sadd.s32 1, %s11666_s28  }
  0x14   : > { %16010 = sst [smem:[#allocation8_spill]] %s11836_s29  ;;  %s612_s0 = sadd.s32 1, %s11662_s7 }
  0x15   : > { %s609_s9 = ssub.s32 %s11666_s28, %s11836_s29  ;;  %p622_p0 = scmp.ne.s32.totalorder %s11662_s7, %s11658_s3 }
  0x16   : > { %p610_p1 = scmp.eq.s32.totalorder %s609_s9, 0  ;;  %p623_p2 = scmp.eq.s32.totalorder %s11832_s8, 1 }
  0x17   : > { %p628_p3 = scmp.ne.s32.totalorder %s11658_s3, %s11654_s27  ;;  %p629_p4 = scmp.eq.s32.totalorder %s11431_s4, 1 }
  0x18   : > { %s11847_s30 = scalar_select %p610_p1, %s11662_s7, %s612_s0  }
  0x19   : > { %p11849_p5 = por %p623_p2, %p622_p0  ;;  %p11853_p6 = por %p629_p4, %p628_p3 }
  0x1a   : > { %16011 = sst [smem:[#allocation9_spill]] %s11847_s30  ;;  %p11434_p7 = scmp.ge.s32.totalorder %s11666_s28, 1 }
  0x1b   : > { %s16012_s2 = scalar_select %p11849_p5, 1, 0 }
  0x1c   : > { %s16014_s5 = scalar_select %p11853_p6, 1, 0 }
  0x1d   : > { %16013 = sst [smem:[#allocation10_spill]] %s16012_s2  ;;  %p749_p8 = scmp.lt.s32.totalorder %s11666_s28, 3 }
  0x1e   : > { %16015 = sst [smem:[#allocation11_spill]] %s16014_s5 }
  0x1f   : > { %p750_p9 = pnand %p11434_p7, %p749_p8 }
  0x21   : > { %753 = sbr.rel (%p750_p9) target bundleno = 6288 (0x1890), region = 124 }
  0x26   : > { %s16016_s1 = sld [smem:[#allocation45_spill]]  ;;  %s11436_s7 = sshll.u32 %s11832_s8, 1  ;;  %vm905_vm0 = vcmask 261120   ;;  %vm1582_vm1 = vcmask 64512   ;;  %vm4137_vm2 = vcmask 130048   ;;  %vm4140_vm3 = vcmask 195584  }
  0x27   : > { %p835_p10 = scmp.lt.s32.totalorder %s11436_s7, 3  ;;  %s16017_s4 = sld [smem:[#allocation46_spill]]  ;;  %vm6622_vm11 = vcmask 523264  }
  0x28   : > { %s16018_s10 = sld [smem:[#allocation41_spill]]  ;;  %s15866_s0 = smov 8  }
  0x29   : > { %s16219_s7 = smov (!%p835_p10, %s11436_s7), 3  ;;  %s16019_s28 = sld [smem:[#allocation43_spill]] }
  0x2a   : > { %s11437_s5 = sshll.u32 %s16219_s7, 3  ;;  %s16021_s2 = sld [smem:[#allocation49_spill]] }
  0x2b   : > { %s16022_s9 = sld [smem:[#allocation50_spill]]  ;;  %s12292_s30 = sshll.u32 %s11832_s8, 4 }
  0x2c   : > { %v900_v0 = vld [vmem:[%s16016_s1 + $0x18] sm:$0xff]  ;;  %v899_v1 = vld [vmem:[%s16016_s1 + $0x10] sm:$0xff]  ;;  %v898_v2 = vld [vmem:[%s16016_s1 + $0x8] sm:$0xff]  ;;  %s16023_s7 = sld [smem:[#allocation51_spill]]  ;;  %p841_p11 = scmp.lt.s32.totalorder %s12292_s30, 31 }
  0x2d   : > { %v11869_v3 = vand.u32 4294901760, %v900_v0  ;;  %v11871_v4 = vand.u32 4294901760, %v899_v1  ;;  %v11873_v5 = vand.u32 4294901760, %v898_v2  ;;  %v897_v6 = vld [vmem:[%s16016_s1] sm:$0xff]  ;;  %v1131_v7 = vld [vmem:[%s16017_s4 + $0x18] sm:$0xff]  ;;  %v1130_v14 = vld [vmem:[%s16017_s4 + $0x10] sm:$0xff] }
  0x2e   : > { %v11881_v8 = vand.u32 4294901760, %v897_v6  ;;  %v11889_v13 = vand.u32 4294901760, %v1131_v7  ;;  %s11899_s6 = scalar_lea.vmem %s16018_s10, %s11437_s5  ;;  %v1129_v19 = vld [vmem:[%s16017_s4 + $0x8] sm:$0xff]  ;;  %v11920_v28 = vand.u32 4294901760, %v1130_v14  ;;  %v1128_v35 = vld [vmem:[%s16017_s4] sm:$0xff]  ;;  %s16020_s1 = sld [smem:[#allocation47_spill]] }
  0x2f   : > { %11450 = vmatpush.msra.mxu2 %v11869_v3  ;;  %v962_v9 = vsub.f32 %v900_v0, %v11869_v3  ;;  %v968_v10 = vsub.f32 %v899_v1, %v11871_v4  ;;  %v974_v11 = vsub.f32 %v898_v2, %v11873_v5  ;;  %925 = vmatpush.msra.mxu0 %v11869_v3  ;;  %s11904_s29 = scalar_lea.vmem %s16019_s28, %s11437_s5  ;;  %v11911_v23 = vld [vmem:[%s11899_s6 + $0x8] sm:$0xff]  ;;  %v11916_v25 = vld [vmem:[%s11899_s6] sm:$0xff]  ;;  %v11935_v39 = vand.u32 4294901760, %v1129_v19  ;;  %s15876_s10 = smov 120  }
  0x30   : > { %v980_v12 = vsub.f32 %v897_v6, %v11881_v8  ;;  %v878_v24 = vld [vmem:[%s11904_s29 + $0x8] sm:$0xff]  ;;  %v877_v27 = vld [vmem:[%s11904_s29] sm:$0xff]  ;;  %v11927_v34 = vsub.f32 %v1131_v7, %v11889_v13  ;;  %v11943_v43 = vsub.f32 %v1130_v14, %v11920_v28  ;;  %v11945_v44 = vand.u32 4294901760, %v1128_v35  ;;  %s15872_s28 = smov 112   ;;  %s15868_s5 = smov 16  }
  0x31   : > { %11451 = vmatpush.msra.mxu2 %v11871_v4  ;;  %v963_v15 = vand.u32 4294901760, %v962_v9  ;;  %v969_v16 = vand.u32 4294901760, %v968_v10  ;;  %v975_v17 = vand.u32 4294901760, %v974_v11  ;;  %927 = vmatpush.msra.mxu0 %v11871_v4  ;;  %v896_v26 = vadd.f32 %v878_v24, %v11911_v23  ;;  %s16024_s27 = sld [smem:[#allocation48_spill]]  ;;  %s16110_s8 = smov 112  }
  0x32   : > { %v981_v18 = vand.u32 4294901760, %v980_v12  ;;  %v895_v32 = vadd.f32 %v877_v27, %v11916_v25  ;;  %v1187_v47 = vand.u32 4294901760, %v11927_v34  ;;  %v1198_v48 = vsub.f32 %v1129_v19, %v11935_v39  ;;  %s16026_s11 = sld [smem:[#allocation52_spill]] }
  0x33   : > { %v964_v20 = vsub.f32 %v962_v9, %v963_v15  ;;  %11452 = vmatpush.msra.mxu2 %v11873_v5  ;;  %v970_v21 = vsub.f32 %v968_v10, %v969_v16  ;;  %v976_v22 = vsub.f32 %v974_v11, %v975_v17  ;;  %929 = vmatpush.msra.mxu0 %v11873_v5  ;;  %v910_v33 = vsel %vm905_vm0, %v896_v26, 0  ;;  %s16028_s12 = sld [smem:[#allocation53_spill]] }
  0x34   : > { %v982_v31 = vsub.f32 %v980_v12, %v981_v18  ;;  %v11932_v37 = vand.u32 4294901760, %v910_v33  ;;  %v907_v38 = vsel %vm905_vm0, %v895_v32, 0  ;;  %v1193_v51 = vand.u32 4294901760, %v11943_v43  ;;  %v1355_v2 = vld [vmem:[%s16020_s1 + $0x18] sm:$0xff]  ;;  %v1353_v7 = vld [vmem:[%s16020_s1 + $0x8] sm:$0xff] }
  0x35   : > { %v965_v29 = vand.u32 4294901760, %v964_v20  ;;  %v971_v30 = vand.u32 4294901760, %v970_v21  ;;  %11453 = vmatpush.msra.mxu2 %v11881_v8  ;;  %931 = vmatpush.msra.mxu0 %v11881_v8  ;;  %v977_v36 = vand.u32 4294901760, %v976_v22  ;;  %v11937_v40 = vand.u32 4294901760, %v907_v38 }
  0x36   : > { %v11940_v41 = vsub.f32 %v910_v33, %v11932_v37  ;;  %v983_v42 = vand.u32 4294901760, %v982_v31  ;;  %v1204_v52 = vsub.f32 %v1128_v35, %v11945_v44  ;;  %v1188_v55 = vsub.f32 %v11927_v34, %v1187_v47 }
  0x37   : > { %1008 = vmatpush.msrb.mxu2 %v962_v9  ;;  %1077 = vmatpush.msrb.mxu0 %v963_v15  ;;  %v11948_v45 = vsub.f32 %v907_v38, %v11937_v40  ;;  %v1199_v56 = vand.u32 4294901760, %v1198_v48  ;;  %v1194_v58 = vsub.f32 %v11943_v43, %v1193_v51  ;;  %v1361_v24 = vsel %vm905_vm0, %v11916_v25, 0 }
  0x38   : > { %11454 = vmatpush.msra.mxu3 %v965_v29  ;;  %966 = vmatpush.msra.mxu1 %v965_v29  ;;  %v11951_v46 = vand.u32 4294901760, %v11940_v41  ;;  %v1205_v59 = vand.u32 4294901760, %v1204_v52  ;;  %v1189_v60 = vand.u32 4294901760, %v1188_v55  ;;  %v1386_v26 = vand.u32 4294901760, %v1361_v24 }
  0x39   : > { %1011 = vmatpush.msrb.mxu2 %v968_v10  ;;  %1081 = vmatpush.msrb.mxu0 %v969_v16  ;;  %v11956_v49 = vand.u32 4294901760, %v11948_v45  ;;  %v1200_v61 = vsub.f32 %v1198_v48, %v1199_v56  ;;  %v1195_v62 = vand.u32 4294901760, %v1194_v58  ;;  %v1382_v10 = vand.u32 4294901760, %v1353_v7 }
  0x3a   : > { %11455 = vmatpush.msra.mxu3 %v971_v30  ;;  %972 = vmatpush.msra.mxu1 %v971_v30  ;;  %v943_v50 = vsub.f32 %v11940_v41, %v11951_v46  ;;  %v1206_v63 = vsub.f32 %v1204_v52, %v1205_v59  ;;  %v1387_v29 = vsub.f32 %v1361_v24, %v1386_v26  ;;  %v1364_v25 = vsel %vm905_vm0, %v11911_v23, 0  ;;  %v11505_v23 = vld [vmem:[%s16021_s2] ss:$0 sm:$0xff]  ;;  %s15870_s2 = smov 104  }
  0x3b   : > { %1014 = vmatpush.msrb.mxu2 %v974_v11  ;;  %1085 = vmatpush.msrb.mxu0 %v975_v17  ;;  %v935_v53 = vsub.f32 %v11948_v45, %v11956_v49  ;;  %v1201_v0 = vand.u32 4294901760, %v1200_v61  ;;  %v1352_v11 = vld [vmem:[%s16020_s1] sm:$0xff]  ;;  %v1428_v14 = vsub.f32 %v1353_v7, %v1382_v10 }
  0x3c   : > { %11456 = vmatpush.msra.mxu3 %v977_v36  ;;  %978 = vmatpush.msra.mxu1 %v977_v36  ;;  %v944_v54 = vand.u32 4294901760, %v943_v50  ;;  %v1207_v1 = vand.u32 4294901760, %v1206_v63  ;;  %v1384_v15 = vand.u32 4294901760, %v1352_v11  ;;  %v1388_v31 = vand.u32 4294901760, %v1387_v29 }
  0x3d   : > { %1017 = vmatpush.msrb.mxu2 %v980_v12  ;;  %1089 = vmatpush.msrb.mxu0 %v981_v18  ;;  %v936_v57 = vand.u32 4294901760, %v935_v53  ;;  %v1429_v18 = vand.u32 4294901760, %v1428_v14 }
  0x3e   : > { %11457 = vmatpush.msra.mxu3 %v983_v42  ;;  %984 = vmatpush.msra.mxu1 %v983_v42  ;;  %v1434_v19 = vsub.f32 %v1352_v11, %v1384_v15  ;;  %v1389_v32 = vsub.f32 %v1387_v29, %v1388_v31 }
  0x3f   : > { %990 = vmatmul.f32.vlgmr.msra.gmra.mxu3 %v11932_v37  ;;  %986 = vmatmul.f32.vlgmr.msra.gmra.mxu1 %v11937_v40  ;;  %v1430_v21 = vsub.f32 %v1428_v14, %v1429_v18 }
  0x40   : > { %1042 = vmatpush.msrb.mxu3 %v11869_v3  ;;  %1112 = vmatpush.msrb.mxu1 %v11869_v3  ;;  %v1378_v3 = vand.u32 4294901760, %v1355_v2  ;;  %v1435_v22 = vand.u32 4294901760, %v1434_v19  ;;  %v1390_v33 = vand.u32 4294901760, %v1389_v32 }
  0x41   : > { %945 = vmatmul.f32.vlgmr.msra.gmra.mxu2 %v944_v54  ;;  %937 = vmatmul.f32.vlgmr.msra.gmra.mxu0 %v936_v57  ;;  %v1431_v27 = vand.u32 4294901760, %v1430_v21 }
  0x42   : > { %1044 = vmatpush.msrb.mxu3 %v11871_v4  ;;  %1114 = vmatpush.msrb.mxu1 %v11871_v4  ;;  %v1354_v4 = vld [vmem:[%s16020_s1 + $0x10] sm:$0xff] }
  0x43   : > { %1149 = vmatpush.msra.mxu2 %v11889_v13  ;;  %1232 = vmatpush.msra.mxu0 %v11927_v34  ;;  %v1380_v6 = vand.u32 4294901760, %v1354_v4  ;;  %v1394_v34 = vand.u32 4294901760, %v1364_v25 }
  0x44   : > { %1046 = vmatpush.msrb.mxu3 %v11873_v5  ;;  %1116 = vmatpush.msrb.mxu1 %v11873_v5  ;;  %v1416_v5 = vsub.f32 %v1355_v2, %v1378_v3 }
  0x45   : > { %1151 = vmatpush.msra.mxu2 %v11920_v28  ;;  %1235 = vmatpush.msra.mxu0 %v11943_v43  ;;  %v1422_v9 = vsub.f32 %v1354_v4, %v1380_v6  ;;  %v1395_v35 = vsub.f32 %v1364_v25, %v1394_v34 }
  0x46   : > { %1048 = vmatpush.msrb.mxu3 %v11881_v8  ;;  %1118 = vmatpush.msrb.mxu1 %v11881_v8  ;;  %v1417_v8 = vand.u32 4294901760, %v1416_v5 }
  0x47   : > { %1052 = vmatmul.f32.vlgmr.msrb.gmra.mxu3 %v11956_v49  ;;  %1120 = vmatmul.f32.vlgmr.msrb.gmra.mxu1 %v11937_v40  ;;  %v1396_v36 = vand.u32 4294901760, %v1395_v35 }
  0x48   : > { %1190 = vmatpush.msra.mxu3 %v1189_v60  ;;  %1153 = vmatpush.msra.mxu2 %v11935_v39  ;;  %v1418_v12 = vsub.f32 %v1416_v5, %v1417_v8 }
  0x49   : > { %1020 = vmatmul.f32.vlgmr.msrb.gmra.mxu2 %v11948_v45  ;;  %1091 = vmatmul.f32.vlgmr.msrb.gmra.mxu0 %v11937_v40 }
  0x4a   : > { %1196 = vmatpush.msra.mxu3 %v1195_v62  ;;  %1155 = vmatpush.msra.mxu2 %v11945_v44  ;;  %v1419_v16 = vand.u32 4294901760, %v1418_v12 }
  0x4b   : > { %1266 = vmatpush.msra.mxu1 %v11889_v13  ;;  %1238 = vmatpush.msra.mxu0 %v1198_v48 }
  0x4c   : > { %1202 = vmatpush.msra.mxu3 %v1201_v0  ;;  %1301 = vmatpush.msrb.mxu2 %v1187_v47 }
  0x4d   : > { %1268 = vmatpush.msra.mxu1 %v11920_v28  ;;  %1241 = vmatpush.msra.mxu0 %v1204_v52 }
  0x4e   : > { %1208 = vmatpush.msra.mxu3 %v1207_v1  ;;  %1305 = vmatpush.msrb.mxu2 %v1193_v51 }
  0x4f   : > { %1058 = vmatmul.f32.gmra.mxu3 %v11951_v46  ;;  %1124 = vmatmul.f32.gmra.mxu1 %v11932_v37 }
  0x50   : > { %1270 = vmatpush.msra.mxu1 %v11935_v39  ;;  %1336 = vmatpush.msrb.mxu3 %v11889_v13  ;;  %v1423_v13 = vand.u32 4294901760, %v1422_v9 }
  0x51   : > { %1025 = vmatmul.f32.gmra.mxu2 %v11940_v41  ;;  %1095 = vmatmul.f32.gmra.mxu0 %v11932_v37 }
  0x52   : > { %1272 = vmatpush.msra.mxu1 %v11945_v44  ;;  %1309 = vmatpush.msrb.mxu2 %v1199_v56  ;;  %v1424_v17 = vsub.f32 %v1422_v9, %v1423_v13  ;;  %v11506_v56 = vld [vmem:[%s16022_s9] ss:$0 sm:$0xff]  ;;  %s842_s9 = scalar_select %p841_p11, %s12292_s30, 31 }
  0x53   : > { %1338 = vmatpush.msrb.mxu3 %v11920_v28  ;;  %1379 = vmatpush.msrb.mxu0 %v1378_v3  ;;  %v1436_v28 = vsub.f32 %v1434_v19, %v1435_v22 }
  0x54   : > { %1313 = vmatpush.msrb.mxu2 %v1205_v59  ;;  %1420 = vmatpush.msrb.mxu1 %v1419_v16  ;;  %v1425_v20 = vand.u32 4294901760, %v1424_v17 }
  0x55   : > { %1340 = vmatpush.msrb.mxu3 %v11935_v39  ;;  %1381 = vmatpush.msrb.mxu0 %v1380_v6  ;;  %v1437_v30 = vand.u32 4294901760, %v1436_v28 }
  0x56   : > { %1426 = vmatpush.msrb.mxu1 %v1425_v20 }
  0x57   : > { %1210 = vmatmul.f32.vlgmr.msra.gmra.mxu3 %v11937_v40  ;;  %1276 = vmatmul.f32.vlgmr.msra.gmra.mxu1 %v11956_v49 }
  0x58   : > { %1342 = vmatpush.msrb.mxu3 %v11945_v44  ;;  %1383 = vmatpush.msrb.mxu0 %v1382_v10 }
  0x59   : > { %1161 = vmatmul.f32.vlgmr.msra.gmra.mxu2 %v936_v57  ;;  %1244 = vmatmul.f32.vlgmr.msra.gmra.mxu0 %v11948_v45 }
  0x5a   : > { %1496 = vmatpush.msra.mxu3 %v1378_v3  ;;  %1462 = vmatpush.msra.mxu2 %v1416_v5 }
  0x5b   : > { %1385 = vmatpush.msrb.mxu0 %v1384_v15  ;;  %1432 = vmatpush.msrb.mxu1 %v1431_v27 }
  0x5c   : > { %1498 = vmatpush.msra.mxu3 %v1380_v6  ;;  %1465 = vmatpush.msra.mxu2 %v1422_v9 }
  0x5d   : > { %1531 = vmatpush.msra.mxu0 %v1417_v8  ;;  %1438 = vmatpush.msrb.mxu1 %v1437_v30 }
  0x5e   : > { %1500 = vmatpush.msra.mxu3 %v1382_v10  ;;  %1468 = vmatpush.msra.mxu2 %v1428_v14 }
  0x5f   : > { %1214 = vmatmul.f32.gmra.mxu3 %v11932_v37  ;;  %1282 = vmatmul.f32.gmra.mxu1 %v11951_v46 }
  0x60   : > { %1502 = vmatpush.msra.mxu3 %v1384_v15  ;;  %1471 = vmatpush.msra.mxu2 %v1434_v19 }
  0x61   : > { %1169 = vmatmul.f32.gmra.mxu2 %v944_v54  ;;  %1249 = vmatmul.f32.gmra.mxu0 %v11940_v41 }
  0x62   : > { %1535 = vmatpush.msra.mxu0 %v1423_v13  ;;  %1566 = vmatpush.msra.mxu1 %v1378_v3 }
  0x64   : > { %1539 = vmatpush.msra.mxu0 %v1429_v18  ;;  %1568 = vmatpush.msra.mxu1 %v1380_v6 }
  0x66   : > { %1543 = vmatpush.msra.mxu0 %v1435_v22  ;;  %1570 = vmatpush.msra.mxu1 %v1382_v10 }
  0x67   : > { %1344 = vmatmul.f32.vlgmr.msrb.gmra.mxu3 %v11937_v40  ;;  %1440 = vmatmul.f32.vlgmr.msrb.gmra.mxu1 %v1386_v26 }
  0x68   : > { %1572 = vmatpush.msra.mxu1 %v1384_v15 }
  0x69   : > { %1315 = vmatmul.f32.vlgmr.msrb.gmra.mxu2 %v11937_v40  ;;  %1391 = vmatmul.f32.vlgmr.msrb.gmra.mxu0 %v1390_v33 }
  0x6f   : > { %1348 = vmatmul.f32.gmra.mxu3 %v11932_v37  ;;  %1444 = vmatmul.f32.gmra.mxu1 %v1394_v34 }
  0x71   : > { %1319 = vmatmul.f32.gmra.mxu2 %v11932_v37  ;;  %v1397_v37 = vsub.f32 %v1395_v35, %v1396_v36 }
  0x73   : > { %v1398_v39 = vand.u32 4294901760, %v1397_v37 }
  0x75   : > { %1399 = vmatmul.f32.gmra.mxu0 %v1398_v39 }
  0x77   : > { %1506 = vmatmul.f32.vlgmr.msra.gmra.mxu3 %v1388_v31  ;;  %1574 = vmatmul.f32.vlgmr.msra.gmra.mxu1 %v1386_v26 }
  0x79   : > { %1474 = vmatmul.f32.vlgmr.msra.gmra.mxu2 %v1387_v29 }
  0x7d   : > { %1545 = vmatmul.f32.vlgmr.msra.gmra.mxu0 %v1386_v26 }
  0x7f   : > { %1512 = vmatmul.f32.gmra.mxu3 %v1396_v36  ;;  %1578 = vmatmul.f32.gmra.mxu1 %v1394_v34 }
  0x81   : > { %1479 = vmatmul.f32.gmra.mxu2 %v1395_v35 }
  0x85   : > { %1549 = vmatmul.f32.gmra.mxu0 %v1394_v34 }
  0xbc   : > { %v987_v42 = vpop.f32.mrf.mxu1 }
  0xbe   : > { %v938_v41 = vpop.f32.mrf.mxu0 }
  0xbf   : > { %v939_v44 = vadd.f32 %v11505_v23, %v938_v41 }
  0xc1   : > { %v988_v46 = vadd.f32 %v987_v42, %v939_v44 }
  0xc2   : > { %v991_v38 = vpop.f32.mrf.mxu3 }
  0xc4   : > { %v946_v40 = vpop.f32.mrf.mxu2  ;;  %v1121_v50 = vpop.f32.mrf.mxu1 }
  0xc5   : > { %v947_v57 = vadd.f32 %v11505_v23, %v946_v40 }
  0xc6   : > { %v1092_v47 = vpop.f32.mrf.mxu0 }
  0xc7   : > { %v992_v62 = vadd.f32 %v991_v38, %v947_v57 }
  0xca   : > { %v1053_v43 = vpop.f32.mrf.mxu3 }
  0xcc   : > { %v1021_v45 = vpop.f32.mrf.mxu2  ;;  %v1125_v58 = vpop.f32.mrf.mxu1 }
  0xcd   : > { %v1022_v49 = vadd.f32 %v1021_v45, %v988_v46 }
  0xce   : > { %v1096_v53 = vpop.f32.mrf.mxu0 }
  0xcf   : > { %v1054_v52 = vadd.f32 %v1053_v43, %v1022_v49 }
  0xd1   : > { %v1093_v55 = vadd.f32 %v1092_v47, %v1054_v52 }
  0xd2   : > { %v1059_v48 = vpop.f32.mrf.mxu3 }
  0xd3   : > { %v12030_v60 = vadd.f32 %v1121_v50, %v1093_v55  ;;  %v11507_v50 = vld [vmem:[%s16023_s7] ss:$0 sm:$0xff]  ;;  %s15874_s7 = smov 24  }
  0xd4   : > { %v1026_v51 = vpop.f32.mrf.mxu2  ;;  %v1277_v7 = vpop.f32.mrf.mxu1 }
  0xd5   : > { %v1584_v0 = vsel %vm1582_vm1, %v12030_v60, 0  ;;  %v1027_v1 = vadd.f32 %v1026_v51, %v992_v62 }
  0xd6   : > { %v1245_v2 = vpop.f32.mrf.mxu0  ;;  %v1606_v5 = vand.u32 4294901760, %v1584_v0 }
  0xd7   : > { %v1060_v6 = vadd.f32 %v1059_v48, %v1027_v1 }
  0xd8   : > { %v1607_v10 = vsub.f32 %v1584_v0, %v1606_v5 }
  0xd9   : > { %v1097_v11 = vadd.f32 %v1096_v53, %v1060_v6 }
  0xda   : > { %v1211_v54 = vpop.f32.mrf.mxu3  ;;  %v1608_v18 = vand.u32 4294901760, %v1607_v10 }
  0xdb   : > { %v12034_v19 = vadd.f32 %v1125_v58, %v1097_v11 }
  0xdc   : > { %v1162_v59 = vpop.f32.mrf.mxu2  ;;  %v1283_v22 = vpop.f32.mrf.mxu1  ;;  %v1609_v26 = vsub.f32 %v1607_v10, %v1608_v18 }
  0xdd   : > { %v1163_v61 = vadd.f32 %v11506_v56, %v1162_v59  ;;  %v1736_v27 = vsel %vm1582_vm1, %v12034_v19, 0 }
  0xde   : > { %v1250_v15 = vpop.f32.mrf.mxu0  ;;  %v1758_v25 = vand.u32 4294901760, %v1736_v27  ;;  %v1610_v34 = vand.u32 4294901760, %v1609_v26 }
  0xdf   : > { %v1212_v3 = vadd.f32 %v1211_v54, %v1163_v61 }
  0xe0   : > { %v1759_v38 = vsub.f32 %v1736_v27, %v1758_v25 }
  0xe1   : > { %v1246_v8 = vadd.f32 %v1245_v2, %v1212_v3 }
  0xe2   : > { %v1215_v63 = vpop.f32.mrf.mxu3  ;;  %v1760_v42 = vand.u32 4294901760, %v1759_v38 }
  0xe3   : > { %v1278_v13 = vadd.f32 %v1277_v7, %v1246_v8 }
  0xe4   : > { %v1170_v4 = vpop.f32.mrf.mxu2  ;;  %v1761_v45 = vsub.f32 %v1759_v38, %v1760_v42  ;;  %v1441_v48 = vpop.f32.mrf.mxu1 }
  0xe5   : > { %v1171_v9 = vadd.f32 %v11506_v56, %v1170_v4 }
  0xe6   : > { %v1762_v47 = vand.u32 4294901760, %v1761_v45  ;;  %v1392_v49 = vpop.f32.mrf.mxu0 }
  0xe7   : > { %v1216_v14 = vadd.f32 %v1215_v63, %v1171_v9  ;;  %v1393_v51 = vadd.f32 %v11507_v50, %v1392_v49 }
  0xe9   : > { %v1251_v20 = vadd.f32 %v1250_v15, %v1216_v14  ;;  %v1442_v52 = vadd.f32 %v1441_v48, %v1393_v51 }
  0xea   : > { %v1345_v12 = vpop.f32.mrf.mxu3 }
  0xeb   : > { %v1284_v29 = vadd.f32 %v1283_v22, %v1251_v20 }
  0xec   : > { %v1316_v16 = vpop.f32.mrf.mxu2  ;;  %v1445_v54 = vpop.f32.mrf.mxu1 }
  0xed   : > { %v1317_v17 = vadd.f32 %v1316_v16, %v1278_v13 }
  0xef   : > { %v12036_v21 = vadd.f32 %v1345_v12, %v1317_v17 }
  0xf1   : > { %2209 = vrot.lane.b32.xlu2 %v12036_v21, %s15876_s10  ;;  %v1587_v24 = vsel %vm1582_vm1, %v12036_v21, 0 }
  0xf2   : > { %v1604_v28 = vand.u32 4294901760, %v1587_v24  ;;  %v1349_v31 = vpop.f32.mrf.mxu3  ;;  %v1400_v55 = vpop.f32.mrf.mxu0 }
  0xf3   : > { %v1401_v59 = vadd.f32 %v11507_v50, %v1400_v55 }
  0xf4   : > { %v1320_v30 = vpop.f32.mrf.mxu2  ;;  %1605 = vmatpush.xpose.msrb.mxu2 %v1604_v28  ;;  %1729 = vmatpush.xpose.msrb.mxu1 %v1604_v28  ;;  %v1631_v32 = vsub.f32 %v1587_v24, %v1604_v28  ;;  %v1575_v63 = vpop.f32.mrf.mxu1 }
  0xf5   : > { %v1321_v33 = vadd.f32 %v1320_v30, %v1284_v29  ;;  %v1446_v1 = vadd.f32 %v1445_v54, %v1401_v59 }
  0xf6   : > { %v1632_v35 = vand.u32 4294901760, %v1631_v32 }
  0xf7   : > { %v12044_v36 = vadd.f32 %v1349_v31, %v1321_v33  ;;  %1611 = vmatmul.f32.vlgmr.msrb.gmra.mxu2 %v1610_v34  ;;  %1731 = vmatmul.f32.vlgmr.msrb.gmra.mxu1 %v1606_v5 }
  0xf8   : > { %1658 = vmatpush.xpose.msra.mxu2 %v1631_v32  ;;  %1707 = vmatpush.xpose.msrb.mxu0 %v1632_v35  ;;  %v1633_v37 = vsub.f32 %v1631_v32, %v1632_v35 }
  0xf9   : > { %2207 = vrot.lane.b32.xlu2 %v12030_v60, %s15876_s10  ;;  %v1739_v39 = vsel %vm1582_vm1, %v12044_v36, 0 }
  0xfa   : > { %v1634_v40 = vand.u32 4294901760, %v1633_v37  ;;  %v1756_v41 = vand.u32 4294901760, %v1739_v39  ;;  %v1507_v57 = vpop.f32.mrf.mxu3  ;;  %v1546_v61 = vpop.f32.mrf.mxu0 }
  0xfb   : > { %1709 = vmatmul.f32.vlgmr.msrb.gmra.mxu0 %v1606_v5 }
  0xfc   : > { %1635 = vmatpush.xpose.msrb.mxu3 %v1634_v40  ;;  %1757 = vmatpush.xpose.msrb.mxu2 %v1756_v41  ;;  %v1783_v23 = vsub.f32 %v1739_v39, %v1756_v41  ;;  %v1475_v53 = vpop.f32.mrf.mxu2  ;;  %v1579_v12 = vpop.f32.mrf.mxu1 }
  0xfd   : > { %1833 = vmatpush.xpose.msra.mxu1 %v1756_v41  ;;  %v1476_v56 = vadd.f32 %v1475_v53, %v1442_v52 }
  0xfe   : > { %1810 = vmatpush.xpose.msra.mxu0 %v1783_v23  ;;  %v1784_v43 = vand.u32 4294901760, %v1783_v23 }
  0xff   : > { %1637 = vmatmul.f32.vlgmr.msrb.gmra.mxu3 %v1606_v5  ;;  %1661 = vmatmul.f32.vlgmr.msra.gmra.mxu2 %v1607_v10  ;;  %v1508_v58 = vadd.f32 %v1507_v57, %v1476_v56 }
 0x100   : > { %1681 = vmatpush.xpose.msra.mxu3 %v1604_v28  ;;  %1837 = vmatmul.f32.vlgmr.msra.gmra.mxu1 %v1760_v42  ;;  %v1785_v44 = vsub.f32 %v1783_v23, %v1784_v43 }
 0x101   : > { %1859 = vmatpush.xpose.msra.mxu2 %v1784_v43  ;;  %v1547_v62 = vadd.f32 %v1546_v61, %v1508_v58 }
 0x102   : > { %v1786_v46 = vand.u32 4294901760, %v1785_v44  ;;  %v1513_v6 = vpop.f32.mrf.mxu3  ;;  %v1550_v9 = vpop.f32.mrf.mxu0 }
 0x103   : > { %1813 = vmatmul.f32.vlgmr.msra.gmra.mxu0 %v1759_v38  ;;  %v12053_v0 = vadd.f32 %v1575_v63, %v1547_v62 }
 0x104   : > { %1787 = vmatpush.xpose.msrb.mxu3 %v1786_v46  ;;  %v1480_v3 = vpop.f32.mrf.mxu2 }
 0x105   : > { %v1927_v2 = vand.u32 4294901760, %v12053_v0  ;;  %v1481_v4 = vadd.f32 %v1480_v3, %v1446_v1 }
 0x107   : > { %1685 = vmatmul.f32.vlgmr.msra.gmra.mxu3 %v1608_v18  ;;  %1763 = vmatmul.f32.vlgmr.msrb.gmra.mxu2 %v1762_v47  ;;  %v1954_v5 = vsub.f32 %v12053_v0, %v1927_v2  ;;  %v1514_v7 = vadd.f32 %v1513_v6, %v1481_v4 }
 0x108   : > { %1881 = vmatpush.xpose.msra.mxu3 %v1756_v41  ;;  %1928 = vmatpush.msrb.mxu0 %v1927_v2 }
 0x109   : > { %v1955_v8 = vand.u32 4294901760, %v1954_v5  ;;  %1981 = vmatpush.msrb.mxu2 %v1954_v5  ;;  %v1551_v10 = vadd.f32 %v1550_v9, %v1514_v7 }
 0x10b   : > { %v1956_v11 = vsub.f32 %v1954_v5, %v1955_v8  ;;  %2030 = vmatpush.msra.mxu0 %v1955_v8  ;;  %v12057_v14 = vadd.f32 %v1579_v12, %v1551_v10 }
 0x10d   : > { %v1957_v13 = vand.u32 4294901760, %v1956_v11  ;;  %v12060_v15 = vand.u32 4294901760, %v12057_v14 }
 0x10f   : > { %1789 = vmatmul.f32.vlgmr.msrb.gmra.mxu3 %v1758_v25  ;;  %1861 = vmatmul.f32.vlgmr.msra.gmra.mxu2 %v1758_v25  ;;  %v12065_v16 = vsub.f32 %v12057_v14, %v12060_v15 }
 0x110   : > { %2004 = vmatpush.msrb.mxu3 %v1927_v2  ;;  %1958 = vmatpush.msrb.mxu1 %v1957_v13 }
 0x111   : > { %2077 = vmatpush.msra.mxu2 %v12060_v15  ;;  %v2104_v17 = vand.u32 4294901760, %v12065_v16 }
 0x112   : > { %2052 = vmatpush.msra.mxu1 %v1927_v2 }
 0x113   : > { %v2105_v18 = vsub.f32 %v12065_v16, %v2104_v17 }
 0x115   : > { %v2106_v20 = vand.u32 4294901760, %v2105_v18 }
 0x117   : > { %1883 = vmatmul.f32.vlgmr.msra.gmra.mxu3 %v1758_v25 }
 0x118   : > { %2107 = vmatpush.msra.mxu3 %v2106_v20 }
 0x14b   : > { %v2210_v57 = vpop.permute.xlu2 %2209 }
 0x14c   : > { %v2213_v59 = vsel %vm1582_vm1, %v2210_v57, 0 }
 0x14d   : > { %v2230_v61 = vand.u32 4294901760, %v2213_v59 }
 0x14f   : > { %v2257_v63 = vsub.f32 %v2213_v59, %v2230_v61 }
 0x151   : > { %v2258_v5 = vand.u32 4294901760, %v2257_v63 }
 0x153   : > { %v2259_v10 = vsub.f32 %v2257_v63, %v2258_v5 }
 0x174   : > { %v1732_v32 = vpop.f32.mrf.mxu1 }
 0x178   : > { %v1710_v29 = vpop.f32.mrf.mxu0 }
 0x17a   : > { %v1612_v22 = vpop.f32.mrf.mxu2 }
 0x17d   : > { %v1838_v41 = vpop.f32.mrf.mxu1 }
 0x180   : > { %v1814_v39 = vpop.f32.mrf.mxu0 }
 0x182   : > { %v1638_v24 = vpop.f32.mrf.mxu3  ;;  %v1662_v26 = vpop.f32.mrf.mxu2 }
 0x183   : > { %v1639_v27 = vadd.f32 %v1638_v24, %v1612_v22  ;;  %v2260_v24 = vand.u32 4294901760, %v2259_v10 }
 0x185   : > { %v1663_v28 = vadd.f32 %v1662_v26, %v1639_v27  ;;  %v2208_v26 = vpop.permute.xlu2 %2207 }
 0x18a   : > { %v1686_v30 = vpop.f32.mrf.mxu3  ;;  %v1764_v33 = vpop.f32.mrf.mxu2 }
 0x18b   : > { %v1687_v31 = vadd.f32 %v1686_v30, %v1663_v28 }
 0x18d   : > { %v1711_v25 = vadd.f32 %v1710_v29, %v1687_v31 }
 0x18f   : > { %v1733_v34 = vadd.f32 %v1732_v32, %v1711_v25 }
 0x191   : > { %v1887_v35 = vsel %vm1582_vm1, %v1733_v34, -inf }
 0x192   : > { %v1790_v37 = vpop.f32.mrf.mxu3  ;;  %1888 = vmax.xlane.f32.xlu0 %v1887_v35  ;;  %v1862_v42 = vpop.f32.mrf.mxu2 }
 0x193   : > { %v1791_v38 = vadd.f32 %v1790_v37, %v1764_v33 }
 0x195   : > { %v1815_v40 = vadd.f32 %v1814_v39, %v1791_v38 }
 0x197   : > { %v1839_v23 = vadd.f32 %v1838_v41, %v1815_v40 }
 0x199   : > { %v1863_v43 = vadd.f32 %v1862_v42, %v1839_v23 }
 0x19a   : > { %v1884_v44 = vpop.f32.mrf.mxu3 }
 0x19b   : > { %v1885_v45 = vadd.f32 %v1884_v44, %v1863_v43 }
 0x19d   : > { %v1890_v46 = vsel %vm1582_vm1, %v1885_v45, -inf }
 0x19e   : > { %1891 = vmax.xlane.f32.xlu0 %v1890_v46 }
 0x1b2   : > { %2363 = vrot.lane.b32.xlu0 %v12044_v36, %s15876_s10 }
 0x205   : > { %v1889_v47 = vpop.xlane.xlu0 %1888 }
 0x206   : > { %v1893_v48 = vsub.f32 %v1733_v34, %v1889_v47 }
 0x208   : > { %v1895_v49 = vmul.f32 1.442695, %v1893_v48 }
 0x20a   : > { %11521 = vpow2.f32 %v1895_v49 }
 0x210   : > { %v11522_v50 = vpop.eup %11521 }
 0x211   : > { %v1892_v51 = vpop.xlane.xlu0 %1891  ;;  %v1899_v52 = vsel %vm1582_vm1, %v11522_v50, 0.0 }
 0x212   : > { %v1894_v53 = vsub.f32 %v1885_v45, %v1892_v51  ;;  %1900 = vadd.xlane.f32.xlu1 %v1899_v52 }
 0x214   : > { %v1897_v54 = vmul.f32 1.442695, %v1894_v53 }
 0x216   : > { %11523 = vpow2.f32 %v1897_v54 }
 0x21c   : > { %v11524_v55 = vpop.eup %11523 }
 0x21d   : > { %v1902_v56 = vsel %vm1582_vm1, %v11524_v55, 0.0 }
 0x21e   : > { %1903 = vadd.xlane.f32.xlu1 %v1902_v56 }
 0x224   : > { %v2364_v2 = vpop.permute.xlu0 %2363 }
 0x225   : > { %v2367_v7 = vsel %vm1582_vm1, %v2364_v2, 0 }
 0x226   : > { %v2384_v11 = vand.u32 4294901760, %v2367_v7 }
 0x228   : > { %v2411_v20 = vsub.f32 %v2367_v7, %v2384_v11 }
 0x22a   : > { %v2412_v29 = vand.u32 4294901760, %v2411_v20 }
 0x22c   : > { %v2413_v32 = vsub.f32 %v2411_v20, %v2412_v29 }
 0x22e   : > { %v2414_v34 = vand.u32 4294901760, %v2413_v32 }
 0x237   : > { %2361 = vrot.lane.b32.xlu1 %v12034_v19, %s15876_s10 }
 0x285   : > { %v1901_v58 = vpop.xlane.xlu1 %1900 }
 0x286   : > { %11525 = vrcp.f32 %v1901_v58 }
 0x28c   : > { %v11526_v62 = vpop.eup %11525 }
 0x28d   : > { %v1907_v1 = vmul.f32 %v11526_v62, %v11522_v50 }
 0x28f   : > { %v1910_v3 = vsel %vm1582_vm1, %v1907_v1, 0 }
 0x290   : > { %v1929_v4 = vand.u32 4294901760, %v1910_v3 }
 0x291   : > { %v1904_v6 = vpop.xlane.xlu1 %1903 }
 0x292   : > { %11527 = vrcp.f32 %v1904_v6  ;;  %1960 = vmatmul.f32.vlgmr.msrb.gmra.mxu1 %v1929_v4  ;;  %v1930_v8 = vsub.f32 %v1910_v3, %v1929_v4 }
 0x293   : > { %2153 = vmatpush.msrb.mxu1 %v12060_v15 }
 0x294   : > { %1984 = vmatmul.f32.vlgmr.msrb.gmra.mxu2 %v1930_v8  ;;  %v1931_v9 = vand.u32 4294901760, %v1930_v8 }
 0x295   : > { %2179 = vmatpush.msrb.mxu2 %v2104_v17  ;;  %v2211_v17 = vsel %vm1582_vm1, %v2208_v26, 0 }
 0x296   : > { %2008 = vmatmul.f32.vlgmr.msrb.gmra.mxu3 %v1931_v9  ;;  %v1932_v12 = vsub.f32 %v1930_v8, %v1931_v9 }
 0x297   : > { %2201 = vmatpush.msrb.mxu3 %v12060_v15  ;;  %v2232_v15 = vand.u32 4294901760, %v2211_v17 }
 0x298   : > { %v11528_v13 = vpop.eup %11527  ;;  %v1933_v18 = vand.u32 4294901760, %v1932_v12 }
 0x299   : > { %v1908_v22 = vmul.f32 %v11528_v13, %v11524_v55  ;;  %v2233_v33 = vsub.f32 %v2211_v17, %v2232_v15 }
 0x29a   : > { %1934 = vmatmul.f32.vlgmr.msrb.gmra.mxu0 %v1933_v18  ;;  %2054 = vmatmul.f32.vlgmr.msra.gmra.mxu1 %v1929_v4 }
 0x29b   : > { %2130 = vmatpush.msrb.mxu0 %v12065_v16  ;;  %2261 = vmatpush.xpose.msra.mxu1 %v2260_v24  ;;  %v2059_v27 = vsel %vm1582_vm1, %v1908_v22, 0  ;;  %v2234_v35 = vand.u32 4294901760, %v2233_v33 }
 0x29c   : > { %v2078_v28 = vand.u32 4294901760, %v2059_v27 }
 0x29d   : > { %v2235_v39 = vsub.f32 %v2233_v33, %v2234_v35 }
 0x29e   : > { %v2079_v30 = vsub.f32 %v2059_v27, %v2078_v28  ;;  %2109 = vmatmul.f32.vlgmr.msra.gmra.mxu3 %v2078_v28 }
 0x29f   : > { %2307 = vmatpush.xpose.msra.mxu3 %v2230_v61  ;;  %v2236_v23 = vand.u32 4294901760, %v2235_v39 }
 0x2a0   : > { %v2080_v31 = vand.u32 4294901760, %v2079_v30 }
 0x2a2   : > { %2032 = vmatmul.f32.vlgmr.msra.gmra.mxu0 %v1929_v4  ;;  %2157 = vmatmul.f32.vlgmr.msrb.gmra.mxu1 %v2080_v31  ;;  %v2081_v25 = vsub.f32 %v2079_v30, %v2080_v31 }
 0x2a3   : > { %2231 = vmatpush.xpose.msra.mxu0 %v2230_v61  ;;  %2355 = vmatpush.xpose.msrb.mxu1 %v2230_v61 }
 0x2a4   : > { %v2082_v16 = vand.u32 4294901760, %v2081_v25 }
 0x2a6   : > { %2083 = vmatmul.f32.vlgmr.msra.gmra.mxu2 %v2082_v16  ;;  %2203 = vmatmul.f32.vlgmr.msrb.gmra.mxu3 %v2078_v28 }
 0x2a7   : > { %2284 = vmatpush.xpose.msra.mxu2 %v2257_v63  ;;  %2415 = vmatpush.xpose.msrb.mxu3 %v2414_v34 }
 0x2a9   : > { %v2362_v37 = vpop.permute.xlu1 %2361 }
 0x2aa   : > { %v2365_v38 = vsel %vm1582_vm1, %v2362_v37, 0  ;;  %2133 = vmatmul.f32.vlgmr.msrb.gmra.mxu0 %v2079_v30  ;;  %2263 = vmatmul.f32.vlgmr.msra.gmra.mxu1 %v2232_v15 }
 0x2ab   : > { %2333 = vmatpush.xpose.msrb.mxu0 %v2258_v5  ;;  %2461 = vmatpush.xpose.msra.mxu1 %v2384_v11  ;;  %v2386_v40 = vand.u32 4294901760, %v2365_v38 }
 0x2ad   : > { %v2387_v41 = vsub.f32 %v2365_v38, %v2386_v40 }
 0x2ae   : > { %2181 = vmatmul.f32.vlgmr.msrb.gmra.mxu2 %v2078_v28  ;;  %2311 = vmatmul.f32.vlgmr.msra.gmra.mxu3 %v2234_v35 }
 0x2af   : > { %2385 = vmatpush.xpose.msrb.mxu2 %v2384_v11  ;;  %2509 = vmatpush.xpose.msra.mxu3 %v2384_v11  ;;  %v2388_v42 = vand.u32 4294901760, %v2387_v41 }
 0x2b1   : > { %v2389_v43 = vsub.f32 %v2387_v41, %v2388_v42 }
 0x2b2   : > { %2237 = vmatmul.f32.vlgmr.msra.gmra.mxu0 %v2236_v23  ;;  %2357 = vmatmul.f32.vlgmr.msrb.gmra.mxu1 %v2232_v15 }
 0x2b3   : > { %2438 = vmatpush.xpose.msra.mxu0 %v2411_v20  ;;  %v2390_v44 = vand.u32 4294901760, %v2389_v43 }
 0x2b6   : > { %2287 = vmatmul.f32.vlgmr.msra.gmra.mxu2 %v2233_v33  ;;  %2417 = vmatmul.f32.vlgmr.msrb.gmra.mxu3 %v2386_v40 }
 0x2b7   : > { %2487 = vmatpush.xpose.msra.mxu2 %v2412_v29 }
 0x2ba   : > { %2335 = vmatmul.f32.vlgmr.msrb.gmra.mxu0 %v2232_v15  ;;  %2465 = vmatmul.f32.vlgmr.msra.gmra.mxu1 %v2388_v42 }
 0x2be   : > { %2391 = vmatmul.f32.vlgmr.msrb.gmra.mxu2 %v2390_v44  ;;  %2511 = vmatmul.f32.vlgmr.msra.gmra.mxu3 %v2386_v40 }
 0x2c2   : > { %2441 = vmatmul.f32.vlgmr.msra.gmra.mxu0 %v2387_v41 }
 0x2c6   : > { %2489 = vmatmul.f32.vlgmr.msra.gmra.mxu2 %v2386_v40 }
 0x30f   : > { %v12090_v45 = vpop.f32.mrf.mxu1 }
 0x317   : > { %v12092_v46 = vpop.f32.mrf.mxu0  ;;  %v12096_v48 = vpop.f32.mrf.mxu1 }
 0x318   : > { %v12100_v50 = vpop.f32.mrf.mxu2 }
 0x319   : > { %v12094_v47 = vpop.f32.mrf.mxu3 }
 0x31f   : > { %v12098_v49 = vpop.f32.mrf.mxu0  ;;  %v12106_v53 = vpop.f32.mrf.mxu1 }
 0x321   : > { %v12102_v51 = vpop.f32.mrf.mxu3 }
 0x327   : > { %v12104_v52 = vpop.f32.mrf.mxu0  ;;  %v2264_v58 = vpop.f32.mrf.mxu1 }
 0x329   : > { %v12108_v54 = vpop.f32.mrf.mxu2  ;;  %v12110_v55 = vpop.f32.mrf.mxu3 }
 0x32f   : > { %v2238_v56 = vpop.f32.mrf.mxu0  ;;  %v2358_v3 = vpop.f32.mrf.mxu1 }
 0x330   : > { %v2265_v61 = vadd.f32 %v2264_v58, %v2238_v56 }
 0x331   : > { %v12112_v57 = vpop.f32.mrf.mxu2  ;;  %v2312_v59 = vpop.f32.mrf.mxu3 }
 0x337   : > { %v2336_v62 = vpop.f32.mrf.mxu0  ;;  %v2466_v12 = vpop.f32.mrf.mxu1 }
 0x339   : > { %v2288_v63 = vpop.f32.mrf.mxu2  ;;  %v2418_v6 = vpop.f32.mrf.mxu3 }
 0x33a   : > { %v2289_v1 = vadd.f32 %v2288_v63, %v2265_v61 }
 0x33c   : > { %v2313_v2 = vadd.f32 %v2312_v59, %v2289_v1 }
 0x33e   : > { %v2337_v4 = vadd.f32 %v2336_v62, %v2313_v2 }
 0x33f   : > { %v2442_v10 = vpop.f32.mrf.mxu0 }
 0x340   : > { %v2359_v5 = vadd.f32 %v2358_v3, %v2337_v4 }
 0x341   : > { %v2392_v7 = vpop.f32.mrf.mxu2  ;;  %v2512_v22 = vpop.f32.mrf.mxu3 }
 0x342   : > { %v2419_v8 = vadd.f32 %v2418_v6, %v2392_v7  ;;  %v2515_v9 = vsel %vm1582_vm1, %v2359_v5, -inf }
 0x343   : > { %2516 = vmax.xlane.f32.xlu2 %v2515_v9 }
 0x344   : > { %v2443_v11 = vadd.f32 %v2442_v10, %v2419_v8 }
 0x346   : > { %v2467_v13 = vadd.f32 %v2466_v12, %v2443_v11 }
 0x349   : > { %v2490_v18 = vpop.f32.mrf.mxu2 }
 0x34a   : > { %v2491_v20 = vadd.f32 %v2490_v18, %v2467_v13 }
 0x34c   : > { %v2513_v24 = vadd.f32 %v2512_v22, %v2491_v20 }
 0x34e   : > { %v2518_v26 = vsel %vm1582_vm1, %v2513_v24, -inf }
 0x34f   : > { %2519 = vmax.xlane.f32.xlu0 %v2518_v26 }
 0x35b   : > { %2538 = vrot.lane.b32.xlu2 %v12053_v0, %s15876_s10 }
 0x363   : > { %2843 = vrot.lane.b32.xlu2 %v12030_v60, %s15872_s28  ;;  %2691 = vrot.lane.b32.xlu0 %v12057_v14, %s15876_s10  ;;  %s16030_s10 = sld [smem:[#allocation44_spill]] }
 0x36b   : > { %2997 = vrot.lane.b32.xlu0 %v12034_v19, %s15872_s28 }
 0x3b6   : > { %v2517_v27 = vpop.xlane.xlu2 %2516 }
 0x3b7   : > { %v2521_v28 = vsub.f32 %v2359_v5, %v2517_v27 }
 0x3b9   : > { %v2523_v17 = vmul.f32 1.442695, %v2521_v28 }
 0x3bb   : > { %11529 = vpow2.f32 %v2523_v17 }
 0x3be   : > { %v2539_v29 = vpop.permute.xlu2 %2538 }
 0x3bf   : > { %v2559_v30 = vand.u32 4294901760, %v2539_v29 }
 0x3c1   : > { %v11530_v15 = vpop.eup %11529  ;;  %v2586_v31 = vsub.f32 %v2539_v29, %v2559_v30  ;;  %2560 = vmatpush.msrb.mxu0 %v2559_v30  ;;  %2636 = vmatpush.msrb.mxu3 %v2559_v30 }
 0x3c2   : > { %v2520_v32 = vpop.xlane.xlu0 %2519  ;;  %v2527_v25 = vsel %vm1582_vm1, %v11530_v15, 0.0 }
 0x3c3   : > { %v2522_v33 = vsub.f32 %v2513_v24, %v2520_v32  ;;  %2528 = vadd.xlane.f32.xlu1 %v2527_v25  ;;  %2613 = vmatpush.msrb.mxu2 %v2586_v31  ;;  %v2587_v16 = vand.u32 4294901760, %v2586_v31 }
 0x3c5   : > { %v2525_v34 = vmul.f32 1.442695, %v2522_v33  ;;  %2662 = vmatpush.msra.mxu0 %v2587_v16  ;;  %v2588_v35 = vsub.f32 %v2586_v31, %v2587_v16 }
 0x3c6   : > { %v2844_v58 = vpop.permute.xlu2 %2843 }
 0x3c7   : > { %11531 = vpow2.f32 %v2525_v34  ;;  %v2589_v37 = vand.u32 4294901760, %v2588_v35  ;;  %v2847_v13 = vsel %vm1582_vm1, %v2844_v58, 0 }
 0x3c8   : > { %v2868_v28 = vand.u32 4294901760, %v2847_v13 }
 0x3c9   : > { %2590 = vmatpush.msrb.mxu1 %v2589_v37 }
 0x3ca   : > { %v2869_v25 = vsub.f32 %v2847_v13, %v2868_v28 }
 0x3cb   : > { %2684 = vmatpush.msra.mxu1 %v2559_v30 }
 0x3cc   : > { %v2870_v37 = vand.u32 4294901760, %v2869_v25 }
 0x3cd   : > { %v11532_v38 = vpop.eup %11531 }
 0x3ce   : > { %v2530_v39 = vsel %vm1582_vm1, %v11532_v38, 0.0 }
 0x3cf   : > { %2531 = vadd.xlane.f32.xlu2 %v2530_v39  ;;  %v2871_v39 = vsub.f32 %v2869_v25, %v2870_v37 }
 0x3d5   : > { %v2692_v40 = vpop.permute.xlu0 %2691 }
 0x3d6   : > { %v2712_v41 = vand.u32 4294901760, %v2692_v40 }
 0x3d8   : > { %v2739_v23 = vsub.f32 %v2692_v40, %v2712_v41  ;;  %2713 = vmatpush.msra.mxu2 %v2712_v41 }
 0x3da   : > { %v2740_v42 = vand.u32 4294901760, %v2739_v23 }
 0x3dc   : > { %2845 = vrot.lane.b32.xlu1 %v12036_v21, %s15872_s28  ;;  %v2741_v43 = vsub.f32 %v2739_v23, %v2740_v42 }
 0x3dd   : > { %v2998_v34 = vpop.permute.xlu0 %2997 }
 0x3de   : > { %v2742_v44 = vand.u32 4294901760, %v2741_v43 }
 0x3e0   : > { %2743 = vmatpush.msra.mxu3 %v2742_v44 }
 0x3e4   : > { %3325 = vrot.lane.b32.xlu1 %v12057_v14, %s15872_s28 }
 0x3e7   : > { %2999 = vrot.lane.b32.xlu2 %v12044_v36, %s15872_s28 }
 0x436   : > { %v2529_v56 = vpop.xlane.xlu1 %2528 }
 0x437   : > { %11533 = vrcp.f32 %v2529_v56 }
 0x43d   : > { %v11534_v59 = vpop.eup %11533 }
 0x43e   : > { %v2535_v61 = vmul.f32 %v11534_v59, %v11530_v15 }
 0x440   : > { %v2542_v62 = vsel %vm1582_vm1, %v2535_v61, 0 }
 0x441   : > { %v2561_v63 = vand.u32 4294901760, %v2542_v62 }
 0x442   : > { %v2532_v1 = vpop.xlane.xlu2 %2531 }
 0x443   : > { %11535 = vrcp.f32 %v2532_v1  ;;  %2592 = vmatmul.f32.vlgmr.msrb.gmra.mxu1 %v2561_v63  ;;  %v2562_v2 = vsub.f32 %v2542_v62, %v2561_v63 }
 0x444   : > { %2789 = vmatpush.msrb.mxu1 %v2712_v41 }
 0x445   : > { %2616 = vmatmul.f32.vlgmr.msrb.gmra.mxu2 %v2562_v2  ;;  %v2563_v3 = vand.u32 4294901760, %v2562_v2 }
 0x446   : > { %2815 = vmatpush.msrb.mxu2 %v2740_v42 }
 0x447   : > { %2640 = vmatmul.f32.vlgmr.msrb.gmra.mxu3 %v2563_v3  ;;  %v2564_v4 = vsub.f32 %v2562_v2, %v2563_v3 }
 0x448   : > { %2837 = vmatpush.msrb.mxu3 %v2712_v41 }
 0x449   : > { %v11536_v5 = vpop.eup %11535  ;;  %v2565_v6 = vand.u32 4294901760, %v2564_v4 }
 0x44a   : > { %v2536_v7 = vmul.f32 %v11536_v5, %v11532_v38  ;;  %v3000_v8 = vpop.permute.xlu2 %2999  ;;  %v3001_v38 = vsel %vm1582_vm1, %v2998_v34, 0 }
 0x44b   : > { %v3003_v9 = vsel %vm1582_vm1, %v3000_v8, 0  ;;  %2566 = vmatmul.f32.vlgmr.msrb.gmra.mxu0 %v2565_v6  ;;  %2686 = vmatmul.f32.vlgmr.msra.gmra.mxu1 %v2561_v63  ;;  %v3022_v40 = vand.u32 4294901760, %v3001_v38 }
 0x44c   : > { %v3020_v10 = vand.u32 4294901760, %v3003_v9  ;;  %2766 = vmatpush.msrb.mxu0 %v2739_v23  ;;  %v2695_v11 = vsel %vm1582_vm1, %v2536_v7, 0  ;;  %v2872_v23 = vand.u32 4294901760, %v2871_v39 }
 0x44d   : > { %v2714_v12 = vand.u32 4294901760, %v2695_v11  ;;  %v3023_v41 = vsub.f32 %v3001_v38, %v3022_v40 }
 0x44e   : > { %v3047_v18 = vsub.f32 %v3003_v9, %v3020_v10  ;;  %v2846_v20 = vpop.permute.xlu1 %2845 }
 0x44f   : > { %v2849_v22 = vsel %vm1582_vm1, %v2846_v20, 0  ;;  %v2715_v24 = vsub.f32 %v2695_v11, %v2714_v12  ;;  %2745 = vmatmul.f32.vlgmr.msra.gmra.mxu3 %v2714_v12  ;;  %v3024_v42 = vand.u32 4294901760, %v3023_v41 }
 0x450   : > { %v3048_v26 = vand.u32 4294901760, %v3047_v18  ;;  %v2866_v27 = vand.u32 4294901760, %v2849_v22 }
 0x451   : > { %v2716_v17 = vand.u32 4294901760, %v2715_v24  ;;  %v3025_v43 = vsub.f32 %v3023_v41, %v3024_v42 }
 0x452   : > { %v3049_v29 = vsub.f32 %v3047_v18, %v3048_v26  ;;  %v2893_v30 = vsub.f32 %v2849_v22, %v2866_v27  ;;  %2943 = vmatpush.xpose.msra.mxu3 %v2866_v27 }
 0x453   : > { %2664 = vmatmul.f32.vlgmr.msra.gmra.mxu0 %v2561_v63  ;;  %2793 = vmatmul.f32.vlgmr.msrb.gmra.mxu1 %v2716_v17  ;;  %v2717_v15 = vsub.f32 %v2715_v24, %v2716_v17  ;;  %v3026_v44 = vand.u32 4294901760, %v3025_v43 }
 0x454   : > { %v2894_v31 = vand.u32 4294901760, %v2893_v30  ;;  %2867 = vmatpush.xpose.msra.mxu0 %v2866_v27  ;;  %v3050_v32 = vand.u32 4294901760, %v3049_v29 }
 0x455   : > { %v2718_v33 = vand.u32 4294901760, %v2717_v15 }
 0x456   : > { %v2895_v16 = vsub.f32 %v2893_v30, %v2894_v31 }
 0x457   : > { %2719 = vmatmul.f32.vlgmr.msra.gmra.mxu2 %v2718_v33  ;;  %2839 = vmatmul.f32.vlgmr.msrb.gmra.mxu3 %v2714_v12 }
 0x458   : > { %2920 = vmatpush.xpose.msra.mxu2 %v2893_v30  ;;  %3051 = vmatpush.xpose.msrb.mxu3 %v3050_v32  ;;  %v2896_v35 = vand.u32 4294901760, %v2895_v16 }
 0x45a   : > { %2897 = vmatpush.xpose.msra.mxu1 %v2896_v35 }
 0x45b   : > { %2769 = vmatmul.f32.vlgmr.msrb.gmra.mxu0 %v2715_v24 }
 0x45c   : > { %2969 = vmatpush.xpose.msrb.mxu0 %v2894_v31 }
 0x45d   : > { %2899 = vmatmul.f32.vlgmr.msra.gmra.mxu1 %v2868_v28 }
 0x45e   : > { %2991 = vmatpush.xpose.msrb.mxu1 %v2866_v27 }
 0x45f   : > { %2817 = vmatmul.f32.vlgmr.msrb.gmra.mxu2 %v2714_v12  ;;  %2947 = vmatmul.f32.vlgmr.msra.gmra.mxu3 %v2870_v37 }
 0x460   : > { %3021 = vmatpush.xpose.msrb.mxu2 %v3020_v10  ;;  %3145 = vmatpush.xpose.msra.mxu3 %v3020_v10 }
 0x462   : > { %3097 = vmatpush.xpose.msra.mxu1 %v3020_v10 }
 0x463   : > { %2873 = vmatmul.f32.vlgmr.msra.gmra.mxu0 %v2872_v23 }
 0x464   : > { %3074 = vmatpush.xpose.msra.mxu0 %v3047_v18 }
 0x465   : > { %2993 = vmatmul.f32.vlgmr.msrb.gmra.mxu1 %v2868_v28 }
 0x467   : > { %2923 = vmatmul.f32.vlgmr.msra.gmra.mxu2 %v2869_v25  ;;  %3053 = vmatmul.f32.vlgmr.msrb.gmra.mxu3 %v3022_v40 }
 0x468   : > { %3123 = vmatpush.xpose.msra.mxu2 %v3048_v26 }
 0x46b   : > { %2971 = vmatmul.f32.vlgmr.msrb.gmra.mxu0 %v2868_v28 }
 0x46d   : > { %3101 = vmatmul.f32.vlgmr.msra.gmra.mxu1 %v3024_v42  ;;  %v3326_v42 = vpop.permute.xlu1 %3325 }
 0x46f   : > { %3027 = vmatmul.f32.vlgmr.msrb.gmra.mxu2 %v3026_v44  ;;  %3147 = vmatmul.f32.vlgmr.msra.gmra.mxu3 %v3022_v40  ;;  %v3346_v44 = vand.u32 4294901760, %v3326_v42 }
 0x473   : > { %3077 = vmatmul.f32.vlgmr.msra.gmra.mxu0 %v3023_v41 }
 0x477   : > { %3125 = vmatmul.f32.vlgmr.msra.gmra.mxu2 %v3022_v40 }
 0x4c0   : > { %v12138_v56 = vpop.f32.mrf.mxu1 }
 0x4c8   : > { %v12140_v58 = vpop.f32.mrf.mxu0  ;;  %v12146_v62 = vpop.f32.mrf.mxu2 }
 0x4c9   : > { %v12148_v63 = vpop.f32.mrf.mxu1 }
 0x4ca   : > { %v12142_v59 = vpop.f32.mrf.mxu3 }
 0x4d0   : > { %v12144_v61 = vpop.f32.mrf.mxu0 }
 0x4d1   : > { %v12156_v4 = vpop.f32.mrf.mxu1 }
 0x4d2   : > { %v12150_v1 = vpop.f32.mrf.mxu3 }
 0x4d8   : > { %v12152_v2 = vpop.f32.mrf.mxu0 }
 0x4da   : > { %v12154_v3 = vpop.f32.mrf.mxu2  ;;  %v12158_v5 = vpop.f32.mrf.mxu3 }
 0x4db   : > { %v2900_v8 = vpop.f32.mrf.mxu1 }
 0x4e0   : > { %v2874_v6 = vpop.f32.mrf.mxu0 }
 0x4e1   : > { %v2901_v10 = vadd.f32 %v2900_v8, %v2874_v6  ;;  %v3373_v6 = vsub.f32 %v3326_v42, %v3346_v44 }
 0x4e2   : > { %v12160_v7 = vpop.f32.mrf.mxu2  ;;  %v2948_v9 = vpop.f32.mrf.mxu3 }
 0x4e3   : > { %v2994_v20 = vpop.f32.mrf.mxu1 }
 0x4e8   : > { %v2972_v11 = vpop.f32.mrf.mxu0 }
 0x4ea   : > { %v2924_v12 = vpop.f32.mrf.mxu2  ;;  %v3054_v26 = vpop.f32.mrf.mxu3 }
 0x4eb   : > { %v2925_v13 = vadd.f32 %v2924_v12, %v2901_v10  ;;  %v3102_v15 = vpop.f32.mrf.mxu1 }
 0x4ed   : > { %v2949_v18 = vadd.f32 %v2948_v9, %v2925_v13  ;;  %v3374_v9 = vand.u32 4294901760, %v3373_v6 }
 0x4ef   : > { %v2973_v22 = vadd.f32 %v2972_v11, %v2949_v18 }
 0x4f0   : > { %v3078_v29 = vpop.f32.mrf.mxu0 }
 0x4f1   : > { %v2995_v24 = vadd.f32 %v2994_v20, %v2973_v22 }
 0x4f2   : > { %v3028_v27 = vpop.f32.mrf.mxu2  ;;  %v3148_v33 = vpop.f32.mrf.mxu3 }
 0x4f3   : > { %v3055_v28 = vadd.f32 %v3054_v26, %v3028_v27  ;;  %v3151_v17 = vsel %vm1582_vm1, %v2995_v24, -inf }
 0x4f4   : > { %3152 = vmax.xlane.f32.xlu2 %v3151_v17 }
 0x4f5   : > { %v3079_v30 = vadd.f32 %v3078_v29, %v3055_v28 }
 0x4f7   : > { %v3103_v31 = vadd.f32 %v3102_v15, %v3079_v30 }
 0x4fa   : > { %v3126_v32 = vpop.f32.mrf.mxu2 }
 0x4fb   : > { %v3127_v25 = vadd.f32 %v3126_v32, %v3103_v31 }
 0x4fd   : > { %v3149_v16 = vadd.f32 %v3148_v33, %v3127_v25 }
 0x4ff   : > { %v3154_v34 = vsel %vm1582_vm1, %v3149_v16, -inf }
 0x500   : > { %3155 = vmax.xlane.f32.xlu0 %v3154_v34 }
 0x514   : > { %3173 = vrot.lane.b32.xlu0 %v12053_v0, %s15872_s28  ;;  %s11624_s28 = scalar_lea.hbm %s15852_s26, 32 }
 0x51c   : > { %3477 = vrot.lane.b32.xlu0 %v12030_v60, %s15870_s2 }
 0x524   : > { %3631 = vrot.lane.b32.xlu0 %v12034_v19, %s15870_s2  ;;  %v3375_v19 = vsub.f32 %v3373_v6, %v3374_v9 }
 0x526   : > { %v3376_v12 = vand.u32 4294901760, %v3375_v19 }
 0x567   : > { %v3153_v35 = vpop.xlane.xlu2 %3152 }
 0x568   : > { %v3157_v37 = vsub.f32 %v2995_v24, %v3153_v35 }
 0x56a   : > { %v3159_v38 = vmul.f32 1.442695, %v3157_v37 }
 0x56c   : > { %11537 = vpow2.f32 %v3159_v38 }
 0x572   : > { %v11538_v39 = vpop.eup %11537 }
 0x573   : > { %v3156_v40 = vpop.xlane.xlu0 %3155  ;;  %v3163_v41 = vsel %vm1582_vm1, %v11538_v39, 0.0 }
 0x574   : > { %v3158_v23 = vsub.f32 %v3149_v16, %v3156_v40  ;;  %3164 = vadd.xlane.f32.xlu1 %v3163_v41 }
 0x576   : > { %v3161_v43 = vmul.f32 1.442695, %v3158_v23 }
 0x578   : > { %11539 = vpow2.f32 %v3161_v43 }
 0x57e   : > { %v11540_v8 = vpop.eup %11539 }
 0x57f   : > { %v3166_v60 = vsel %vm1582_vm1, %v11540_v8, 0.0 }
 0x580   : > { %3167 = vadd.xlane.f32.xlu2 %v3166_v60 }
 0x586   : > { %v3174_v10 = vpop.permute.xlu0 %3173 }
 0x587   : > { %v3194_v11 = vand.u32 4294901760, %v3174_v10 }
 0x589   : > { %v3221_v13 = vsub.f32 %v3174_v10, %v3194_v11  ;;  %3195 = vmatpush.msrb.mxu0 %v3194_v11  ;;  %3271 = vmatpush.msrb.mxu3 %v3194_v11 }
 0x58b   : > { %3377 = vmatpush.msra.mxu3 %v3376_v12  ;;  %v3222_v18 = vand.u32 4294901760, %v3221_v13  ;;  %3248 = vmatpush.msrb.mxu2 %v3221_v13 }
 0x58d   : > { %3347 = vmatpush.msra.mxu2 %v3346_v44  ;;  %v3223_v20 = vsub.f32 %v3221_v13, %v3222_v18  ;;  %3633 = vrot.lane.b32.xlu1 %v12044_v36, %s15870_s2 }
 0x58e   : > { %3297 = vmatpush.msra.mxu0 %v3222_v18  ;;  %v3478_v33 = vpop.permute.xlu0 %3477 }
 0x58f   : > { %v3224_v22 = vand.u32 4294901760, %v3223_v20  ;;  %v3481_v38 = vsel %vm1582_vm1, %v3478_v33, 0 }
 0x591   : > { %3225 = vmatpush.msrb.mxu1 %v3224_v22 }
 0x593   : > { %3319 = vmatpush.msra.mxu1 %v3194_v11 }
 0x596   : > { %v3632_v18 = vpop.permute.xlu0 %3631 }
 0x598   : > { %3479 = vrot.lane.b32.xlu2 %v12036_v21, %s15870_s2 }
 0x5e7   : > { %v3165_v24 = vpop.xlane.xlu1 %3164 }
 0x5e8   : > { %11541 = vrcp.f32 %v3165_v24  ;;  %v3635_v24 = vsel %vm1582_vm1, %v3632_v18, 0 }
 0x5ee   : > { %v11542_v26 = vpop.eup %11541 }
 0x5ef   : > { %v3171_v27 = vmul.f32 %v11542_v26, %v11538_v39 }
 0x5f1   : > { %v3177_v28 = vsel %vm1582_vm1, %v3171_v27, 0  ;;  %v3656_v27 = vand.u32 4294901760, %v3635_v24 }
 0x5f2   : > { %v3196_v17 = vand.u32 4294901760, %v3177_v28 }
 0x5f3   : > { %v3168_v29 = vpop.xlane.xlu2 %3167 }
 0x5f4   : > { %11543 = vrcp.f32 %v3168_v29  ;;  %v3197_v30 = vsub.f32 %v3177_v28, %v3196_v17  ;;  %3227 = vmatmul.f32.vlgmr.msrb.gmra.mxu1 %v3196_v17 }
 0x5f5   : > { %3423 = vmatpush.msrb.mxu1 %v3346_v44 }
 0x5f6   : > { %3251 = vmatmul.f32.vlgmr.msrb.gmra.mxu2 %v3197_v30  ;;  %v3198_v36 = vand.u32 4294901760, %v3197_v30 }
 0x5f7   : > { %3449 = vmatpush.msrb.mxu2 %v3374_v9 }
 0x5f8   : > { %3275 = vmatmul.f32.vlgmr.msrb.gmra.mxu3 %v3198_v36  ;;  %v3199_v15 = vsub.f32 %v3197_v30, %v3198_v36 }
 0x5f9   : > { %3471 = vmatpush.msrb.mxu3 %v3346_v44  ;;  %v3502_v44 = vand.u32 4294901760, %v3481_v38 }
 0x5fa   : > { %v11544_v31 = vpop.eup %11543  ;;  %v3200_v21 = vand.u32 4294901760, %v3199_v15 }
 0x5fb   : > { %v3172_v32 = vmul.f32 %v11544_v31, %v11540_v8  ;;  %v3480_v25 = vpop.permute.xlu2 %3479  ;;  %v3503_v11 = vsub.f32 %v3481_v38, %v3502_v44 }
 0x5fc   : > { %v3483_v16 = vsel %vm1582_vm1, %v3480_v25, 0  ;;  %3201 = vmatmul.f32.vlgmr.msrb.gmra.mxu0 %v3200_v21  ;;  %3321 = vmatmul.f32.vlgmr.msra.gmra.mxu1 %v3196_v17 }
 0x5fd   : > { %v3329_v34 = vsel %vm1582_vm1, %v3172_v32, 0  ;;  %v3500_v35 = vand.u32 4294901760, %v3483_v16  ;;  %3400 = vmatpush.msrb.mxu0 %v3373_v6  ;;  %v3504_v22 = vand.u32 4294901760, %v3503_v11 }
 0x5fe   : > { %v3348_v37 = vand.u32 4294901760, %v3329_v34 }
 0x5ff   : > { %v3527_v39 = vsub.f32 %v3483_v16, %v3500_v35  ;;  %v3634_v40 = vpop.permute.xlu1 %3633  ;;  %v3505_v26 = vsub.f32 %v3503_v11, %v3504_v22 }
 0x600   : > { %v3349_v41 = vsub.f32 %v3329_v34, %v3348_v37  ;;  %v3637_v23 = vsel %vm1582_vm1, %v3634_v40, 0  ;;  %3379 = vmatmul.f32.vlgmr.msra.gmra.mxu3 %v3348_v37 }
 0x601   : > { %v3528_v42 = vand.u32 4294901760, %v3527_v39  ;;  %v3654_v43 = vand.u32 4294901760, %v3637_v23  ;;  %3577 = vmatpush.xpose.msra.mxu3 %v3500_v35  ;;  %v3506_v28 = vand.u32 4294901760, %v3505_v26 }
 0x602   : > { %v3350_v8 = vand.u32 4294901760, %v3349_v41 }
 0x603   : > { %v3529_v60 = vsub.f32 %v3527_v39, %v3528_v42  ;;  %v3681_v9 = vsub.f32 %v3637_v23, %v3654_v43 }
 0x604   : > { %3299 = vmatmul.f32.vlgmr.msra.gmra.mxu0 %v3196_v17  ;;  %3427 = vmatmul.f32.vlgmr.msrb.gmra.mxu1 %v3350_v8  ;;  %v3351_v19 = vsub.f32 %v3349_v41, %v3350_v8  ;;  %v3657_v17 = vsub.f32 %v3635_v24, %v3656_v27 }
 0x605   : > { %v3682_v6 = vand.u32 4294901760, %v3681_v9  ;;  %3501 = vmatpush.xpose.msra.mxu0 %v3500_v35  ;;  %v3530_v10 = vand.u32 4294901760, %v3529_v60 }
 0x606   : > { %v3352_v12 = vand.u32 4294901760, %v3351_v19  ;;  %v3658_v29 = vand.u32 4294901760, %v3657_v17 }
 0x607   : > { %v3683_v13 = vsub.f32 %v3681_v9, %v3682_v6  ;;  %3531 = vmatpush.xpose.msra.mxu1 %v3530_v10 }
 0x608   : > { %3353 = vmatmul.f32.vlgmr.msra.gmra.mxu2 %v3352_v12  ;;  %3473 = vmatmul.f32.vlgmr.msrb.gmra.mxu3 %v3348_v37  ;;  %v3659_v30 = vsub.f32 %v3657_v17, %v3658_v29 }
 0x609   : > { %3554 = vmatpush.xpose.msra.mxu2 %v3527_v39  ;;  %v3684_v20 = vand.u32 4294901760, %v3683_v13 }
 0x60a   : > { %v3660_v36 = vand.u32 4294901760, %v3659_v30 }
 0x60b   : > { %3625 = vmatpush.xpose.msrb.mxu1 %v3500_v35  ;;  %3685 = vmatpush.xpose.msrb.mxu3 %v3684_v20 }
 0x60c   : > { %3403 = vmatmul.f32.vlgmr.msrb.gmra.mxu0 %v3349_v41  ;;  %3533 = vmatmul.f32.vlgmr.msra.gmra.mxu1 %v3502_v44 }
 0x60d   : > { %3603 = vmatpush.xpose.msrb.mxu0 %v3528_v42 }
 0x60f   : > { %3731 = vmatpush.xpose.msra.mxu1 %v3654_v43 }
 0x610   : > { %3451 = vmatmul.f32.vlgmr.msrb.gmra.mxu2 %v3348_v37  ;;  %3581 = vmatmul.f32.vlgmr.msra.gmra.mxu3 %v3504_v22 }
 0x611   : > { %3655 = vmatpush.xpose.msrb.mxu2 %v3654_v43  ;;  %3779 = vmatpush.xpose.msra.mxu3 %v3654_v43 }
 0x614   : > { %3507 = vmatmul.f32.vlgmr.msra.gmra.mxu0 %v3506_v28  ;;  %3627 = vmatmul.f32.vlgmr.msrb.gmra.mxu1 %v3502_v44 }
 0x615   : > { %3708 = vmatpush.xpose.msra.mxu0 %v3681_v9 }
 0x618   : > { %3557 = vmatmul.f32.vlgmr.msra.gmra.mxu2 %v3503_v11  ;;  %3687 = vmatmul.f32.vlgmr.msrb.gmra.mxu3 %v3656_v27 }
 0x619   : > { %3757 = vmatpush.xpose.msra.mxu2 %v3682_v6 }
 0x61c   : > { %3605 = vmatmul.f32.vlgmr.msrb.gmra.mxu0 %v3502_v44  ;;  %3735 = vmatmul.f32.vlgmr.msra.gmra.mxu1 %v3658_v29 }
 0x620   : > { %3661 = vmatmul.f32.vlgmr.msrb.gmra.mxu2 %v3660_v36  ;;  %3781 = vmatmul.f32.vlgmr.msra.gmra.mxu3 %v3656_v27 }
 0x624   : > { %3711 = vmatmul.f32.vlgmr.msra.gmra.mxu0 %v3657_v17 }
 0x628   : > { %3759 = vmatmul.f32.vlgmr.msra.gmra.mxu2 %v3656_v27 }
 0x671   : > { %v3228_v15 = vpop.f32.mrf.mxu1 }
 0x679   : > { %v3202_v31 = vpop.f32.mrf.mxu0  ;;  %v3322_v32 = vpop.f32.mrf.mxu1 }
 0x67a   : > { %v3252_v33 = vpop.f32.mrf.mxu2 }
 0x67b   : > { %v3276_v21 = vpop.f32.mrf.mxu3 }
 0x681   : > { %v3300_v25 = vpop.f32.mrf.mxu0  ;;  %v3428_v35 = vpop.f32.mrf.mxu1 }
 0x683   : > { %v3380_v16 = vpop.f32.mrf.mxu3 }
 0x689   : > { %v3404_v34 = vpop.f32.mrf.mxu0  ;;  %v3534_v41 = vpop.f32.mrf.mxu1 }
 0x68b   : > { %v3354_v37 = vpop.f32.mrf.mxu2  ;;  %v12182_v38 = vpop.f32.mrf.mxu3 }
 0x691   : > { %v3508_v39 = vpop.f32.mrf.mxu0  ;;  %v3628_v9 = vpop.f32.mrf.mxu1 }
 0x692   : > { %v3535_v42 = vadd.f32 %v3534_v41, %v3508_v39 }
 0x693   : > { %v12184_v40 = vpop.f32.mrf.mxu2  ;;  %v3582_v23 = vpop.f32.mrf.mxu3 }
 0x699   : > { %v3606_v43 = vpop.f32.mrf.mxu0  ;;  %v3736_v22 = vpop.f32.mrf.mxu1 }
 0x69b   : > { %v3558_v44 = vpop.f32.mrf.mxu2  ;;  %v3688_v10 = vpop.f32.mrf.mxu3 }
 0x69c   : > { %v3559_v8 = vadd.f32 %v3558_v44, %v3535_v42 }
 0x69e   : > { %v3583_v60 = vadd.f32 %v3582_v23, %v3559_v8 }
 0x6a0   : > { %v3607_v19 = vadd.f32 %v3606_v43, %v3583_v60 }
 0x6a1   : > { %v3712_v18 = vpop.f32.mrf.mxu0 }
 0x6a2   : > { %v3629_v6 = vadd.f32 %v3628_v9, %v3607_v19  ;;  %v3229_v9 = vadd.f32 %v3228_v15, %v3202_v31 }
 0x6a3   : > { %v3662_v11 = vpop.f32.mrf.mxu2  ;;  %v3782_v28 = vpop.f32.mrf.mxu3 }
 0x6a4   : > { %v3689_v12 = vadd.f32 %v3688_v10, %v3662_v11  ;;  %v3785_v13 = vsel %vm1582_vm1, %v3629_v6, -inf  ;;  %v3253_v19 = vadd.f32 %v3252_v33, %v3229_v9  ;;  %v3381_v10 = vadd.f32 %v3380_v16, %v3354_v37 }
 0x6a5   : > { %3786 = vmax.xlane.f32.xlu2 %v3785_v13 }
 0x6a6   : > { %v3713_v20 = vadd.f32 %v3712_v18, %v3689_v12  ;;  %v3405_v18 = vadd.f32 %v3404_v34, %v3381_v10 }
 0x6a8   : > { %v3737_v24 = vadd.f32 %v3736_v22, %v3713_v20 }
 0x6ab   : > { %v3760_v26 = vpop.f32.mrf.mxu2 }
 0x6ac   : > { %v3761_v27 = vadd.f32 %v3760_v26, %v3737_v24 }
 0x6ae   : > { %v3783_v17 = vadd.f32 %v3782_v28, %v3761_v27 }
 0x6b0   : > { %v3788_v29 = vsel %vm1582_vm1, %v3783_v17, -inf }
 0x6b1   : > { %3789 = vmax.xlane.f32.xlu1 %v3788_v29 }
 0x6ca   : > { %3807 = vrot.lane.b32.xlu1 %v12053_v0, %s15870_s2  ;;  %v2594_v0 = vadd.f32 %v12138_v56, %v12140_v58  ;;  %v2747_v56 = vadd.f32 %v12150_v1, %v12154_v3  ;;  %v3429_v58 = vadd.f32 %v3428_v35, %v3405_v18 }
 0x6cc   : > { %v2618_v13 = vadd.f32 %v12146_v62, %v2594_v0  ;;  %v3453_v62 = vadd.f32 %v12184_v40, %v3429_v58 }
 0x6ce   : > { %v2642_v15 = vadd.f32 %v12142_v59, %v2618_v13  ;;  %v3475_v33 = vadd.f32 %v12182_v38, %v3453_v62 }
 0x6d0   : > { %v2666_v31 = vadd.f32 %v12144_v61, %v2642_v15 }
 0x6d2   : > { %v2688_v59 = vadd.f32 %v12148_v63, %v2666_v31 }
 0x718   : > { %v3787_v30 = vpop.xlane.xlu2 %3786 }
 0x719   : > { %v3791_v36 = vsub.f32 %v3629_v6, %v3787_v30  ;;  %v3277_v6 = vadd.f32 %v3276_v21, %v3253_v19 }
 0x71b   : > { %v3793_v39 = vmul.f32 1.442695, %v3791_v36  ;;  %v3301_v11 = vadd.f32 %v3300_v25, %v3277_v6 }
 0x71d   : > { %11545 = vpow2.f32 %v3793_v39  ;;  %v3323_v22 = vadd.f32 %v3322_v32, %v3301_v11  ;;  %v2771_v32 = vadd.f32 %v12152_v2, %v2747_v56 }
 0x71f   : > { %v2795_v1 = vadd.f32 %v12156_v4, %v2771_v32 }
 0x721   : > { %v2819_v61 = vadd.f32 %v12160_v7, %v2795_v1 }
 0x723   : > { %v11546_v41 = vpop.eup %11545  ;;  %v2841_v3 = vadd.f32 %v12158_v5, %v2819_v61 }
 0x724   : > { %v3790_v23 = vpop.xlane.xlu1 %3789  ;;  %v3797_v42 = vsel %vm1582_vm1, %v11546_v41, 0.0 }
 0x725   : > { %v3792_v43 = vsub.f32 %v3783_v17, %v3790_v23  ;;  %3798 = vadd.xlane.f32.xlu0 %v3797_v42 }
 0x727   : > { %v3795_v44 = vmul.f32 1.442695, %v3792_v43 }
 0x729   : > { %11547 = vpow2.f32 %v3795_v44 }
 0x72f   : > { %v11548_v8 = vpop.eup %11547 }
 0x730   : > { %v3800_v60 = vsel %vm1582_vm1, %v11548_v8, 0.0 }
 0x731   : > { %3801 = vadd.xlane.f32.xlu2 %v3800_v60 }
 0x739   : > { %3959 = vrot.lane.b32.xlu0 %v12057_v14, %s15870_s2  ;;  %s16029_s2 = sld [smem:[#allocation42_spill]] }
 0x73c   : > { %v3808_v12 = vpop.permute.xlu1 %3807 }
 0x73d   : > { %v3828_v20 = vand.u32 4294901760, %v3808_v12 }
 0x73f   : > { %v3855_v24 = vsub.f32 %v3808_v12, %v3828_v20  ;;  %3829 = vmatpush.msrb.mxu0 %v3828_v20  ;;  %3905 = vmatpush.msrb.mxu3 %v3828_v20 }
 0x741   : > { %4121 = vrot.lane.b32.xlu0 %v3323_v22, %s15868_s5  ;;  %3882 = vmatpush.msrb.mxu2 %v3855_v24  ;;  %v3856_v14 = vand.u32 4294901760, %v3855_v24 }
 0x743   : > { %3931 = vmatpush.msra.mxu0 %v3856_v14  ;;  %v3857_v21 = vsub.f32 %v3855_v24, %v3856_v14 }
 0x745   : > { %v3858_v25 = vand.u32 4294901760, %v3857_v21 }
 0x747   : > { %3859 = vmatpush.msrb.mxu1 %v3858_v25 }
 0x749   : > { %3953 = vmatpush.msra.mxu1 %v3828_v20  ;;  %4123 = vrot.lane.b32.xlu0 %v3475_v33, %s15868_s5  ;;  %s16192_s5 = smov 8  }
 0x74a   : > { %4113 = vrot.lane.b32.xlu2 %v2688_v59, %s15866_s0 }
 0x752   : > { %4115 = vrot.lane.b32.xlu2 %v2841_v3, %s15866_s0  ;;  %s16025_s0 = smov %s16024_s27 }
 0x798   : > { %v3799_v2 = vpop.xlane.xlu0 %3798 }
 0x799   : > { %11549 = vrcp.f32 %v3799_v2  ;;  %v4145_v2 = vld [vmem:[%s16025_s0 + $0x10] sm:$0xff] }
 0x79f   : > { %v11550_v63 = vpop.eup %11549 }
 0x7a0   : > { %v3805_v16 = vmul.f32 %v11550_v63, %v11546_v41  ;;  %v4171_v63 = vand.u32 4294901760, %v4145_v2 }
 0x7a2   : > { %v3811_v34 = vsel %vm1582_vm1, %v3805_v16, 0  ;;  %v4144_v16 = vld [vmem:[%s16025_s0 + $0x8] sm:$0xff] }
 0x7a3   : > { %v3830_v35 = vand.u32 4294901760, %v3811_v34 }
 0x7a4   : > { %v3802_v37 = vpop.xlane.xlu2 %3801 }
 0x7a5   : > { %v3831_v4 = vsub.f32 %v3811_v34, %v3830_v35  ;;  %11551 = vrcp.f32 %v3802_v37  ;;  %3861 = vmatmul.f32.vlgmr.msrb.gmra.mxu1 %v3830_v35  ;;  %v4213_v34 = vsub.f32 %v4145_v2, %v4171_v63  ;;  %v4143_v37 = vld [vmem:[%s16025_s0] sm:$0xff]  ;;  %s16047_s0 = smov 120  }
 0x7a7   : > { %3885 = vmatmul.f32.vlgmr.msrb.gmra.mxu2 %v3831_v4  ;;  %v3832_v38 = vand.u32 4294901760, %v3831_v4 }
 0x7a9   : > { %3909 = vmatmul.f32.vlgmr.msrb.gmra.mxu3 %v3832_v38  ;;  %v3833_v40 = vsub.f32 %v3831_v4, %v3832_v38  ;;  %v4214_v4 = vand.u32 4294901760, %v4213_v34 }
 0x7ab   : > { %v11552_v7 = vpop.eup %11551  ;;  %v3960_v26 = vpop.permute.xlu0 %3959  ;;  %v3834_v5 = vand.u32 4294901760, %v3833_v40  ;;  %v4175_v40 = vand.u32 4294901760, %v4143_v37 }
 0x7ac   : > { %v3806_v27 = vmul.f32 %v11552_v7, %v11548_v8  ;;  %v3980_v28 = vand.u32 4294901760, %v3960_v26  ;;  %v4146_v8 = vld [vmem:[%s16024_s27 + $0x18] sm:$0xff]  ;;  %v4215_v7 = vsub.f32 %v4213_v34, %v4214_v4  ;;  %s11439_s27 = sshll.u32 %s842_s9, 3 }
 0x7ad   : > { %3835 = vmatmul.f32.vlgmr.msrb.gmra.mxu0 %v3834_v5  ;;  %3955 = vmatmul.f32.vlgmr.msra.gmra.mxu1 %v3830_v35  ;;  %v12217_v19 = vand.u32 4294901760, %v4146_v8  ;;  %v4225_v5 = vsub.f32 %v4143_v37, %v4175_v40  ;;  %s12353_s9 = scalar_lea.vmem %s16030_s10, %s11439_s27 }
 0x7ae   : > { %v3963_v17 = vsel %vm1582_vm1, %v3806_v27, 0  ;;  %v4007_v29 = vsub.f32 %v3960_v26, %v3980_v28  ;;  %3981 = vmatpush.msra.mxu2 %v3980_v28  ;;  %4057 = vmatpush.msrb.mxu1 %v3980_v28  ;;  %v4216_v27 = vand.u32 4294901760, %v4215_v7 }
 0x7af   : > { %v3982_v30 = vand.u32 4294901760, %v3963_v17  ;;  %v4207_v10 = vsub.f32 %v4146_v8, %v12217_v19 }
 0x7b0   : > { %v4008_v36 = vand.u32 4294901760, %v4007_v29  ;;  %4034 = vmatpush.msrb.mxu0 %v4007_v29 }
 0x7b1   : > { %v3983_v39 = vsub.f32 %v3963_v17, %v3982_v30  ;;  %v4208_v12 = vand.u32 4294901760, %v4207_v10  ;;  %v4226_v17 = vand.u32 4294901760, %v4225_v5 }
 0x7b2   : > { %v4009_v41 = vsub.f32 %v4007_v29, %v4008_v36  ;;  %4083 = vmatpush.msrb.mxu2 %v4008_v36 }
 0x7b3   : > { %v3984_v23 = vand.u32 4294901760, %v3983_v39  ;;  %v4209_v18 = vsub.f32 %v4207_v10, %v4208_v12  ;;  %v4122_v8 = vpop.permute.xlu0 %4121 }
 0x7b4   : > { %v4010_v42 = vand.u32 4294901760, %v4009_v41 }
 0x7b5   : > { %3933 = vmatmul.f32.vlgmr.msra.gmra.mxu0 %v3830_v35  ;;  %4061 = vmatmul.f32.vlgmr.msrb.gmra.mxu1 %v3984_v23  ;;  %v3985_v43 = vsub.f32 %v3983_v39, %v3984_v23  ;;  %v4210_v24 = vand.u32 4294901760, %v4209_v18  ;;  %v4173_v35 = vand.u32 4294901760, %v4144_v16 }
 0x7b6   : > { %4011 = vmatpush.msra.mxu3 %v4010_v42  ;;  %4170 = vmatpush.msra.mxu0 %v12217_v19 }
 0x7b7   : > { %4013 = vmatmul.f32.vlgmr.msra.gmra.mxu3 %v3982_v30  ;;  %v3986_v44 = vand.u32 4294901760, %v3985_v43  ;;  %4211 = vmatpush.msra.mxu1 %v4210_v24  ;;  %v4219_v38 = vsub.f32 %v4144_v16, %v4173_v35  ;;  %v4114_v43 = vpop.permute.xlu2 %4113 }
 0x7b8   : > { %4105 = vmatpush.msrb.mxu3 %v3980_v28  ;;  %4172 = vmatpush.msra.mxu0 %v4171_v63 }
 0x7b9   : > { %3987 = vmatmul.f32.vlgmr.msra.gmra.mxu2 %v3986_v44  ;;  %v4220_v26 = vand.u32 4294901760, %v4219_v38  ;;  %4217 = vmatpush.msra.mxu1 %v4216_v27 }
 0x7ba   : > { %4287 = vmatpush.msra.mxu3 %v12217_v19  ;;  %4253 = vmatpush.msra.mxu2 %v4207_v10 }
 0x7bb   : > { %4174 = vmatpush.msra.mxu0 %v4173_v35  ;;  %v4221_v28 = vsub.f32 %v4219_v38, %v4220_v26 }
 0x7bc   : > { %4289 = vmatpush.msra.mxu3 %v4171_v63  ;;  %4256 = vmatpush.msra.mxu2 %v4213_v34 }
 0x7bd   : > { %4037 = vmatmul.f32.vlgmr.msrb.gmra.mxu0 %v3983_v39  ;;  %v4222_v29 = vand.u32 4294901760, %v4221_v28  ;;  %v1962_v39 = vadd.f32 %v12090_v45, %v12092_v46  ;;  %v2111_v45 = vadd.f32 %v12102_v51, %v12108_v54 }
 0x7be   : > { %4291 = vmatpush.msra.mxu3 %v4173_v35  ;;  %4259 = vmatpush.msra.mxu2 %v4219_v38  ;;  %v11599_v38 = vld [vmem:[%s11899_s6] sm:$0xff] }
 0x7bf   : > { %4107 = vmatmul.f32.vlgmr.msrb.gmra.mxu3 %v3982_v30  ;;  %4176 = vmatpush.msra.mxu0 %v4175_v40  ;;  %v1986_v41 = vadd.f32 %v12100_v50, %v1962_v39  ;;  %v4116_v51 = vpop.permute.xlu2 %4115 }
 0x7c0   : > { %4293 = vmatpush.msra.mxu3 %v4175_v40  ;;  %4262 = vmatpush.msra.mxu2 %v4225_v5 }
 0x7c1   : > { %4085 = vmatmul.f32.vlgmr.msrb.gmra.mxu2 %v3982_v30  ;;  %4322 = vmatpush.msrb.mxu0 %v4208_v12  ;;  %v4227_v30 = vsub.f32 %v4225_v5, %v4226_v17  ;;  %v2010_v23 = vadd.f32 %v12094_v47, %v1986_v41  ;;  %v11674_v41 = vmov 32.0  }
 0x7c2   : > { %4223 = vmatpush.msra.mxu1 %v4222_v29  ;;  %11553 = vrcp.f32 %v11674_v41 }
 0x7c3   : > { %4326 = vmatpush.msrb.mxu0 %v4214_v4  ;;  %v4228_v36 = vand.u32 4294901760, %v4227_v30  ;;  %v2034_v42 = vadd.f32 %v12098_v49, %v2010_v23  ;;  %v2135_v49 = vadd.f32 %v12104_v52, %v2111_v45  ;;  %v11600_v30 = vld [vmem:[%s11899_s6 + $0x8] sm:$0xff]  ;;  %s12348_s6 = scalar_lea.vmem %s16029_s2, %s11439_s27  ;;  %s16168_s2 = smov 104  }
 0x7c5   : > { %4330 = vmatpush.msrb.mxu0 %v4220_v26  ;;  %4229 = vmatpush.msra.mxu1 %v4228_v36  ;;  %v2056_v44 = vadd.f32 %v12096_v48, %v2034_v42 }
 0x7c7   : > { %4334 = vmatpush.msrb.mxu0 %v4226_v17  ;;  %4357 = vmatpush.msrb.mxu1 %v12217_v19 }
 0x7c8   : > { %v11554_v23 = vpop.eup %11553 }
 0x7c9   : > { %4359 = vmatpush.msrb.mxu1 %v4171_v63  ;;  %v4384_v42 = vmul.f32 32.0, %v11554_v23  ;;  %vm4388_vm4 = vweird.f32 %v11554_v23 }
 0x7cb   : > { %4361 = vmatpush.msrb.mxu1 %v4173_v35 }
 0x7cd   : > { %4363 = vmatpush.msrb.mxu1 %v4175_v40 }
 0x822   : > { %v3862_v60 = vpop.f32.mrf.mxu1 }
 0x82a   : > { %v3836_v9 = vpop.f32.mrf.mxu0  ;;  %v3886_v6 = vpop.f32.mrf.mxu2 }
 0x82b   : > { %v3863_v0 = vadd.f32 %v3862_v60, %v3836_v9  ;;  %v3956_v56 = vpop.f32.mrf.mxu1  ;;  %v4135_v60 = vsel %vm1582_vm1, %v2056_v44, %v4114_v43  ;;  %v4385_v43 = vsub.f32 1.0, %v4384_v42 }
 0x82c   : > { %v3910_v13 = vpop.f32.mrf.mxu3  ;;  %v4138_v9 = vsel %vm4137_vm2, %v4135_v60, %v4122_v8 }
 0x82d   : > { %v3887_v11 = vadd.f32 %v3886_v6, %v3863_v0  ;;  %v2159_v6 = vadd.f32 %v12106_v53, %v2135_v49  ;;  %v4386_v44 = vmul.f32 %v11554_v23, %v4385_v43 }
 0x82f   : > { %v3911_v20 = vadd.f32 %v3910_v13, %v3887_v11  ;;  %v2183_v11 = vadd.f32 %v12112_v57, %v2159_v6  ;;  %v4124_v13 = vpop.permute.xlu0 %4123  ;;  %v4387_v8 = vadd.f32 %v11554_v23, %v4386_v44 }
 0x831   : > { %v2205_v54 = vadd.f32 %v12110_v55, %v2183_v11  ;;  %v12261_v60 = vsel %vm4388_vm4, %v11554_v23, %v4387_v8 }
 0x832   : > { %v3934_v22 = vpop.f32.mrf.mxu0  ;;  %16027 = vst [vmem:[#allocation12_spill] sm:$0xff] %v12261_v60 }
 0x833   : > { %v3935_v15 = vadd.f32 %v3934_v22, %v3911_v20  ;;  %v4062_v25 = vpop.f32.mrf.mxu1  ;;  %v4136_v18 = vsel %vm1582_vm1, %v2205_v54, %v4116_v51 }
 0x834   : > { %v4139_v52 = vsel %vm4137_vm2, %v4136_v18, %v4124_v13  ;;  %v4453_v13 = vld [vmem:[%s16028_s12 + $0x8] sm:$0xff] }
 0x835   : > { %v3957_v58 = vadd.f32 %v3956_v56, %v3935_v15 }
 0x837   : > { %4129 = vrot.lane.b32.xlu1 %v3957_v58, %s15874_s7 }
 0x83a   : > { %v4014_v14 = vpop.f32.mrf.mxu3  ;;  %v4038_v21 = vpop.f32.mrf.mxu0 }
 0x83c   : > { %v3988_v31 = vpop.f32.mrf.mxu2 }
 0x83d   : > { %v4015_v62 = vadd.f32 %v4014_v14, %v3988_v31  ;;  %v11508_v14 = vld [vmem:[%s16026_s11] ss:$0 sm:$0xff] }
 0x83f   : > { %v4039_v32 = vadd.f32 %v4038_v21, %v4015_v62 }
 0x841   : > { %v4063_v59 = vadd.f32 %v4062_v25, %v4039_v32 }
 0x842   : > { %v4108_v61 = vpop.f32.mrf.mxu3 }
 0x844   : > { %v4086_v33 = vpop.f32.mrf.mxu2 }
 0x845   : > { %v4087_v1 = vadd.f32 %v4086_v33, %v4063_v59 }
 0x847   : > { %v4109_v3 = vadd.f32 %v4108_v61, %v4087_v1 }
 0x849   : > { %4131 = vrot.lane.b32.xlu1 %v4109_v3, %s15874_s7 }
 0x8a9   : > { %v4130_v19 = vpop.permute.xlu1 %4129 }
 0x8aa   : > { %v4141_v46 = vsel %vm4140_vm3, %v4138_v9, %v4130_v19 }
 0x8ab   : > { %v4152_v47 = vsel %vm905_vm0, %v4141_v46, 0 }
 0x8ac   : > { %v4177_v50 = vand.u32 4294901760, %v4152_v47 }
 0x8ae   : > { %v4178_v0 = vsub.f32 %v4152_v47, %v4177_v50  ;;  %4231 = vmatmul.f32.vlgmr.msra.gmra.mxu1 %v4177_v50 }
 0x8b0   : > { %v4179_v48 = vand.u32 4294901760, %v4178_v0  ;;  %4265 = vmatmul.f32.vlgmr.msra.gmra.mxu2 %v4178_v0 }
 0x8b2   : > { %v4180_v10 = vsub.f32 %v4178_v0, %v4179_v48  ;;  %4297 = vmatmul.f32.vlgmr.msra.gmra.mxu3 %v4179_v48 }
 0x8b4   : > { %v4181_v12 = vand.u32 4294901760, %v4180_v10  ;;  %v4455_v10 = vld [vmem:[%s16028_s12 + $0x18] sm:$0xff] }
 0x8b5   : > { %v4478_v11 = vand.u32 4294901760, %v4455_v10 }
 0x8b6   : > { %4182 = vmatmul.f32.vlgmr.msra.gmra.mxu0 %v4181_v12  ;;  %v4454_v12 = vld [vmem:[%s16028_s12 + $0x10] sm:$0xff] }
 0x8b7   : > { %v4516_v51 = vsub.f32 %v4455_v10, %v4478_v11  ;;  %v4480_v54 = vand.u32 4294901760, %v4454_v12  ;;  %4596 = vmatpush.msra.mxu1 %v4478_v11  ;;  %4479 = vmatpush.msrb.mxu2 %v4478_v11  ;;  %v11509_v10 = vld [vmem:[%s15850_s24] ss:$0 sm:$0xff] }
 0x8b9   : > { %v4517_v18 = vand.u32 4294901760, %v4516_v51  ;;  %4562 = vmatpush.msra.mxu0 %v4516_v51  ;;  %4598 = vmatpush.msra.mxu1 %v4480_v54 }
 0x8ba   : > { %4481 = vmatpush.msrb.mxu2 %v4480_v54 }
 0x8bb   : > { %v4132_v20 = vpop.permute.xlu1 %4131 }
 0x8bc   : > { %v4142_v22 = vsel %vm4140_vm3, %v4139_v52, %v4132_v20  ;;  %v4522_v52 = vsub.f32 %v4454_v12, %v4480_v54  ;;  %v4482_v20 = vand.u32 4294901760, %v4453_v13 }
 0x8bd   : > { %v4155_v24 = vsel %vm905_vm0, %v4142_v22, 0  ;;  %v4452_v22 = vld [vmem:[%s16028_s12] sm:$0xff] }
 0x8be   : > { %v4185_v53 = vand.u32 4294901760, %v4155_v24  ;;  %4565 = vmatpush.msra.mxu0 %v4522_v52  ;;  %4600 = vmatpush.msra.mxu1 %v4482_v20 }
 0x8bf   : > { %4483 = vmatpush.msrb.mxu2 %v4482_v20 }
 0x8c0   : > { %v4186_v15 = vsub.f32 %v4155_v24, %v4185_v53  ;;  %4235 = vmatmul.f32.gmra.mxu1 %v4185_v53  ;;  %v4518_v24 = vsub.f32 %v4516_v51, %v4517_v18 }
 0x8c2   : > { %4270 = vmatmul.f32.gmra.mxu2 %v4186_v15  ;;  %v4187_v57 = vand.u32 4294901760, %v4186_v15 }
 0x8c4   : > { %4303 = vmatmul.f32.gmra.mxu3 %v4187_v57  ;;  %v4188_v56 = vsub.f32 %v4186_v15, %v4187_v57  ;;  %v4528_v15 = vsub.f32 %v4453_v13, %v4482_v20  ;;  %v4484_v57 = vand.u32 4294901760, %v4452_v22  ;;  %v879_v13 = vld [vmem:[%s12353_s9] sm:$0xff] }
 0x8c6   : > { %v4189_v58 = vand.u32 4294901760, %v4188_v56  ;;  %v4519_v56 = vand.u32 4294901760, %v4518_v24  ;;  %4568 = vmatpush.msra.mxu0 %v4528_v15  ;;  %4602 = vmatpush.msra.mxu1 %v4484_v57 }
 0x8c7   : > { %4485 = vmatpush.msrb.mxu2 %v4484_v57 }
 0x8c8   : > { %4190 = vmatmul.f32.gmra.mxu0 %v4189_v58  ;;  %4365 = vmatmul.f32.vlgmr.msrb.gmra.mxu1 %v4177_v50 }
 0x8c9   : > { %4520 = vmatpush.msrb.mxu3 %v4519_v56  ;;  %4631 = vmatpush.msra.mxu2 %v4517_v18  ;;  %v11510_v18 = vld [vmem:[%s15851_s25] ss:$0 sm:$0xff] }
 0x8ca   : > { %v11601_v56 = vld [vmem:[%s11904_s29] sm:$0xff] }
 0x8d0   : > { %4336 = vmatmul.f32.vlgmr.msrb.gmra.mxu0 %v4177_v50  ;;  %4369 = vmatmul.f32.gmra.mxu1 %v4185_v53 }
 0x8d8   : > { %4340 = vmatmul.f32.gmra.mxu0 %v4185_v53  ;;  %v4523_v53 = vand.u32 4294901760, %v4522_v52 }
 0x8da   : > { %v4524_v58 = vsub.f32 %v4522_v52, %v4523_v53  ;;  %4635 = vmatpush.msra.mxu2 %v4523_v53 }
 0x92b   : > { %v4232_v55 = vpop.f32.mrf.mxu1 }
 0x933   : > { %v4183_v31 = vpop.f32.mrf.mxu0  ;;  %v4266_v59 = vpop.f32.mrf.mxu2 }
 0x934   : > { %v4184_v62 = vadd.f32 %v11508_v14, %v4183_v31  ;;  %v4525_v31 = vand.u32 4294901760, %v4524_v58 }
 0x935   : > { %v4298_v61 = vpop.f32.mrf.mxu3 }
 0x936   : > { %v4233_v32 = vadd.f32 %v4232_v55, %v4184_v62  ;;  %v4529_v55 = vand.u32 4294901760, %v4528_v15  ;;  %4526 = vmatpush.msrb.mxu3 %v4525_v31  ;;  %v880_v31 = vld [vmem:[%s12353_s9 + $0x8] sm:$0xff] }
 0x938   : > { %v4267_v33 = vadd.f32 %v4266_v59, %v4233_v32  ;;  %v4530_v62 = vsub.f32 %v4528_v15, %v4529_v55  ;;  %4639 = vmatpush.msra.mxu2 %v4529_v55 }
 0x93a   : > { %v4299_v3 = vadd.f32 %v4298_v61, %v4267_v33  ;;  %v4531_v32 = vand.u32 4294901760, %v4530_v62 }
 0x93c   : > { %4532 = vmatpush.msrb.mxu3 %v4531_v32 }
 0x93d   : > { %v4236_v21 = vpop.f32.mrf.mxu1 }
 0x945   : > { %v4191_v25 = vpop.f32.mrf.mxu0  ;;  %v4366_v63 = vpop.f32.mrf.mxu1 }
 0x946   : > { %v4192_v1 = vadd.f32 %v11508_v14, %v4191_v25  ;;  %v4271_v35 = vpop.f32.mrf.mxu2  ;;  %v4534_v14 = vsub.f32 %v4452_v22, %v4484_v57 }
 0x947   : > { %v4304_v7 = vpop.f32.mrf.mxu3 }
 0x948   : > { %v4237_v2 = vadd.f32 %v4236_v21, %v4192_v1  ;;  %v4535_v21 = vand.u32 4294901760, %v4534_v14  ;;  %4571 = vmatpush.msra.mxu0 %v4534_v14 }
 0x94a   : > { %v4272_v37 = vadd.f32 %v4271_v35, %v4237_v2  ;;  %v4536_v25 = vsub.f32 %v4534_v14, %v4535_v21  ;;  %4643 = vmatpush.msra.mxu2 %v4535_v21 }
 0x94c   : > { %v4305_v26 = vadd.f32 %v4304_v7, %v4272_v37  ;;  %v4537_v33 = vand.u32 4294901760, %v4536_v25 }
 0x94d   : > { %v4337_v16 = vpop.f32.mrf.mxu0  ;;  %v4370_v17 = vpop.f32.mrf.mxu1 }
 0x94e   : > { %v4338_v34 = vadd.f32 %v4337_v16, %v4299_v3  ;;  %4538 = vmatpush.msrb.mxu3 %v4537_v33  ;;  %v4685_v3 = vld [vmem:[%s15839_s13 + $0x18] sm:$0xff] }
 0x94f   : > { %v12294_v2 = vand.u32 4294901760, %v4685_v3 }
 0x950   : > { %v4367_v4 = vadd.f32 %v4366_v63, %v4338_v34  ;;  %4666 = vmatpush.msra.mxu3 %v4478_v11  ;;  %v4684_v63 = vld [vmem:[%s15839_s13 + $0x10] sm:$0xff] }
 0x951   : > { %4751 = vmatpush.msrb.mxu0 %v12294_v2  ;;  %v12301_v34 = vsub.f32 %v4685_v3, %v12294_v2  ;;  %v12303_v35 = vand.u32 4294901760, %v4684_v63 }
 0x952   : > { %v4373_v40 = vadd.f32 %v11599_v38, %v4367_v4  ;;  %4668 = vmatpush.msra.mxu3 %v4480_v54  ;;  %v4683_v4 = vld [vmem:[%s15839_s13 + $0x8] sm:$0xff]  ;;  %v12362_v54 = vld [vmem:[%s12348_s6] sm:$0xff] }
 0x953   : > { %4753 = vmatpush.msrb.mxu0 %v12303_v35  ;;  %v4901_v38 = vand.u32 4294901760, %v12301_v34  ;;  %v12315_v7 = vsub.f32 %v4684_v63, %v12303_v35  ;;  %v4436_v24 = vadd.f32 %v879_v13, %v12362_v54  ;;  %v11602_v63 = vld [vmem:[%s11904_s29 + $0x8] sm:$0xff] }
 0x954   : > { %v4377_v5 = vsel %vm905_vm0, %v4373_v40, 0.0  ;;  %4670 = vmatpush.msra.mxu3 %v4482_v20  ;;  %v12455_v13 = vld [vmem:[%s12348_s6 + $0x28] sm:$0xff] }
 0x955   : > { %v4341_v27 = vpop.f32.mrf.mxu0  ;;  %4378 = vadd.xlane.f32.xlu2 %v4377_v5  ;;  %v4691_v55 = vsel %vm905_vm0, %v4436_v24, 0 }
 0x956   : > { %v4342_v28 = vadd.f32 %v4341_v27, %v4305_v26  ;;  %4672 = vmatpush.msra.mxu3 %v4484_v57  ;;  %v4682_v27 = vld [vmem:[%s15839_s13] sm:$0xff]  ;;  %v12383_v25 = vand.u32 4294901760, %v4691_v55 }
 0x958   : > { %v4371_v29 = vadd.f32 %v4370_v17, %v4342_v28  ;;  %v4902_v17 = vsub.f32 %v12301_v34, %v4901_v38  ;;  %v12392_v3 = vsub.f32 %v4691_v55, %v12383_v25  ;;  %v885_v55 = vld [vmem:[%s12353_s9 + $0x30] sm:$0xff] }
 0x95a   : > { %v4374_v36 = vadd.f32 %v11600_v30, %v4371_v29  ;;  %v4907_v29 = vand.u32 4294901760, %v12315_v7  ;;  %v12328_v30 = vand.u32 4294901760, %v4682_v27  ;;  %v4903_v41 = vand.u32 4294901760, %v4902_v17 }
 0x95c   : > { %v4380_v39 = vsel %vm905_vm0, %v4374_v36, 0.0  ;;  %v4908_v23 = vsub.f32 %v12315_v7, %v4907_v29  ;;  %v12339_v43 = vsub.f32 %v4682_v27, %v12328_v30  ;;  %4904 = vmatpush.msrb.mxu1 %v4903_v41 }
 0x95d   : > { %4381 = vadd.xlane.f32.xlu0 %v4380_v39 }
 0x95e   : > { %v4909_v8 = vand.u32 4294901760, %v4908_v23 }
 0x960   : > { %4910 = vmatpush.msrb.mxu1 %v4909_v8  ;;  %v12428_v8 = vld [vmem:[%s12348_s6 + $0x18] sm:$0xff] }
 0x9c8   : > { %v4379_v9 = vpop.xlane.xlu2 %4378 }
 0x9c9   : > { %v4390_v19 = vmul.f32 %v12261_v60, %v4379_v9 }
 0x9cb   : > { %v12264_v45 = vsub.f32 %v4373_v40, %v4390_v19  ;;  %v12312_v40 = vand.u32 4294901760, %v4683_v4  ;;  %v4919_v19 = vand.u32 4294901760, %v12339_v43 }
 0x9cd   : > { %v4394_v46 = vmul.f32 %v12264_v45, %v12264_v45  ;;  %4755 = vmatpush.msrb.mxu0 %v12312_v40 }
 0x9cf   : > { %v4396_v47 = vsel %vm905_vm0, %v4394_v46, 0.0  ;;  %4757 = vmatpush.msrb.mxu0 %v12328_v30 }
 0x9d0   : > { %4397 = vadd.xlane.f32.xlu1 %v4396_v47  ;;  %v4382_v50 = vpop.xlane.xlu0 %4381 }
 0x9d1   : > { %v4391_v49 = vmul.f32 %v12261_v60, %v4382_v50 }
 0x9d3   : > { %v12270_v0 = vsub.f32 %v4374_v36, %v4391_v49  ;;  %v12331_v36 = vsub.f32 %v4683_v4, %v12312_v40  ;;  %v4920_v49 = vsub.f32 %v12339_v43, %v4919_v19 }
 0x9d5   : > { %v4395_v48 = vmul.f32 %v12270_v0, %v12270_v0  ;;  %v4913_v42 = vand.u32 4294901760, %v12331_v36  ;;  %v4921_v11 = vand.u32 4294901760, %v4920_v49  ;;  %v883_v49 = vld [vmem:[%s12353_s9 + $0x20] sm:$0xff] }
 0x9d7   : > { %v4399_v6 = vsel %vm905_vm0, %v4395_v48, 0.0  ;;  %v4914_v9 = vsub.f32 %v12331_v36, %v4913_v42 }
 0x9d8   : > { %4400 = vadd.xlane.f32.xlu2 %v4399_v6 }
 0x9d9   : > { %v4915_v50 = vand.u32 4294901760, %v4914_v9 }
 0x9db   : > { %4916 = vmatpush.msrb.mxu1 %v4915_v50  ;;  %v12444_v50 = vld [vmem:[%s12348_s6 + $0x20] sm:$0xff] }
 0x9dd   : > { %4922 = vmatpush.msrb.mxu1 %v4921_v11 }
 0xa43   : > { %v4398_v59 = vpop.xlane.xlu1 %4397 }
 0xa44   : > { %v4402_v1 = vmul.f32 %v4398_v59, %v12261_v60 }
 0xa46   : > { %v4404_v61 = vadd.f32 1e-05, %v4402_v1 }
 0xa48   : > { %11555 = vrsqrt.f32 %v4404_v61  ;;  %vm4412_vm6 = vweird.f32 %v4404_v61 }
 0xa4b   : > { %v4401_v16 = vpop.xlane.xlu2 %4400 }
 0xa4c   : > { %v4403_v37 = vmul.f32 %v4401_v16, %v12261_v60 }
 0xa4e   : > { %v11556_v26 = vpop.eup %11555  ;;  %v4405_v5 = vadd.f32 1e-05, %v4403_v37 }
 0xa4f   : > { %v4407_v28 = vmul.f32 %v11556_v26, %v4404_v61  ;;  %vm4413_vm5 = vweird.f32 %v11556_v26 }
 0xa50   : > { %11557 = vrsqrt.f32 %v4405_v5  ;;  %vm4414_vm7 = vmor %vm4412_vm6, %vm4413_vm5  ;;  %vm4422_vm9 = vweird.f32 %v4405_v5 }
 0xa51   : > { %v4408_v39 = vmul.f32 %v11556_v26, %v4407_v28 }
 0xa53   : > { %v4409_v44 = vmul.f32 0.5, %v4408_v39  ;;  %v4760_v39 = vand.u32 4294901760, %v12392_v3 }
 0xa55   : > { %v4410_v46 = vsub.f32 1.5, %v4409_v44 }
 0xa56   : > { %v11558_v47 = vpop.eup %11557 }
 0xa57   : > { %v4411_v48 = vmul.f32 %v11556_v26, %v4410_v46  ;;  %v4417_v6 = vmul.f32 %v11558_v47, %v4405_v5  ;;  %vm4423_vm8 = vweird.f32 %v11558_v47  ;;  %v881_v5 = vld [vmem:[%s12353_s9 + $0x10] sm:$0xff] }
 0xa58   : > { %vm4424_vm10 = vmor %vm4422_vm9, %vm4423_vm8 }
 0xa59   : > { %v4415_v12 = vsel %vm4414_vm7, %v11556_v26, %v4411_v48  ;;  %v4418_v51 = vmul.f32 %v11558_v47, %v4417_v6  ;;  %v12401_v26 = vld [vmem:[%s12348_s6 + $0x10] sm:$0xff] }
 0xa5a   : > { %v4426_v52 = vmul.f32 %v4415_v12, %v12264_v45  ;;  %v12376_v45 = vld [vmem:[%s12348_s6 + $0x8] sm:$0xff] }
 0xa5b   : > { %v4419_v20 = vmul.f32 0.5, %v4418_v51  ;;  %v4437_v33 = vadd.f32 %v880_v31, %v12376_v45 }
 0xa5c   : > { %v4429_v22 = vmul.f32 %v11509_v10, %v4426_v52 }
 0xa5d   : > { %v4420_v53 = vsub.f32 1.5, %v4419_v20  ;;  %v4694_v37 = vsel %vm905_vm0, %v4437_v33, 0 }
 0xa5e   : > { %v12370_v15 = vadd.f32 %v11510_v18, %v4429_v22  ;;  %v12408_v41 = vand.u32 4294901760, %v4694_v37 }
 0xa5f   : > { %v4421_v57 = vmul.f32 %v11558_v47, %v4420_v53 }
 0xa60   : > { %16031 = vst [vmem:[#allocation13_spill] sm:$0xff] %v12370_v15  ;;  %v4434_v58 = vadd.f32 %v11601_v56, %v12370_v15  ;;  %v12420_v44 = vsub.f32 %v4694_v37, %v12408_v41 }
 0xa61   : > { %v4425_v14 = vsel %vm4424_vm10, %v11558_v47, %v4421_v57 }
 0xa62   : > { %v4427_v62 = vmul.f32 %v4425_v14, %v12270_v0  ;;  %v4461_v21 = vsel %vm905_vm0, %v4434_v58, 0  ;;  %v4768_v46 = vand.u32 4294901760, %v12420_v44  ;;  %v12465_v58 = vld [vmem:[%s12348_s6 + $0x30] sm:$0xff] }
 0xa63   : > { %v12381_v32 = vand.u32 4294901760, %v4461_v21 }
 0xa64   : > { %v4430_v59 = vmul.f32 %v11509_v10, %v4427_v62  ;;  %v4440_v10 = vadd.f32 %v883_v49, %v12444_v50  ;;  %v12509_v49 = vld [vmem:[%s12348_s6 + $0x50] sm:$0xff] }
 0xa65   : > { %4540 = vmatmul.f32.vlgmr.msrb.gmra.mxu3 %v12381_v32  ;;  %v4487_v1 = vsub.f32 %v4461_v21, %v12381_v32  ;;  %v4442_v21 = vadd.f32 %v885_v55, %v12465_v58 }
 0xa66   : > { %v12388_v61 = vadd.f32 %v11510_v18, %v4430_v59  ;;  %5106 = vmatpush.msrb.mxu3 %v12294_v2  ;;  %v4703_v51 = vsel %vm905_vm0, %v4440_v10, 0  ;;  %v884_v18 = vld [vmem:[%s12353_s9 + $0x28] sm:$0xff] }
 0xa67   : > { %4574 = vmatmul.f32.vlgmr.msra.gmra.mxu0 %v4487_v1  ;;  %v4488_v0 = vand.u32 4294901760, %v4487_v1  ;;  %v12458_v22 = vand.u32 4294901760, %v4703_v51  ;;  %v4441_v24 = vadd.f32 %v884_v18, %v12455_v13  ;;  %v4709_v33 = vsel %vm905_vm0, %v4442_v21, 0 }
 0xa68   : > { %16032 = vst [vmem:[#allocation14_spill] sm:$0xff] %v12388_v61  ;;  %v4435_v16 = vadd.f32 %v11602_v63, %v12388_v61  ;;  %5108 = vmatpush.msrb.mxu3 %v12303_v35  ;;  %5225 = vmatpush.msra.mxu0 %v4901_v38  ;;  %v4438_v38 = vadd.f32 %v881_v5, %v12401_v26  ;;  %v12479_v37 = vand.u32 4294901760, %v4709_v33 }
 0xa69   : > { %4606 = vmatmul.f32.vlgmr.msra.gmra.mxu1 %v4488_v0  ;;  %v4489_v4 = vsub.f32 %v4487_v1, %v4488_v0  ;;  %v4791_v57 = vsub.f32 %v4703_v51, %v12458_v22  ;;  %v4706_v56 = vsel %vm905_vm0, %v4441_v24, 0  ;;  %v12476_v1 = vld [vmem:[%s12348_s6 + $0x38] sm:$0xff] }
 0xa6a   : > { %v4464_v27 = vsel %vm905_vm0, %v4435_v16, 0  ;;  %5110 = vmatpush.msrb.mxu3 %v12312_v40  ;;  %5316 = vmatpush.msra.mxu1 %v12294_v2  ;;  %v12468_v62 = vand.u32 4294901760, %v4706_v56  ;;  %v886_v0 = vld [vmem:[%s12353_s9 + $0x38] sm:$0xff]  ;;  %v4807_v5 = vsub.f32 %v4709_v33, %v12479_v37  ;;  %v891_v33 = vld [vmem:[%s12353_s9 + $0x60] sm:$0xff] }
 0xa6b   : > { %v4490_v28 = vand.u32 4294901760, %v4489_v4  ;;  %v4494_v17 = vand.u32 4294901760, %v4464_v27  ;;  %5229 = vmatpush.msra.mxu0 %v4907_v29  ;;  %v4761_v29 = vsub.f32 %v12392_v3, %v4760_v39  ;;  %v4792_v31 = vand.u32 4294901760, %v4791_v57  ;;  %v890_v24 = vld [vmem:[%s12353_s9 + $0x58] sm:$0xff] }
 0xa6c   : > { %5112 = vmatpush.msrb.mxu3 %v12328_v30  ;;  %5318 = vmatpush.msra.mxu1 %v12303_v35  ;;  %v4697_v35 = vsel %vm905_vm0, %v4438_v38, 0  ;;  %v4799_v59 = vsub.f32 %v4706_v56, %v12468_v62  ;;  %v4808_v38 = vand.u32 4294901760, %v4807_v5 }
 0xa6d   : > { %4491 = vmatmul.f32.vlgmr.msrb.gmra.mxu2 %v4490_v28  ;;  %4544 = vmatmul.f32.gmra.mxu3 %v4494_v17  ;;  %v4495_v2 = vsub.f32 %v4464_v27, %v4494_v17  ;;  %v12434_v47 = vand.u32 4294901760, %v4697_v35  ;;  %v12487_v28 = vld [vmem:[%s12348_s6 + $0x40] sm:$0xff] }
 0xa6e   : > { %5002 = vmatpush.msrb.mxu2 %v12301_v34  ;;  %5233 = vmatpush.msra.mxu0 %v4913_v42  ;;  %v882_v42 = vld [vmem:[%s12353_s9 + $0x18] sm:$0xff]  ;;  %v4800_v16 = vand.u32 4294901760, %v4799_v59 }
 0xa6f   : > { %4579 = vmatmul.f32.gmra.mxu0 %v4495_v2  ;;  %v4496_v23 = vand.u32 4294901760, %v4495_v2  ;;  %5320 = vmatpush.msra.mxu1 %v12312_v40  ;;  %v4762_v40 = vand.u32 4294901760, %v4761_v29  ;;  %v4809_v29 = vsub.f32 %v4807_v5, %v4808_v38 }
 0xa70   : > { %5005 = vmatpush.msrb.mxu2 %v12315_v7  ;;  %5237 = vmatpush.msra.mxu0 %v4919_v19  ;;  %v4439_v7 = vadd.f32 %v882_v42, %v12428_v8  ;;  %v4769_v19 = vsub.f32 %v12420_v44, %v4768_v46  ;;  %v4801_v4 = vsub.f32 %v4799_v59, %v4800_v16  ;;  %v888_v42 = vld [vmem:[%s12353_s9 + $0x48] sm:$0xff] }
 0xa71   : > { %4612 = vmatmul.f32.gmra.mxu1 %v4496_v23  ;;  %v4497_v34 = vsub.f32 %v4495_v2, %v4496_v23 }
 0xa72   : > { %5008 = vmatpush.msrb.mxu2 %v12331_v36  ;;  %5322 = vmatpush.msra.mxu1 %v12328_v30  ;;  %v4775_v36 = vsub.f32 %v4697_v35, %v12434_v47  ;;  %v4700_v30 = vsel %vm905_vm0, %v4439_v7, 0 }
 0xa73   : > { %v4498_v9 = vand.u32 4294901760, %v4497_v34  ;;  %v12447_v6 = vand.u32 4294901760, %v4700_v30  ;;  %v12497_v34 = vld [vmem:[%s12348_s6 + $0x48] sm:$0xff] }
 0xa74   : > { %5011 = vmatpush.msrb.mxu2 %v12339_v43  ;;  %v4770_v43 = vand.u32 4294901760, %v4769_v19  ;;  %v4776_v48 = vand.u32 4294901760, %v4775_v36  ;;  %v4445_v7 = vadd.f32 %v888_v42, %v12497_v34 }
 0xa75   : > { %4499 = vmatmul.f32.gmra.mxu2 %v4498_v9  ;;  %4674 = vmatmul.f32.vlgmr.msra.gmra.mxu3 %v12381_v32  ;;  %v4783_v12 = vsub.f32 %v4700_v30, %v12447_v6  ;;  %v4810_v9 = vand.u32 4294901760, %v4809_v29 }
 0xa76   : > { %v4777_v11 = vsub.f32 %v4775_v36, %v4776_v48  ;;  %v4718_v30 = vsel %vm905_vm0, %v4445_v7, 0  ;;  %v893_v7 = vld [vmem:[%s12353_s9 + $0x70] sm:$0xff] }
 0xa77   : > { %4763 = vmatmul.f32.vlgmr.msrb.gmra.mxu0 %v4762_v40  ;;  %v4784_v20 = vand.u32 4294901760, %v4783_v12 }
 0xa78   : > { %v4778_v52 = vand.u32 4294901760, %v4777_v11  ;;  %v12513_v11 = vand.u32 4294901760, %v4718_v30 }
 0xa79   : > { %4924 = vmatmul.f32.vlgmr.msrb.gmra.mxu1 %v12383_v25  ;;  %v4785_v53 = vsub.f32 %v4783_v12, %v4784_v20 }
 0xa7a   : > { %v12518_v18 = vsub.f32 %v4718_v30, %v12513_v11 }
 0xa7b   : > { %v4786_v14 = vand.u32 4294901760, %v4785_v53 }
 0xa7c   : > { %v4832_v56 = vand.u32 4294901760, %v12518_v18 }
 0xa7d   : > { %4645 = vmatmul.f32.vlgmr.msra.gmra.mxu2 %v12381_v32  ;;  %4678 = vmatmul.f32.gmra.mxu3 %v4494_v17  ;;  %v4793_v32 = vsub.f32 %v4791_v57, %v4792_v31 }
 0xa7f   : > { %4771 = vmatmul.f32.gmra.mxu0 %v4770_v43  ;;  %v4794_v63 = vand.u32 4294901760, %v4793_v32  ;;  %v889_v43 = vld [vmem:[%s12353_s9 + $0x50] sm:$0xff]  ;;  %v12537_v32 = vld [vmem:[%s12348_s6 + $0x60] sm:$0xff] }
 0xa81   : > { %4928 = vmatmul.f32.gmra.mxu1 %v12408_v41 }
 0xa85   : > { %4649 = vmatmul.f32.gmra.mxu2 %v4494_v17  ;;  %5116 = vmatmul.f32.vlgmr.msrb.gmra.mxu3 %v4760_v39  ;;  %v887_v17 = vld [vmem:[%s12353_s9 + $0x40] sm:$0xff]  ;;  %v4802_v39 = vand.u32 4294901760, %v4801_v4 }
 0xa86   : > { %v4444_v23 = vadd.f32 %v887_v17, %v12487_v28  ;;  %v12550_v17 = vld [vmem:[%s12348_s6 + $0x68] sm:$0xff] }
 0xa87   : > { %4779 = vmatmul.f32.gmra.mxu0 %v4778_v52 }
 0xa88   : > { %v4715_v35 = vsel %vm905_vm0, %v4444_v23, 0 }
 0xa89   : > { %4932 = vmatmul.f32.gmra.mxu1 %v12434_v47 }
 0xa8d   : > { %5014 = vmatmul.f32.vlgmr.msrb.gmra.mxu2 %v12392_v3  ;;  %5122 = vmatmul.f32.gmra.mxu3 %v4768_v46  ;;  %v4443_v3 = vadd.f32 %v886_v0, %v12476_v1  ;;  %v12500_v46 = vand.u32 4294901760, %v4715_v35 }
 0xa8f   : > { %4787 = vmatmul.f32.gmra.mxu0 %v4786_v14  ;;  %v4712_v27 = vsel %vm905_vm0, %v4443_v3, 0  ;;  %v4833_v14 = vsub.f32 %v12518_v18, %v4832_v56 }
 0xa90   : > { %v12490_v2 = vand.u32 4294901760, %v4712_v27 }
 0xa91   : > { %4936 = vmatmul.f32.gmra.mxu1 %v12447_v6  ;;  %v4834_v0 = vand.u32 4294901760, %v4833_v14  ;;  %v12592_v14 = vld [vmem:[%s12348_s6 + $0x78] sm:$0xff] }
 0xa95   : > { %5019 = vmatmul.f32.gmra.mxu2 %v12420_v44  ;;  %5128 = vmatmul.f32.gmra.mxu3 %v4776_v48  ;;  %v4815_v44 = vsub.f32 %v4712_v27, %v12490_v2 }
 0xa97   : > { %4795 = vmatmul.f32.gmra.mxu0 %v4794_v63  ;;  %v4816_v40 = vand.u32 4294901760, %v4815_v44 }
 0xa99   : > { %4940 = vmatmul.f32.gmra.mxu1 %v12458_v22  ;;  %v4817_v19 = vsub.f32 %v4815_v44, %v4816_v40 }
 0xa9b   : > { %v4818_v48 = vand.u32 4294901760, %v4817_v19 }
 0xa9d   : > { %5024 = vmatmul.f32.gmra.mxu2 %v4775_v36  ;;  %5134 = vmatmul.f32.gmra.mxu3 %v4784_v20  ;;  %v12504_v36 = vsub.f32 %v4715_v35, %v12500_v46  ;;  %v12523_v20 = vld [vmem:[%s12348_s6 + $0x58] sm:$0xff] }
 0xa9e   : > { %v4447_v55 = vadd.f32 %v890_v24, %v12523_v20 }
 0xa9f   : > { %4803 = vmatmul.f32.gmra.mxu0 %v4802_v39  ;;  %v4824_v10 = vand.u32 4294901760, %v12504_v36  ;;  %v892_v39 = vld [vmem:[%s12353_s9 + $0x68] sm:$0xff] }
 0xaa0   : > { %v4724_v21 = vsel %vm905_vm0, %v4447_v55, 0  ;;  %v4449_v29 = vadd.f32 %v892_v39, %v12550_v17  ;;  %v5390_v39 = vld [vmem:[%s15840_s14 + $0x10] sm:$0xff] }
 0xaa1   : > { %4944 = vmatmul.f32.gmra.mxu1 %v12468_v62  ;;  %v4825_v51 = vsub.f32 %v12504_v36, %v4824_v10 }
 0xaa3   : > { %v4826_v53 = vand.u32 4294901760, %v4825_v51 }
 0xaa5   : > { %5029 = vmatmul.f32.gmra.mxu2 %v4783_v12  ;;  %5140 = vmatmul.f32.gmra.mxu3 %v4792_v31  ;;  %v4446_v12 = vadd.f32 %v889_v43, %v12509_v49 }
 0xaa7   : > { %4811 = vmatmul.f32.gmra.mxu0 %v4810_v9  ;;  %v4721_v52 = vsel %vm905_vm0, %v4446_v12, 0  ;;  %v4730_v9 = vsel %vm905_vm0, %v4449_v29, 0 }
 0xaa8   : > { %v12573_v19 = vand.u32 4294901760, %v4730_v9 }
 0xaa9   : > { %4948 = vmatmul.f32.gmra.mxu1 %v12479_v37 }
 0xaaa   : > { %v12584_v51 = vsub.f32 %v4730_v9, %v12573_v19 }
 0xaad   : > { %5034 = vmatmul.f32.gmra.mxu2 %v4791_v57  ;;  %5146 = vmatmul.f32.gmra.mxu3 %v4800_v16  ;;  %v12527_v57 = vand.u32 4294901760, %v4721_v52  ;;  %v4448_v16 = vadd.f32 %v891_v33, %v12537_v32 }
 0xaaf   : > { %4819 = vmatmul.f32.gmra.mxu0 %v4818_v48  ;;  %v12532_v31 = vsub.f32 %v4721_v52, %v12527_v57  ;;  %v4727_v27 = vsel %vm905_vm0, %v4448_v16, 0 }
 0xab1   : > { %4952 = vmatmul.f32.gmra.mxu1 %v12490_v2  ;;  %v4840_v63 = vand.u32 4294901760, %v12532_v31 }
 0xab3   : > { %v4841_v3 = vsub.f32 %v12532_v31, %v4840_v63 }
 0xab5   : > { %5039 = vmatmul.f32.gmra.mxu2 %v4799_v59  ;;  %5152 = vmatmul.f32.gmra.mxu3 %v4808_v38  ;;  %v12541_v59 = vand.u32 4294901760, %v4724_v21  ;;  %v4842_v38 = vand.u32 4294901760, %v4841_v3 }
 0xab7   : > { %4827 = vmatmul.f32.gmra.mxu0 %v4826_v53  ;;  %v12546_v4 = vsub.f32 %v4724_v21, %v12541_v59  ;;  %v894_v21 = vld [vmem:[%s12353_s9 + $0x78] sm:$0xff]  ;;  %s16193_s9 = smov 24  }
 0xab8   : > { %v4451_v16 = vadd.f32 %v894_v21, %v12592_v14 }
 0xab9   : > { %4956 = vmatmul.f32.gmra.mxu1 %v12500_v46  ;;  %v4848_v23 = vand.u32 4294901760, %v12546_v4 }
 0xaba   : > { %v4736_v29 = vsel %vm905_vm0, %v4451_v16, 0 }
 0xabb   : > { %v4849_v35 = vsub.f32 %v12546_v4, %v4848_v23 }
 0xabd   : > { %5044 = vmatmul.f32.gmra.mxu2 %v4807_v5  ;;  %5158 = vmatmul.f32.gmra.mxu3 %v4816_v40  ;;  %v12555_v5 = vand.u32 4294901760, %v4727_v27  ;;  %v12566_v40 = vld [vmem:[%s12348_s6 + $0x70] sm:$0xff]  ;;  %v4850_v43 = vand.u32 4294901760, %v4849_v35  ;;  %s16190_s6 = smov 16  }
 0xabf   : > { %4835 = vmatmul.f32.gmra.mxu0 %v4834_v0  ;;  %v12562_v42 = vsub.f32 %v4727_v27, %v12555_v5 }
 0xac1   : > { %4960 = vmatmul.f32.gmra.mxu1 %v12513_v11  ;;  %v4856_v48 = vand.u32 4294901760, %v12562_v42 }
 0xac3   : > { %v4857_v24 = vsub.f32 %v12562_v42, %v4856_v48 }
 0xac5   : > { %5049 = vmatmul.f32.gmra.mxu2 %v4815_v44  ;;  %5164 = vmatmul.f32.gmra.mxu3 %v4824_v10  ;;  %v5391_v44 = vld [vmem:[%s15840_s14 + $0x18] sm:$0xff]  ;;  %v4450_v10 = vadd.f32 %v893_v7, %v12566_v40  ;;  %v4858_v0 = vand.u32 4294901760, %v4857_v24 }
 0xac6   : > { %v12575_v30 = vand.u32 4294901760, %v5391_v44 }
 0xac7   : > { %4843 = vmatmul.f32.gmra.mxu0 %v4842_v38  ;;  %v4733_v53 = vsel %vm905_vm0, %v4450_v10, 0  ;;  %v5458_v38 = vand.u32 4294901760, %v5390_v39 }
 0xac8   : > { %5457 = vmatpush.msra.mxu2 %v12575_v30  ;;  %v5606_v12 = vsub.f32 %v5391_v44, %v12575_v30  ;;  %5812 = vmatpush.msrb.mxu1 %v12575_v30  ;;  %v5388_v44 = vld [vmem:[%s15840_s14] sm:$0xff] }
 0xac9   : > { %4964 = vmatmul.f32.gmra.mxu1 %v12527_v57  ;;  %v5462_v24 = vand.u32 4294901760, %v5388_v44 }
 0xaca   : > { %v5607_v52 = vand.u32 4294901760, %v5606_v12  ;;  %5708 = vmatpush.msrb.mxu0 %v5606_v12  ;;  %5459 = vmatpush.msra.mxu2 %v5458_v38 }
 0xacb   : > { %5814 = vmatpush.msrb.mxu1 %v5458_v38  ;;  %v5624_v21 = vsub.f32 %v5388_v44, %v5462_v24 }
 0xacc   : > { %v5608_v55 = vsub.f32 %v5606_v12, %v5607_v52 }
 0xacd   : > { %5054 = vmatmul.f32.gmra.mxu2 %v12504_v36  ;;  %5170 = vmatmul.f32.gmra.mxu3 %v4832_v56  ;;  %v4864_v36 = vand.u32 4294901760, %v12584_v51  ;;  %v12596_v56 = vand.u32 4294901760, %v4733_v53 }
 0xace   : > { %v5609_v33 = vand.u32 4294901760, %v5608_v55 }
 0xacf   : > { %4851 = vmatmul.f32.gmra.mxu0 %v4850_v43  ;;  %v4865_v3 = vsub.f32 %v12584_v51, %v4864_v36  ;;  %v12604_v27 = vsub.f32 %v4733_v53, %v12596_v56  ;;  %v12618_v43 = vand.u32 4294901760, %v4736_v29 }
 0xad0   : > { %5610 = vmatpush.msra.mxu3 %v5609_v33 }
 0xad1   : > { %4968 = vmatmul.f32.gmra.mxu1 %v12541_v59  ;;  %v4866_v9 = vand.u32 4294901760, %v4865_v3  ;;  %v4872_v7 = vand.u32 4294901760, %v12604_v27 }
 0xad3   : > { %v4873_v33 = vsub.f32 %v12604_v27, %v4872_v7 }
 0xad5   : > { %5059 = vmatmul.f32.gmra.mxu2 %v12518_v18  ;;  %5176 = vmatmul.f32.gmra.mxu3 %v4840_v63  ;;  %v5389_v18 = vld [vmem:[%s15840_s14 + $0x8] sm:$0xff]  ;;  %v5612_v63 = vsub.f32 %v5390_v39, %v5458_v38  ;;  %v5625_v39 = vand.u32 4294901760, %v5624_v21 }
 0xad6   : > { %v5460_v35 = vand.u32 4294901760, %v5389_v18 }
 0xad7   : > { %4859 = vmatmul.f32.gmra.mxu0 %v4858_v0  ;;  %v5613_v10 = vand.u32 4294901760, %v5612_v63  ;;  %v12627_v0 = vsub.f32 %v4736_v29, %v12618_v43 }
 0xad8   : > { %v5618_v12 = vsub.f32 %v5389_v18, %v5460_v35  ;;  %5461 = vmatpush.msra.mxu2 %v5460_v35  ;;  %5711 = vmatpush.msrb.mxu0 %v5612_v63  ;;  %v4874_v18 = vand.u32 4294901760, %v4873_v33  ;;  %v5397_v33 = vsel %vm905_vm0, %v12362_v54, 0 }
 0xad9   : > { %4972 = vmatmul.f32.gmra.mxu1 %v12555_v5  ;;  %v5614_v53 = vsub.f32 %v5612_v63, %v5613_v10  ;;  %v4880_v63 = vand.u32 4294901760, %v12627_v0 }
 0xada   : > { %5816 = vmatpush.msrb.mxu1 %v5460_v35  ;;  %v5619_v55 = vand.u32 4294901760, %v5618_v12  ;;  %5463 = vmatpush.msra.mxu2 %v5462_v24 }
 0xadb   : > { %5714 = vmatpush.msrb.mxu0 %v5618_v12  ;;  %v5615_v16 = vand.u32 4294901760, %v5614_v53  ;;  %v4881_v29 = vsub.f32 %v12627_v0, %v4880_v63 }
 0xadc   : > { %v5620_v3 = vsub.f32 %v5618_v12, %v5619_v55  ;;  %5931 = vmatpush.msrb.mxu2 %v5607_v52  ;;  %5818 = vmatpush.msrb.mxu1 %v5462_v24 }
 0xadd   : > { %5064 = vmatmul.f32.gmra.mxu2 %v12532_v31  ;;  %5182 = vmatmul.f32.gmra.mxu3 %v4848_v23  ;;  %v5626_v23 = vsub.f32 %v5624_v21, %v5625_v39  ;;  %v4882_v12 = vand.u32 4294901760, %v4881_v29 }
 0xade   : > { %5717 = vmatpush.msrb.mxu0 %v5624_v21  ;;  %5616 = vmatpush.msra.mxu3 %v5615_v16  ;;  %v5621_v31 = vand.u32 4294901760, %v5620_v3 }
 0xadf   : > { %4867 = vmatmul.f32.gmra.mxu0 %v4866_v9  ;;  %5935 = vmatpush.msrb.mxu2 %v5613_v10  ;;  %v5627_v9 = vand.u32 4294901760, %v5626_v23 }
 0xae0   : > { %5622 = vmatpush.msra.mxu3 %v5621_v31  ;;  %v12651_v31 = vand.u32 4294901760, %v5397_v33 }
 0xae1   : > { %4976 = vmatmul.f32.gmra.mxu1 %v12573_v19  ;;  %5939 = vmatpush.msrb.mxu2 %v5619_v55 }
 0xae2   : > { %5628 = vmatpush.msra.mxu3 %v5627_v9  ;;  %v5400_v9 = vsel %vm905_vm0, %v12376_v45, 0 }
 0xae3   : > { %5943 = vmatpush.msrb.mxu2 %v5625_v39 }
 0xae4   : > { %v4575_v44 = vpop.f32.mrf.mxu0  ;;  %6022 = vmatpush.msrb.mxu3 %v12575_v30 }
 0xae5   : > { %5069 = vmatmul.f32.gmra.mxu2 %v12546_v4  ;;  %5188 = vmatmul.f32.gmra.mxu3 %v4856_v48  ;;  %v11511_v4 = vld [vmem:[%s15842_s16] ss:$0 sm:$0xff] }
 0xae6   : > { %v4607_v52 = vpop.f32.mrf.mxu1  ;;  %6024 = vmatpush.msrb.mxu3 %v5458_v38 }
 0xae7   : > { %4875 = vmatmul.f32.gmra.mxu0 %v4874_v18 }
 0xae8   : > { %v4541_v10 = vpop.f32.mrf.mxu3  ;;  %6026 = vmatpush.msrb.mxu3 %v5460_v35 }
 0xae9   : > { %4980 = vmatmul.f32.gmra.mxu1 %v12596_v56 }
 0xaea   : > { %6028 = vmatpush.msrb.mxu3 %v5462_v24 }
 0xaec   : > { %v4580_v53 = vpop.f32.mrf.mxu0 }
 0xaed   : > { %5074 = vmatmul.f32.gmra.mxu2 %v12562_v42  ;;  %5194 = vmatmul.f32.gmra.mxu3 %v4864_v36 }
 0xaee   : > { %v4613_v48 = vpop.f32.mrf.mxu1 }
 0xaef   : > { %4883 = vmatmul.f32.gmra.mxu0 %v4882_v12 }
 0xaf0   : > { %v4492_v30 = vpop.f32.mrf.mxu2  ;;  %v4545_v55 = vpop.f32.mrf.mxu3 }
 0xaf1   : > { %v4493_v21 = vadd.f32 %v11511_v4, %v4492_v30  ;;  %4984 = vmatmul.f32.gmra.mxu1 %v12618_v43 }
 0xaf3   : > { %v4542_v38 = vadd.f32 %v4541_v10, %v4493_v21 }
 0xaf4   : > { %v4764_v35 = vpop.f32.mrf.mxu0 }
 0xaf5   : > { %5079 = vmatmul.f32.gmra.mxu2 %v12584_v51  ;;  %5200 = vmatmul.f32.gmra.mxu3 %v4872_v7  ;;  %v4576_v42 = vadd.f32 %v4575_v44, %v4542_v38  ;;  %v12655_v7 = vsub.f32 %v5397_v33, %v12651_v31 }
 0xaf6   : > { %v4925_v36 = vpop.f32.mrf.mxu1 }
 0xaf7   : > { %5239 = vmatmul.f32.vlgmr.msra.gmra.mxu0 %v12383_v25  ;;  %v4608_v24 = vadd.f32 %v4607_v52, %v4576_v42  ;;  %v15886_v10 = vand.u32 4294901760, %v12655_v7 }
 0xaf8   : > { %v4500_v16 = vpop.f32.mrf.mxu2  ;;  %v4675_v3 = vpop.f32.mrf.mxu3 }
 0xaf9   : > { %v4501_v39 = vadd.f32 %v11511_v4, %v4500_v16  ;;  %5324 = vmatmul.f32.vlgmr.msra.gmra.mxu1 %v12383_v25  ;;  %v5467_v45 = vsub.f32 %v12655_v7, %v15886_v10 }
 0xafb   : > { %v4546_v23 = vadd.f32 %v4545_v55, %v4501_v39  ;;  %v5468_v21 = vand.u32 4294901760, %v5467_v45  ;;  %v5406_v39 = vsel %vm905_vm0, %v12428_v8, 0 }
 0xafc   : > { %v4772_v51 = vpop.f32.mrf.mxu0 }
 0xafd   : > { %5084 = vmatmul.f32.gmra.mxu2 %v12604_v27  ;;  %5206 = vmatmul.f32.gmra.mxu3 %v4880_v63  ;;  %v4581_v18 = vadd.f32 %v4580_v53, %v4546_v23  ;;  %v12662_v27 = vand.u32 4294901760, %v5400_v9 }
 0xafe   : > { %v4929_v54 = vpop.f32.mrf.mxu1 }
 0xaff   : > { %5243 = vmatmul.f32.gmra.mxu0 %v12408_v41  ;;  %v4614_v44 = vadd.f32 %v4613_v48, %v4581_v18  ;;  %v12672_v53 = vsub.f32 %v5400_v9, %v12662_v27  ;;  %v12679_v48 = vld [vmem:[%s15843_s17] ss:$0 sm:$0xff] }
 0xb00   : > { %v4646_v52 = vpop.f32.mrf.mxu2  ;;  %v4679_v25 = vpop.f32.mrf.mxu3  ;;  %v4765_v33 = vadd.f32 %v12679_v48, %v4764_v35 }
 0xb01   : > { %v4647_v29 = vadd.f32 %v4646_v52, %v4608_v24  ;;  %5328 = vmatmul.f32.gmra.mxu1 %v12408_v41  ;;  %v5403_v41 = vsel %vm905_vm0, %v12401_v26, 0  ;;  %v15884_v38 = vand.u32 4294901760, %v12672_v53 }
 0xb02   : > { %v12684_v42 = vand.u32 4294901760, %v5403_v41  ;;  %v4926_v23 = vadd.f32 %v4925_v36, %v4765_v33 }
 0xb03   : > { %v12664_v63 = vadd.f32 %v4675_v3, %v4647_v29  ;;  %v5475_v16 = vsub.f32 %v12672_v53, %v15884_v38  ;;  %v4773_v29 = vadd.f32 %v12679_v48, %v4772_v51 }
 0xb04   : > { %v4780_v12 = vpop.f32.mrf.mxu0  ;;  %v12694_v3 = vsub.f32 %v5403_v41, %v12684_v42 }
 0xb05   : > { %16033 = vst [vmem:[#allocation15_spill] sm:$0xff] %v12664_v63  ;;  %5089 = vmatmul.f32.gmra.mxu2 %v12627_v0  ;;  %5630 = vmatmul.f32.vlgmr.msra.gmra.mxu3 %v12651_v31 }
 0xb06   : > { %v4933_v4 = vpop.f32.mrf.mxu1  ;;  %v15882_v52 = vand.u32 4294901760, %v12694_v3 }
 0xb07   : > { %5247 = vmatmul.f32.gmra.mxu0 %v12434_v47 }
 0xb08   : > { %v4650_v0 = vpop.f32.mrf.mxu2  ;;  %v5117_v30 = vpop.f32.mrf.mxu3  ;;  %v5483_v8 = vsub.f32 %v12694_v3, %v15882_v52 }
 0xb09   : > { %v4651_v55 = vadd.f32 %v4650_v0, %v4614_v44  ;;  %5332 = vmatmul.f32.gmra.mxu1 %v12434_v47  ;;  %v5476_v44 = vand.u32 4294901760, %v5475_v16  ;;  %v5409_v0 = vsel %vm905_vm0, %v12444_v50, 0 }
 0xb0a   : > { %v5484_v33 = vand.u32 4294901760, %v5483_v8 }
 0xb0b   : > { %v12687_v26 = vadd.f32 %v4679_v25, %v4651_v55  ;;  %v12701_v25 = vand.u32 4294901760, %v5406_v39  ;;  %v4930_v55 = vadd.f32 %v4929_v54, %v4773_v29 }
 0xb0c   : > { %v4788_v24 = vpop.f32.mrf.mxu0 }
 0xb0d   : > { %16034 = vst [vmem:[#allocation16_spill] sm:$0xff] %v12687_v26  ;;  %5469 = vmatmul.f32.vlgmr.msra.gmra.mxu2 %v5468_v21  ;;  %5634 = vmatmul.f32.gmra.mxu3 %v12662_v27  ;;  %v12711_v36 = vsub.f32 %v5406_v39, %v12701_v25  ;;  %v4781_v39 = vadd.f32 %v12679_v48, %v4780_v12 }
 0xb0e   : > { %v4937_v47 = vpop.f32.mrf.mxu1 }
 0xb0f   : > { %5251 = vmatmul.f32.gmra.mxu0 %v12447_v6  ;;  %v15880_v16 = vand.u32 4294901760, %v12711_v36  ;;  %v4934_v29 = vadd.f32 %v4933_v4, %v4781_v39  ;;  %v5415_v39 = vsel %vm905_vm0, %v12465_v58, 0 }
 0xb10   : > { %v5015_v35 = vpop.f32.mrf.mxu2  ;;  %v5123_v18 = vpop.f32.mrf.mxu3 }
 0xb11   : > { %v5016_v9 = vadd.f32 %v5015_v35, %v4926_v23  ;;  %5336 = vmatmul.f32.gmra.mxu1 %v12447_v6  ;;  %v12718_v23 = vand.u32 4294901760, %v5409_v0  ;;  %v5491_v50 = vsub.f32 %v12711_v36, %v15880_v16 }
 0xb13   : > { %v12704_v45 = vadd.f32 %v5117_v30, %v5016_v9  ;;  %v12728_v54 = vsub.f32 %v5409_v0, %v12718_v23  ;;  %v4789_v0 = vadd.f32 %v12679_v48, %v4788_v24 }
 0xb14   : > { %v4796_v41 = vpop.f32.mrf.mxu0 }
 0xb15   : > { %5477 = vmatmul.f32.gmra.mxu2 %v5476_v44  ;;  %5638 = vmatmul.f32.gmra.mxu3 %v12684_v42  ;;  %v5412_v44 = vsel %vm905_vm0, %v12455_v13, 0 }
 0xb16   : > { %v4941_v6 = vpop.f32.mrf.mxu1 }
 0xb17   : > { %5255 = vmatmul.f32.gmra.mxu0 %v12458_v22 }
 0xb18   : > { %v5020_v51 = vpop.f32.mrf.mxu2  ;;  %v5129_v30 = vpop.f32.mrf.mxu3 }
 0xb19   : > { %v5021_v21 = vadd.f32 %v5020_v51, %v4930_v55  ;;  %5340 = vmatmul.f32.gmra.mxu1 %v12458_v22  ;;  %v5492_v55 = vand.u32 4294901760, %v5491_v50  ;;  %v15881_v51 = vand.u32 4294901760, %v12728_v54  ;;  %v4938_v50 = vadd.f32 %v4937_v47, %v4789_v0 }
 0xb1a   : > { %v5418_v0 = vsel %vm905_vm0, %v12476_v1, 0 }
 0xb1b   : > { %v12721_v35 = vadd.f32 %v5123_v18, %v5021_v21  ;;  %v12735_v21 = vand.u32 4294901760, %v5412_v44  ;;  %v5499_v13 = vsub.f32 %v12728_v54, %v15881_v51 }
 0xb1c   : > { %v4804_v9 = vpop.f32.mrf.mxu0 }
 0xb1d   : > { %5485 = vmatmul.f32.gmra.mxu2 %v5484_v33  ;;  %5642 = vmatmul.f32.gmra.mxu3 %v12701_v25  ;;  %v12745_v4 = vsub.f32 %v5412_v44, %v12735_v21  ;;  %v4797_v44 = vadd.f32 %v12679_v48, %v4796_v41 }
 0xb1e   : > { %v4945_v22 = vpop.f32.mrf.mxu1 }
 0xb1f   : > { %5259 = vmatmul.f32.gmra.mxu0 %v12468_v62 }
 0xb20   : > { %v5025_v12 = vpop.f32.mrf.mxu2  ;;  %v5135_v18 = vpop.f32.mrf.mxu3 }
 0xb21   : > { %v5026_v8 = vadd.f32 %v5025_v12, %v4934_v29  ;;  %5344 = vmatmul.f32.gmra.mxu1 %v12468_v62  ;;  %v5500_v12 = vand.u32 4294901760, %v5499_v13  ;;  %v4942_v13 = vadd.f32 %v4941_v6, %v4797_v44  ;;  %v5421_v44 = vsel %vm905_vm0, %v12487_v28, 0 }
 0xb23   : > { %v12738_v33 = vadd.f32 %v5129_v30, %v5026_v8  ;;  %v15883_v8 = vand.u32 4294901760, %v12745_v4 }
 0xb24   : > { %v4812_v16 = vpop.f32.mrf.mxu0 }
 0xb25   : > { %5493 = vmatmul.f32.gmra.mxu2 %v5492_v55  ;;  %5646 = vmatmul.f32.gmra.mxu3 %v12718_v23  ;;  %v12752_v55 = vand.u32 4294901760, %v5415_v39  ;;  %v5507_v58 = vsub.f32 %v12745_v4, %v15883_v8 }
 0xb26   : > { %v4949_v62 = vpop.f32.mrf.mxu1 }
 0xb27   : > { %5263 = vmatmul.f32.gmra.mxu0 %v12479_v37  ;;  %v12762_v47 = vsub.f32 %v5415_v39, %v12752_v55  ;;  %v4805_v39 = vadd.f32 %v12679_v48, %v4804_v9 }
 0xb28   : > { %v5030_v24 = vpop.f32.mrf.mxu2  ;;  %v5141_v30 = vpop.f32.mrf.mxu3 }
 0xb29   : > { %v5031_v29 = vadd.f32 %v5030_v24, %v4938_v50  ;;  %5348 = vmatmul.f32.gmra.mxu1 %v12479_v37  ;;  %v5508_v24 = vand.u32 4294901760, %v5507_v58  ;;  %v4946_v58 = vadd.f32 %v4945_v22, %v4805_v39  ;;  %v5424_v39 = vsel %vm905_vm0, %v12497_v34, 0 }
 0xb2b   : > { %v12755_v51 = vadd.f32 %v5135_v18, %v5031_v29  ;;  %v15885_v29 = vand.u32 4294901760, %v12762_v47 }
 0xb2c   : > { %v4820_v52 = vpop.f32.mrf.mxu0 }
 0xb2d   : > { %5501 = vmatmul.f32.gmra.mxu2 %v5500_v12  ;;  %5650 = vmatmul.f32.gmra.mxu3 %v12735_v21  ;;  %v12769_v12 = vand.u32 4294901760, %v5418_v0  ;;  %v5515_v1 = vsub.f32 %v12762_v47, %v15885_v29 }
 0xb2e   : > { %v4953_v37 = vpop.f32.mrf.mxu1 }
 0xb2f   : > { %5267 = vmatmul.f32.gmra.mxu0 %v12490_v2  ;;  %v12779_v6 = vsub.f32 %v5418_v0, %v12769_v12  ;;  %v4813_v0 = vadd.f32 %v12679_v48, %v4812_v16 }
 0xb30   : > { %v5035_v41 = vpop.f32.mrf.mxu2  ;;  %v5147_v18 = vpop.f32.mrf.mxu3 }
 0xb31   : > { %v5036_v50 = vadd.f32 %v5035_v41, %v4942_v13  ;;  %5352 = vmatmul.f32.gmra.mxu1 %v12490_v2  ;;  %v5516_v41 = vand.u32 4294901760, %v5515_v1  ;;  %v4950_v1 = vadd.f32 %v4949_v62, %v4813_v0  ;;  %v5427_v0 = vsel %vm905_vm0, %v12509_v49, 0 }
 0xb33   : > { %v12772_v8 = vadd.f32 %v5141_v30, %v5036_v50  ;;  %v15887_v50 = vand.u32 4294901760, %v12779_v6 }
 0xb34   : > { %v4828_v38 = vpop.f32.mrf.mxu0 }
 0xb35   : > { %5509 = vmatmul.f32.gmra.mxu2 %v5508_v24  ;;  %5654 = vmatmul.f32.gmra.mxu3 %v12752_v55  ;;  %v12786_v24 = vand.u32 4294901760, %v5421_v44  ;;  %v5523_v28 = vsub.f32 %v12779_v6, %v15887_v50 }
 0xb36   : > { %v4957_v2 = vpop.f32.mrf.mxu1 }
 0xb37   : > { %5271 = vmatmul.f32.gmra.mxu0 %v12500_v46  ;;  %v12796_v22 = vsub.f32 %v5421_v44, %v12786_v24  ;;  %v4821_v44 = vadd.f32 %v12679_v48, %v4820_v52 }
 0xb38   : > { %v5040_v9 = vpop.f32.mrf.mxu2  ;;  %v5153_v30 = vpop.f32.mrf.mxu3 }
 0xb39   : > { %v5041_v13 = vadd.f32 %v5040_v9, %v4946_v58  ;;  %5356 = vmatmul.f32.gmra.mxu1 %v12500_v46  ;;  %v5524_v9 = vand.u32 4294901760, %v5523_v28  ;;  %v4954_v28 = vadd.f32 %v4953_v37, %v4821_v44  ;;  %v5430_v44 = vsel %vm905_vm0, %v12523_v20, 0 }
 0xb3b   : > { %v12789_v29 = vadd.f32 %v5147_v18, %v5041_v13  ;;  %v15890_v13 = vand.u32 4294901760, %v12796_v22 }
 0xb3c   : > { %v4836_v10 = vpop.f32.mrf.mxu0 }
 0xb3d   : > { %5517 = vmatmul.f32.gmra.mxu2 %v5516_v41  ;;  %5658 = vmatmul.f32.gmra.mxu3 %v12769_v12  ;;  %v12803_v41 = vand.u32 4294901760, %v5424_v39  ;;  %v5531_v34 = vsub.f32 %v12796_v22, %v15890_v13 }
 0xb3e   : > { %v4961_v46 = vpop.f32.mrf.mxu1 }
 0xb3f   : > { %5275 = vmatmul.f32.gmra.mxu0 %v12513_v11  ;;  %v12813_v62 = vsub.f32 %v5424_v39, %v12803_v41  ;;  %v4829_v39 = vadd.f32 %v12679_v48, %v4828_v38 }
 0xb40   : > { %v5045_v16 = vpop.f32.mrf.mxu2  ;;  %v5159_v18 = vpop.f32.mrf.mxu3 }
 0xb41   : > { %v5046_v58 = vadd.f32 %v5045_v16, %v4950_v1  ;;  %5360 = vmatmul.f32.gmra.mxu1 %v12513_v11  ;;  %v5532_v16 = vand.u32 4294901760, %v5531_v34  ;;  %v4958_v34 = vadd.f32 %v4957_v2, %v4829_v39  ;;  %v5433_v39 = vsel %vm905_vm0, %v12537_v32, 0 }
 0xb43   : > { %v12806_v50 = vadd.f32 %v5153_v30, %v5046_v58  ;;  %v15892_v58 = vand.u32 4294901760, %v12813_v62 }
 0xb44   : > { %v4844_v60 = vpop.f32.mrf.mxu0 }
 0xb45   : > { %5525 = vmatmul.f32.gmra.mxu2 %v5524_v9  ;;  %5662 = vmatmul.f32.gmra.mxu3 %v12786_v24  ;;  %v12820_v9 = vand.u32 4294901760, %v5427_v0  ;;  %v5539_v49 = vsub.f32 %v12813_v62, %v15892_v58 }
 0xb46   : > { %v4965_v11 = vpop.f32.mrf.mxu1 }
 0xb47   : > { %5279 = vmatmul.f32.gmra.mxu0 %v12527_v57  ;;  %v12830_v37 = vsub.f32 %v5427_v0, %v12820_v9  ;;  %v4837_v0 = vadd.f32 %v12679_v48, %v4836_v10 }
 0xb48   : > { %v5050_v52 = vpop.f32.mrf.mxu2  ;;  %v5165_v30 = vpop.f32.mrf.mxu3 }
 0xb49   : > { %v5051_v1 = vadd.f32 %v5050_v52, %v4954_v28  ;;  %5364 = vmatmul.f32.gmra.mxu1 %v12527_v57  ;;  %v5540_v52 = vand.u32 4294901760, %v5539_v49  ;;  %v4962_v49 = vadd.f32 %v4961_v46, %v4837_v0  ;;  %v5436_v0 = vsel %vm905_vm0, %v12550_v17, 0 }
 0xb4b   : > { %v12823_v13 = vadd.f32 %v5159_v18, %v5051_v1  ;;  %v15894_v1 = vand.u32 4294901760, %v12830_v37 }
 0xb4c   : > { %v4852_v61 = vpop.f32.mrf.mxu0 }
 0xb4d   : > { %5533 = vmatmul.f32.gmra.mxu2 %v5532_v16  ;;  %5666 = vmatmul.f32.gmra.mxu3 %v12803_v41  ;;  %v12837_v16 = vand.u32 4294901760, %v5430_v44  ;;  %v5547_v20 = vsub.f32 %v12830_v37, %v15894_v1 }
 0xb4e   : > { %v4969_v57 = vpop.f32.mrf.mxu1 }
 0xb4f   : > { %5283 = vmatmul.f32.gmra.mxu0 %v12541_v59  ;;  %v12847_v2 = vsub.f32 %v5430_v44, %v12837_v16  ;;  %v4845_v44 = vadd.f32 %v12679_v48, %v4844_v60 }
 0xb50   : > { %v5055_v38 = vpop.f32.mrf.mxu2  ;;  %v5171_v18 = vpop.f32.mrf.mxu3 }
 0xb51   : > { %v5056_v28 = vadd.f32 %v5055_v38, %v4958_v34  ;;  %5368 = vmatmul.f32.gmra.mxu1 %v12541_v59  ;;  %v5548_v38 = vand.u32 4294901760, %v5547_v20  ;;  %v4966_v20 = vadd.f32 %v4965_v11, %v4845_v44  ;;  %v5439_v44 = vsel %vm905_vm0, %v12566_v40, 0 }
 0xb53   : > { %v12840_v58 = vadd.f32 %v5165_v30, %v5056_v28  ;;  %v15896_v28 = vand.u32 4294901760, %v12847_v2 }
 0xb54   : > { %v4860_v15 = vpop.f32.mrf.mxu0 }
 0xb55   : > { %16035 = vst [vmem:[#allocation17_spill] sm:$0xff] %v12840_v58  ;;  %5541 = vmatmul.f32.gmra.mxu2 %v5540_v52  ;;  %5670 = vmatmul.f32.gmra.mxu3 %v12820_v9  ;;  %v12854_v52 = vand.u32 4294901760, %v5433_v39  ;;  %v5555_v32 = vsub.f32 %v12847_v2, %v15896_v28 }
 0xb56   : > { %v4973_v59 = vpop.f32.mrf.mxu1 }
 0xb57   : > { %5287 = vmatmul.f32.gmra.mxu0 %v12555_v5  ;;  %v12864_v46 = vsub.f32 %v5433_v39, %v12854_v52  ;;  %v4853_v39 = vadd.f32 %v12679_v48, %v4852_v61 }
 0xb58   : > { %v5060_v10 = vpop.f32.mrf.mxu2  ;;  %v5177_v30 = vpop.f32.mrf.mxu3 }
 0xb59   : > { %v5061_v34 = vadd.f32 %v5060_v10, %v4962_v49  ;;  %5372 = vmatmul.f32.gmra.mxu1 %v12555_v5  ;;  %v5556_v10 = vand.u32 4294901760, %v5555_v32  ;;  %v4970_v32 = vadd.f32 %v4969_v57, %v4853_v39  ;;  %v5442_v39 = vsel %vm905_vm0, %v12592_v14, 0 }
 0xb5b   : > { %v12857_v1 = vadd.f32 %v5171_v18, %v5061_v34  ;;  %v15897_v34 = vand.u32 4294901760, %v12864_v46 }
 0xb5c   : > { %v4868_v26 = vpop.f32.mrf.mxu0 }
 0xb5d   : > { %16036 = vst [vmem:[#allocation18_spill] sm:$0xff] %v12857_v1  ;;  %5549 = vmatmul.f32.gmra.mxu2 %v5548_v38  ;;  %5674 = vmatmul.f32.gmra.mxu3 %v12837_v16  ;;  %v12871_v38 = vand.u32 4294901760, %v5436_v0  ;;  %v5563_v17 = vsub.f32 %v12864_v46, %v15897_v34 }
 0xb5e   : > { %v4977_v5 = vpop.f32.mrf.mxu1 }
 0xb5f   : > { %5291 = vmatmul.f32.gmra.mxu0 %v12573_v19  ;;  %v12881_v11 = vsub.f32 %v5436_v0, %v12871_v38  ;;  %v4861_v0 = vadd.f32 %v12679_v48, %v4860_v15 }
 0xb60   : > { %v5065_v60 = vpop.f32.mrf.mxu2  ;;  %v5183_v18 = vpop.f32.mrf.mxu3 }
 0xb61   : > { %v5066_v49 = vadd.f32 %v5065_v60, %v4966_v20  ;;  %5376 = vmatmul.f32.gmra.mxu1 %v12573_v19  ;;  %v5564_v60 = vand.u32 4294901760, %v5563_v17  ;;  %v4974_v17 = vadd.f32 %v4973_v59, %v4861_v0 }
 0xb63   : > { %v12874_v28 = vadd.f32 %v5177_v30, %v5066_v49  ;;  %v15898_v49 = vand.u32 4294901760, %v12881_v11 }
 0xb64   : > { %v4876_v58 = vpop.f32.mrf.mxu0 }
 0xb65   : > { %16037 = vst [vmem:[#allocation19_spill] sm:$0xff] %v12874_v28  ;;  %5557 = vmatmul.f32.gmra.mxu2 %v5556_v10  ;;  %5678 = vmatmul.f32.gmra.mxu3 %v12854_v52  ;;  %v12888_v10 = vand.u32 4294901760, %v5439_v44  ;;  %v5571_v40 = vsub.f32 %v12881_v11, %v15898_v49 }
 0xb66   : > { %v4981_v19 = vpop.f32.mrf.mxu1 }
 0xb67   : > { %5295 = vmatmul.f32.gmra.mxu0 %v12596_v56  ;;  %v12898_v57 = vsub.f32 %v5439_v44, %v12888_v10  ;;  %v4869_v44 = vadd.f32 %v12679_v48, %v4868_v26 }
 0xb68   : > { %v5070_v61 = vpop.f32.mrf.mxu2  ;;  %v5189_v30 = vpop.f32.mrf.mxu3 }
 0xb69   : > { %v5071_v20 = vadd.f32 %v5070_v61, %v4970_v32  ;;  %5380 = vmatmul.f32.gmra.mxu1 %v12596_v56  ;;  %v5572_v61 = vand.u32 4294901760, %v5571_v40  ;;  %v4978_v0 = vadd.f32 %v4977_v5, %v4869_v44 }
 0xb6b   : > { %v12891_v34 = vadd.f32 %v5183_v18, %v5071_v20  ;;  %v15899_v20 = vand.u32 4294901760, %v12898_v57 }
 0xb6c   : > { %v4884_v1 = vpop.f32.mrf.mxu0 }
 0xb6d   : > { %5565 = vmatmul.f32.gmra.mxu2 %v5564_v60  ;;  %5682 = vmatmul.f32.gmra.mxu3 %v12871_v38  ;;  %v12905_v60 = vand.u32 4294901760, %v5442_v39  ;;  %v5579_v14 = vsub.f32 %v12898_v57, %v15899_v20 }
 0xb6e   : > { %v4985_v56 = vpop.f32.mrf.mxu1 }
 0xb6f   : > { %5299 = vmatmul.f32.gmra.mxu0 %v12618_v43 }
 0xb70   : > { %v5075_v15 = vpop.f32.mrf.mxu2  ;;  %v5195_v18 = vpop.f32.mrf.mxu3 }
 0xb71   : > { %v5076_v32 = vadd.f32 %v5075_v15, %v4974_v17  ;;  %5384 = vmatmul.f32.gmra.mxu1 %v12618_v43  ;;  %v12917_v43 = vsub.f32 %v5442_v39, %v12905_v60  ;;  %v16038_v17 = vand.u32 4294901760, %v12655_v7  ;;  %v5580_v15 = vand.u32 4294901760, %v5579_v14 }
 0xb73   : > { %v12908_v49 = vadd.f32 %v5189_v30, %v5076_v32  ;;  %v15900_v32 = vand.u32 4294901760, %v12917_v43 }
 0xb74   : > { %v12910_v28 = vpop.f32.mrf.mxu0 }
 0xb75   : > { %5573 = vmatmul.f32.gmra.mxu2 %v5572_v61  ;;  %5686 = vmatmul.f32.gmra.mxu3 %v12888_v10  ;;  %v4877_v61 = vadd.f32 %v12679_v48, %v4876_v58  ;;  %v5587_v5 = vsub.f32 %v12917_v43, %v15900_v32  ;;  %v16039_v58 = vand.u32 4294901760, %v12672_v53 }
 0xb76   : > { %v12919_v59 = vpop.f32.mrf.mxu1 }
 0xb77   : > { %5720 = vmatmul.f32.vlgmr.msrb.gmra.mxu0 %v12655_v7  ;;  %v4982_v7 = vadd.f32 %v4981_v19, %v4877_v61 }
 0xb78   : > { %v5080_v26 = vpop.f32.mrf.mxu2  ;;  %v5201_v30 = vpop.f32.mrf.mxu3 }
 0xb79   : > { %v5081_v40 = vadd.f32 %v5080_v26, %v4978_v0  ;;  %5822 = vmatmul.f32.vlgmr.msrb.gmra.mxu1 %v16038_v17 }
 0xb7b   : > { %v12926_v20 = vadd.f32 %v5195_v18, %v5081_v40  ;;  %v5588_v18 = vand.u32 4294901760, %v5587_v5  ;;  %v4885_v40 = vadd.f32 %v12679_v48, %v4884_v1  ;;  %v12957_v1 = vld [vmem:[%s15844_s18] ss:$0 sm:$0xff] }
 0xb7c   : > { %v12928_v39 = vpop.f32.mrf.mxu0 }
 0xb7d   : > { %5581 = vmatmul.f32.gmra.mxu2 %v5580_v15  ;;  %5690 = vmatmul.f32.gmra.mxu3 %v12905_v60  ;;  %v4986_v19 = vadd.f32 %v4985_v56, %v4885_v40 }
 0xb7e   : > { %v12934_v44 = vpop.f32.mrf.mxu1 }
 0xb7f   : > { %5725 = vmatmul.f32.gmra.mxu0 %v12672_v53  ;;  %v16040_v53 = vand.u32 4294901760, %v12694_v3 }
 0xb80   : > { %v5085_v14 = vpop.f32.mrf.mxu2  ;;  %v5207_v0 = vpop.f32.mrf.mxu3 }
 0xb81   : > { %v5086_v26 = vadd.f32 %v5085_v14, %v4982_v7  ;;  %5828 = vmatmul.f32.gmra.mxu1 %v16039_v58 }
 0xb83   : > { %v12940_v17 = vadd.f32 %v5201_v30, %v5086_v26 }
 0xb84   : > { %v12942_v15 = vpop.f32.mrf.mxu0 }
 0xb85   : > { %5589 = vmatmul.f32.gmra.mxu2 %v5588_v18  ;;  %6030 = vmatmul.f32.vlgmr.msrb.gmra.mxu3 %v12651_v31 }
 0xb86   : > { %v12945_v32 = vpop.f32.mrf.mxu1 }
 0xb87   : > { %5730 = vmatmul.f32.gmra.mxu0 %v12694_v3 }
 0xb88   : > { %v5090_v61 = vpop.f32.mrf.mxu2  ;;  %v5631_v7 = vpop.f32.mrf.mxu3 }
 0xb89   : > { %v5091_v14 = vadd.f32 %v5090_v61, %v4986_v19  ;;  %5834 = vmatmul.f32.gmra.mxu1 %v16040_v53 }
 0xb8b   : > { %v12950_v5 = vadd.f32 %v5207_v0, %v5091_v14  ;;  %v16041_v0 = vand.u32 4294901760, %v12711_v36  ;;  %v16043_v14 = vand.u32 4294901760, %v12728_v54 }
 0xb8c   : > { %v5252_v48 = vpop.f32.mrf.mxu0 }
 0xb8d   : > { %5945 = vmatmul.f32.vlgmr.msrb.gmra.mxu2 %v12651_v31  ;;  %6034 = vmatmul.f32.gmra.mxu3 %v12662_v27 }
 0xb8e   : > { %v5337_v56 = vpop.f32.mrf.mxu1 }
 0xb8f   : > { %5735 = vmatmul.f32.gmra.mxu0 %v12711_v36 }
 0xb90   : > { %v5470_v30 = vpop.f32.mrf.mxu2  ;;  %v5635_v26 = vpop.f32.mrf.mxu3 }
 0xb91   : > { %v5471_v3 = vadd.f32 %v12957_v1, %v5470_v30  ;;  %5840 = vmatmul.f32.gmra.mxu1 %v16041_v0  ;;  %v16044_v0 = vand.u32 4294901760, %v12745_v4 }
 0xb93   : > { %v12963_v58 = vadd.f32 %v5631_v7, %v5471_v3 }
 0xb94   : > { %v5256_v31 = vpop.f32.mrf.mxu0 }
 0xb95   : > { %16042 = vst [vmem:[#allocation20_spill] sm:$0xff] %v12963_v58  ;;  %5949 = vmatmul.f32.gmra.mxu2 %v12662_v27  ;;  %6038 = vmatmul.f32.gmra.mxu3 %v12684_v42 }
 0xb96   : > { %v5341_v18 = vpop.f32.mrf.mxu1 }
 0xb97   : > { %5740 = vmatmul.f32.gmra.mxu0 %v12728_v54 }
 0xb98   : > { %v5478_v40 = vpop.f32.mrf.mxu2  ;;  %v5639_v19 = vpop.f32.mrf.mxu3 }
 0xb99   : > { %v5479_v61 = vadd.f32 %v12957_v1, %v5478_v40  ;;  %5846 = vmatmul.f32.gmra.mxu1 %v16043_v14 }
 0xb9b   : > { %v12971_v53 = vadd.f32 %v5635_v26, %v5479_v61 }
 0xb9c   : > { %v5260_v36 = vpop.f32.mrf.mxu0 }
 0xb9d   : > { %5953 = vmatmul.f32.gmra.mxu2 %v12684_v42  ;;  %6042 = vmatmul.f32.gmra.mxu3 %v12701_v25  ;;  %v5261_v61 = vadd.f32 %v5260_v36, %v12789_v29 }
 0xb9e   : > { %v5345_v27 = vpop.f32.mrf.mxu1 }
 0xb9f   : > { %5745 = vmatmul.f32.gmra.mxu0 %v12745_v4 }
 0xba0   : > { %v5486_v7 = vpop.f32.mrf.mxu2  ;;  %v5643_v30 = vpop.f32.mrf.mxu3 }
 0xba1   : > { %v5487_v3 = vadd.f32 %v12957_v1, %v5486_v7  ;;  %5852 = vmatmul.f32.gmra.mxu1 %v16044_v0  ;;  %v5253_v0 = vadd.f32 %v5252_v48, %v12755_v51 }
 0xba3   : > { %v12979_v40 = vadd.f32 %v5639_v19, %v5487_v3  ;;  %v16046_v19 = vand.u32 4294901760, %v12762_v47 }
 0xba4   : > { %v5264_v54 = vpop.f32.mrf.mxu0 }
 0xba5   : > { %v5265_v26 = vadd.f32 %v5264_v54, %v12806_v50  ;;  %5957 = vmatmul.f32.gmra.mxu2 %v12701_v25  ;;  %6046 = vmatmul.f32.gmra.mxu3 %v12718_v23  ;;  %v5257_v25 = vadd.f32 %v5256_v31, %v12772_v8  ;;  %v12994_v50 = vadd.f32 %v5345_v27, %v5261_v61 }
 0xba6   : > { %v5349_v42 = vpop.f32.mrf.mxu1 }
 0xba7   : > { %v12985_v14 = vadd.f32 %v5349_v42, %v5265_v26  ;;  %5750 = vmatmul.f32.gmra.mxu0 %v12762_v47  ;;  %16048 = vst [vmem:[#allocation22_spill] sm:$0xff] %v12994_v50  ;;  %v13006_v8 = vadd.f32 %v5341_v18, %v5257_v25  ;;  %v6113_v27 = vsel %vm1582_vm1, %v12994_v50, 0  ;;  %v16052_v42 = vand.u32 4294901760, %v12779_v6 }
 0xba8   : > { %v5494_v7 = vpop.f32.mrf.mxu2  ;;  %v5647_v58 = vpop.f32.mrf.mxu3 }
 0xba9   : > { %16045 = vst [vmem:[#allocation21_spill] sm:$0xff] %v12985_v14  ;;  %v5495_v4 = vadd.f32 %v12957_v1, %v5494_v7  ;;  %5858 = vmatmul.f32.gmra.mxu1 %v16046_v19  ;;  %7139 = vrot.lane.b32.xlu2 %v12985_v14, %s16047_s0  ;;  %v6116_v29 = vsel %vm1582_vm1, %v12985_v14, 0  ;;  %v5245_v19 = vadd.f32 %v12928_v39, %v12721_v35 }
 0xbaa   : > { %v13004_v26 = vand.u32 4294901760, %v6116_v29  ;;  %16049 = vst [vmem:[#allocation23_spill] sm:$0xff] %v13006_v8 }
 0xbab   : > { %v12998_v36 = vadd.f32 %v5643_v30, %v5495_v4  ;;  %v13027_v4 = vand.u32 4294901760, %v6113_v27 }
 0xbac   : > { %v5268_v3 = vpop.f32.mrf.mxu0  ;;  %v13025_v7 = vsub.f32 %v6116_v29, %v13004_v26 }
 0xbad   : > { %v5269_v54 = vadd.f32 %v5268_v3, %v12823_v13  ;;  %5961 = vmatmul.f32.gmra.mxu2 %v12718_v23  ;;  %6050 = vmatmul.f32.gmra.mxu3 %v12735_v21  ;;  %v5249_v13 = vadd.f32 %v12942_v15, %v12738_v33  ;;  %v13015_v23 = vadd.f32 %v5337_v56, %v5253_v0  ;;  %v6110_v33 = vsel %vm1582_vm1, %v13006_v8, 0 }
 0xbae   : > { %v5353_v47 = vpop.f32.mrf.mxu1  ;;  %v13054_v0 = vsub.f32 %v6113_v27, %v13027_v4  ;;  %v13056_v35 = vand.u32 4294901760, %v6110_v33  ;;  %v13068_v27 = vadd.f32 %v12934_v44, %v5245_v19 }
 0xbaf   : > { %v13008_v31 = vadd.f32 %v5353_v47, %v5269_v54  ;;  %5755 = vmatmul.f32.gmra.mxu0 %v12779_v6  ;;  %16051 = vst [vmem:[#allocation25_spill] sm:$0xff] %v13015_v23  ;;  %v13043_v25 = vadd.f32 %v12945_v32, %v5249_v13  ;;  %v15901_v32 = vand.u32 4294901760, %v13025_v7  ;;  %v16055_v13 = vand.u32 4294901760, %v12796_v22 }
 0xbb0   : > { %v5502_v30 = vpop.f32.mrf.mxu2  ;;  %v5651_v51 = vpop.f32.mrf.mxu3  ;;  %16054 = vst [vmem:[#allocation27_spill] sm:$0xff] %v13068_v27  ;;  %v13082_v44 = vsub.f32 %v6110_v33, %v13056_v35  ;;  %v6101_v33 = vsel %vm1582_vm1, %v13068_v27, 0 }
 0xbb1   : > { %16050 = vst [vmem:[#allocation24_spill] sm:$0xff] %v13008_v31  ;;  %v5503_v48 = vadd.f32 %v12957_v1, %v5502_v30  ;;  %5864 = vmatmul.f32.gmra.mxu1 %v16052_v42  ;;  %v6119_v18 = vsel %vm1582_vm1, %v13008_v31, 0  ;;  %v6171_v42 = vsub.f32 %v13025_v7, %v15901_v32 }
 0xbb2   : > { %v13022_v61 = vand.u32 4294901760, %v6119_v18  ;;  %16053 = vst [vmem:[#allocation26_spill] sm:$0xff] %v13043_v25 }
 0xbb3   : > { %v13031_v15 = vadd.f32 %v5647_v58, %v5503_v48  ;;  %v6107_v58 = vsel %vm1582_vm1, %v13015_v23, 0 }
 0xbb4   : > { %v13033_v56 = vpop.f32.mrf.mxu0  ;;  %6130 = vmatpush.xpose.msra.mxu0 %v13022_v61  ;;  %6262 = vmatpush.xpose.msra.mxu3 %v13022_v61  ;;  %v13038_v6 = vsub.f32 %v6119_v18, %v13022_v61  ;;  %v13073_v48 = vand.u32 4294901760, %v6107_v58  ;;  %v15902_v18 = vand.u32 4294901760, %v13054_v0 }
 0xbb5   : > { %5965 = vmatmul.f32.gmra.mxu2 %v12735_v21  ;;  %6054 = vmatmul.f32.gmra.mxu3 %v12752_v55  ;;  %v5241_v21 = vadd.f32 %v12910_v28, %v12704_v45  ;;  %v6104_v45 = vsel %vm1582_vm1, %v13043_v25, 0 }
 0xbb6   : > { %v13049_v29 = vpop.f32.mrf.mxu1  ;;  %6225 = vmatpush.xpose.msra.mxu2 %v13038_v6  ;;  %v15903_v3 = vand.u32 4294901760, %v13038_v6 }
 0xbb7   : > { %5760 = vmatmul.f32.gmra.mxu0 %v12796_v22 }
 0xbb8   : > { %v5510_v39 = vpop.f32.mrf.mxu2  ;;  %v5655_v54 = vpop.f32.mrf.mxu3  ;;  %6132 = vmatpush.xpose.msra.mxu0 %v13004_v26  ;;  %6264 = vmatpush.xpose.msra.mxu3 %v13004_v26  ;;  %v6165_v47 = vsub.f32 %v13038_v6, %v15903_v3 }
 0xbb9   : > { %v5511_v30 = vadd.f32 %v12957_v1, %v5510_v39  ;;  %5870 = vmatmul.f32.gmra.mxu1 %v16055_v13  ;;  %v13091_v39 = vadd.f32 %v12919_v59, %v5241_v21  ;;  %v6177_v59 = vsub.f32 %v13054_v0, %v15902_v18  ;;  %v13107_v21 = vsub.f32 %v6107_v58, %v13073_v48 }
 0xbba   : > { %6228 = vmatpush.xpose.msra.mxu2 %v13025_v7  ;;  %v6166_v28 = vand.u32 4294901760, %v6165_v47  ;;  %v13095_v47 = vand.u32 4294901760, %v6104_v45  ;;  %v13116_v18 = vand.u32 4294901760, %v6101_v33 }
 0xbbb   : > { %v13085_v19 = vadd.f32 %v5651_v51, %v5511_v30  ;;  %16056 = vst [vmem:[#allocation28_spill] sm:$0xff] %v13091_v39  ;;  %v6172_v30 = vand.u32 4294901760, %v6171_v42  ;;  %v16057_v42 = vand.u32 4294901760, %v12813_v62  ;;  %v6098_v58 = vsel %vm1582_vm1, %v13091_v39, 0 }
 0xbbc   : > { %v13087_v22 = vpop.f32.mrf.mxu0  ;;  %6134 = vmatpush.xpose.msra.mxu0 %v13027_v4  ;;  %6167 = vmatpush.xpose.msra.mxu1 %v6166_v28  ;;  %v6178_v3 = vand.u32 4294901760, %v6177_v59  ;;  %v13135_v59 = vand.u32 4294901760, %v6098_v58 }
 0xbbd   : > { %6266 = vmatpush.xpose.msra.mxu3 %v13027_v4  ;;  %5969 = vmatmul.f32.gmra.mxu2 %v12752_v55  ;;  %v15908_v55 = vand.u32 4294901760, %v13082_v44 }
 0xbbe   : > { %6058 = vmatmul.f32.gmra.mxu3 %v12769_v12  ;;  %v13100_v51 = vpop.f32.mrf.mxu1  ;;  %6231 = vmatpush.xpose.msra.mxu2 %v13054_v0  ;;  %v13159_v23 = vsub.f32 %v6098_v58, %v13135_v59 }
 0xbbf   : > { %5765 = vmatmul.f32.gmra.mxu0 %v12813_v62  ;;  %v6183_v14 = vsub.f32 %v13082_v44, %v15908_v55 }
 0xbc0   : > { %v5518_v13 = vpop.f32.mrf.mxu2  ;;  %v5659_v28 = vpop.f32.mrf.mxu3  ;;  %6136 = vmatpush.xpose.msra.mxu0 %v13056_v35  ;;  %6173 = vmatpush.xpose.msra.mxu1 %v6172_v30  ;;  %v13125_v30 = vsub.f32 %v6104_v45, %v13095_v47 }
 0xbc1   : > { %v5519_v32 = vadd.f32 %v12957_v1, %v5518_v13  ;;  %6268 = vmatpush.xpose.msra.mxu3 %v13056_v35  ;;  %5876 = vmatmul.f32.gmra.mxu1 %v16057_v42  ;;  %v15911_v13 = vand.u32 4294901760, %v13107_v21  ;;  %v6184_v45 = vand.u32 4294901760, %v6183_v14  ;;  %v16058_v14 = vand.u32 4294901760, %v12830_v37 }
 0xbc2   : > { %6234 = vmatpush.xpose.msra.mxu2 %v13082_v44 }
 0xbc3   : > { %v13128_v27 = vadd.f32 %v5655_v54, %v5519_v32  ;;  %v6189_v32 = vsub.f32 %v13107_v21, %v15911_v13  ;;  %v13145_v54 = vsub.f32 %v6101_v33, %v13116_v18 }
 0xbc4   : > { %v13130_v62 = vpop.f32.mrf.mxu0  ;;  %6138 = vmatpush.xpose.msra.mxu0 %v13073_v48  ;;  %6179 = vmatpush.xpose.msra.mxu1 %v6178_v3  ;;  %v15917_v3 = vand.u32 4294901760, %v13125_v30 }
 0xbc5   : > { %6270 = vmatpush.xpose.msra.mxu3 %v13073_v48  ;;  %5973 = vmatmul.f32.gmra.mxu2 %v12769_v12  ;;  %v6190_v33 = vand.u32 4294901760, %v6189_v32  ;;  %v15916_v25 = vand.u32 4294901760, %v13145_v54 }
 0xbc6   : > { %6062 = vmatmul.f32.gmra.mxu3 %v12786_v24  ;;  %v13138_v42 = vpop.f32.mrf.mxu1  ;;  %6237 = vmatpush.xpose.msra.mxu2 %v13107_v21  ;;  %v6195_v13 = vsub.f32 %v13125_v30, %v15917_v3 }
 0xbc7   : > { %5770 = vmatmul.f32.gmra.mxu0 %v12830_v37 }
 0xbc8   : > { %v5526_v12 = vpop.f32.mrf.mxu2  ;;  %v5663_v55 = vpop.f32.mrf.mxu3  ;;  %6140 = vmatpush.xpose.msra.mxu0 %v13095_v47  ;;  %6185 = vmatpush.xpose.msra.mxu1 %v6184_v45  ;;  %v6196_v58 = vand.u32 4294901760, %v6195_v13  ;;  %v16059_v13 = vand.u32 4294901760, %v12847_v2 }
 0xbc9   : > { %v5527_v39 = vadd.f32 %v12957_v1, %v5526_v12  ;;  %6272 = vmatpush.xpose.msra.mxu3 %v13095_v47  ;;  %5882 = vmatmul.f32.gmra.mxu1 %v16058_v14 }
 0xbca   : > { %6240 = vmatpush.xpose.msra.mxu2 %v13125_v30 }
 0xbcb   : > { %v13162_v45 = vadd.f32 %v5659_v28, %v5527_v39  ;;  %v6201_v39 = vsub.f32 %v13145_v54, %v15916_v25  ;;  %v6206_v28 = vand.u32 4294901760, %v13159_v23 }
 0xbcc   : > { %v13164_v12 = vpop.f32.mrf.mxu0  ;;  %6142 = vmatpush.xpose.msra.mxu0 %v13116_v18  ;;  %6191 = vmatpush.xpose.msra.mxu1 %v6190_v33  ;;  %v16060_v33 = vand.u32 4294901760, %v13038_v6 }
 0xbcd   : > { %6274 = vmatpush.xpose.msra.mxu3 %v13116_v18  ;;  %5977 = vmatmul.f32.gmra.mxu2 %v12786_v24  ;;  %v6202_v25 = vand.u32 4294901760, %v6201_v39  ;;  %v6207_v3 = vsub.f32 %v13159_v23, %v6206_v28 }
 0xbce   : > { %6066 = vmatmul.f32.gmra.mxu3 %v12803_v41  ;;  %v13170_v37 = vpop.f32.mrf.mxu1  ;;  %6243 = vmatpush.xpose.msra.mxu2 %v13145_v54 }
 0xbcf   : > { %5775 = vmatmul.f32.gmra.mxu0 %v12847_v2  ;;  %v16061_v2 = vand.u32 4294901760, %v13025_v7  ;;  %v6208_v6 = vand.u32 4294901760, %v6207_v3  ;;  %v16064_v7 = vand.u32 4294901760, %v13082_v44 }
 0xbd0   : > { %v5534_v32 = vpop.f32.mrf.mxu2  ;;  %v13178_v14 = vpop.f32.mrf.mxu3  ;;  %6144 = vmatpush.xpose.msra.mxu0 %v13135_v59  ;;  %6197 = vmatpush.xpose.msra.mxu1 %v6196_v58 }
 0xbd1   : > { %v5535_v24 = vadd.f32 %v12957_v1, %v5534_v32  ;;  %6276 = vmatpush.xpose.msra.mxu3 %v13135_v59  ;;  %5888 = vmatmul.f32.gmra.mxu1 %v16059_v13 }
 0xbd2   : > { %6246 = vmatpush.xpose.msra.mxu2 %v13159_v23 }
 0xbd3   : > { %v13191_v31 = vadd.f32 %v5663_v55, %v5535_v24  ;;  %v16062_v55 = vand.u32 4294901760, %v12864_v46 }
 0xbd4   : > { %6295 = vmatpush.xpose.msrb.mxu0 %v16060_v33  ;;  %v5288_v58 = vpop.f32.mrf.mxu0  ;;  %6203 = vmatpush.xpose.msra.mxu1 %v6202_v25  ;;  %v16063_v25 = vand.u32 4294901760, %v13054_v0  ;;  %v16065_v0 = vand.u32 4294901760, %v12881_v11 }
 0xbd5   : > { %5981 = vmatmul.f32.gmra.mxu2 %v12803_v41 }
 0xbd6   : > { %6070 = vmatmul.f32.gmra.mxu3 %v12820_v9  ;;  %v5373_v1 = vpop.f32.mrf.mxu1 }
 0xbd7   : > { %5780 = vmatmul.f32.gmra.mxu0 %v12864_v46 }
 0xbd8   : > { %6299 = vmatpush.xpose.msrb.mxu0 %v16061_v2  ;;  %v13198_v39 = vpop.f32.mrf.mxu2  ;;  %v13200_v32 = vpop.f32.mrf.mxu3  ;;  %6209 = vmatpush.xpose.msra.mxu1 %v6208_v6 }
 0xbd9   : > { %5894 = vmatmul.f32.gmra.mxu1 %v16062_v55 }
 0xbdc   : > { %6303 = vmatpush.xpose.msrb.mxu0 %v16063_v25  ;;  %6338 = vmatpush.xpose.msrb.mxu1 %v13022_v61  ;;  %v5292_v41 = vpop.f32.mrf.mxu0  ;;  %v16066_v61 = vand.u32 4294901760, %v13107_v21 }
 0xbdd   : > { %5985 = vmatmul.f32.gmra.mxu2 %v12820_v9  ;;  %v6095_v9 = vsel %vm1582_vm1, %v12664_v63, 0  ;;  %v5293_v21 = vadd.f32 %v5292_v41, %v12926_v20 }
 0xbde   : > { %6074 = vmatmul.f32.gmra.mxu3 %v12837_v16  ;;  %v5377_v3 = vpop.f32.mrf.mxu1  ;;  %v13224_v13 = vand.u32 4294901760, %v6095_v9 }
 0xbdf   : > { %5785 = vmatmul.f32.gmra.mxu0 %v12881_v11  ;;  %v16067_v11 = vand.u32 4294901760, %v13125_v30  ;;  %v16070_v30 = vand.u32 4294901760, %v13145_v54  ;;  %v13249_v20 = vadd.f32 %v5377_v3, %v5293_v21 }
 0xbe0   : > { %6307 = vmatpush.xpose.msrb.mxu0 %v16064_v7  ;;  %6340 = vmatpush.xpose.msrb.mxu1 %v13004_v26  ;;  %v13213_v46 = vpop.f32.mrf.mxu2  ;;  %v13215_v24 = vpop.f32.mrf.mxu3 }
 0xbe1   : > { %5900 = vmatmul.f32.gmra.mxu1 %v16065_v0  ;;  %16071 = vst [vmem:[#allocation30_spill] sm:$0xff] %v13249_v20  ;;  %v6377_v23 = vsel %vm1582_vm1, %v13249_v20, 0 }
 0xbe4   : > { %6311 = vmatpush.xpose.msrb.mxu0 %v16066_v61  ;;  %6342 = vmatpush.xpose.msrb.mxu1 %v13027_v4  ;;  %v5296_v44 = vpop.f32.mrf.mxu0 }
 0xbe5   : > { %v5297_v26 = vadd.f32 %v5296_v44, %v12940_v17  ;;  %5989 = vmatmul.f32.gmra.mxu2 %v12837_v16  ;;  %v13241_v16 = vsub.f32 %v6095_v9, %v13224_v13  ;;  %v16069_v17 = vand.u32 4294901760, %v12898_v57  ;;  %v13290_v9 = vand.u32 4294901760, %v6377_v23 }
 0xbe6   : > { %6078 = vmatmul.f32.gmra.mxu3 %v12854_v52  ;;  %v5381_v33 = vpop.f32.mrf.mxu1 }
 0xbe7   : > { %5790 = vmatmul.f32.gmra.mxu0 %v12898_v57  ;;  %v13234_v4 = vadd.f32 %v5381_v33, %v5297_v26  ;;  %v6147_v57 = vand.u32 4294901760, %v13241_v16  ;;  %v16077_v26 = vld [vmem:[#allocation18_spill] sm:$0xff] }
 0xbe8   : > { %6315 = vmatpush.xpose.msrb.mxu0 %v16067_v11  ;;  %6344 = vmatpush.xpose.msrb.mxu1 %v13056_v35  ;;  %v13236_v2 = vpop.f32.mrf.mxu2  ;;  %v13238_v6 = vpop.f32.mrf.mxu3  ;;  %v5289_v35 = vadd.f32 %v5288_v58, %v12908_v49  ;;  %v5277_v11 = vadd.f32 %v13087_v22, %v16077_v26 }
 0xbe9   : > { %16068 = vst [vmem:[#allocation29_spill] sm:$0xff] %v13234_v4  ;;  %5906 = vmatmul.f32.gmra.mxu1 %v16069_v17  ;;  %v6380_v25 = vsel %vm1582_vm1, %v13234_v4, 0  ;;  %v6148_v3 = vsub.f32 %v13241_v16, %v6147_v57  ;;  %v13315_v17 = vsub.f32 %v6377_v23, %v13290_v9 }
 0xbea   : > { %v13263_v54 = vand.u32 4294901760, %v6380_v25 }
 0xbec   : > { %6319 = vmatpush.xpose.msrb.mxu0 %v16070_v30  ;;  %6346 = vmatpush.xpose.msrb.mxu1 %v13073_v48  ;;  %v5300_v55 = vpop.f32.mrf.mxu0  ;;  %v13288_v0 = vsub.f32 %v6380_v25, %v13263_v54 }
 0xbed   : > { %v5301_v41 = vadd.f32 %v5300_v55, %v12950_v5  ;;  %5993 = vmatmul.f32.gmra.mxu2 %v12854_v52  ;;  %v5285_v5 = vadd.f32 %v13164_v12, %v12891_v34  ;;  %v13267_v52 = vadd.f32 %v5373_v1, %v5289_v35  ;;  %v16075_v34 = vld [vmem:[#allocation19_spill] sm:$0xff]  ;;  %v16079_v55 = vld [vmem:[#allocation17_spill] sm:$0xff] }
 0xbee   : > { %6082 = vmatmul.f32.gmra.mxu3 %v12871_v38  ;;  %v5385_v48 = vpop.f32.mrf.mxu1  ;;  %v5281_v12 = vadd.f32 %v13130_v62, %v16075_v34  ;;  %v15921_v30 = vand.u32 4294901760, %v13288_v0  ;;  %v5273_v25 = vadd.f32 %v13033_v56, %v16079_v55  ;;  %v15920_v56 = vand.u32 4294901760, %v13315_v17 }
 0xbef   : > { %v13260_v49 = vadd.f32 %v5385_v48, %v5301_v41  ;;  %5795 = vmatmul.f32.gmra.mxu0 %v12917_v43  ;;  %16073 = vst [vmem:[#allocation32_spill] sm:$0xff] %v13267_v52  ;;  %v6374_v62 = vsel %vm1582_vm1, %v13267_v52, 0  ;;  %v13335_v41 = vadd.f32 %v13100_v51, %v5277_v11 }
 0xbf0   : > { %6323 = vmatpush.xpose.msrb.mxu0 %v6206_v28  ;;  %6348 = vmatpush.xpose.msrb.mxu1 %v13095_v47  ;;  %v13269_v58 = vpop.f32.mrf.mxu2  ;;  %v13271_v7 = vpop.f32.mrf.mxu3  ;;  %v16074_v47 = vand.u32 4294901760, %v12917_v43  ;;  %v13293_v43 = vadd.f32 %v13170_v37, %v5285_v5  ;;  %v13307_v33 = vadd.f32 %v13138_v42, %v5281_v12  ;;  %v6435_v23 = vsub.f32 %v13288_v0, %v15921_v30 }
 0xbf1   : > { %16072 = vst [vmem:[#allocation31_spill] sm:$0xff] %v13260_v49  ;;  %v6383_v28 = vsel %vm1582_vm1, %v13260_v49, 0  ;;  %v13357_v12 = vadd.f32 %v13049_v29, %v5273_v25  ;;  %v6365_v26 = vsel %vm1582_vm1, %v13335_v41, 0  ;;  %v6441_v11 = vsub.f32 %v13315_v17, %v15920_v56 }
 0xbf2   : > { %5912 = vmatmul.f32.gmra.mxu1 %v16074_v47  ;;  %v13284_v1 = vand.u32 4294901760, %v6383_v28  ;;  %16076 = vst [vmem:[#allocation19_spill] sm:$0xff] %v13293_v43  ;;  %v6371_v35 = vsel %vm1582_vm1, %v13293_v43, 0  ;;  %v6368_v5 = vsel %vm1582_vm1, %v13307_v33, 0 }
 0xbf3   : > { %16078 = vst [vmem:[#allocation18_spill] sm:$0xff] %v13307_v33  ;;  %v6442_v56 = vand.u32 4294901760, %v6441_v11 }
 0xbf4   : > { %6350 = vmatpush.xpose.msrb.mxu1 %v13116_v18  ;;  %v13295_v61 = vpop.f32.mrf.mxu0  ;;  %6394 = vmatpush.xpose.msrb.mxu2 %v13284_v1  ;;  %v13299_v44 = vsub.f32 %v6383_v28, %v13284_v1  ;;  %v6149_v18 = vand.u32 4294901760, %v6148_v3  ;;  %16080 = vst [vmem:[#allocation17_spill] sm:$0xff] %v13335_v41  ;;  %v13346_v28 = vand.u32 4294901760, %v6371_v35  ;;  %v16081_v3 = vld [vmem:[#allocation16_spill] sm:$0xff] }
 0xbf5   : > { %5997 = vmatmul.f32.gmra.mxu2 %v12871_v38  ;;  %v13317_v38 = vand.u32 4294901760, %v6374_v62  ;;  %v6359_v34 = vsel %vm1582_vm1, %v16081_v3, 0  ;;  %16082 = vst [vmem:[#allocation33_spill] sm:$0xff] %v13357_v12 }
 0xbf6   : > { %6086 = vmatmul.f32.gmra.mxu3 %v12888_v10  ;;  %v13310_v37 = vpop.f32.mrf.mxu1  ;;  %v15922_v21 = vand.u32 4294901760, %v13299_v44  ;;  %v13372_v29 = vsub.f32 %v6371_v35, %v13346_v28  ;;  %v6362_v35 = vsel %vm1582_vm1, %v13357_v12, 0 }
 0xbf7   : > { %6150 = vmatmul.f32.vlgmr.msra.gmra.mxu0 %v6149_v18  ;;  %v13344_v47 = vsub.f32 %v6374_v62, %v13317_v38  ;;  %v13363_v18 = vand.u32 4294901760, %v6368_v5 }
 0xbf8   : > { %6352 = vmatpush.xpose.msrb.mxu1 %v13135_v59  ;;  %6489 = vmatpush.xpose.msra.mxu0 %v13299_v44  ;;  %v13321_v22 = vpop.f32.mrf.mxu2  ;;  %v13323_v42 = vpop.f32.mrf.mxu3  ;;  %v6429_v59 = vsub.f32 %v13299_v44, %v15922_v21  ;;  %v16083_v41 = vand.u32 4294901760, %v13372_v29 }
 0xbf9   : > { %6396 = vmatpush.xpose.msrb.mxu2 %v13263_v54  ;;  %v13393_v21 = vsub.f32 %v6368_v5, %v13363_v18 }
 0xbfa   : > { %6211 = vmatmul.f32.vlgmr.msra.gmra.mxu1 %v13224_v13  ;;  %v6430_v48 = vand.u32 4294901760, %v6429_v59  ;;  %v15923_v59 = vand.u32 4294901760, %v13344_v47  ;;  %v6453_v52 = vsub.f32 %v13372_v29, %v16083_v41 }
 0xbfc   : > { %6526 = vmatpush.xpose.msra.mxu1 %v13284_v1  ;;  %6492 = vmatpush.xpose.msra.mxu0 %v13288_v0  ;;  %v13350_v51 = vpop.f32.mrf.mxu0  ;;  %v6447_v30 = vsub.f32 %v13344_v47, %v15923_v59  ;;  %v13407_v59 = vand.u32 4294901760, %v6362_v35  ;;  %v6454_v12 = vand.u32 4294901760, %v6453_v52 }
 0xbfd   : > { %6398 = vmatpush.xpose.msrb.mxu2 %v13290_v9  ;;  %6431 = vmatpush.xpose.msrb.mxu3 %v6430_v48  ;;  %v13382_v48 = vand.u32 4294901760, %v6359_v34 }
 0xbfe   : > { %6001 = vmatmul.f32.gmra.mxu2 %v12888_v10  ;;  %6090 = vmatmul.f32.gmra.mxu3 %v12905_v60  ;;  %v13361_v62 = vpop.f32.mrf.mxu1  ;;  %v6436_v10 = vand.u32 4294901760, %v6435_v23  ;;  %v13385_v23 = vand.u32 4294901760, %v6365_v26 }
 0xbff   : > { %6325 = vmatmul.f32.vlgmr.msrb.gmra.mxu0 %v13224_v13  ;;  %v6410_v11 = vsub.f32 %v6359_v34, %v13382_v48 }
 0xc00   : > { %6528 = vmatpush.xpose.msra.mxu1 %v13263_v54  ;;  %6495 = vmatpush.xpose.msra.mxu0 %v13315_v17  ;;  %v13376_v55 = vpop.f32.mrf.mxu2  ;;  %v13378_v25 = vpop.f32.mrf.mxu3 }
 0xc01   : > { %6400 = vmatpush.xpose.msrb.mxu2 %v13317_v38  ;;  %6437 = vmatpush.xpose.msrb.mxu3 %v6436_v10  ;;  %v6448_v10 = vand.u32 4294901760, %v6447_v30  ;;  %v6411_v30 = vand.u32 4294901760, %v6410_v11 }
 0xc02   : > { %6354 = vmatmul.f32.vlgmr.msrb.gmra.mxu1 %v13224_v13 }
 0xc03   : > { %v6412_v33 = vsub.f32 %v6410_v11, %v6411_v30 }
 0xc04   : > { %6530 = vmatpush.xpose.msra.mxu1 %v13290_v9  ;;  %6498 = vmatpush.xpose.msra.mxu0 %v13344_v47  ;;  %v13397_v13 = vpop.f32.mrf.mxu0 }
 0xc05   : > { %6402 = vmatpush.xpose.msrb.mxu2 %v13346_v28  ;;  %6443 = vmatpush.xpose.msrb.mxu3 %v6442_v56  ;;  %v13413_v56 = vsub.f32 %v6365_v26, %v13385_v23  ;;  %v6469_v26 = vsub.f32 %v6362_v35, %v13407_v59 }
 0xc06   : > { %6005 = vmatmul.f32.gmra.mxu2 %v12905_v60  ;;  %6280 = vmatmul.f32.vlgmr.msra.gmra.mxu3 %v6147_v57  ;;  %v13405_v5 = vpop.f32.mrf.mxu1  ;;  %v6458_v60 = vand.u32 4294901760, %v13393_v21 }
 0xc07   : > { %v6464_v43 = vand.u32 4294901760, %v13413_v56  ;;  %v6470_v35 = vand.u32 4294901760, %v6469_v26 }
 0xc08   : > { %6532 = vmatpush.xpose.msra.mxu1 %v13317_v38  ;;  %6501 = vmatpush.xpose.msra.mxu0 %v13372_v29  ;;  %v13417_v34 = vpop.f32.mrf.mxu2  ;;  %v13419_v57 = vpop.f32.mrf.mxu3  ;;  %v6459_v41 = vsub.f32 %v13393_v21, %v6458_v60 }
 0xc09   : > { %6404 = vmatpush.xpose.msrb.mxu2 %v13363_v18  ;;  %6449 = vmatpush.xpose.msrb.mxu3 %v6448_v10  ;;  %v6465_v3 = vsub.f32 %v13413_v56, %v6464_v43  ;;  %v6471_v4 = vsub.f32 %v6469_v26, %v6470_v35 }
 0xc0a   : > { %v6460_v52 = vand.u32 4294901760, %v6459_v41  ;;  %v6413_v41 = vand.u32 4294901760, %v6412_v33  ;;  %v16086_v33 = vand.u32 4294901760, %v13315_v17 }
 0xc0c   : > { %6534 = vmatpush.xpose.msra.mxu1 %v13346_v28  ;;  %6504 = vmatpush.xpose.msra.mxu0 %v13393_v21  ;;  %v13427_v63 = vpop.f32.mrf.mxu0 }
 0xc0d   : > { %6406 = vmatpush.xpose.msrb.mxu2 %v13385_v23  ;;  %6455 = vmatpush.xpose.msrb.mxu3 %v6454_v12  ;;  %v6466_v12 = vand.u32 4294901760, %v6465_v3 }
 0xc0e   : > { %6249 = vmatmul.f32.vlgmr.msra.gmra.mxu2 %v13241_v16  ;;  %v13432_v10 = vpop.f32.mrf.mxu1  ;;  %v16084_v16 = vand.u32 4294901760, %v13299_v44 }
 0xc10   : > { %6536 = vmatpush.xpose.msra.mxu1 %v13363_v18  ;;  %6507 = vmatpush.xpose.msra.mxu0 %v13413_v56  ;;  %v13436_v20 = vpop.f32.mrf.mxu2  ;;  %v13438_v21 = vpop.f32.mrf.mxu3  ;;  %v16085_v56 = vand.u32 4294901760, %v13288_v0  ;;  %v16087_v0 = vand.u32 4294901760, %v13344_v47 }
 0xc11   : > { %6408 = vmatpush.xpose.msrb.mxu2 %v13407_v59  ;;  %6461 = vmatpush.xpose.msrb.mxu3 %v6460_v52  ;;  %v6472_v52 = vand.u32 4294901760, %v6471_v4 }
 0xc14   : > { %6538 = vmatpush.xpose.msra.mxu1 %v13385_v23  ;;  %6510 = vmatpush.xpose.msra.mxu0 %v6469_v26  ;;  %v5741_v49 = vpop.f32.mrf.mxu0 }
 0xc15   : > { %6559 = vmatpush.xpose.msra.mxu2 %v16084_v16  ;;  %6467 = vmatpush.xpose.msrb.mxu3 %v6466_v12  ;;  %v16088_v16 = vand.u32 4294901760, %v13372_v29 }
 0xc16   : > { %6414 = vmatmul.f32.vlgmr.msrb.gmra.mxu2 %v6413_v41  ;;  %v5847_v8 = vpop.f32.mrf.mxu1 }
 0xc17   : > { %6513 = vmatmul.f32.vlgmr.msra.gmra.mxu0 %v6410_v11 }
 0xc18   : > { %6540 = vmatpush.xpose.msra.mxu1 %v13407_v59  ;;  %v13447_v50 = vpop.f32.mrf.mxu2  ;;  %v13449_v44 = vpop.f32.mrf.mxu3 }
 0xc19   : > { %6563 = vmatpush.xpose.msra.mxu2 %v16085_v56  ;;  %6473 = vmatpush.xpose.msrb.mxu3 %v6472_v52  ;;  %v5737_v56 = vadd.f32 %v13427_v63, %v12998_v36  ;;  %v16091_v63 = vld [vmem:[#allocation20_spill] sm:$0xff] }
 0xc1a   : > { %v5722_v36 = vadd.f32 %v13295_v61, %v16091_v63 }
 0xc1b   : > { %6544 = vmatmul.f32.vlgmr.msra.gmra.mxu1 %v6411_v30 }
 0xc1c   : > { %6475 = vmatmul.f32.vlgmr.msrb.gmra.mxu3 %v13382_v48  ;;  %v5746_v3 = vpop.f32.mrf.mxu0  ;;  %v5824_v61 = vadd.f32 %v13310_v37, %v5722_v36 }
 0xc1d   : > { %6567 = vmatpush.xpose.msra.mxu2 %v16086_v33  ;;  %6602 = vmatpush.xpose.msra.mxu3 %v13284_v1  ;;  %v5732_v33 = vadd.f32 %v13397_v13, %v12979_v40 }
 0xc1e   : > { %v5853_v4 = vpop.f32.mrf.mxu1 }
 0xc1f   : > { %v5836_v40 = vadd.f32 %v13405_v5, %v5732_v33 }
 0xc20   : > { %v5954_v11 = vpop.f32.mrf.mxu2  ;;  %v6043_v26 = vpop.f32.mrf.mxu3 }
 0xc21   : > { %6571 = vmatpush.xpose.msra.mxu2 %v16087_v0  ;;  %6604 = vmatpush.xpose.msra.mxu3 %v13263_v54 }
 0xc24   : > { %v5751_v17 = vpop.f32.mrf.mxu0 }
 0xc25   : > { %6575 = vmatpush.xpose.msra.mxu2 %v16088_v16  ;;  %6606 = vmatpush.xpose.msra.mxu3 %v13290_v9 }
 0xc26   : > { %v5859_v1 = vpop.f32.mrf.mxu1 }
 0xc28   : > { %v5958_v30 = vpop.f32.mrf.mxu2  ;;  %v6047_v12 = vpop.f32.mrf.mxu3 }
 0xc29   : > { %6579 = vmatpush.xpose.msra.mxu2 %v6458_v60  ;;  %6608 = vmatpush.xpose.msra.mxu3 %v13317_v38 }
 0xc2c   : > { %v5756_v54 = vpop.f32.mrf.mxu0 }
 0xc2d   : > { %6583 = vmatpush.xpose.msra.mxu2 %v6464_v43  ;;  %6610 = vmatpush.xpose.msra.mxu3 %v13346_v28  ;;  %v5747_v28 = vadd.f32 %v5746_v3, %v13085_v19  ;;  %v5842_v19 = vadd.f32 %v13432_v10, %v5737_v56 }
 0xc2e   : > { %v5865_v29 = vpop.f32.mrf.mxu1 }
 0xc30   : > { %v5962_v47 = vpop.f32.mrf.mxu2  ;;  %v6051_v41 = vpop.f32.mrf.mxu3 }
 0xc31   : > { %6587 = vmatpush.xpose.msra.mxu2 %v6470_v35  ;;  %6612 = vmatpush.xpose.msra.mxu3 %v13363_v18  ;;  %v5752_v18 = vadd.f32 %v5751_v17, %v13128_v27  ;;  %v5742_v35 = vadd.f32 %v5741_v49, %v13031_v15  ;;  %v5727_v27 = vadd.f32 %v13350_v51, %v12971_v53 }
 0xc32   : > { %v5757_v15 = vadd.f32 %v5756_v54, %v13162_v45  ;;  %v5955_v51 = vadd.f32 %v5954_v11, %v5836_v40  ;;  %v5947_v11 = vadd.f32 %v13436_v20, %v5824_v61 }
 0xc33   : > { %v5860_v52 = vadd.f32 %v5859_v1, %v5752_v18  ;;  %v5830_v17 = vadd.f32 %v13361_v62, %v5727_v27 }
 0xc34   : > { %6589 = vmatmul.f32.vlgmr.msra.gmra.mxu2 %v13382_v48  ;;  %v13468_v43 = vpop.f32.mrf.mxu0  ;;  %v5866_v10 = vadd.f32 %v5865_v29, %v5757_v15 }
 0xc35   : > { %6614 = vmatpush.xpose.msra.mxu3 %v13385_v23  ;;  %16089 = vst [vmem:[#allocation34_spill] sm:$0xff] %v13468_v43  ;;  %v5854_v23 = vadd.f32 %v5853_v4, %v5747_v28 }
 0xc36   : > { %v13472_v60 = vpop.f32.mrf.mxu1 }
 0xc38   : > { %v5966_v9 = vpop.f32.mrf.mxu2  ;;  %v6055_v38 = vpop.f32.mrf.mxu3 }
 0xc39   : > { %6616 = vmatpush.xpose.msra.mxu3 %v13407_v59  ;;  %v5967_v0 = vadd.f32 %v5966_v9, %v5854_v23 }
 0xc3b   : > { %v13490_v13 = vadd.f32 %v6051_v41, %v5967_v0 }
 0xc3c   : > { %6618 = vmatmul.f32.vlgmr.msra.gmra.mxu3 %v13382_v48  ;;  %v5848_v48 = vadd.f32 %v5847_v8, %v5742_v35  ;;  %v13487_v4 = vpop.f32.mrf.mxu0  ;;  %v5959_v8 = vadd.f32 %v5958_v30, %v5842_v19 }
 0xc3d   : > { %16092 = vst [vmem:[#allocation20_spill] sm:$0xff] %v13490_v13  ;;  %v13507_v62 = vand.u32 4294901760, %v13490_v13 }
 0xc3e   : > { %v5963_v49 = vadd.f32 %v5962_v47, %v5848_v48  ;;  %v13493_v53 = vpop.f32.mrf.mxu1  ;;  %v5951_v47 = vadd.f32 %v13447_v50, %v5830_v17  ;;  %v13502_v5 = vadd.f32 %v6043_v26, %v5959_v8 }
 0xc3f   : > { %v13530_v20 = vsub.f32 %v13490_v13, %v13507_v62 }
 0xc40   : > { %v5970_v59 = vpop.f32.mrf.mxu2  ;;  %v13495_v45 = vadd.f32 %v6047_v12, %v5963_v49  ;;  %v13511_v12 = vadd.f32 %v13449_v44, %v5955_v51  ;;  %v13523_v26 = vadd.f32 %v13438_v21, %v5951_v47  ;;  %v13533_v44 = vand.u32 4294901760, %v13502_v5 }
 0xc41   : > { %v5971_v16 = vadd.f32 %v5970_v59, %v5860_v52  ;;  %v6059_v43 = vpop.f32.mrf.mxu3  ;;  %v6703_v48 = vand.u32 4294901760, %v13530_v20 }
 0xc42   : > { %16093 = vst [vmem:[#allocation36_spill] sm:$0xff] %v13495_v45  ;;  %v13520_v50 = vand.u32 4294901760, %v13495_v45  ;;  %v13549_v18 = vand.u32 4294901760, %v13511_v12  ;;  %v13561_v59 = vsub.f32 %v13502_v5, %v13533_v44  ;;  %v13564_v33 = vand.u32 4294901760, %v13523_v26 }
 0xc43   : > { %v13483_v3 = vadd.f32 %v6055_v38, %v5971_v16  ;;  %v13536_v38 = vadd.f32 %v13419_v57, %v5947_v11  ;;  %v6704_v63 = vsub.f32 %v13530_v20, %v6703_v48 }
 0xc44   : > { %v13546_v28 = vsub.f32 %v13495_v45, %v13520_v50  ;;  %v13578_v19 = vsub.f32 %v13511_v12, %v13549_v18  ;;  %v6726_v36 = vsub.f32 %v13523_v26, %v13564_v33  ;;  %v6715_v40 = vand.u32 4294901760, %v13561_v59 }
 0xc45   : > { %16090 = vst [vmem:[#allocation35_spill] sm:$0xff] %v13483_v3  ;;  %v13498_v1 = vand.u32 4294901760, %v13483_v3  ;;  %v13569_v0 = vand.u32 4294901760, %v13536_v38 }
 0xc46   : > { %v13552_v57 = vpop.f32.mrf.mxu1  ;;  %v6709_v15 = vand.u32 4294901760, %v13546_v28  ;;  %v6716_v11 = vsub.f32 %v13561_v59, %v6715_v40 }
 0xc47   : > { %v13517_v37 = vsub.f32 %v13483_v3, %v13498_v1  ;;  %v6732_v51 = vsub.f32 %v13536_v38, %v13569_v0 }
 0xc48   : > { %v5974_v54 = vpop.f32.mrf.mxu2  ;;  %v6710_v17 = vsub.f32 %v13546_v28, %v6709_v15 }
 0xc49   : > { %v5975_v30 = vadd.f32 %v5974_v54, %v5866_v10  ;;  %v13504_v41 = vpop.f32.mrf.mxu3  ;;  %v6697_v35 = vand.u32 4294901760, %v13517_v37  ;;  %v6721_v10 = vand.u32 4294901760, %v13578_v19 }
 0xc4b   : > { %v13513_v29 = vadd.f32 %v6059_v43, %v5975_v30  ;;  %v13538_v43 = vpop.f32.mrf.mxu0  ;;  %v6698_v27 = vsub.f32 %v13517_v37, %v6697_v35  ;;  %v6705_v30 = vand.u32 4294901760, %v6704_v63 }
 0xc4d   : > { %v13526_v9 = vand.u32 4294901760, %v13513_v29  ;;  %v6699_v8 = vand.u32 4294901760, %v6698_v27  ;;  %v6733_v27 = vand.u32 4294901760, %v6732_v51 }
 0xc4f   : > { %6657 = vmatpush.msrb.mxu0 %v13526_v9  ;;  %6789 = vmatpush.msrb.mxu3 %v13526_v9  ;;  %v6690_v21 = vsub.f32 %v13513_v29, %v13526_v9 }
 0xc50   : > { %v13554_v56 = vpop.f32.mrf.mxu2 }
 0xc51   : > { %v13556_v23 = vpop.f32.mrf.mxu3  ;;  %6659 = vmatpush.msrb.mxu0 %v13498_v1  ;;  %6752 = vmatpush.msrb.mxu2 %v6690_v21  ;;  %v6691_v52 = vand.u32 4294901760, %v6690_v21 }
 0xc52   : > { %6791 = vmatpush.msrb.mxu3 %v13498_v1 }
 0xc53   : > { %6661 = vmatpush.msrb.mxu0 %v13507_v62  ;;  %6755 = vmatpush.msrb.mxu2 %v13517_v37  ;;  %v6692_v16 = vsub.f32 %v6690_v21, %v6691_v52  ;;  %v13594_v61 = vpop.f32.mrf.mxu0  ;;  %v13604_v21 = vpop.f32.mrf.mxu1 }
 0xc54   : > { %6793 = vmatpush.msrb.mxu3 %v13507_v62 }
 0xc55   : > { %6663 = vmatpush.msrb.mxu0 %v13520_v50  ;;  %6758 = vmatpush.msrb.mxu2 %v13530_v20  ;;  %v6693_v49 = vand.u32 4294901760, %v6692_v16  ;;  %v6727_v20 = vand.u32 4294901760, %v6726_v36  ;;  %v6722_v16 = vsub.f32 %v13578_v19, %v6721_v10 }
 0xc56   : > { %6795 = vmatpush.msrb.mxu3 %v13520_v50 }
 0xc57   : > { %6665 = vmatpush.msrb.mxu0 %v13533_v44  ;;  %6694 = vmatpush.msrb.mxu1 %v6693_v49  ;;  %v6717_v49 = vand.u32 4294901760, %v6716_v11  ;;  %v6728_v63 = vsub.f32 %v6726_v36, %v6727_v20 }
 0xc58   : > { %6761 = vmatpush.msrb.mxu2 %v13546_v28  ;;  %6797 = vmatpush.msrb.mxu3 %v13533_v44  ;;  %v13598_v54 = vpop.f32.mrf.mxu2  ;;  %v6711_v28 = vand.u32 4294901760, %v6710_v17 }
 0xc59   : > { %v13600_v47 = vpop.f32.mrf.mxu3  ;;  %6667 = vmatpush.msrb.mxu0 %v13549_v18  ;;  %6700 = vmatpush.msrb.mxu1 %v6699_v8  ;;  %v6734_v8 = vsub.f32 %v6732_v51, %v6733_v27 }
 0xc5a   : > { %6764 = vmatpush.msrb.mxu2 %v13561_v59  ;;  %6799 = vmatpush.msrb.mxu3 %v13549_v18  ;;  %v6723_v59 = vand.u32 4294901760, %v6722_v16 }
 0xc5b   : > { %6669 = vmatpush.msrb.mxu0 %v13564_v33  ;;  %6706 = vmatpush.msrb.mxu1 %v6705_v30  ;;  %v5895_v11 = vpop.f32.mrf.mxu1 }
 0xc5c   : > { %6767 = vmatpush.msrb.mxu2 %v13578_v19  ;;  %6801 = vmatpush.msrb.mxu3 %v13564_v33  ;;  %v6729_v19 = vand.u32 4294901760, %v6728_v63 }
 0xc5d   : > { %6671 = vmatpush.msrb.mxu0 %v13569_v0  ;;  %6712 = vmatpush.msrb.mxu1 %v6711_v28  ;;  %v5781_v28 = vpop.f32.mrf.mxu0 }
 0xc5e   : > { %6770 = vmatpush.msrb.mxu2 %v6726_v36  ;;  %6803 = vmatpush.msrb.mxu3 %v13569_v0  ;;  %v6735_v36 = vand.u32 4294901760, %v6734_v8 }
 0xc5f   : > { %6822 = vmatpush.msra.mxu0 %v6691_v52  ;;  %6718 = vmatpush.msrb.mxu1 %v6717_v49 }
 0xc60   : > { %6773 = vmatpush.msrb.mxu2 %v6732_v51  ;;  %v13614_v17 = vpop.f32.mrf.mxu2 }
 0xc61   : > { %v13616_v30 = vpop.f32.mrf.mxu3  ;;  %6826 = vmatpush.msra.mxu0 %v6697_v35  ;;  %6724 = vmatpush.msrb.mxu1 %v6723_v59 }
 0xc63   : > { %6830 = vmatpush.msra.mxu0 %v6703_v48  ;;  %6730 = vmatpush.msrb.mxu1 %v6729_v19  ;;  %v5901_v35 = vpop.f32.mrf.mxu1 }
 0xc65   : > { %6834 = vmatpush.msra.mxu0 %v6709_v15  ;;  %6736 = vmatpush.msrb.mxu1 %v6735_v36  ;;  %v5786_v37 = vpop.f32.mrf.mxu0 }
 0xc67   : > { %6865 = vmatpush.msra.mxu1 %v13526_v9  ;;  %6838 = vmatpush.msra.mxu0 %v6715_v40 }
 0xc68   : > { %v5990_v52 = vpop.f32.mrf.mxu2 }
 0xc69   : > { %6867 = vmatpush.msra.mxu1 %v13498_v1  ;;  %6842 = vmatpush.msra.mxu0 %v6721_v10  ;;  %v6079_v51 = vpop.f32.mrf.mxu3  ;;  %v11603_v1 = vld [vmem:[%s15844_s18] ss:$0 sm:$0xff] }
 0xc6a   : > { %v5567_v40 = vadd.f32 %v11603_v1, %v13269_v58 }
 0xc6b   : > { %6869 = vmatpush.msra.mxu1 %v13507_v62  ;;  %6846 = vmatpush.msra.mxu0 %v6727_v20  ;;  %v5575_v62 = vadd.f32 %v11603_v1, %v13321_v22  ;;  %v5543_v22 = vadd.f32 %v11603_v1, %v13198_v39 }
 0xc6c   : > { %v5680_v16 = vadd.f32 %v13238_v6, %v5567_v40 }
 0xc6d   : > { %6871 = vmatpush.msra.mxu1 %v13520_v50  ;;  %6850 = vmatpush.msra.mxu0 %v6733_v27  ;;  %v5583_v50 = vadd.f32 %v11603_v1, %v13376_v55  ;;  %v5791_v15 = vpop.f32.mrf.mxu0  ;;  %v5591_v55 = vadd.f32 %v11603_v1, %v13417_v34 }
 0xc6e   : > { %v5782_v63 = vadd.f32 %v5781_v28, %v5680_v16 }
 0xc6f   : > { %6873 = vmatpush.msra.mxu1 %v13533_v44  ;;  %v5907_v44 = vpop.f32.mrf.mxu1  ;;  %v5688_v20 = vadd.f32 %v13323_v42, %v5583_v50  ;;  %v5692_v39 = vadd.f32 %v13378_v25, %v5591_v55 }
 0xc70   : > { %v5994_v48 = vpop.f32.mrf.mxu2 }
 0xc71   : > { %6875 = vmatpush.msra.mxu1 %v13549_v18  ;;  %v6083_v9 = vpop.f32.mrf.mxu3  ;;  %v5559_v18 = vadd.f32 %v11603_v1, %v13236_v2  ;;  %v5792_v49 = vadd.f32 %v5791_v15, %v5688_v20 }
 0xc73   : > { %6877 = vmatpush.msra.mxu1 %v13564_v33  ;;  %v5684_v33 = vadd.f32 %v13271_v7, %v5575_v62  ;;  %v5676_v58 = vadd.f32 %v13215_v24, %v5559_v18  ;;  %v5908_v42 = vadd.f32 %v5907_v44, %v5792_v49 }
 0xc75   : > { %6879 = vmatpush.msra.mxu1 %v13569_v0  ;;  %v5551_v0 = vadd.f32 %v11603_v1, %v13213_v46  ;;  %v5787_v27 = vadd.f32 %v5786_v37, %v5684_v33  ;;  %v5777_v7 = vadd.f32 %v13594_v61, %v5676_v58  ;;  %v5668_v46 = vadd.f32 %v13178_v14, %v5543_v22  ;;  %v5796_v19 = vpop.f32.mrf.mxu0  ;;  %v16094_v14 = vld [vmem:[#allocation34_spill] sm:$0xff] }
 0xc76   : > { %v5896_v37 = vadd.f32 %v5895_v11, %v5782_v63  ;;  %v5797_v62 = vadd.f32 %v5796_v19, %v5692_v39  ;;  %v5762_v50 = vadd.f32 %v16094_v14, %v13191_v31 }
 0xc77   : > { %v5672_v59 = vadd.f32 %v13200_v32, %v5551_v0  ;;  %v5902_v8 = vadd.f32 %v5901_v35, %v5787_v27  ;;  %v5767_v24 = vadd.f32 %v13487_v4, %v5668_v46  ;;  %v5913_v28 = vpop.f32.mrf.mxu1  ;;  %v5890_v32 = vadd.f32 %v13604_v21, %v5777_v7 }
 0xc78   : > { %v5998_v10 = vpop.f32.mrf.mxu2  ;;  %v5995_v61 = vadd.f32 %v5994_v48, %v5896_v37  ;;  %v5914_v4 = vadd.f32 %v5913_v28, %v5797_v62  ;;  %v5872_v48 = vadd.f32 %v13472_v60, %v5762_v50 }
 0xc79   : > { %v6087_v2 = vpop.f32.mrf.mxu3  ;;  %v5772_v6 = vadd.f32 %v13538_v43, %v5672_v59  ;;  %v5999_v34 = vadd.f32 %v5998_v10, %v5902_v8  ;;  %v5991_v15 = vadd.f32 %v5990_v52, %v5890_v32  ;;  %v5878_v25 = vadd.f32 %v13493_v53, %v5767_v24 }
 0xc7a   : > { %v13658_v44 = vadd.f32 %v6079_v51, %v5995_v61 }
 0xc7b   : > { %v5884_v43 = vadd.f32 %v13552_v57, %v5772_v6  ;;  %v13654_v11 = vadd.f32 %v6083_v9, %v5999_v34  ;;  %v5983_v10 = vadd.f32 %v13598_v54, %v5878_v25  ;;  %v13666_v57 = vadd.f32 %v13616_v30, %v5991_v15 }
 0xc7c   : > { %16096 = vst [vmem:[#allocation37_spill] sm:$0xff] %v13658_v44  ;;  %v13678_v60 = vand.u32 4294901760, %v13658_v44 }
 0xc7d   : > { %16095 = vst [vmem:[#allocation34_spill] sm:$0xff] %v13654_v11  ;;  %v5987_v40 = vadd.f32 %v13614_v17, %v5884_v43  ;;  %v13669_v53 = vand.u32 4294901760, %v13654_v11  ;;  %v5979_v17 = vadd.f32 %v13554_v56, %v5872_v48  ;;  %v6151_v9 = vpop.f32.mrf.mxu0  ;;  %v13685_v30 = vadd.f32 %v13556_v23, %v5983_v10 }
 0xc7e   : > { %16097 = vst [vmem:[#allocation38_spill] sm:$0xff] %v13666_v57  ;;  %v13691_v56 = vand.u32 4294901760, %v13666_v57  ;;  %v13711_v55 = vsub.f32 %v13658_v44, %v13678_v60 }
 0xc7f   : > { %v13673_v51 = vadd.f32 %v13600_v47, %v5987_v40  ;;  %v6212_v20 = vpop.f32.mrf.mxu1  ;;  %v13695_v47 = vsub.f32 %v13654_v11, %v13669_v53  ;;  %v13698_v16 = vadd.f32 %v13504_v41, %v5979_v17  ;;  %v13714_v41 = vand.u32 4294901760, %v13685_v30 }
 0xc80   : > { %v6213_v49 = vadd.f32 %v6212_v20, %v6151_v9  ;;  %v13721_v7 = vsub.f32 %v13666_v57, %v13691_v56  ;;  %v15950_v37 = vand.u32 4294901760, %v13711_v55 }
 0xc81   : > { %v6002_v36 = vpop.f32.mrf.mxu2  ;;  %v6091_v31 = vpop.f32.mrf.mxu3  ;;  %v13701_v27 = vand.u32 4294901760, %v13673_v51  ;;  %v13740_v34 = vsub.f32 %v13685_v30, %v13714_v41 }
 0xc82   : > { %v6003_v1 = vadd.f32 %v6002_v36, %v5908_v42  ;;  %v13724_v42 = vand.u32 4294901760, %v13698_v16  ;;  %v15949_v32 = vand.u32 4294901760, %v13721_v7  ;;  %v6950_v43 = vsub.f32 %v13711_v55, %v15950_v37 }
 0xc83   : > { %v13728_v46 = vsub.f32 %v13673_v51, %v13701_v27  ;;  %v15947_v48 = vand.u32 4294901760, %v13740_v34 }
 0xc84   : > { %v13649_v35 = vadd.f32 %v6087_v2, %v6003_v1  ;;  %v15951_v2 = vand.u32 4294901760, %v13695_v47  ;;  %v13749_v61 = vsub.f32 %v13698_v16, %v13724_v42  ;;  %v6951_v10 = vand.u32 4294901760, %v6950_v43 }
 0xc85   : > { %v6326_v39 = vpop.f32.mrf.mxu0  ;;  %v15948_v15 = vand.u32 4294901760, %v13728_v46  ;;  %v6968_v17 = vsub.f32 %v13740_v34, %v15947_v48 }
 0xc86   : > { %v13661_v21 = vand.u32 4294901760, %v13649_v35  ;;  %v6944_v28 = vsub.f32 %v13695_v47, %v15951_v2 }
 0xc87   : > { %v6355_v62 = vpop.f32.mrf.mxu1 }
 0xc88   : > { %v13682_v54 = vsub.f32 %v13649_v35, %v13661_v21  ;;  %v6945_v40 = vand.u32 4294901760, %v6944_v28 }
 0xc89   : > { %v6006_v18 = vpop.f32.mrf.mxu2  ;;  %v6281_v8 = vpop.f32.mrf.mxu3 }
 0xc8a   : > { %v6007_v52 = vadd.f32 %v6006_v18, %v5914_v4  ;;  %v15952_v22 = vand.u32 4294901760, %v13682_v54  ;;  %v6956_v4 = vsub.f32 %v13721_v7, %v15949_v32  ;;  %v15946_v18 = vand.u32 4294901760, %v13749_v61 }
 0xc8c   : > { %v13675_v33 = vadd.f32 %v6091_v31, %v6007_v52  ;;  %v6938_v36 = vsub.f32 %v13682_v54, %v15952_v22  ;;  %v6962_v31 = vsub.f32 %v13728_v46, %v15948_v15  ;;  %v6957_v52 = vand.u32 4294901760, %v6956_v4 }
 0xc8d   : > { %v6974_v20 = vsub.f32 %v13749_v61, %v15946_v18 }
 0xc8e   : > { %16098 = vst [vmem:[#allocation39_spill] sm:$0xff] %v13675_v33  ;;  %v13688_v0 = vand.u32 4294901760, %v13675_v33  ;;  %v6939_v14 = vand.u32 4294901760, %v6938_v36  ;;  %v6963_v9 = vand.u32 4294901760, %v6962_v31  ;;  %v16103_v31 = vld [vmem:[#allocation26_spill] sm:$0xff] }
 0xc90   : > { %6897 = vmatpush.msra.mxu2 %v13688_v0  ;;  %v13706_v23 = vsub.f32 %v13675_v33, %v13688_v0 }
 0xc91   : > { %v6250_v58 = vpop.f32.mrf.mxu2 }
 0xc92   : > { %v6251_v63 = vadd.f32 %v6250_v58, %v6213_v49  ;;  %6899 = vmatpush.msra.mxu2 %v13661_v21  ;;  %v15953_v59 = vand.u32 4294901760, %v13706_v23  ;;  %v6969_v49 = vand.u32 4294901760, %v6968_v17  ;;  %v6975_v58 = vand.u32 4294901760, %v6974_v20  ;;  %v16105_v17 = vld [vmem:[#allocation30_spill] sm:$0xff]  ;;  %v16107_v20 = vld [vmem:[#allocation16_spill] sm:$0xff] }
 0xc94   : > { %v6282_v6 = vadd.f32 %v6281_v8, %v6251_v63  ;;  %6901 = vmatpush.msra.mxu2 %v13669_v53  ;;  %v6932_v19 = vsub.f32 %v13706_v23, %v15953_v59  ;;  %v16099_v8 = vld [vmem:[#allocation22_spill] sm:$0xff]  ;;  %v6514_v36 = vpop.f32.mrf.mxu0 }
 0xc96   : > { %6903 = vmatpush.msra.mxu2 %v13678_v60  ;;  %v6933_v1 = vand.u32 4294901760, %v6932_v19  ;;  %v6327_v24 = vadd.f32 %v6326_v39, %v6282_v6 }
 0xc98   : > { %6905 = vmatpush.msra.mxu2 %v13691_v56  ;;  %6934 = vmatpush.msra.mxu3 %v6933_v1  ;;  %v6356_v50 = vadd.f32 %v6355_v62, %v6327_v24  ;;  %v16100_v1 = vld [vmem:[#allocation23_spill] sm:$0xff]  ;;  %v6545_v24 = vpop.f32.mrf.mxu1 }
 0xc99   : > { %v6415_v6 = vpop.f32.mrf.mxu2 }
 0xc9a   : > { %6907 = vmatpush.msra.mxu2 %v13701_v27  ;;  %6940 = vmatpush.msra.mxu3 %v6939_v14  ;;  %v6623_v25 = vsel %vm6622_vm11, %v6356_v50, -inf }
 0xc9b   : > { %6624 = vmax.xlane.f32.xlu0 %v6623_v25 }
 0xc9c   : > { %6909 = vmatpush.msra.mxu2 %v13714_v41  ;;  %6946 = vmatpush.msra.mxu3 %v6945_v40  ;;  %v16101_v40 = vld [vmem:[#allocation31_spill] sm:$0xff] }
 0xc9e   : > { %6911 = vmatpush.msra.mxu2 %v13724_v42  ;;  %6952 = vmatpush.msra.mxu3 %v6951_v10  ;;  %v16102_v10 = vld [vmem:[#allocation24_spill] sm:$0xff] }
 0xc9f   : > { %v6476_v63 = vpop.f32.mrf.mxu3 }
 0xca0   : > { %6958 = vmatpush.msra.mxu3 %v6957_v52  ;;  %v6477_v19 = vadd.f32 %v6476_v63, %v6415_v6  ;;  %v16104_v52 = vld [vmem:[#allocation29_spill] sm:$0xff] }
 0xca2   : > { %6964 = vmatpush.msra.mxu3 %v6963_v9  ;;  %v6515_v39 = vadd.f32 %v6514_v36, %v6477_v19  ;;  %v16106_v9 = vld [vmem:[#allocation18_spill] sm:$0xff] }
 0xca4   : > { %6970 = vmatpush.msra.mxu3 %v6969_v49  ;;  %v6546_v62 = vadd.f32 %v6545_v24, %v6515_v39 }
 0xca6   : > { %6976 = vmatpush.msra.mxu3 %v6975_v58 }
 0xcaf   : > { %7137 = vrot.lane.b32.xlu0 %v16099_v8, %s16047_s0 }
 0xcb7   : > { %7135 = vrot.lane.b32.xlu0 %v16100_v1, %s16047_s0  ;;  %v6590_v28 = vpop.f32.mrf.mxu2 }
 0xcb8   : > { %v6591_v14 = vadd.f32 %v6590_v28, %v6546_v62  ;;  %v16109_v28 = vld [vmem:[#allocation27_spill] sm:$0xff] }
 0xcbf   : > { %v6619_v43 = vpop.f32.mrf.mxu3  ;;  %7414 = vrot.lane.b32.xlu0 %v16101_v40, %s16047_s0 }
 0xcc0   : > { %v6620_v25 = vadd.f32 %v6619_v43, %v6591_v14  ;;  %v16111_v43 = vld [vmem:[#allocation15_spill] sm:$0xff] }
 0xcc2   : > { %v6626_v4 = vsel %vm6622_vm11, %v6620_v25, -inf }
 0xcc3   : > { %6627 = vmax.xlane.f32.xlu1 %v6626_v4  ;;  %v16113_v4 = vld [vmem:[#allocation33_spill] sm:$0xff] }
 0xcdc   : > { %7141 = vrot.lane.b32.xlu1 %v16102_v10, %s16047_s0 }
 0xce4   : > { %7131 = vrot.lane.b32.xlu1 %v16103_v31, %s16047_s0 }
 0xcec   : > { %7412 = vrot.lane.b32.xlu1 %v16104_v52, %s16047_s0 }
 0xcf4   : > { %7410 = vrot.lane.b32.xlu1 %v16105_v17, %s16047_s0 }
 0xcfc   : > { %7404 = vrot.lane.b32.xlu1 %v16106_v9, %s16047_s0 }
 0xd04   : > { %7398 = vrot.lane.b32.xlu1 %v16107_v20, %s16047_s0 }
 0xd0c   : > { %7715 = vrot.lane.b32.xlu1 %v13513_v29, %s16047_s0 }
 0xd0e   : > { %v6625_v49 = vpop.xlane.xlu0 %6624 }
 0xd0f   : > { %v6629_v58 = vsub.f32 %v6356_v50, %v6625_v49  ;;  %v16108_v50 = vld [vmem:[#allocation25_spill] sm:$0xff]  ;;  %v16114_v49 = vld [vmem:[#allocation28_spill] sm:$0xff] }
 0xd11   : > { %v6631_v63 = vmul.f32 1.442695, %v6629_v58  ;;  %v16115_v58 = vld [vmem:[#allocation32_spill] sm:$0xff] }
 0xd13   : > { %11559 = vpow2.f32 %v6631_v63  ;;  %v16116_v63 = vld [vmem:[#allocation17_spill] sm:$0xff] }
 0xd14   : > { %7987 = vrot.lane.b32.xlu1 %v13675_v33, %s16047_s0 }
 0xd19   : > { %v11560_v6 = vpop.eup %11559 }
 0xd1a   : > { %v6635_v19 = vsel %vm6622_vm11, %v11560_v6, 0.0 }
 0xd1b   : > { %6636 = vadd.xlane.f32.xlu2 %v6635_v19  ;;  %v7140_v19 = vpop.permute.xlu2 %7139 }
 0xd1c   : > { %7983 = vrot.lane.b32.xlu1 %v13654_v11, %s16047_s0  ;;  %v7157_v22 = vsel %vm1582_vm1, %v7140_v19, 0  ;;  %v16118_v19 = vand.u32 4294901760, %v13682_v54 }
 0xd21   : > { %v7138_v18 = vpop.permute.xlu0 %7137 }
 0xd24   : > { %7981 = vrot.lane.b32.xlu1 %v13658_v44, %s16047_s0 }
 0xd2c   : > { %7979 = vrot.lane.b32.xlu1 %v13666_v57, %s16047_s0 }
 0xd33   : > { %7133 = vrot.lane.b32.xlu2 %v16108_v50, %s16047_s0 }
 0xd34   : > { %7977 = vrot.lane.b32.xlu1 %v13673_v51, %s16047_s0 }
 0xd36   : > { %v6628_v36 = vpop.xlane.xlu1 %6627 }
 0xd37   : > { %v6630_v39 = vsub.f32 %v6620_v25, %v6628_v36  ;;  %v16112_v25 = vld [vmem:[#allocation19_spill] sm:$0xff] }
 0xd39   : > { %v6633_v24 = vmul.f32 1.442695, %v6630_v39 }
 0xd3b   : > { %11561 = vpow2.f32 %v6633_v24  ;;  %7129 = vrot.lane.b32.xlu2 %v16109_v28, %s16047_s0 }
 0xd3c   : > { %7973 = vrot.lane.b32.xlu1 %v13698_v16, %s16047_s0 }
 0xd41   : > { %v13812_v62 = vpop.eup %11561 }
 0xd42   : > { %v6638_v14 = vsel %vm6622_vm11, %v13812_v62, 0.0 }
 0xd43   : > { %6639 = vadd.xlane.f32.xlu0 %v6638_v14  ;;  %7125 = vrot.lane.b32.xlu2 %v16111_v43, %s16047_s0 }
 0xd44   : > { %8249 = vrot.lane.b32.xlu1 %v16099_v8, %s16110_s8 }
 0xd4b   : > { %7406 = vrot.lane.b32.xlu2 %v16112_v25, %s16047_s0 }
 0xd4c   : > { %8245 = vrot.lane.b32.xlu1 %v16108_v50, %s16110_s8 }
 0xd4e   : > { %v7142_v39 = vpop.permute.xlu1 %7141 }
 0xd4f   : > { %v7159_v48 = vsel %vm1582_vm1, %v7142_v39, 0  ;;  %v13856_v39 = vand.u32 4294901760, %v7157_v22 }
 0xd50   : > { %v13846_v37 = vand.u32 4294901760, %v7159_v48 }
 0xd53   : > { %7400 = vrot.lane.b32.xlu2 %v16113_v4, %s16047_s0 }
 0xd57   : > { %7127 = vrot.lane.b32.xlu0 %v16114_v49, %s16047_s0 }
 0xd5b   : > { %7713 = vrot.lane.b32.xlu2 %v13483_v3, %s16047_s0 }
 0xd5f   : > { %7408 = vrot.lane.b32.xlu0 %v16115_v58, %s16047_s0 }
 0xd63   : > { %7985 = vrot.lane.b32.xlu2 %v13649_v35, %s16047_s0 }
 0xd67   : > { %7402 = vrot.lane.b32.xlu0 %v16116_v63, %s16047_s0 }
 0xd6b   : > { %7707 = vrot.lane.b32.xlu2 %v13502_v5, %s16047_s0 }
 0xd6f   : > { %7711 = vrot.lane.b32.xlu0 %v13490_v13, %s16047_s0 }
 0xd73   : > { %7705 = vrot.lane.b32.xlu2 %v13511_v12, %s16047_s0 }
 0xd77   : > { %7709 = vrot.lane.b32.xlu0 %v13495_v45, %s16047_s0 }
 0xd8e   : > { %v6637_v36 = vpop.xlane.xlu2 %6636 }
 0xd8f   : > { %11563 = vrcp.f32 %v6637_v36  ;;  %v13851_v36 = vsub.f32 %v7159_v48, %v13846_v37 }
 0xd91   : > { %v7204_v45 = vand.u32 4294901760, %v13851_v36 }
 0xd95   : > { %v11564_v24 = vpop.eup %11563 }
 0xd96   : > { %v6643_v14 = vmul.f32 %v11564_v24, %v11560_v6  ;;  %v16117_v6 = vand.u32 4294901760, %v13706_v23  ;;  %v7155_v24 = vsel %vm1582_vm1, %v7138_v18, 0 }
 0xd97   : > { %v13863_v50 = vand.u32 4294901760, %v7155_v24 }
 0xd98   : > { %v6646_v15 = vsel %vm6622_vm11, %v6643_v14, 0  ;;  %v7136_v14 = vpop.permute.xlu0 %7135 }
 0xd99   : > { %v6672_v32 = vand.u32 4294901760, %v6646_v15  ;;  %v7153_v18 = vsel %vm1582_vm1, %v7136_v14, 0  ;;  %v7132_v14 = vpop.permute.xlu1 %7131 }
 0xd9b   : > { %v6673_v2 = vsub.f32 %v6646_v15, %v6672_v32  ;;  %6738 = vmatmul.f32.vlgmr.msrb.gmra.mxu1 %v6672_v32 }
 0xd9c   : > { %7029 = vmatpush.msrb.mxu1 %v13688_v0 }
 0xd9d   : > { %6776 = vmatmul.f32.vlgmr.msrb.gmra.mxu2 %v6673_v2  ;;  %v6674_v59 = vand.u32 4294901760, %v6673_v2 }
 0xd9e   : > { %7031 = vmatpush.msrb.mxu1 %v13661_v21  ;;  %7062 = vmatpush.msrb.mxu2 %v16117_v6  ;;  %v16119_v6 = vand.u32 4294901760, %v13695_v47 }
 0xd9f   : > { %6807 = vmatmul.f32.vlgmr.msrb.gmra.mxu3 %v6674_v59  ;;  %v6675_v15 = vsub.f32 %v6673_v2, %v6674_v59  ;;  %v13870_v59 = vsub.f32 %v7157_v22, %v13856_v39  ;;  %v7134_v2 = vpop.permute.xlu2 %7133  ;;  %v7205_v22 = vsub.f32 %v13851_v36, %v7204_v45 }
 0xda0   : > { %7033 = vmatpush.msrb.mxu1 %v13669_v53  ;;  %7066 = vmatpush.msrb.mxu2 %v16118_v19  ;;  %v13887_v19 = vand.u32 4294901760, %v7153_v18 }
 0xda1   : > { %7105 = vmatpush.msrb.mxu3 %v13688_v0  ;;  %v6676_v48 = vand.u32 4294901760, %v6675_v15  ;;  %v16120_v0 = vand.u32 4294901760, %v13711_v55  ;;  %v13879_v15 = vsub.f32 %v7155_v24, %v13863_v50  ;;  %v7151_v24 = vsel %vm1582_vm1, %v7134_v2, 0 }
 0xda2   : > { %7035 = vmatpush.msrb.mxu1 %v13678_v60  ;;  %7070 = vmatpush.msrb.mxu2 %v16119_v6  ;;  %v13902_v6 = vsub.f32 %v7153_v18, %v13887_v19  ;;  %v13904_v2 = vand.u32 4294901760, %v7151_v24  ;;  %v16124_v18 = vand.u32 4294901760, %v13749_v61 }
 0xda3   : > { %7107 = vmatpush.msrb.mxu3 %v13661_v21  ;;  %6677 = vmatmul.f32.vlgmr.msrb.gmra.mxu0 %v6676_v48  ;;  %v15964_v21 = vand.u32 4294901760, %v13870_v59  ;;  %v7206_v48 = vand.u32 4294901760, %v7205_v22 }
 0xda4   : > { %6881 = vmatmul.f32.vlgmr.msra.gmra.mxu1 %v6672_v32  ;;  %6992 = vmatpush.msrb.mxu0 %v13706_v23  ;;  %v16121_v23 = vand.u32 4294901760, %v13721_v7 }
 0xda5   : > { %7037 = vmatpush.msrb.mxu1 %v13691_v56  ;;  %7074 = vmatpush.msrb.mxu2 %v16120_v0  ;;  %v13912_v0 = vpop.permute.xlu0 %7414 }
 0xda6   : > { %7109 = vmatpush.msrb.mxu3 %v13669_v53  ;;  %6995 = vmatpush.msrb.mxu0 %v13682_v54  ;;  %v16122_v53 = vand.u32 4294901760, %v13728_v46  ;;  %v15961_v54 = vand.u32 4294901760, %v13879_v15 }
 0xda7   : > { %7039 = vmatpush.msrb.mxu1 %v13701_v27  ;;  %7078 = vmatpush.msrb.mxu2 %v16121_v23  ;;  %v15960_v23 = vand.u32 4294901760, %v13902_v6 }
 0xda8   : > { %7111 = vmatpush.msrb.mxu3 %v13678_v60  ;;  %6998 = vmatpush.msrb.mxu0 %v13695_v47  ;;  %v16123_v60 = vand.u32 4294901760, %v13740_v34  ;;  %v7211_v47 = vsub.f32 %v13870_v59, %v15964_v21  ;;  %v7217_v22 = vsub.f32 %v13879_v15, %v15961_v54 }
 0xda9   : > { %7041 = vmatpush.msrb.mxu1 %v13714_v41  ;;  %7082 = vmatpush.msrb.mxu2 %v16122_v53 }
 0xdaa   : > { %7113 = vmatpush.msrb.mxu3 %v13691_v56  ;;  %7001 = vmatpush.msrb.mxu0 %v13711_v55  ;;  %v7149_v56 = vsel %vm1582_vm1, %v7132_v14, 0  ;;  %v7130_v55 = vpop.permute.xlu2 %7129  ;;  %v7212_v14 = vand.u32 4294901760, %v7211_v47 }
 0xdab   : > { %7043 = vmatpush.msrb.mxu1 %v13724_v42  ;;  %7086 = vmatpush.msrb.mxu2 %v16123_v60  ;;  %v13924_v53 = vand.u32 4294901760, %v7149_v56 }
 0xdac   : > { %7115 = vmatpush.msrb.mxu3 %v13701_v27  ;;  %6852 = vmatmul.f32.vlgmr.msra.gmra.mxu0 %v6672_v32  ;;  %v13927_v27 = vsub.f32 %v7151_v24, %v13904_v2  ;;  %v7147_v32 = vsel %vm1582_vm1, %v7130_v55, 0  ;;  %v7223_v24 = vsub.f32 %v13902_v6, %v15960_v23 }
 0xdad   : > { %7207 = vmatpush.xpose.msra.mxu1 %v7206_v48  ;;  %7090 = vmatpush.msrb.mxu2 %v16124_v18  ;;  %v13937_v60 = vand.u32 4294901760, %v7147_v32 }
 0xdae   : > { %7004 = vmatpush.msrb.mxu0 %v13721_v7  ;;  %7117 = vmatpush.msrb.mxu3 %v13714_v41  ;;  %v7218_v41 = vand.u32 4294901760, %v7217_v22  ;;  %v13934_v7 = vsub.f32 %v7149_v56, %v13924_v53  ;;  %v15957_v48 = vand.u32 4294901760, %v13927_v27  ;;  %v7224_v47 = vand.u32 4294901760, %v7223_v24 }
 0xdb0   : > { %7007 = vmatpush.msrb.mxu0 %v13728_v46  ;;  %7119 = vmatpush.msrb.mxu3 %v13724_v42  ;;  %v15958_v42 = vand.u32 4294901760, %v13934_v7  ;;  %v7229_v56 = vsub.f32 %v13927_v27, %v15957_v48 }
 0xdb1   : > { %7213 = vmatpush.xpose.msra.mxu1 %v7212_v14 }
 0xdb2   : > { %7010 = vmatpush.msrb.mxu0 %v13740_v34  ;;  %v13946_v34 = vsub.f32 %v7147_v32, %v13937_v60  ;;  %v7230_v18 = vand.u32 4294901760, %v7229_v56  ;;  %v7235_v22 = vsub.f32 %v13934_v7, %v15958_v42  ;;  %v7126_v14 = vpop.permute.xlu2 %7125 }
 0xdb3   : > { %v7143_v24 = vsel %vm1582_vm1, %v7126_v14, 0 }
 0xdb4   : > { %7013 = vmatpush.msrb.mxu0 %v13749_v61  ;;  %v15959_v61 = vand.u32 4294901760, %v13946_v34  ;;  %v13964_v42 = vand.u32 4294901760, %v7143_v24 }
 0xdb5   : > { %7219 = vmatpush.xpose.msra.mxu1 %v7218_v41 }
 0xdb6   : > { %v6640_v46 = vpop.xlane.xlu0 %6639  ;;  %7170 = vmatpush.xpose.msra.mxu0 %v13846_v37  ;;  %v7241_v56 = vsub.f32 %v13946_v34, %v15959_v61  ;;  %v13969_v14 = vsub.f32 %v7143_v24, %v13964_v42 }
 0xdb7   : > { %11565 = vrcp.f32 %v6640_v46 }
 0xdb9   : > { %7225 = vmatpush.xpose.msra.mxu1 %v7224_v47  ;;  %v7236_v47 = vand.u32 4294901760, %v7235_v22  ;;  %v7413_v22 = vpop.permute.xlu1 %7412 }
 0xdba   : > { %7172 = vmatpush.xpose.msra.mxu0 %v13856_v39 }
 0xdbd   : > { %v11566_v55 = vpop.eup %11565  ;;  %7231 = vmatpush.xpose.msra.mxu1 %v7230_v18 }
 0xdbe   : > { %v6644_v32 = vmul.f32 %v11566_v55, %v13812_v62  ;;  %7174 = vmatpush.xpose.msra.mxu0 %v13863_v50  ;;  %v7242_v62 = vand.u32 4294901760, %v7241_v56  ;;  %v7432_v56 = vsel %vm1582_vm1, %v13912_v0, 0 }
 0xdc0   : > { %v6886_v41 = vsel %vm6622_vm11, %v6644_v32, 0 }
 0xdc1   : > { %v6912_v46 = vand.u32 4294901760, %v6886_v41  ;;  %7237 = vmatpush.xpose.msra.mxu1 %v7236_v47 }
 0xdc2   : > { %7176 = vmatpush.xpose.msra.mxu0 %v13887_v19 }
 0xdc3   : > { %v6913_v48 = vsub.f32 %v6886_v41, %v6912_v46  ;;  %6978 = vmatmul.f32.vlgmr.msra.gmra.mxu3 %v6912_v46 }
 0xdc4   : > { %7302 = vmatpush.xpose.msra.mxu3 %v13846_v37 }
 0xdc5   : > { %7016 = vmatmul.f32.vlgmr.msrb.gmra.mxu0 %v6913_v48  ;;  %v6914_v55 = vand.u32 4294901760, %v6913_v48  ;;  %7243 = vmatpush.xpose.msra.mxu1 %v7242_v62  ;;  %v13984_v62 = vand.u32 4294901760, %v7432_v56 }
 0xdc6   : > { %7178 = vmatpush.xpose.msra.mxu0 %v13904_v2 }
 0xdc7   : > { %v6915_v18 = vsub.f32 %v6913_v48, %v6914_v55  ;;  %7047 = vmatmul.f32.vlgmr.msrb.gmra.mxu1 %v6914_v55  ;;  %v15962_v48 = vand.u32 4294901760, %v13969_v14 }
 0xdc8   : > { %7304 = vmatpush.xpose.msra.mxu3 %v13856_v39 }
 0xdc9   : > { %v7128_v32 = vpop.permute.xlu0 %7127  ;;  %v6916_v41 = vand.u32 4294901760, %v6915_v18  ;;  %v7430_v18 = vsel %vm1582_vm1, %v7413_v22, 0  ;;  %v7188_v0 = vsub.f32 %v13969_v14, %v15962_v48 }
 0xdca   : > { %v7145_v47 = vsel %vm1582_vm1, %v7128_v32, 0  ;;  %7180 = vmatpush.xpose.msra.mxu0 %v13924_v53  ;;  %v14000_v23 = vand.u32 4294901760, %v7430_v18 }
 0xdcb   : > { %v13973_v61 = vand.u32 4294901760, %v7145_v47  ;;  %6917 = vmatmul.f32.vlgmr.msra.gmra.mxu2 %v6916_v41  ;;  %7121 = vmatmul.f32.vlgmr.msrb.gmra.mxu3 %v6912_v46  ;;  %v7411_v41 = vpop.permute.xlu1 %7410  ;;  %v7189_v54 = vand.u32 4294901760, %v7188_v0 }
 0xdcc   : > { %7265 = vmatpush.xpose.msra.mxu2 %v13851_v36  ;;  %7306 = vmatpush.xpose.msra.mxu3 %v13863_v50  ;;  %v7428_v48 = vsel %vm1582_vm1, %v7411_v41, 0 }
 0xdcd   : > { %v13981_v24 = vsub.f32 %v7145_v47, %v13973_v61  ;;  %v13998_v47 = vsub.f32 %v7432_v56, %v13984_v62  ;;  %v14013_v0 = vand.u32 4294901760, %v7428_v48 }
 0xdce   : > { %7182 = vmatpush.xpose.msra.mxu0 %v13937_v60 }
 0xdcf   : > { %v15963_v55 = vand.u32 4294901760, %v13981_v24  ;;  %v15965_v21 = vand.u32 4294901760, %v13998_v47 }
 0xdd0   : > { %7268 = vmatpush.xpose.msra.mxu2 %v13870_v59  ;;  %7308 = vmatpush.xpose.msra.mxu3 %v13887_v19 }
 0xdd1   : > { %v7247_v32 = vsub.f32 %v13981_v24, %v15963_v55  ;;  %v7407_v55 = vpop.permute.xlu2 %7406  ;;  %v7409_v56 = vpop.permute.xlu0 %7408 }
 0xdd2   : > { %7184 = vmatpush.xpose.msra.mxu0 %v13973_v61  ;;  %v7426_v36 = vsel %vm1582_vm1, %v7409_v56, 0 }
 0xdd3   : > { %7092 = vmatmul.f32.vlgmr.msrb.gmra.mxu2 %v6912_v46  ;;  %v7248_v22 = vand.u32 4294901760, %v7247_v32  ;;  %v14011_v46 = vsub.f32 %v7430_v18, %v14000_v23  ;;  %v14027_v18 = vsub.f32 %v7428_v48, %v14013_v0  ;;  %v16126_v32 = vand.u32 4294901760, %v13879_v15  ;;  %v7405_v41 = vpop.permute.xlu1 %7404 }
 0xdd4   : > { %7271 = vmatpush.xpose.msra.mxu2 %v13879_v15  ;;  %7310 = vmatpush.xpose.msra.mxu3 %v13904_v2 }
 0xdd5   : > { %7249 = vmatpush.xpose.msra.mxu1 %v7248_v22  ;;  %7190 = vmatmul.f32.vlgmr.msra.gmra.mxu0 %v7189_v54  ;;  %v15966_v54 = vand.u32 4294901760, %v14011_v46  ;;  %v7424_v22 = vsel %vm1582_vm1, %v7407_v55, 0  ;;  %v15967_v56 = vand.u32 4294901760, %v14027_v18  ;;  %v16127_v55 = vand.u32 4294901760, %v13902_v6 }
 0xdd6   : > { %7335 = vmatpush.xpose.msrb.mxu0 %v7204_v45  ;;  %v16125_v45 = vand.u32 4294901760, %v13870_v59  ;;  %v14029_v59 = vand.u32 4294901760, %v7426_v36  ;;  %v14042_v15 = vand.u32 4294901760, %v7424_v22  ;;  %v16135_v63 = vand.u32 4294901760, %v14011_v46 }
 0xdd7   : > { %v7484_v48 = vsub.f32 %v14011_v46, %v15966_v54 }
 0xdd8   : > { %7274 = vmatpush.xpose.msra.mxu2 %v13902_v6  ;;  %7312 = vmatpush.xpose.msra.mxu3 %v13924_v53  ;;  %v16129_v6 = vand.u32 4294901760, %v13927_v27 }
 0xdd9   : > { %7378 = vmatpush.xpose.msrb.mxu1 %v13846_v37  ;;  %v7478_v37 = vsub.f32 %v13998_v47, %v15965_v21  ;;  %v14045_v21 = vsub.f32 %v7426_v36, %v14029_v59  ;;  %v16128_v36 = vand.u32 4294901760, %v13969_v14 }
 0xdda   : > { %7339 = vmatpush.xpose.msrb.mxu0 %v16125_v45  ;;  %7251 = vmatmul.f32.vlgmr.msra.gmra.mxu1 %v13964_v42  ;;  %v7422_v45 = vsel %vm1582_vm1, %v7405_v41, 0  ;;  %v14055_v41 = vsub.f32 %v7424_v22, %v14042_v15 }
 0xddc   : > { %7277 = vmatpush.xpose.msra.mxu2 %v13927_v27  ;;  %7314 = vmatpush.xpose.msra.mxu3 %v13937_v60  ;;  %v16130_v27 = vand.u32 4294901760, %v13934_v7 }
 0xddd   : > { %7380 = vmatpush.xpose.msrb.mxu1 %v13856_v39  ;;  %v7479_v39 = vand.u32 4294901760, %v7478_v37  ;;  %v14052_v37 = vand.u32 4294901760, %v7422_v45 }
 0xdde   : > { %7343 = vmatpush.xpose.msrb.mxu0 %v16126_v32  ;;  %v7401_v32 = vpop.permute.xlu2 %7400 }
 0xddf   : > { %v14069_v22 = vsub.f32 %v7422_v45, %v14052_v37 }
 0xde0   : > { %7280 = vmatpush.xpose.msra.mxu2 %v13934_v7  ;;  %7316 = vmatpush.xpose.msra.mxu3 %v13973_v61 }
 0xde1   : > { %7382 = vmatpush.xpose.msrb.mxu1 %v13863_v50  ;;  %v7403_v50 = vpop.permute.xlu0 %7402  ;;  %v15970_v45 = vand.u32 4294901760, %v14069_v22 }
 0xde2   : > { %7347 = vmatpush.xpose.msrb.mxu0 %v16127_v55  ;;  %v7485_v55 = vand.u32 4294901760, %v7484_v48 }
 0xde3   : > { %7320 = vmatmul.f32.vlgmr.msra.gmra.mxu3 %v16128_v36  ;;  %v15971_v36 = vand.u32 4294901760, %v14055_v41 }
 0xde4   : > { %7480 = vmatpush.xpose.msrb.mxu3 %v7479_v39  ;;  %v7490_v39 = vsub.f32 %v14027_v18, %v15967_v56  ;;  %7283 = vmatpush.xpose.msra.mxu2 %v13946_v34  ;;  %v7418_v56 = vsel %vm1582_vm1, %v7401_v32, 0  ;;  %v16132_v32 = vand.u32 4294901760, %v13946_v34 }
 0xde5   : > { %7384 = vmatpush.xpose.msrb.mxu1 %v13887_v19  ;;  %v7420_v19 = vsel %vm1582_vm1, %v7403_v50, 0  ;;  %v14086_v7 = vand.u32 4294901760, %v7418_v56 }
 0xde6   : > { %7351 = vmatpush.xpose.msrb.mxu0 %v16129_v6  ;;  %v14072_v54 = vand.u32 4294901760, %v7420_v19  ;;  %v7491_v48 = vand.u32 4294901760, %v7490_v39  ;;  %v16131_v6 = vand.u32 4294901760, %v14045_v21 }
 0xde8   : > { %7486 = vmatpush.xpose.msrb.mxu3 %v7485_v55  ;;  %v7496_v50 = vsub.f32 %v14045_v21, %v16131_v6  ;;  %7286 = vmatpush.xpose.msra.mxu2 %v13981_v24  ;;  %v14089_v55 = vsub.f32 %v7420_v19, %v14072_v54  ;;  %v7399_v6 = vpop.permute.xlu1 %7398 }
 0xde9   : > { %7386 = vmatpush.xpose.msrb.mxu1 %v13904_v2  ;;  %v14081_v2 = vpop.permute.xlu2 %7713 }
 0xdea   : > { %7355 = vmatpush.xpose.msrb.mxu0 %v16130_v27  ;;  %v7497_v39 = vand.u32 4294901760, %v7496_v50  ;;  %v7502_v27 = vsub.f32 %v14055_v41, %v15971_v36  ;;  %v15969_v19 = vand.u32 4294901760, %v14089_v55 }
 0xdeb   : > { %7289 = vmatmul.f32.vlgmr.msra.gmra.mxu2 %v13969_v14  ;;  %v16133_v14 = vand.u32 4294901760, %v13981_v24 }
 0xdec   : > { %7443 = vmatpush.xpose.msrb.mxu2 %v13984_v62  ;;  %7492 = vmatpush.xpose.msrb.mxu3 %v7491_v48  ;;  %v7503_v34 = vand.u32 4294901760, %v7502_v27  ;;  %v7508_v48 = vsub.f32 %v14069_v22, %v15970_v45 }
 0xded   : > { %7388 = vmatpush.xpose.msrb.mxu1 %v13924_v53  ;;  %v14100_v53 = vsub.f32 %v7418_v56, %v14086_v7 }
 0xdee   : > { %7359 = vmatpush.xpose.msrb.mxu0 %v16132_v32  ;;  %v7509_v50 = vand.u32 4294901760, %v7508_v48  ;;  %v7514_v32 = vsub.f32 %v14089_v55, %v15969_v19 }
 0xdef   : > { %v15968_v24 = vand.u32 4294901760, %v14100_v53 }
 0xdf0   : > { %7445 = vmatpush.xpose.msrb.mxu2 %v14000_v23  ;;  %7498 = vmatpush.xpose.msrb.mxu3 %v7497_v39  ;;  %v7716_v48 = vpop.permute.xlu1 %7715 }
 0xdf1   : > { %7390 = vmatpush.xpose.msrb.mxu1 %v13937_v60  ;;  %v7416_v60 = vsel %vm1582_vm1, %v7399_v6, 0  ;;  %v14114_v56 = vpop.permute.xlu2 %7985  ;;  %v7520_v27 = vsub.f32 %v14100_v53, %v15968_v24 }
 0xdf2   : > { %7363 = vmatpush.xpose.msrb.mxu0 %v16133_v14  ;;  %v14122_v39 = vand.u32 4294901760, %v7416_v60  ;;  %v7712_v14 = vpop.permute.xlu0 %7711 }
 0xdf4   : > { %7447 = vmatpush.xpose.msrb.mxu2 %v14013_v0  ;;  %7504 = vmatpush.xpose.msrb.mxu3 %v7503_v34  ;;  %v14132_v34 = vsub.f32 %v7416_v60, %v14122_v39 }
 0xdf5   : > { %7365 = vmatmul.f32.vlgmr.msrb.gmra.mxu0 %v13964_v42  ;;  %7392 = vmatpush.xpose.msrb.mxu1 %v13973_v61  ;;  %v7515_v61 = vand.u32 4294901760, %v7514_v32  ;;  %v14138_v32 = vand.u32 4294901760, %v7716_v48 }
 0xdf6   : > { %7538 = vmatpush.xpose.msra.mxu0 %v13998_v47 }
 0xdf8   : > { %7449 = vmatpush.xpose.msrb.mxu2 %v14029_v59  ;;  %7510 = vmatpush.xpose.msrb.mxu3 %v7509_v50  ;;  %v7460_v50 = vand.u32 4294901760, %v14132_v34 }
 0xdf9   : > { %7575 = vmatpush.xpose.msra.mxu1 %v13984_v62  ;;  %v7708_v6 = vpop.permute.xlu2 %7707 }
 0xdfa   : > { %7541 = vmatpush.xpose.msra.mxu0 %v14011_v46  ;;  %7394 = vmatmul.f32.vlgmr.msrb.gmra.mxu1 %v13964_v42  ;;  %v7521_v42 = vand.u32 4294901760, %v7520_v27  ;;  %v7461_v60 = vsub.f32 %v14132_v34, %v7460_v50  ;;  %v14150_v27 = vand.u32 4294901760, %v14081_v2  ;;  %v14169_v3 = vand.u32 4294901760, %v7708_v6 }
 0xdfc   : > { %7451 = vmatpush.xpose.msrb.mxu2 %v14042_v15  ;;  %7516 = vmatpush.xpose.msrb.mxu3 %v7515_v61  ;;  %v14147_v61 = vsub.f32 %v7716_v48, %v14138_v32  ;;  %v7462_v24 = vand.u32 4294901760, %v7461_v60  ;;  %v14161_v48 = vsub.f32 %v14081_v2, %v14150_v27 }
 0xdfd   : > { %7577 = vmatpush.xpose.msra.mxu1 %v14000_v23 }
 0xdfe   : > { %7544 = vmatpush.xpose.msra.mxu0 %v14027_v18  ;;  %v15974_v19 = vand.u32 4294901760, %v14147_v61 }
 0xe00   : > { %7453 = vmatpush.xpose.msrb.mxu2 %v14052_v37  ;;  %7522 = vmatpush.xpose.msrb.mxu3 %v7521_v42  ;;  %v7710_v42 = vpop.permute.xlu0 %7709  ;;  %v7772_v2 = vsub.f32 %v14147_v61, %v15974_v19 }
 0xe01   : > { %7579 = vmatpush.xpose.msra.mxu1 %v14013_v0  ;;  %v14163_v45 = vand.u32 4294901760, %v7710_v42  ;;  %v7706_v36 = vpop.permute.xlu2 %7705 }
 0xe02   : > { %7547 = vmatpush.xpose.msra.mxu0 %v14045_v21  ;;  %v7773_v19 = vand.u32 4294901760, %v7772_v2 }
 0xe03   : > { %7524 = vmatmul.f32.vlgmr.msrb.gmra.mxu3 %v14122_v39 }
 0xe04   : > { %7651 = vmatpush.xpose.msra.mxu3 %v13984_v62  ;;  %7455 = vmatpush.xpose.msrb.mxu2 %v14072_v54  ;;  %v14154_v62 = vand.u32 4294901760, %v7712_v14 }
 0xe05   : > { %7581 = vmatpush.xpose.msra.mxu1 %v14029_v59 }
 0xe06   : > { %7550 = vmatpush.xpose.msra.mxu0 %v14055_v41  ;;  %v14172_v60 = vsub.f32 %v7712_v14, %v14154_v62 }
 0xe08   : > { %7653 = vmatpush.xpose.msra.mxu3 %v14000_v23  ;;  %7457 = vmatpush.xpose.msrb.mxu2 %v14086_v7  ;;  %v16134_v23 = vand.u32 4294901760, %v13998_v47  ;;  %v15979_v47 = vand.u32 4294901760, %v14161_v48  ;;  %v15978_v14 = vand.u32 4294901760, %v14172_v60 }
 0xe09   : > { %7583 = vmatpush.xpose.msra.mxu1 %v14042_v15 }
 0xe0a   : > { %7553 = vmatpush.xpose.msra.mxu0 %v14069_v22 }
 0xe0b   : > { %7463 = vmatmul.f32.vlgmr.msrb.gmra.mxu2 %v7462_v24  ;;  %v14189_v24 = vsub.f32 %v7708_v6, %v14169_v3 }
 0xe0c   : > { %7608 = vmatpush.xpose.msra.mxu2 %v16134_v23  ;;  %7655 = vmatpush.xpose.msra.mxu3 %v14013_v0  ;;  %v14179_v23 = vand.u32 4294901760, %v7706_v36  ;;  %v14182_v0 = vsub.f32 %v7710_v42, %v14163_v45 }
 0xe0d   : > { %7585 = vmatpush.xpose.msra.mxu1 %v14052_v37  ;;  %v15976_v6 = vand.u32 4294901760, %v14189_v24 }
 0xe0e   : > { %7556 = vmatpush.xpose.msra.mxu0 %v14089_v55  ;;  %v14195_v42 = vsub.f32 %v7706_v36, %v14179_v23  ;;  %v15977_v46 = vand.u32 4294901760, %v14182_v0 }
 0xe10   : > { %7612 = vmatpush.xpose.msra.mxu2 %v16135_v63  ;;  %7657 = vmatpush.xpose.msra.mxu3 %v14029_v59  ;;  %v16136_v63 = vand.u32 4294901760, %v14027_v18  ;;  %v7778_v59 = vsub.f32 %v14161_v48, %v15979_v47  ;;  %v7784_v18 = vsub.f32 %v14172_v60, %v15978_v14  ;;  %v15975_v36 = vand.u32 4294901760, %v14195_v42 }
 0xe11   : > { %7587 = vmatpush.xpose.msra.mxu1 %v14072_v54 }
 0xe12   : > { %7559 = vmatpush.xpose.msra.mxu0 %v14100_v53  ;;  %v7779_v2 = vand.u32 4294901760, %v7778_v59  ;;  %v7802_v59 = vsub.f32 %v14195_v42, %v15975_v36 }
 0xe14   : > { %7616 = vmatpush.xpose.msra.mxu2 %v16136_v63  ;;  %7659 = vmatpush.xpose.msra.mxu3 %v14042_v15  ;;  %v16137_v15 = vand.u32 4294901760, %v14045_v21  ;;  %v7796_v63 = vsub.f32 %v14189_v24, %v15976_v6 }
 0xe15   : > { %7562 = vmatmul.f32.vlgmr.msra.gmra.mxu0 %v14132_v34  ;;  %7589 = vmatpush.xpose.msra.mxu1 %v14086_v7  ;;  %v7790_v34 = vsub.f32 %v14182_v0, %v15977_v46 }
 0xe16   : > { %7737 = vmatpush.msrb.mxu0 %v14138_v32 }
 0xe17   : > { %v7791_v21 = vand.u32 4294901760, %v7790_v34 }
 0xe18   : > { %7739 = vmatpush.msrb.mxu0 %v14150_v27  ;;  %7620 = vmatpush.xpose.msra.mxu2 %v16137_v15  ;;  %v16138_v15 = vand.u32 4294901760, %v14055_v41  ;;  %v16141_v41 = vand.u32 4294901760, %v14100_v53 }
 0xe19   : > { %7774 = vmatpush.msrb.mxu1 %v7773_v19  ;;  %7661 = vmatpush.xpose.msra.mxu3 %v14052_v37  ;;  %v7785_v19 = vand.u32 4294901760, %v7784_v18  ;;  %v7797_v37 = vand.u32 4294901760, %v7796_v63  ;;  %v16139_v18 = vand.u32 4294901760, %v14069_v22  ;;  %v14252_v22 = vpop.f32.mrf.mxu1 }
 0xe1a   : > { %7741 = vmatpush.msrb.mxu0 %v14154_v62  ;;  %7593 = vmatmul.f32.vlgmr.msra.gmra.mxu1 %v7460_v50  ;;  %v7803_v50 = vand.u32 4294901760, %v7802_v59  ;;  %16142 = vst [vmem:[#allocation22_spill] sm:$0xff] %v14252_v22 }
 0xe1b   : > { %7780 = vmatpush.msrb.mxu1 %v7779_v2 }
 0xe1c   : > { %7743 = vmatpush.msrb.mxu0 %v14163_v45  ;;  %7624 = vmatpush.xpose.msra.mxu2 %v16138_v15 }
 0xe1d   : > { %7786 = vmatpush.msrb.mxu1 %v7785_v19  ;;  %7663 = vmatpush.xpose.msra.mxu3 %v14072_v54  ;;  %v16140_v54 = vand.u32 4294901760, %v14089_v55 }
 0xe1e   : > { %7745 = vmatpush.msrb.mxu0 %v14169_v3 }
 0xe1f   : > { %7792 = vmatpush.msrb.mxu1 %v7791_v21 }
 0xe20   : > { %7747 = vmatpush.msrb.mxu0 %v14179_v23  ;;  %7628 = vmatpush.xpose.msra.mxu2 %v16139_v18  ;;  %v14256_v55 = vpop.f32.mrf.mxu2 }
 0xe21   : > { %7798 = vmatpush.msrb.mxu1 %v7797_v37  ;;  %7665 = vmatpush.xpose.msra.mxu3 %v14086_v7  ;;  %v14254_v7 = vpop.f32.mrf.mxu0  ;;  %16144 = vst [vmem:[#allocation31_spill] sm:$0xff] %v14256_v55 }
 0xe22   : > { %16143 = vst [vmem:[#allocation23_spill] sm:$0xff] %v14254_v7  ;;  %v14258_v53 = vpop.f32.mrf.mxu3 }
 0xe23   : > { %7804 = vmatpush.msrb.mxu1 %v7803_v50  ;;  %16145 = vst [vmem:[#allocation24_spill] sm:$0xff] %v14258_v53 }
 0xe24   : > { %7667 = vmatmul.f32.vlgmr.msra.gmra.mxu3 %v14122_v39  ;;  %7632 = vmatpush.xpose.msra.mxu2 %v16140_v54 }
 0xe25   : > { %7869 = vmatpush.msrb.mxu3 %v14138_v32 }
 0xe27   : > { %7871 = vmatpush.msrb.mxu3 %v14150_v27 }
 0xe28   : > { %7636 = vmatpush.xpose.msra.mxu2 %v16141_v41 }
 0xe29   : > { %7873 = vmatpush.msrb.mxu3 %v14154_v62  ;;  %v14262_v2 = vpop.f32.mrf.mxu0 }
 0xe2a   : > { %16147 = vst [vmem:[#allocation29_spill] sm:$0xff] %v14262_v2 }
 0xe2b   : > { %7875 = vmatpush.msrb.mxu3 %v14163_v45  ;;  %7638 = vmatmul.f32.vlgmr.msra.gmra.mxu2 %v14122_v39  ;;  %v14260_v39 = vpop.f32.mrf.mxu1 }
 0xe2c   : > { %7832 = vmatpush.msrb.mxu2 %v14147_v61  ;;  %16146 = vst [vmem:[#allocation26_spill] sm:$0xff] %v14260_v39 }
 0xe2d   : > { %7877 = vmatpush.msrb.mxu3 %v14169_v3 }
 0xe2e   : > { %7835 = vmatpush.msrb.mxu2 %v14161_v48 }
 0xe2f   : > { %7879 = vmatpush.msrb.mxu3 %v14179_v23 }
 0xe30   : > { %7838 = vmatpush.msrb.mxu2 %v14172_v60 }
 0xe32   : > { %7841 = vmatpush.msrb.mxu2 %v14182_v0 }
 0xe34   : > { %7844 = vmatpush.msrb.mxu2 %v14189_v24 }
 0xe36   : > { %7847 = vmatpush.msrb.mxu2 %v14195_v42 }
 0xe42   : > { %v14268_v63 = vpop.f32.mrf.mxu0 }
 0xe43   : > { %16150 = vst [vmem:[#allocation16_spill] sm:$0xff] %v14268_v63 }
 0xe44   : > { %v14270_v21 = vpop.f32.mrf.mxu1 }
 0xe45   : > { %16151 = vst [vmem:[#allocation28_spill] sm:$0xff] %v14270_v21 }
 0xe46   : > { %v14266_v19 = vpop.f32.mrf.mxu3 }
 0xe47   : > { %16149 = vst [vmem:[#allocation18_spill] sm:$0xff] %v14266_v19 }
 0xe4e   : > { %v14264_v34 = vpop.f32.mrf.mxu2  ;;  %v14274_v15 = vpop.f32.mrf.mxu3 }
 0xe4f   : > { %16148 = vst [vmem:[#allocation30_spill] sm:$0xff] %v14264_v34 }
 0xe50   : > { %16153 = vst [vmem:[#allocation40_spill] sm:$0xff] %v14274_v15 }
 0xe52   : > { %v7191_v37 = vpop.f32.mrf.mxu0 }
 0xe56   : > { %v14272_v59 = vpop.f32.mrf.mxu2 }
 0xe57   : > { %16152 = vst [vmem:[#allocation32_spill] sm:$0xff] %v14272_v59  ;;  %v7252_v50 = vpop.f32.mrf.mxu1 }
 0xe58   : > { %v7253_v18 = vadd.f32 %v7252_v50, %v7191_v37 }
 0xe66   : > { %v7321_v36 = vpop.f32.mrf.mxu3 }
 0xe6e   : > { %v7290_v54 = vpop.f32.mrf.mxu2 }
 0xe6f   : > { %v7291_v41 = vadd.f32 %v7290_v54, %v7253_v18 }
 0xe71   : > { %v7322_v6 = vadd.f32 %v7321_v36, %v7291_v41 }
 0xe72   : > { %v7366_v46 = vpop.f32.mrf.mxu0 }
 0xe73   : > { %v7367_v14 = vadd.f32 %v7366_v46, %v7322_v6 }
 0xe77   : > { %v7395_v47 = vpop.f32.mrf.mxu1 }
 0xe78   : > { %v7396_v34 = vadd.f32 %v7395_v47, %v7367_v14 }
 0xe7a   : > { %v7671_v19 = vsel %vm6622_vm11, %v7396_v34, -inf }
 0xe7b   : > { %7672 = vmax.xlane.f32.xlu0 %v7671_v19  ;;  %v16154_v19 = vld [vmem:[#allocation21_spill] sm:$0xff] }
 0xe86   : > { %v7525_v59 = vpop.f32.mrf.mxu3 }
 0xe8e   : > { %v7464_v15 = vpop.f32.mrf.mxu2 }
 0xe8f   : > { %8253 = vrot.lane.b32.xlu0 %v16102_v10, %s16110_s8  ;;  %v7526_v37 = vadd.f32 %v7525_v59, %v7464_v15 }
 0xe92   : > { %v7563_v50 = vpop.f32.mrf.mxu0 }
 0xe93   : > { %v7564_v18 = vadd.f32 %v7563_v50, %v7526_v37 }
 0xe97   : > { %8526 = vrot.lane.b32.xlu0 %v16101_v40, %s16110_s8  ;;  %v7594_v54 = vpop.f32.mrf.mxu1 }
 0xe98   : > { %v7595_v36 = vadd.f32 %v7594_v54, %v7564_v18  ;;  %v7988_v54 = vpop.permute.xlu1 %7987 }
 0xea7   : > { %v7668_v6 = vpop.f32.mrf.mxu3 }
 0xeae   : > { %v7639_v41 = vpop.f32.mrf.mxu2 }
 0xeaf   : > { %v7640_v46 = vadd.f32 %v7639_v41, %v7595_v36 }
 0xeb1   : > { %v7669_v47 = vadd.f32 %v7668_v6, %v7640_v46 }
 0xeb3   : > { %v7674_v14 = vsel %vm6622_vm11, %v7669_v47, -inf }
 0xeb4   : > { %7675 = vmax.xlane.f32.xlu2 %v7674_v14  ;;  %v14316_v14 = vand.u32 4294901760, %v7988_v54 }
 0xecc   : > { %7703 = vrot.lane.b32.xlu2 %v13523_v26, %s16047_s0 }
 0xed4   : > { %7701 = vrot.lane.b32.xlu2 %v13536_v38, %s16047_s0 }
 0xedc   : > { %7975 = vrot.lane.b32.xlu2 %v13685_v30, %s16047_s0 }
 0xee4   : > { %8251 = vrot.lane.b32.xlu2 %v16154_v19, %s16110_s8 }
 0xeec   : > { %8247 = vrot.lane.b32.xlu2 %v16100_v1, %s16110_s8 }
 0xeee   : > { %v7673_v59 = vpop.xlane.xlu0 %7672 }
 0xeef   : > { %v7677_v15 = vsub.f32 %v7396_v34, %v7673_v59  ;;  %v7984_v34 = vpop.permute.xlu1 %7983 }
 0xef1   : > { %v7679_v37 = vmul.f32 1.442695, %v7677_v15  ;;  %v14319_v15 = vand.u32 4294901760, %v14114_v56 }
 0xef3   : > { %11567 = vpow2.f32 %v7679_v37  ;;  %v14324_v37 = vsub.f32 %v7988_v54, %v14316_v14 }
 0xef4   : > { %8243 = vrot.lane.b32.xlu2 %v16103_v31, %s16110_s8 }
 0xef5   : > { %v16155_v22 = vand.u32 4294901760, %v14324_v37 }
 0xef7   : > { %v7982_v36 = vpop.permute.xlu1 %7981  ;;  %v8044_v7 = vsub.f32 %v14324_v37, %v16155_v22 }
 0xef9   : > { %v14294_v50 = vpop.eup %11567 }
 0xefa   : > { %v7683_v18 = vsel %vm6622_vm11, %v14294_v50, 0.0 }
 0xefb   : > { %7684 = vadd.xlane.f32.xlu1 %v7683_v18  ;;  %v14326_v18 = vand.u32 4294901760, %v7984_v34 }
 0xefc   : > { %8524 = vrot.lane.b32.xlu2 %v16104_v52, %s16110_s8 }
 0xefd   : > { %v14342_v39 = vsub.f32 %v7984_v34, %v14326_v18 }
 0xeff   : > { %v7980_v41 = vpop.permute.xlu1 %7979 }
 0xf00   : > { %v14349_v53 = vand.u32 4294901760, %v7980_v41 }
 0xf02   : > { %v14373_v54 = vsub.f32 %v7980_v41, %v14349_v53  ;;  %v16157_v41 = vand.u32 4294901760, %v14342_v39 }
 0xf04   : > { %8522 = vrot.lane.b32.xlu2 %v16105_v17, %s16110_s8 }
 0xf07   : > { %v7978_v21 = vpop.permute.xlu1 %7977 }
 0xf0c   : > { %8516 = vrot.lane.b32.xlu2 %v16106_v9, %s16110_s8 }
 0xf14   : > { %8510 = vrot.lane.b32.xlu2 %v16107_v20, %s16110_s8  ;;  %8241 = vrot.lane.b32.xlu1 %v16109_v28, %s16110_s8 }
 0xf1c   : > { %8819 = vrot.lane.b32.xlu2 %v13513_v29, %s16110_s8  ;;  %8237 = vrot.lane.b32.xlu1 %v16111_v43, %s16110_s8  ;;  %v8045_v43 = vand.u32 4294901760, %v8044_v7 }
 0xf24   : > { %9083 = vrot.lane.b32.xlu2 %v13675_v33, %s16110_s8  ;;  %8518 = vrot.lane.b32.xlu1 %v16112_v25, %s16110_s8 }
 0xf27   : > { %v7676_v46 = vpop.xlane.xlu2 %7675 }
 0xf28   : > { %v7678_v6 = vsub.f32 %v7669_v47, %v7676_v46  ;;  %v14330_v46 = vand.u32 4294901760, %v7982_v36 }
 0xf2a   : > { %v7681_v59 = vmul.f32 1.442695, %v7678_v6  ;;  %v14334_v6 = vsub.f32 %v14114_v56, %v14319_v15  ;;  %v14354_v55 = vsub.f32 %v7982_v36, %v14330_v46 }
 0xf2c   : > { %11569 = vpow2.f32 %v7681_v59  ;;  %9079 = vrot.lane.b32.xlu2 %v13654_v11, %s16110_s8  ;;  %8512 = vrot.lane.b32.xlu1 %v16113_v4, %s16110_s8  ;;  %v16156_v22 = vand.u32 4294901760, %v14334_v6 }
 0xf2e   : > { %v8050_v11 = vsub.f32 %v14334_v6, %v16156_v22  ;;  %v16158_v22 = vand.u32 4294901760, %v14147_v61 }
 0xf2f   : > { %v7704_v47 = vpop.permute.xlu2 %7703 }
 0xf30   : > { %v14336_v59 = vand.u32 4294901760, %v7704_v47  ;;  %v8051_v7 = vand.u32 4294901760, %v8050_v11  ;;  %v16161_v11 = vand.u32 4294901760, %v14172_v60 }
 0xf32   : > { %v14338_v63 = vpop.eup %11569  ;;  %v14345_v2 = vsub.f32 %v7704_v47, %v14336_v59  ;;  %7749 = vmatpush.msrb.mxu0 %v14336_v59  ;;  %7881 = vmatpush.msrb.mxu3 %v14336_v59  ;;  %v14360_v47 = vand.u32 4294901760, %v7978_v21 }
 0xf33   : > { %v7686_v56 = vsel %vm6622_vm11, %v14338_v63, 0.0 }
 0xf34   : > { %v15987_v34 = vand.u32 4294901760, %v14345_v2  ;;  %9077 = vrot.lane.b32.xlu2 %v13658_v44, %s16110_s8  ;;  %7687 = vadd.xlane.f32.xlu0 %v7686_v56  ;;  %v14382_v25 = vsub.f32 %v7978_v21, %v14360_v47  ;;  %v8056_v44 = vsub.f32 %v14342_v39, %v16157_v41 }
 0xf35   : > { %7850 = vmatpush.msrb.mxu2 %v14345_v2  ;;  %8815 = vrot.lane.b32.xlu1 %v13490_v13, %s16110_s8  ;;  %v7974_v13 = vpop.permute.xlu1 %7973 }
 0xf36   : > { %v7808_v36 = vsub.f32 %v14345_v2, %v15987_v34  ;;  %v14393_v21 = vand.u32 4294901760, %v7974_v13  ;;  %v8057_v61 = vand.u32 4294901760, %v8056_v44  ;;  %v16164_v60 = vand.u32 4294901760, %v14382_v25 }
 0xf37   : > { %v7702_v56 = vpop.permute.xlu2 %7701 }
 0xf38   : > { %v14376_v33 = vand.u32 4294901760, %v7702_v56  ;;  %v7809_v4 = vand.u32 4294901760, %v7808_v36  ;;  %v16160_v36 = vand.u32 4294901760, %v14161_v48 }
 0xf3a   : > { %v7812_v34 = vsub.f32 %v7702_v56, %v14376_v33  ;;  %7751 = vmatpush.msrb.mxu0 %v14376_v33  ;;  %7810 = vmatpush.msrb.mxu1 %v7809_v4  ;;  %v16159_v4 = vand.u32 4294901760, %v14354_v55 }
 0xf3b   : > { %7883 = vmatpush.msrb.mxu3 %v14376_v33 }
 0xf3c   : > { %7902 = vmatpush.msra.mxu0 %v16158_v22  ;;  %v7813_v28 = vand.u32 4294901760, %v7812_v34  ;;  %9075 = vrot.lane.b32.xlu2 %v13666_v57, %s16110_s8  ;;  %v8062_v56 = vsub.f32 %v14354_v55, %v16159_v4  ;;  %v16162_v4 = vand.u32 4294901760, %v14373_v54  ;;  %v14412_v57 = vsub.f32 %v7974_v13, %v14393_v21 }
 0xf3d   : > { %8046 = vmatpush.msra.mxu3 %v8045_v43  ;;  %7853 = vmatpush.msrb.mxu2 %v7812_v34  ;;  %v16165_v13 = vand.u32 4294901760, %v14189_v24 }
 0xf3e   : > { %7906 = vmatpush.msra.mxu0 %v16160_v36  ;;  %v7814_v22 = vsub.f32 %v7812_v34, %v7813_v28  ;;  %9081 = vrot.lane.b32.xlu1 %v13649_v35, %s16110_s8  ;;  %v8068_v41 = vsub.f32 %v14373_v54, %v16162_v4  ;;  %v8063_v44 = vand.u32 4294901760, %v8062_v56  ;;  %v16163_v36 = vand.u32 4294901760, %v14182_v0 }
 0xf3f   : > { %8009 = vmatpush.msra.mxu2 %v14316_v14  ;;  %8052 = vmatpush.msra.mxu3 %v8051_v7  ;;  %v7976_v43 = vpop.permute.xlu2 %7975  ;;  %v8074_v7 = vsub.f32 %v14382_v25, %v16164_v60  ;;  %v8085_v56 = vand.u32 4294901760, %v14412_v57 }
 0xf40   : > { %7910 = vmatpush.msra.mxu0 %v16161_v11  ;;  %v14414_v48 = vand.u32 4294901760, %v7976_v43  ;;  %v7815_v34 = vand.u32 4294901760, %v7814_v22 }
 0xf41   : > { %8011 = vmatpush.msra.mxu2 %v14319_v15  ;;  %8058 = vmatpush.msra.mxu3 %v8057_v61  ;;  %v8069_v61 = vand.u32 4294901760, %v8068_v41  ;;  %v8075_v22 = vand.u32 4294901760, %v8074_v7 }
 0xf42   : > { %7914 = vmatpush.msra.mxu0 %v16163_v36  ;;  %v14423_v11 = vsub.f32 %v7976_v43, %v14414_v48  ;;  %7816 = vmatpush.msrb.mxu1 %v7815_v34  ;;  %v16166_v43 = vand.u32 4294901760, %v14195_v42  ;;  %v8086_v42 = vsub.f32 %v14412_v57, %v8085_v56 }
 0xf43   : > { %8013 = vmatpush.msra.mxu2 %v14326_v18  ;;  %8064 = vmatpush.msra.mxu3 %v8063_v44 }
 0xf44   : > { %7918 = vmatpush.msra.mxu0 %v16165_v13  ;;  %v8079_v0 = vand.u32 4294901760, %v14423_v11  ;;  %7945 = vmatpush.msra.mxu1 %v14138_v32  ;;  %v16167_v32 = vand.u32 4294901760, %v14345_v2 }
 0xf45   : > { %8015 = vmatpush.msra.mxu2 %v14330_v46  ;;  %8070 = vmatpush.msra.mxu3 %v8069_v61 }
 0xf46   : > { %9073 = vrot.lane.b32.xlu2 %v13673_v51, %s16110_s8  ;;  %7922 = vmatpush.msra.mxu0 %v16166_v43  ;;  %v8080_v24 = vsub.f32 %v14423_v11, %v8079_v0 }
 0xf47   : > { %7947 = vmatpush.msra.mxu1 %v14150_v27  ;;  %8017 = vmatpush.msra.mxu2 %v14349_v53  ;;  %v8087_v27 = vand.u32 4294901760, %v8086_v42  ;;  %v8252_v44 = vpop.permute.xlu2 %8251  ;;  %v16173_v42 = vand.u32 4294901760, %v14334_v6 }
 0xf48   : > { %8076 = vmatpush.msra.mxu3 %v8075_v22  ;;  %8811 = vrot.lane.b32.xlu1 %v13502_v5, %s16110_s8  ;;  %v8081_v41 = vand.u32 4294901760, %v8080_v24  ;;  %v8269_v13 = vsel %vm1582_vm1, %v8252_v44, 0 }
 0xf49   : > { %7926 = vmatpush.msra.mxu0 %v16167_v32  ;;  %7949 = vmatpush.msra.mxu1 %v14154_v62  ;;  %v14487_v24 = vand.u32 4294901760, %v8269_v13 }
 0xf4a   : > { %8019 = vmatpush.msra.mxu2 %v14360_v47  ;;  %8239 = vrot.lane.b32.xlu0 %v16114_v49, %s16110_s8 }
 0xf4b   : > { %7930 = vmatpush.msra.mxu0 %v7813_v28  ;;  %7951 = vmatpush.msra.mxu1 %v14163_v45  ;;  %v8250_v28 = vpop.permute.xlu1 %8249  ;;  %v16170_v45 = vld [vmem:[#allocation35_spill] sm:$0xff] }
 0xf4c   : > { %8021 = vmatpush.msra.mxu2 %v14414_v48  ;;  %8082 = vmatpush.msra.mxu3 %v8081_v41  ;;  %v8267_v43 = vsel %vm1582_vm1, %v8250_v28, 0  ;;  %v16174_v28 = vand.u32 4294901760, %v14342_v39 }
 0xf4d   : > { %7953 = vmatpush.msra.mxu1 %v14169_v3  ;;  %v16169_v3 = vld [vmem:[#allocation17_spill] sm:$0xff] }
 0xf4e   : > { %8023 = vmatpush.msra.mxu2 %v14393_v21  ;;  %9069 = vrot.lane.b32.xlu2 %v13698_v16, %s16110_s8 }
 0xf4f   : > { %8088 = vmatpush.msra.mxu3 %v8087_v27  ;;  %7955 = vmatpush.msra.mxu1 %v14179_v23  ;;  %v16171_v23 = vld [vmem:[#allocation36_spill] sm:$0xff]  ;;  %v8248_v32 = vpop.permute.xlu2 %8247 }
 0xf50   : > { %8809 = vrot.lane.b32.xlu1 %v13511_v12, %s16110_s8  ;;  %v8265_v44 = vsel %vm1582_vm1, %v8248_v32, 0 }
 0xf51   : > { %7957 = vmatpush.msra.mxu1 %v14336_v59  ;;  %v8254_v59 = vpop.permute.xlu0 %8253 }
 0xf52   : > { %8520 = vrot.lane.b32.xlu0 %v16115_v58, %s16110_s8 }
 0xf53   : > { %7959 = vmatpush.msra.mxu1 %v14376_v33  ;;  %v8246_v62 = vpop.permute.xlu1 %8245 }
 0xf56   : > { %9345 = vrot.lane.b32.xlu2 %v16099_v8, %s16168_s2  ;;  %v8271_v8 = vsel %vm1582_vm1, %v8254_v59, 0 }
 0xf57   : > { %v14476_v60 = vand.u32 4294901760, %v8271_v8 }
 0xf59   : > { %v14481_v22 = vsub.f32 %v8271_v8, %v14476_v60 }
 0xf5a   : > { %8514 = vrot.lane.b32.xlu0 %v16169_v3, %s16110_s8 }
 0xf5b   : > { %v8316_v59 = vand.u32 4294901760, %v14481_v22 }
 0xf5d   : > { %v8317_v8 = vsub.f32 %v14481_v22, %v8316_v59 }
 0xf62   : > { %8817 = vrot.lane.b32.xlu0 %v16170_v45, %s16110_s8 }
 0xf6a   : > { %8813 = vrot.lane.b32.xlu0 %v16171_v23, %s16110_s8 }
 0xf6e   : > { %v7685_v2 = vpop.xlane.xlu1 %7684 }
 0xf6f   : > { %11571 = vrcp.f32 %v7685_v2  ;;  %v14493_v2 = vand.u32 4294901760, %v8267_v43 }
 0xf75   : > { %v11572_v4 = vpop.eup %11571 }
 0xf76   : > { %v7691_v33 = vmul.f32 %v11572_v4, %v14294_v50  ;;  %v16172_v50 = vand.u32 4294901760, %v14324_v37  ;;  %v14500_v4 = vsub.f32 %v8269_v13, %v14487_v24  ;;  %v8244_v13 = vpop.permute.xlu2 %8243 }
 0xf78   : > { %v7726_v34 = vsel %vm6622_vm11, %v7691_v33, 0  ;;  %v14509_v33 = vsub.f32 %v8267_v43, %v14493_v2 }
 0xf79   : > { %v7752_v36 = vand.u32 4294901760, %v7726_v34 }
 0xf7b   : > { %v7753_v7 = vsub.f32 %v7726_v34, %v7752_v36  ;;  %7818 = vmatmul.f32.vlgmr.msrb.gmra.mxu1 %v7752_v36  ;;  %v14517_v34 = vand.u32 4294901760, %v8265_v44 }
 0xf7c   : > { %8141 = vmatpush.msrb.mxu1 %v14316_v14 }
 0xf7d   : > { %7856 = vmatmul.f32.vlgmr.msrb.gmra.mxu2 %v7753_v7  ;;  %v7754_v61 = vand.u32 4294901760, %v7753_v7 }
 0xf7e   : > { %8143 = vmatpush.msrb.mxu1 %v14319_v15  ;;  %8174 = vmatpush.msrb.mxu2 %v16172_v50 }
 0xf7f   : > { %7887 = vmatmul.f32.vlgmr.msrb.gmra.mxu3 %v7754_v61  ;;  %v7755_v41 = vsub.f32 %v7753_v7, %v7754_v61  ;;  %v8263_v7 = vsel %vm1582_vm1, %v8246_v62, 0  ;;  %v8318_v61 = vand.u32 4294901760, %v8317_v8  ;;  %v14534_v62 = vsub.f32 %v8265_v44, %v14517_v34 }
 0xf80   : > { %8145 = vmatpush.msrb.mxu1 %v14326_v18  ;;  %8178 = vmatpush.msrb.mxu2 %v16173_v42  ;;  %v14531_v50 = vand.u32 4294901760, %v8263_v7 }
 0xf81   : > { %8217 = vmatpush.msrb.mxu3 %v14316_v14  ;;  %v7756_v27 = vand.u32 4294901760, %v7755_v41  ;;  %v16175_v14 = vand.u32 4294901760, %v14354_v55  ;;  %v8334_v43 = vand.u32 4294901760, %v14534_v62 }
 0xf82   : > { %8147 = vmatpush.msrb.mxu1 %v14330_v46  ;;  %8182 = vmatpush.msrb.mxu2 %v16174_v28 }
 0xf83   : > { %8219 = vmatpush.msrb.mxu3 %v14319_v15  ;;  %7757 = vmatmul.f32.vlgmr.msrb.gmra.mxu0 %v7756_v27  ;;  %v8322_v15 = vand.u32 4294901760, %v14500_v4  ;;  %v8335_v42 = vsub.f32 %v14534_v62, %v8334_v43 }
 0xf84   : > { %7961 = vmatmul.f32.vlgmr.msra.gmra.mxu1 %v7752_v36  ;;  %8104 = vmatpush.msrb.mxu0 %v14324_v37  ;;  %v16176_v37 = vand.u32 4294901760, %v14373_v54 }
 0xf85   : > { %8149 = vmatpush.msrb.mxu1 %v14349_v53  ;;  %8186 = vmatpush.msrb.mxu2 %v16175_v14  ;;  %v8527_v14 = vpop.permute.xlu0 %8526 }
 0xf86   : > { %8221 = vmatpush.msrb.mxu3 %v14326_v18  ;;  %8107 = vmatpush.msrb.mxu0 %v14334_v6  ;;  %v16177_v18 = vand.u32 4294901760, %v14382_v25  ;;  %v8328_v6 = vand.u32 4294901760, %v14509_v33 }
 0xf87   : > { %8151 = vmatpush.msrb.mxu1 %v14360_v47  ;;  %8190 = vmatpush.msrb.mxu2 %v16176_v37 }
 0xf88   : > { %8223 = vmatpush.msrb.mxu3 %v14330_v46  ;;  %8110 = vmatpush.msrb.mxu0 %v14342_v39  ;;  %v8323_v39 = vsub.f32 %v14500_v4, %v8322_v15  ;;  %v8261_v46 = vsel %vm1582_vm1, %v8244_v13, 0 }
 0xf89   : > { %8153 = vmatpush.msrb.mxu1 %v14414_v48  ;;  %8194 = vmatpush.msrb.mxu2 %v16177_v18 }
 0xf8a   : > { %8225 = vmatpush.msrb.mxu3 %v14349_v53  ;;  %8113 = vmatpush.msrb.mxu0 %v14354_v55  ;;  %v8242_v55 = vpop.permute.xlu1 %8241  ;;  %v8329_v53 = vsub.f32 %v14509_v33, %v8328_v6  ;;  %v8324_v32 = vand.u32 4294901760, %v8323_v39 }
 0xf8b   : > { %8155 = vmatpush.msrb.mxu1 %v14393_v21  ;;  %8198 = vmatpush.msrb.mxu2 %v8079_v0  ;;  %v14552_v0 = vsub.f32 %v8263_v7, %v14531_v50 }
 0xf8c   : > { %8227 = vmatpush.msrb.mxu3 %v14360_v47  ;;  %7932 = vmatmul.f32.vlgmr.msra.gmra.mxu0 %v7752_v36  ;;  %v14555_v47 = vand.u32 4294901760, %v8261_v46  ;;  %v8259_v36 = vsel %vm1582_vm1, %v8242_v55, 0 }
 0xf8d   : > { %8319 = vmatpush.xpose.msra.mxu1 %v8318_v61  ;;  %8202 = vmatpush.msrb.mxu2 %v8085_v56  ;;  %v14565_v41 = vand.u32 4294901760, %v8259_v36 }
 0xf8e   : > { %8116 = vmatpush.msrb.mxu0 %v14373_v54  ;;  %8229 = vmatpush.msrb.mxu3 %v14414_v48  ;;  %v8330_v54 = vand.u32 4294901760, %v8329_v53  ;;  %v8340_v48 = vand.u32 4294901760, %v14552_v0  ;;  %v14563_v56 = vsub.f32 %v8261_v46, %v14555_v47 }
 0xf90   : > { %8119 = vmatpush.msrb.mxu0 %v14382_v25  ;;  %8231 = vmatpush.msrb.mxu3 %v14393_v21  ;;  %v8346_v25 = vand.u32 4294901760, %v14563_v56  ;;  %v14574_v21 = vsub.f32 %v8259_v36, %v14565_v41  ;;  %v8341_v27 = vsub.f32 %v14552_v0, %v8340_v48 }
 0xf91   : > { %8325 = vmatpush.xpose.msra.mxu1 %v8324_v32 }
 0xf92   : > { %8122 = vmatpush.msrb.mxu0 %v14423_v11  ;;  %v8336_v11 = vand.u32 4294901760, %v8335_v42  ;;  %v8352_v28 = vand.u32 4294901760, %v14574_v21  ;;  %v8342_v44 = vand.u32 4294901760, %v8341_v27  ;;  %v8238_v18 = vpop.permute.xlu1 %8237  ;;  %v8525_v27 = vpop.permute.xlu2 %8524 }
 0xf93   : > { %v8255_v39 = vsel %vm1582_vm1, %v8238_v18, 0 }
 0xf94   : > { %8125 = vmatpush.msrb.mxu0 %v14412_v57  ;;  %v8347_v57 = vsub.f32 %v14563_v56, %v8346_v25  ;;  %v8353_v37 = vsub.f32 %v14574_v21, %v8352_v28  ;;  %v14594_v55 = vand.u32 4294901760, %v8255_v39 }
 0xf95   : > { %8331 = vmatpush.xpose.msra.mxu1 %v8330_v54 }
 0xf96   : > { %8282 = vmatpush.xpose.msra.mxu0 %v14476_v60  ;;  %v8348_v8 = vand.u32 4294901760, %v8347_v57  ;;  %v8354_v7 = vand.u32 4294901760, %v8353_v37  ;;  %v14598_v54 = vsub.f32 %v8255_v39, %v14594_v55  ;;  %v8542_v39 = vsel %vm1582_vm1, %v8525_v27, 0 }
 0xf99   : > { %8337 = vmatpush.xpose.msra.mxu1 %v8336_v11 }
 0xf9a   : > { %8284 = vmatpush.xpose.msra.mxu0 %v14487_v24 }
 0xf9d   : > { %8343 = vmatpush.xpose.msra.mxu1 %v8342_v44 }
 0xf9e   : > { %8286 = vmatpush.xpose.msra.mxu0 %v14493_v2 }
 0xfa1   : > { %8349 = vmatpush.xpose.msra.mxu1 %v8348_v8  ;;  %v8544_v8 = vsel %vm1582_vm1, %v8527_v14, 0 }
 0xfa2   : > { %8288 = vmatpush.xpose.msra.mxu0 %v14517_v34  ;;  %v14612_v18 = vand.u32 4294901760, %v8544_v8 }
 0xfa5   : > { %8355 = vmatpush.xpose.msra.mxu1 %v8354_v7 }
 0xfa6   : > { %8290 = vmatpush.xpose.msra.mxu0 %v14531_v50 }
 0xfa7   : > { %v7688_v13 = vpop.xlane.xlu0 %7687 }
 0xfa8   : > { %11573 = vrcp.f32 %v7688_v13 }
 0xfaa   : > { %8292 = vmatpush.xpose.msra.mxu0 %v14555_v47 }
 0xfae   : > { %v11574_v61 = vpop.eup %11573  ;;  %8294 = vmatpush.xpose.msra.mxu0 %v14565_v41 }
 0xfaf   : > { %v7692_v46 = vmul.f32 %v11574_v61, %v14338_v63  ;;  %v8299_v63 = vand.u32 4294901760, %v14598_v54 }
 0xfb1   : > { %v7998_v53 = vsel %vm6622_vm11, %v7692_v46, 0  ;;  %v8300_v37 = vsub.f32 %v14598_v54, %v8299_v63 }
 0xfb2   : > { %v8024_v32 = vand.u32 4294901760, %v7998_v53 }
 0xfb3   : > { %v8301_v14 = vand.u32 4294901760, %v8300_v37 }
 0xfb4   : > { %v8025_v36 = vsub.f32 %v7998_v53, %v8024_v32  ;;  %8090 = vmatmul.f32.vlgmr.msra.gmra.mxu3 %v8024_v32  ;;  %v8523_v53 = vpop.permute.xlu2 %8522 }
 0xfb5   : > { %8414 = vmatpush.xpose.msra.mxu3 %v14476_v60 }
 0xfb6   : > { %8128 = vmatmul.f32.vlgmr.msrb.gmra.mxu0 %v8025_v36  ;;  %v8026_v42 = vand.u32 4294901760, %v8025_v36 }
 0xfb8   : > { %8159 = vmatmul.f32.vlgmr.msrb.gmra.mxu1 %v8026_v42  ;;  %v8027_v11 = vsub.f32 %v8025_v36, %v8026_v42  ;;  %v14625_v36 = vsub.f32 %v8544_v8, %v14612_v18 }
 0xfb9   : > { %8416 = vmatpush.xpose.msra.mxu3 %v14487_v24 }
 0xfba   : > { %v8028_v44 = vand.u32 4294901760, %v8027_v11 }
 0xfbc   : > { %v8240_v57 = vpop.permute.xlu0 %8239  ;;  %8029 = vmatmul.f32.vlgmr.msra.gmra.mxu2 %v8028_v44  ;;  %8233 = vmatmul.f32.vlgmr.msrb.gmra.mxu3 %v8024_v32  ;;  %v8589_v44 = vand.u32 4294901760, %v14625_v36 }
 0xfbd   : > { %v8257_v7 = vsel %vm1582_vm1, %v8240_v57, 0  ;;  %8377 = vmatpush.xpose.msra.mxu2 %v14481_v22  ;;  %8418 = vmatpush.xpose.msra.mxu3 %v14493_v2  ;;  %v14630_v22 = vand.u32 4294901760, %v8542_v39 }
 0xfbe   : > { %v14610_v13 = vand.u32 4294901760, %v8257_v7 }
 0xfbf   : > { %v14639_v57 = vsub.f32 %v8542_v39, %v14630_v22 }
 0xfc0   : > { %v14615_v61 = vsub.f32 %v8257_v7, %v14610_v13  ;;  %8296 = vmatpush.xpose.msra.mxu0 %v14610_v13 }
 0xfc1   : > { %8380 = vmatpush.xpose.msra.mxu2 %v14500_v4  ;;  %8420 = vmatpush.xpose.msra.mxu3 %v14517_v34  ;;  %v8595_v37 = vand.u32 4294901760, %v14639_v57 }
 0xfc2   : > { %v8358_v46 = vand.u32 4294901760, %v14615_v61 }
 0xfc3   : > { %8302 = vmatmul.f32.vlgmr.msra.gmra.mxu0 %v8301_v14  ;;  %v8517_v14 = vpop.permute.xlu2 %8516 }
 0xfc4   : > { %8447 = vmatpush.xpose.msrb.mxu0 %v8316_v59  ;;  %8204 = vmatmul.f32.vlgmr.msrb.gmra.mxu2 %v8024_v32  ;;  %v8359_v42 = vsub.f32 %v14615_v61, %v8358_v46  ;;  %v8540_v59 = vsel %vm1582_vm1, %v8523_v53, 0  ;;  %v8521_v27 = vpop.permute.xlu0 %8520  ;;  %v8519_v32 = vpop.permute.xlu1 %8518 }
 0xfc5   : > { %8383 = vmatpush.xpose.msra.mxu2 %v14509_v33  ;;  %8422 = vmatpush.xpose.msra.mxu3 %v14531_v50  ;;  %v14641_v8 = vand.u32 4294901760, %v8540_v59  ;;  %v8538_v4 = vsel %vm1582_vm1, %v8521_v27, 0 }
 0xfc6   : > { %v8360_v11 = vand.u32 4294901760, %v8359_v42  ;;  %v14657_v33 = vand.u32 4294901760, %v8538_v4 }
 0xfc7   : > { %v14655_v7 = vsub.f32 %v8540_v59, %v14641_v8 }
 0xfc8   : > { %8451 = vmatpush.xpose.msrb.mxu0 %v8322_v15  ;;  %8361 = vmatpush.xpose.msra.mxu1 %v8360_v11  ;;  %v8590_v15 = vsub.f32 %v14625_v36, %v8589_v44  ;;  %v14669_v42 = vsub.f32 %v8538_v4, %v14657_v33 }
 0xfc9   : > { %8386 = vmatpush.xpose.msra.mxu2 %v14534_v62  ;;  %8424 = vmatpush.xpose.msra.mxu3 %v14555_v47  ;;  %v8601_v39 = vand.u32 4294901760, %v14655_v7 }
 0xfcb   : > { %8363 = vmatmul.f32.vlgmr.msra.gmra.mxu1 %v14594_v55 }
 0xfcc   : > { %8455 = vmatpush.xpose.msrb.mxu0 %v8328_v6  ;;  %8490 = vmatpush.xpose.msrb.mxu1 %v14476_v60  ;;  %v8536_v60 = vsel %vm1582_vm1, %v8519_v32, 0  ;;  %v8591_v6 = vand.u32 4294901760, %v8590_v15  ;;  %v8513_v62 = vpop.permute.xlu1 %8512  ;;  %v8515_v59 = vpop.permute.xlu0 %8514 }
 0xfcd   : > { %8389 = vmatpush.xpose.msra.mxu2 %v14552_v0  ;;  %8426 = vmatpush.xpose.msra.mxu3 %v14565_v41  ;;  %v14666_v53 = vand.u32 4294901760, %v8536_v60  ;;  %v8607_v0 = vand.u32 4294901760, %v14669_v42  ;;  %v8532_v32 = vsel %vm1582_vm1, %v8515_v59, 0 }
 0xfce   : > { %v14705_v15 = vand.u32 4294901760, %v8532_v32 }
 0xfcf   : > { %v14681_v11 = vsub.f32 %v8536_v60, %v14666_v53 }
 0xfd0   : > { %8459 = vmatpush.xpose.msrb.mxu0 %v8334_v43  ;;  %8492 = vmatpush.xpose.msrb.mxu1 %v14487_v24  ;;  %v8596_v24 = vsub.f32 %v14639_v57, %v8595_v37  ;;  %v8534_v43 = vsel %vm1582_vm1, %v8517_v14, 0  ;;  %v14723_v14 = vsub.f32 %v8532_v32, %v14705_v15 }
 0xfd1   : > { %8392 = vmatpush.xpose.msra.mxu2 %v14563_v56  ;;  %8428 = vmatpush.xpose.msra.mxu3 %v14610_v13  ;;  %v14691_v27 = vand.u32 4294901760, %v8534_v43  ;;  %v8613_v4 = vand.u32 4294901760, %v14681_v11 }
 0xfd3   : > { %v8614_v60 = vsub.f32 %v14681_v11, %v8613_v4 }
 0xfd4   : > { %8463 = vmatpush.xpose.msrb.mxu0 %v8340_v48  ;;  %8494 = vmatpush.xpose.msrb.mxu1 %v14493_v2  ;;  %v8597_v2 = vand.u32 4294901760, %v8596_v24  ;;  %v8602_v48 = vsub.f32 %v14655_v7, %v8601_v39  ;;  %v8511_v24 = vpop.permute.xlu2 %8510 }
 0xfd5   : > { %8592 = vmatpush.xpose.msrb.mxu3 %v8591_v6  ;;  %8395 = vmatpush.xpose.msra.mxu2 %v14574_v21  ;;  %v14711_v21 = vpop.permute.xlu1 %8815 }
 0xfd6   : > { %8432 = vmatmul.f32.vlgmr.msra.gmra.mxu3 %v8299_v63  ;;  %v8603_v56 = vand.u32 4294901760, %v8602_v48  ;;  %v14703_v63 = vsub.f32 %v8534_v43, %v14691_v27 }
 0xfd8   : > { %8467 = vmatpush.xpose.msrb.mxu0 %v8346_v25  ;;  %8496 = vmatpush.xpose.msrb.mxu1 %v14517_v34  ;;  %v8608_v25 = vsub.f32 %v14669_v42, %v8607_v0  ;;  %v8530_v34 = vsel %vm1582_vm1, %v8513_v62, 0  ;;  %v8528_v62 = vsel %vm1582_vm1, %v8511_v24, 0 }
 0xfd9   : > { %8598 = vmatpush.xpose.msrb.mxu3 %v8597_v2  ;;  %8398 = vmatpush.xpose.msra.mxu2 %v14615_v61  ;;  %v14720_v6 = vand.u32 4294901760, %v8530_v34  ;;  %v14750_v48 = vand.u32 4294901760, %v8528_v62 }
 0xfdb   : > { %v14730_v61 = vsub.f32 %v8530_v34, %v14720_v6 }
 0xfdc   : > { %8471 = vmatpush.xpose.msrb.mxu0 %v8352_v28  ;;  %8498 = vmatpush.xpose.msrb.mxu1 %v14531_v50  ;;  %v8609_v28 = vand.u32 4294901760, %v8608_v25  ;;  %v8619_v50 = vand.u32 4294901760, %v14703_v63  ;;  %v14760_v25 = vsub.f32 %v8528_v62, %v14750_v48 }
 0xfdd   : > { %8555 = vmatpush.xpose.msrb.mxu2 %v14612_v18  ;;  %8604 = vmatpush.xpose.msrb.mxu3 %v8603_v56  ;;  %v15992_v43 = vand.u32 4294901760, %v14730_v61  ;;  %v14741_v59 = vpop.permute.xlu1 %9081  ;;  %v8818_v56 = vpop.permute.xlu0 %8817 }
 0xfde   : > { %8401 = vmatmul.f32.vlgmr.msra.gmra.mxu2 %v14598_v54  ;;  %v8615_v54 = vand.u32 4294901760, %v8614_v60  ;;  %v8572_v60 = vand.u32 4294901760, %v14760_v25  ;;  %v14774_v24 = vand.u32 4294901760, %v8818_v56 }
 0xfe0   : > { %8475 = vmatpush.xpose.msrb.mxu0 %v8358_v46  ;;  %8500 = vmatpush.xpose.msrb.mxu1 %v14555_v47  ;;  %v8625_v46 = vand.u32 4294901760, %v14723_v14  ;;  %v8620_v47 = vsub.f32 %v14703_v63, %v8619_v50 }
 0xfe1   : > { %8557 = vmatpush.xpose.msrb.mxu2 %v14630_v22  ;;  %8610 = vmatpush.xpose.msrb.mxu3 %v8609_v28 }
 0xfe2   : > { %v8626_v2 = vsub.f32 %v14723_v14, %v8625_v46 }
 0xfe3   : > { %8477 = vmatmul.f32.vlgmr.msrb.gmra.mxu0 %v14594_v55 }
 0xfe4   : > { %8650 = vmatpush.xpose.msra.mxu0 %v14625_v36  ;;  %8502 = vmatpush.xpose.msrb.mxu1 %v14565_v41  ;;  %v8621_v41 = vand.u32 4294901760, %v8620_v47  ;;  %v8627_v32 = vand.u32 4294901760, %v8626_v2  ;;  %v8573_v47 = vsub.f32 %v14760_v25, %v8572_v60 }
 0xfe5   : > { %8559 = vmatpush.xpose.msrb.mxu2 %v14641_v8  ;;  %8616 = vmatpush.xpose.msrb.mxu3 %v8615_v54  ;;  %v8812_v28 = vpop.permute.xlu1 %8811 }
 0xfe6   : > { %v8574_v2 = vand.u32 4294901760, %v8573_v47  ;;  %v14800_v47 = vand.u32 4294901760, %v8812_v28 }
 0xfe8   : > { %8653 = vmatpush.xpose.msra.mxu0 %v14639_v57  ;;  %8504 = vmatpush.xpose.msrb.mxu1 %v14610_v13  ;;  %v8632_v13 = vsub.f32 %v14730_v61, %v15992_v43 }
 0xfe9   : > { %8561 = vmatpush.xpose.msrb.mxu2 %v14657_v33  ;;  %8622 = vmatpush.xpose.msrb.mxu3 %v8621_v41  ;;  %v14782_v41 = vand.u32 4294901760, %v14711_v21 }
 0xfea   : > { %v8633_v34 = vand.u32 4294901760, %v8632_v13 }
 0xfeb   : > { %8506 = vmatmul.f32.vlgmr.msrb.gmra.mxu1 %v14594_v55  ;;  %v8820_v55 = vpop.permute.xlu2 %8819 }
 0xfec   : > { %8656 = vmatpush.xpose.msra.mxu0 %v14655_v7  ;;  %8687 = vmatpush.xpose.msra.mxu1 %v14612_v18  ;;  %v14767_v54 = vand.u32 4294901760, %v8820_v55 }
 0xfed   : > { %8563 = vmatpush.xpose.msrb.mxu2 %v14666_v53  ;;  %8628 = vmatpush.xpose.msrb.mxu3 %v8627_v32  ;;  %v14787_v32 = vsub.f32 %v8818_v56, %v14774_v24 }
 0xfee   : > { %v14778_v62 = vsub.f32 %v8820_v55, %v14767_v54  ;;  %v14798_v55 = vsub.f32 %v14711_v21, %v14782_v41 }
 0xff0   : > { %8659 = vmatpush.xpose.msra.mxu0 %v14669_v42  ;;  %8689 = vmatpush.xpose.msra.mxu1 %v14630_v22  ;;  %v8887_v56 = vand.u32 4294901760, %v14798_v55 }
 0xff1   : > { %8565 = vmatpush.xpose.msrb.mxu2 %v14691_v27  ;;  %8634 = vmatpush.xpose.msrb.mxu3 %v8633_v34  ;;  %v8810_v34 = vpop.permute.xlu1 %8809 }
 0xff2   : > { %v14804_v36 = vand.u32 4294901760, %v8810_v34  ;;  %v8888_v7 = vsub.f32 %v14798_v55, %v8887_v56 }
 0xff4   : > { %8662 = vmatpush.xpose.msra.mxu0 %v14681_v11  ;;  %8691 = vmatpush.xpose.msra.mxu1 %v14641_v8  ;;  %v14824_v57 = vsub.f32 %v8810_v34, %v14804_v36 }
 0xff5   : > { %8763 = vmatpush.xpose.msra.mxu3 %v14612_v18  ;;  %8567 = vmatpush.xpose.msrb.mxu2 %v14705_v15  ;;  %v8814_v18 = vpop.permute.xlu0 %8813 }
 0xff6   : > { %8636 = vmatmul.f32.vlgmr.msrb.gmra.mxu3 %v14750_v48  ;;  %v14789_v13 = vand.u32 4294901760, %v8814_v18 }
 0xff8   : > { %8665 = vmatpush.xpose.msra.mxu0 %v14703_v63  ;;  %8693 = vmatpush.xpose.msra.mxu1 %v14657_v33 }
 0xff9   : > { %8765 = vmatpush.xpose.msra.mxu3 %v14630_v22  ;;  %8569 = vmatpush.xpose.msrb.mxu2 %v14720_v6  ;;  %v15990_v22 = vand.u32 4294901760, %v14778_v62 }
 0xffb   : > { %v8876_v21 = vsub.f32 %v14778_v62, %v15990_v22 }
 0xffc   : > { %8668 = vmatpush.xpose.msra.mxu0 %v14723_v14  ;;  %8695 = vmatpush.xpose.msra.mxu1 %v14666_v53 }
 0xffd   : > { %8720 = vmatpush.xpose.msra.mxu2 %v8589_v44  ;;  %8767 = vmatpush.xpose.msra.mxu3 %v14641_v8  ;;  %v15991_v44 = vand.u32 4294901760, %v14787_v32  ;;  %v14808_v8 = vsub.f32 %v8814_v18, %v14789_v13 }
 0xffe   : > { %8575 = vmatmul.f32.vlgmr.msrb.gmra.mxu2 %v8574_v2  ;;  %v14819_v2 = vsub.f32 %v8812_v28, %v14800_v47  ;;  %v7819_v28 = vpop.f32.mrf.mxu1 }
0x1000   : > { %8671 = vmatpush.xpose.msra.mxu0 %v14730_v61  ;;  %8697 = vmatpush.xpose.msra.mxu1 %v14691_v27  ;;  %v7758_v18 = vpop.f32.mrf.mxu0  ;;  %v8899_v22 = vand.u32 4294901760, %v14819_v2 }
0x1001   : > { %8724 = vmatpush.xpose.msra.mxu2 %v8595_v37  ;;  %8769 = vmatpush.xpose.msra.mxu3 %v14657_v33  ;;  %v8893_v37 = vand.u32 4294901760, %v14808_v8  ;;  %v8882_v33 = vsub.f32 %v14787_v32, %v15991_v44  ;;  %v7820_v34 = vadd.f32 %v7819_v28, %v7758_v18  ;;  %v8905_v44 = vand.u32 4294901760, %v14824_v57 }
0x1002   : > { %v7888_v28 = vpop.f32.mrf.mxu3  ;;  %v8889_v18 = vand.u32 4294901760, %v8888_v7  ;;  %v8900_v42 = vsub.f32 %v14819_v2, %v8899_v22 }
0x1003   : > { %8674 = vmatmul.f32.vlgmr.msra.gmra.mxu0 %v14760_v25  ;;  %v8877_v25 = vand.u32 4294901760, %v8876_v21  ;;  %v8883_v21 = vand.u32 4294901760, %v8882_v33  ;;  %v8894_v43 = vsub.f32 %v14808_v8, %v8893_v37 }
0x1004   : > { %8841 = vmatpush.msrb.mxu0 %v14767_v54  ;;  %8699 = vmatpush.xpose.msra.mxu1 %v14705_v15 }
0x1005   : > { %8728 = vmatpush.xpose.msra.mxu2 %v8601_v39  ;;  %8771 = vmatpush.xpose.msra.mxu3 %v14666_v53  ;;  %v7857_v39 = vpop.f32.mrf.mxu2 }
0x1006   : > { %8843 = vmatpush.msrb.mxu0 %v14774_v24  ;;  %v7858_v53 = vadd.f32 %v7857_v39, %v7820_v34  ;;  %v7962_v39 = vpop.f32.mrf.mxu1 }
0x1008   : > { %8845 = vmatpush.msrb.mxu0 %v14782_v41  ;;  %8701 = vmatpush.xpose.msra.mxu1 %v14720_v6 }
0x1009   : > { %8732 = vmatpush.xpose.msra.mxu2 %v8607_v0  ;;  %8773 = vmatpush.xpose.msra.mxu3 %v14691_v27  ;;  %v8895_v0 = vand.u32 4294901760, %v8894_v43  ;;  %v8906_v27 = vsub.f32 %v14824_v57, %v8905_v44  ;;  %v7933_v33 = vpop.f32.mrf.mxu0 }
0x100a   : > { %8847 = vmatpush.msrb.mxu0 %v14789_v13 }
0x100b   : > { %8705 = vmatmul.f32.vlgmr.msra.gmra.mxu1 %v8572_v60  ;;  %v8901_v60 = vand.u32 4294901760, %v8900_v42  ;;  %v8907_v7 = vand.u32 4294901760, %v8906_v27 }
0x100c   : > { %8878 = vmatpush.msrb.mxu1 %v8877_v25  ;;  %8849 = vmatpush.msrb.mxu0 %v14800_v47  ;;  %v7889_v25 = vadd.f32 %v7888_v28, %v7858_v53 }
0x100d   : > { %8736 = vmatpush.xpose.msra.mxu2 %v8613_v4  ;;  %8775 = vmatpush.xpose.msra.mxu3 %v14705_v15  ;;  %v16178_v4 = vand.u32 4294901760, %v14730_v61 }
0x100e   : > { %8851 = vmatpush.msrb.mxu0 %v14804_v36  ;;  %8884 = vmatpush.msrb.mxu1 %v8883_v21  ;;  %v7934_v34 = vadd.f32 %v7933_v33, %v7889_v25 }
0x1010   : > { %8890 = vmatpush.msrb.mxu1 %v8889_v18  ;;  %v14861_v11 = vadd.f32 %v7962_v39, %v7934_v34 }
0x1011   : > { %8740 = vmatpush.xpose.msra.mxu2 %v8619_v50  ;;  %8777 = vmatpush.xpose.msra.mxu3 %v14720_v6 }
0x1012   : > { %8896 = vmatpush.msrb.mxu1 %v8895_v0 }
0x1014   : > { %8902 = vmatpush.msrb.mxu1 %v8901_v60  ;;  %8779 = vmatmul.f32.vlgmr.msra.gmra.mxu3 %v14750_v48 }
0x1015   : > { %8973 = vmatpush.msrb.mxu3 %v14767_v54  ;;  %8744 = vmatpush.xpose.msra.mxu2 %v8625_v46 }
0x1016   : > { %8908 = vmatpush.msrb.mxu1 %v8907_v7 }
0x1017   : > { %8975 = vmatpush.msrb.mxu3 %v14774_v24 }
0x1019   : > { %8977 = vmatpush.msrb.mxu3 %v14782_v41  ;;  %8748 = vmatpush.xpose.msra.mxu2 %v16178_v4 }
0x101b   : > { %8979 = vmatpush.msrb.mxu3 %v14789_v13 }
0x101c   : > { %8750 = vmatmul.f32.vlgmr.msra.gmra.mxu2 %v14750_v48 }
0x101d   : > { %8936 = vmatpush.msrb.mxu2 %v14778_v62  ;;  %8981 = vmatpush.msrb.mxu3 %v14800_v47 }
0x101f   : > { %8939 = vmatpush.msrb.mxu2 %v14787_v32  ;;  %8983 = vmatpush.msrb.mxu3 %v14804_v36 }
0x1021   : > { %8942 = vmatpush.msrb.mxu2 %v14798_v55 }
0x1023   : > { %8945 = vmatpush.msrb.mxu2 %v14808_v8 }
0x1025   : > { %8948 = vmatpush.msrb.mxu2 %v14819_v2 }
0x1027   : > { %8951 = vmatpush.msrb.mxu2 %v14824_v57 }
0x1033   : > { %v8129_v6 = vpop.f32.mrf.mxu0 }
0x1035   : > { %v8160_v61 = vpop.f32.mrf.mxu1 }
0x1037   : > { %v8091_v63 = vpop.f32.mrf.mxu3 }
0x103f   : > { %v8030_v15 = vpop.f32.mrf.mxu2  ;;  %v8234_v53 = vpop.f32.mrf.mxu3 }
0x1040   : > { %v8092_v50 = vadd.f32 %v8091_v63, %v8030_v15  ;;  %v8303_v28 = vpop.f32.mrf.mxu0 }
0x1042   : > { %v8130_v14 = vadd.f32 %v8129_v6, %v8092_v50 }
0x1044   : > { %v8161_v46 = vadd.f32 %v8160_v61, %v8130_v14 }
0x1047   : > { %v8205_v43 = vpop.f32.mrf.mxu2 }
0x1048   : > { %v8206_v48 = vadd.f32 %v8205_v43, %v8161_v46  ;;  %v8364_v25 = vpop.f32.mrf.mxu1 }
0x1049   : > { %v8365_v18 = vadd.f32 %v8364_v25, %v8303_v28 }
0x104a   : > { %v14881_v21 = vadd.f32 %v8234_v53, %v8206_v48 }
0x1059   : > { %v8433_v27 = vpop.f32.mrf.mxu3 }
0x1060   : > { %v8478_v33 = vpop.f32.mrf.mxu0 }
0x1061   : > { %v8402_v42 = vpop.f32.mrf.mxu2 }
0x1062   : > { %v8403_v0 = vadd.f32 %v8402_v42, %v8365_v18 }
0x1064   : > { %v8434_v60 = vadd.f32 %v8433_v27, %v8403_v0 }
0x1066   : > { %v8479_v34 = vadd.f32 %v8478_v33, %v8434_v60 }
0x1068   : > { %v8507_v7 = vpop.f32.mrf.mxu1 }
0x1069   : > { %v8508_v39 = vadd.f32 %v8507_v7, %v8479_v34  ;;  %v16183_v7 = vld [vmem:[#allocation33_spill] sm:$0xff] }
0x106b   : > { %v8783_v4 = vsel %vm6622_vm11, %v8508_v39, -inf }
0x106c   : > { %8784 = vmax.xlane.f32.xlu0 %v8783_v4 }
0x1079   : > { %v8637_v15 = vpop.f32.mrf.mxu3 }
0x1080   : > { %9349 = vrot.lane.b32.xlu0 %v16102_v10, %s16168_s2  ;;  %v8675_v6 = vpop.f32.mrf.mxu0 }
0x1081   : > { %v8576_v63 = vpop.f32.mrf.mxu2 }
0x1082   : > { %v8638_v50 = vadd.f32 %v8637_v15, %v8576_v63 }
0x1084   : > { %v8676_v14 = vadd.f32 %v8675_v6, %v8638_v50 }
0x1088   : > { %9622 = vrot.lane.b32.xlu0 %v16101_v40, %s16168_s2  ;;  %v8706_v61 = vpop.f32.mrf.mxu1 }
0x1089   : > { %v8707_v46 = vadd.f32 %v8706_v61, %v8676_v14 }
0x1097   : > { %v8780_v53 = vpop.f32.mrf.mxu3 }
0x109f   : > { %v8751_v43 = vpop.f32.mrf.mxu2 }
0x10a0   : > { %v8752_v48 = vadd.f32 %v8751_v43, %v8707_v46 }
0x10a2   : > { %v8781_v28 = vadd.f32 %v8780_v53, %v8752_v48 }
0x10a4   : > { %v8786_v25 = vsel %vm6622_vm11, %v8781_v28, -inf }
0x10a5   : > { %8787 = vmax.xlane.f32.xlu1 %v8786_v25 }
0x10be   : > { %8807 = vrot.lane.b32.xlu1 %v13523_v26, %s16110_s8 }
0x10c6   : > { %8805 = vrot.lane.b32.xlu1 %v13536_v38, %s16110_s8 }
0x10ce   : > { %9071 = vrot.lane.b32.xlu1 %v13685_v30, %s16110_s8 }
0x10d6   : > { %9347 = vrot.lane.b32.xlu1 %v16154_v19, %s16168_s2  ;;  %v16180_v19 = vld [vmem:[#allocation27_spill] sm:$0xff] }
0x10de   : > { %9343 = vrot.lane.b32.xlu1 %v16100_v1, %s16168_s2  ;;  %v9084_v1 = vpop.permute.xlu2 %9083 }
0x10df   : > { %v8785_v40 = vpop.xlane.xlu0 %8784 }
0x10e0   : > { %v8789_v10 = vsub.f32 %v8508_v39, %v8785_v40  ;;  %v14935_v39 = vand.u32 4294901760, %v9084_v1 }
0x10e2   : > { %v8791_v18 = vmul.f32 1.442695, %v8789_v10  ;;  %v14941_v4 = vsub.f32 %v9084_v1, %v14935_v39 }
0x10e4   : > { %11575 = vpow2.f32 %v8791_v18  ;;  %v9139_v61 = vand.u32 4294901760, %v14941_v4 }
0x10e6   : > { %9339 = vrot.lane.b32.xlu1 %v16103_v31, %s16168_s2  ;;  %v16179_v31 = vld [vmem:[#allocation25_spill] sm:$0xff]  ;;  %v9140_v25 = vsub.f32 %v14941_v4, %v9139_v61 }
0x10ea   : > { %v14901_v42 = vpop.eup %11575 }
0x10eb   : > { %v8795_v0 = vsel %vm6622_vm11, %v14901_v42, 0.0 }
0x10ec   : > { %8796 = vadd.xlane.f32.xlu2 %v8795_v0 }
0x10ee   : > { %9620 = vrot.lane.b32.xlu1 %v16104_v52, %s16168_s2  ;;  %v9080_v52 = vpop.permute.xlu2 %9079 }
0x10ef   : > { %v14945_v15 = vand.u32 4294901760, %v9080_v52 }
0x10f1   : > { %v14957_v46 = vsub.f32 %v9080_v52, %v14945_v15 }
0x10f3   : > { %v9151_v40 = vand.u32 4294901760, %v14957_v46 }
0x10f6   : > { %9618 = vrot.lane.b32.xlu1 %v16105_v17, %s16168_s2  ;;  %v16181_v17 = vld [vmem:[#allocation15_spill] sm:$0xff]  ;;  %v9078_v60 = vpop.permute.xlu2 %9077 }
0x10f7   : > { %v14947_v50 = vand.u32 4294901760, %v9078_v60 }
0x10f9   : > { %v14967_v48 = vsub.f32 %v9078_v60, %v14947_v50 }
0x10fb   : > { %v9157_v0 = vand.u32 4294901760, %v14967_v48 }
0x10fe   : > { %9612 = vrot.lane.b32.xlu1 %v16106_v9, %s16168_s2  ;;  %v9076_v34 = vpop.permute.xlu2 %9075 }
0x10ff   : > { %v14959_v43 = vand.u32 4294901760, %v9076_v34 }
0x1101   : > { %v14979_v10 = vsub.f32 %v9076_v34, %v14959_v43  ;;  %v9152_v34 = vsub.f32 %v14957_v46, %v9151_v40 }
0x1103   : > { %v9163_v60 = vand.u32 4294901760, %v14979_v10 }
0x1104   : > { %9341 = vrot.lane.b32.xlu2 %v16179_v31, %s16168_s2 }
0x1106   : > { %9606 = vrot.lane.b32.xlu1 %v16107_v20, %s16168_s2  ;;  %v9074_v63 = vpop.permute.xlu2 %9073 }
0x110c   : > { %9337 = vrot.lane.b32.xlu2 %v16180_v19, %s16168_s2 }
0x110e   : > { %9915 = vrot.lane.b32.xlu1 %v13513_v29, %s16168_s2  ;;  %v16182_v29 = vld [vmem:[#allocation19_spill] sm:$0xff]  ;;  %v9070_v1 = vpop.permute.xlu2 %9069 }
0x1114   : > { %9333 = vrot.lane.b32.xlu2 %v16181_v17, %s16168_s2 }
0x1116   : > { %9909 = vrot.lane.b32.xlu1 %v16171_v23, %s16168_s2 }
0x1118   : > { %v8788_v9 = vpop.xlane.xlu1 %8787 }
0x1119   : > { %v8790_v27 = vsub.f32 %v8781_v28, %v8788_v9 }
0x111b   : > { %v8793_v20 = vmul.f32 1.442695, %v8790_v27  ;;  %v9141_v27 = vand.u32 4294901760, %v9140_v25  ;;  %v16185_v25 = vand.u32 4294901760, %v14787_v32 }
0x111c   : > { %9614 = vrot.lane.b32.xlu2 %v16182_v29, %s16168_s2 }
0x111d   : > { %11577 = vpow2.f32 %v8793_v20  ;;  %v14996_v20 = vand.u32 4294901760, %v9070_v1 }
0x111e   : > { %9905 = vrot.lane.b32.xlu1 %v13511_v12, %s16168_s2  ;;  %v14938_v12 = vand.u32 4294901760, %v14741_v59 }
0x1120   : > { %v14951_v6 = vsub.f32 %v14741_v59, %v14938_v12  ;;  %v14969_v59 = vand.u32 4294901760, %v9074_v63 }
0x1122   : > { %v9145_v53 = vand.u32 4294901760, %v14951_v6  ;;  %v14986_v19 = vsub.f32 %v9074_v63, %v14969_v59 }
0x1123   : > { %v14927_v33 = vpop.eup %11577 }
0x1124   : > { %v8798_v23 = vsel %vm6622_vm11, %v14927_v33, 0.0  ;;  %9608 = vrot.lane.b32.xlu2 %v16183_v7, %s16168_s2  ;;  %v9146_v9 = vsub.f32 %v14951_v6, %v9145_v53 }
0x1125   : > { %8799 = vadd.xlane.f32.xlu0 %v8798_v23  ;;  %v9169_v23 = vand.u32 4294901760, %v14986_v19 }
0x1126   : > { %9903 = vrot.lane.b32.xlu1 %v13523_v26, %s16168_s2  ;;  %v9147_v63 = vand.u32 4294901760, %v9146_v9 }
0x112e   : > { %9901 = vrot.lane.b32.xlu1 %v13536_v38, %s16168_s2 }
0x1130   : > { %v8808_v26 = vpop.permute.xlu1 %8807 }
0x1131   : > { %v14953_v14 = vand.u32 4294901760, %v8808_v26 }
0x1133   : > { %v14962_v38 = vsub.f32 %v8808_v26, %v14953_v14  ;;  %8853 = vmatpush.msrb.mxu0 %v14953_v14  ;;  %8985 = vmatpush.msrb.mxu3 %v14953_v14  ;;  %v9158_v26 = vsub.f32 %v14967_v48, %v9157_v0 }
0x1135   : > { %v8911_v28 = vand.u32 4294901760, %v14962_v38  ;;  %8954 = vmatpush.msrb.mxu2 %v14962_v38 }
0x1137   : > { %v8912_v18 = vsub.f32 %v14962_v38, %v8911_v28 }
0x1138   : > { %v8806_v31 = vpop.permute.xlu1 %8805 }
0x1139   : > { %v14988_v52 = vand.u32 4294901760, %v8806_v31  ;;  %9335 = vrot.lane.b32.xlu0 %v16114_v49, %s16168_s2  ;;  %v8913_v17 = vand.u32 4294901760, %v8912_v18  ;;  %v16184_v49 = vand.u32 4294901760, %v14778_v62  ;;  %v15014_v18 = vsub.f32 %v9070_v1, %v14996_v20 }
0x113a   : > { %v9153_v62 = vand.u32 4294901760, %v9152_v34  ;;  %v9159_v1 = vand.u32 4294901760, %v9158_v26 }
0x113b   : > { %v8916_v29 = vsub.f32 %v8806_v31, %v14988_v52  ;;  %8855 = vmatpush.msrb.mxu0 %v14988_v52  ;;  %8914 = vmatpush.msrb.mxu1 %v8913_v17  ;;  %v9164_v17 = vsub.f32 %v14979_v10, %v9163_v60  ;;  %v9181_v55 = vand.u32 4294901760, %v15014_v18 }
0x113c   : > { %8987 = vmatpush.msrb.mxu3 %v14988_v52 }
0x113d   : > { %9006 = vmatpush.msra.mxu0 %v16184_v49  ;;  %v8917_v7 = vand.u32 4294901760, %v8916_v29  ;;  %8957 = vmatpush.msrb.mxu2 %v8916_v29  ;;  %v9165_v34 = vand.u32 4294901760, %v9164_v17 }
0x113e   : > { %9142 = vmatpush.msra.mxu3 %v9141_v27 }
0x113f   : > { %9010 = vmatpush.msra.mxu0 %v16185_v25  ;;  %9105 = vmatpush.msra.mxu2 %v14935_v39  ;;  %v8918_v31 = vsub.f32 %v8916_v29, %v8917_v7  ;;  %v9170_v29 = vsub.f32 %v14986_v19, %v9169_v23 }
0x1140   : > { %9148 = vmatpush.msra.mxu3 %v9147_v63  ;;  %v9072_v9 = vpop.permute.xlu1 %9071 }
0x1141   : > { %9014 = vmatpush.msra.mxu0 %v8887_v56  ;;  %9107 = vmatpush.msra.mxu2 %v14938_v12  ;;  %v15022_v32 = vand.u32 4294901760, %v9072_v9  ;;  %v8919_v27 = vand.u32 4294901760, %v8918_v31  ;;  %v9171_v8 = vand.u32 4294901760, %v9170_v29 }
0x1142   : > { %9154 = vmatpush.msra.mxu3 %v9153_v62  ;;  %9616 = vrot.lane.b32.xlu0 %v16115_v58, %s16168_s2 }
0x1143   : > { %9018 = vmatpush.msra.mxu0 %v8893_v37  ;;  %9109 = vmatpush.msra.mxu2 %v14945_v15  ;;  %v15034_v56 = vsub.f32 %v9072_v9, %v15022_v32 }
0x1144   : > { %9160 = vmatpush.msra.mxu3 %v9159_v1  ;;  %8920 = vmatpush.msrb.mxu1 %v8919_v27 }
0x1145   : > { %9022 = vmatpush.msra.mxu0 %v8899_v22  ;;  %v9175_v58 = vand.u32 4294901760, %v15034_v56  ;;  %9111 = vmatpush.msra.mxu2 %v14947_v50 }
0x1146   : > { %9049 = vmatpush.msra.mxu1 %v14767_v54  ;;  %9166 = vmatpush.msra.mxu3 %v9165_v34  ;;  %v9182_v54 = vsub.f32 %v15014_v18, %v9181_v55 }
0x1147   : > { %9026 = vmatpush.msra.mxu0 %v8905_v44  ;;  %9113 = vmatpush.msra.mxu2 %v14959_v43  ;;  %v9176_v22 = vsub.f32 %v15034_v56, %v9175_v58 }
0x1148   : > { %9051 = vmatpush.msra.mxu1 %v14774_v24  ;;  %9172 = vmatpush.msra.mxu3 %v9171_v8  ;;  %v9183_v44 = vand.u32 4294901760, %v9182_v54  ;;  %v9348_v57 = vpop.permute.xlu1 %9347 }
0x1149   : > { %9030 = vmatpush.msra.mxu0 %v8911_v28  ;;  %9115 = vmatpush.msra.mxu2 %v14969_v59  ;;  %v9177_v24 = vand.u32 4294901760, %v9176_v22 }
0x114a   : > { %9053 = vmatpush.msra.mxu1 %v14782_v41  ;;  %9610 = vrot.lane.b32.xlu0 %v16169_v3, %s16168_s2  ;;  %v9346_v3 = vpop.permute.xlu2 %9345 }
0x114b   : > { %9034 = vmatpush.msra.mxu0 %v8917_v7  ;;  %9117 = vmatpush.msra.mxu2 %v15022_v32 }
0x114c   : > { %9055 = vmatpush.msra.mxu1 %v14789_v13  ;;  %9178 = vmatpush.msra.mxu3 %v9177_v24  ;;  %v9350_v13 = vpop.permute.xlu0 %9349 }
0x114d   : > { %9119 = vmatpush.msra.mxu2 %v14996_v20  ;;  %v9367_v37 = vsel %vm1582_vm1, %v9350_v13, 0 }
0x114e   : > { %9057 = vmatpush.msra.mxu1 %v14800_v47  ;;  %9184 = vmatpush.msra.mxu3 %v9183_v44  ;;  %v15069_v28 = vand.u32 4294901760, %v9367_v37 }
0x1150   : > { %9059 = vmatpush.msra.mxu1 %v14804_v36  ;;  %v15074_v49 = vsub.f32 %v9367_v37, %v15069_v28  ;;  %v9344_v63 = vpop.permute.xlu1 %9343 }
0x1152   : > { %9061 = vmatpush.msra.mxu1 %v14953_v14  ;;  %9913 = vrot.lane.b32.xlu0 %v16170_v45, %s16168_s2  ;;  %v9365_v45 = vsel %vm1582_vm1, %v9348_v57, 0  ;;  %v9412_v31 = vand.u32 4294901760, %v15074_v49 }
0x1153   : > { %v15080_v7 = vand.u32 4294901760, %v9365_v45 }
0x1154   : > { %9063 = vmatpush.msra.mxu1 %v14988_v52  ;;  %v9623_v44 = vpop.permute.xlu0 %9622 }
0x115f   : > { %v8797_v41 = vpop.xlane.xlu2 %8796 }
0x1160   : > { %11579 = vrcp.f32 %v8797_v41 }
0x1166   : > { %v11580_v2 = vpop.eup %11579 }
0x1167   : > { %v8803_v47 = vmul.f32 %v11580_v2, %v14901_v42  ;;  %v9363_v42 = vsel %vm1582_vm1, %v9346_v3, 0  ;;  %v9342_v17 = vpop.permute.xlu2 %9341 }
0x1168   : > { %v15086_v62 = vand.u32 4294901760, %v9363_v42 }
0x1169   : > { %v8830_v38 = vsel %vm6622_vm11, %v8803_v47, 0 }
0x116a   : > { %v8856_v36 = vand.u32 4294901760, %v8830_v38 }
0x116c   : > { %v8857_v14 = vsub.f32 %v8830_v38, %v8856_v36  ;;  %8922 = vmatmul.f32.vlgmr.msrb.gmra.mxu1 %v8856_v36 }
0x116d   : > { %9237 = vmatpush.msrb.mxu1 %v14935_v39 }
0x116e   : > { %8960 = vmatmul.f32.vlgmr.msrb.gmra.mxu2 %v8857_v14  ;;  %v8858_v52 = vand.u32 4294901760, %v8857_v14 }
0x116f   : > { %9239 = vmatpush.msrb.mxu1 %v14938_v12  ;;  %9270 = vmatpush.msrb.mxu2 %v9139_v61  ;;  %v15093_v61 = vsub.f32 %v9365_v45, %v15080_v7 }
0x1170   : > { %8991 = vmatmul.f32.vlgmr.msrb.gmra.mxu3 %v8858_v52  ;;  %v8859_v26 = vsub.f32 %v8857_v14, %v8858_v52 }
0x1171   : > { %9241 = vmatpush.msrb.mxu1 %v14945_v15  ;;  %9274 = vmatpush.msrb.mxu2 %v9145_v53  ;;  %v9361_v53 = vsel %vm1582_vm1, %v9344_v63, 0 }
0x1172   : > { %9313 = vmatpush.msrb.mxu3 %v14935_v39  ;;  %v8860_v25 = vand.u32 4294901760, %v8859_v26  ;;  %v15102_v39 = vsub.f32 %v9363_v42, %v15086_v62  ;;  %v15110_v9 = vand.u32 4294901760, %v9361_v53 }
0x1173   : > { %9243 = vmatpush.msrb.mxu1 %v14947_v50  ;;  %9278 = vmatpush.msrb.mxu2 %v9151_v40  ;;  %v9413_v40 = vsub.f32 %v15074_v49, %v9412_v31 }
0x1174   : > { %9315 = vmatpush.msrb.mxu3 %v14938_v12  ;;  %8861 = vmatmul.f32.vlgmr.msrb.gmra.mxu0 %v8860_v25  ;;  %v9418_v12 = vand.u32 4294901760, %v15093_v61 }
0x1175   : > { %9065 = vmatmul.f32.vlgmr.msra.gmra.mxu1 %v8856_v36  ;;  %9200 = vmatpush.msrb.mxu0 %v14941_v4  ;;  %v9359_v4 = vsel %vm1582_vm1, %v9342_v17, 0 }
0x1176   : > { %9245 = vmatpush.msrb.mxu1 %v14959_v43  ;;  %9282 = vmatpush.msrb.mxu2 %v9157_v0  ;;  %v9340_v0 = vpop.permute.xlu1 %9339  ;;  %v15127_v1 = vand.u32 4294901760, %v9359_v4 }
0x1177   : > { %9317 = vmatpush.msrb.mxu3 %v14945_v15  ;;  %9203 = vmatpush.msrb.mxu0 %v14951_v6  ;;  %v9424_v15 = vand.u32 4294901760, %v15102_v39  ;;  %v9414_v6 = vand.u32 4294901760, %v9413_v40 }
0x1178   : > { %9247 = vmatpush.msrb.mxu1 %v14969_v59  ;;  %9286 = vmatpush.msrb.mxu2 %v9163_v60  ;;  %v15125_v60 = vsub.f32 %v9361_v53, %v15110_v9 }
0x1179   : > { %9319 = vmatpush.msrb.mxu3 %v14947_v50  ;;  %9206 = vmatpush.msrb.mxu0 %v14957_v46  ;;  %v9419_v50 = vsub.f32 %v15093_v61, %v9418_v12  ;;  %v9357_v46 = vsel %vm1582_vm1, %v9340_v0, 0 }
0x117a   : > { %9249 = vmatpush.msrb.mxu1 %v15022_v32  ;;  %9290 = vmatpush.msrb.mxu2 %v9169_v23  ;;  %v9430_v23 = vand.u32 4294901760, %v15125_v60  ;;  %v15145_v27 = vand.u32 4294901760, %v9357_v46 }
0x117b   : > { %9321 = vmatpush.msrb.mxu3 %v14959_v43  ;;  %9209 = vmatpush.msrb.mxu0 %v14967_v48  ;;  %v9338_v43 = vpop.permute.xlu2 %9337  ;;  %v9425_v48 = vsub.f32 %v15102_v39, %v9424_v15  ;;  %v9420_v29 = vand.u32 4294901760, %v9419_v50 }
0x117c   : > { %9251 = vmatpush.msrb.mxu1 %v14996_v20  ;;  %9294 = vmatpush.msrb.mxu2 %v9175_v58  ;;  %v9355_v34 = vsel %vm1582_vm1, %v9338_v43, 0  ;;  %v9431_v8 = vsub.f32 %v15125_v60, %v9430_v23 }
0x117d   : > { %9323 = vmatpush.msrb.mxu3 %v14969_v59  ;;  %9036 = vmatmul.f32.vlgmr.msra.gmra.mxu0 %v8856_v36  ;;  %v15148_v59 = vsub.f32 %v9359_v4, %v15127_v1  ;;  %v15158_v58 = vand.u32 4294901760, %v9355_v34  ;;  %v9640_v4 = vsel %vm1582_vm1, %v9623_v44, 0 }
0x117e   : > { %9415 = vmatpush.xpose.msra.mxu1 %v9414_v6  ;;  %9298 = vmatpush.msrb.mxu2 %v9181_v55  ;;  %v9621_v26 = vpop.permute.xlu1 %9620 }
0x117f   : > { %9212 = vmatpush.msrb.mxu0 %v14979_v10  ;;  %9325 = vmatpush.msrb.mxu3 %v15022_v32  ;;  %v9426_v10 = vand.u32 4294901760, %v9425_v48  ;;  %v15155_v32 = vsub.f32 %v9357_v46, %v15145_v27  ;;  %v9436_v55 = vand.u32 4294901760, %v15148_v59  ;;  %v15209_v46 = vand.u32 4294901760, %v9640_v4 }
0x1180   : > { %v9638_v43 = vsel %vm1582_vm1, %v9621_v26, 0 }
0x1181   : > { %9215 = vmatpush.msrb.mxu0 %v14986_v19  ;;  %9327 = vmatpush.msrb.mxu3 %v14996_v20  ;;  %v9442_v19 = vand.u32 4294901760, %v15155_v32  ;;  %v15167_v20 = vsub.f32 %v9355_v34, %v15158_v58  ;;  %v9437_v22 = vsub.f32 %v15148_v59, %v9436_v55 }
0x1182   : > { %9421 = vmatpush.xpose.msra.mxu1 %v9420_v29 }
0x1183   : > { %9218 = vmatpush.msrb.mxu0 %v15034_v56  ;;  %v9432_v56 = vand.u32 4294901760, %v9431_v8  ;;  %v9448_v54 = vand.u32 4294901760, %v15167_v20  ;;  %v9438_v24 = vand.u32 4294901760, %v9437_v22  ;;  %v9334_v57 = vpop.permute.xlu2 %9333  ;;  %v15221_v8 = vsub.f32 %v9640_v4, %v15209_v46 }
0x1184   : > { %v9351_v47 = vsel %vm1582_vm1, %v9334_v57, 0 }
0x1185   : > { %9221 = vmatpush.msrb.mxu0 %v15014_v18  ;;  %v9443_v18 = vsub.f32 %v15155_v32, %v9442_v19  ;;  %v9449_v41 = vsub.f32 %v15167_v20, %v9448_v54  ;;  %v15187_v36 = vand.u32 4294901760, %v9351_v47 }
0x1186   : > { %9427 = vmatpush.xpose.msra.mxu1 %v9426_v10  ;;  %v9619_v34 = vpop.permute.xlu1 %9618 }
0x1187   : > { %9378 = vmatpush.xpose.msra.mxu0 %v15069_v28  ;;  %v9444_v3 = vand.u32 4294901760, %v9443_v18  ;;  %v9450_v13 = vand.u32 4294901760, %v9449_v41  ;;  %v15191_v52 = vsub.f32 %v9351_v47, %v15187_v36 }
0x1189   : > { %v9395_v25 = vand.u32 4294901760, %v15191_v52 }
0x118a   : > { %9433 = vmatpush.xpose.msra.mxu1 %v9432_v56  ;;  %v9636_v56 = vsel %vm1582_vm1, %v9619_v34, 0 }
0x118b   : > { %9380 = vmatpush.xpose.msra.mxu0 %v15080_v7  ;;  %v9396_v0 = vsub.f32 %v15191_v52, %v9395_v25  ;;  %v9615_v44 = vpop.permute.xlu2 %9614 }
0x118d   : > { %v9397_v48 = vand.u32 4294901760, %v9396_v0 }
0x118e   : > { %9439 = vmatpush.xpose.msra.mxu1 %v9438_v24  ;;  %v9685_v24 = vand.u32 4294901760, %v15221_v8  ;;  %v9613_v41 = vpop.permute.xlu1 %9612 }
0x118f   : > { %9382 = vmatpush.xpose.msra.mxu0 %v15086_v62 }
0x1192   : > { %9445 = vmatpush.xpose.msra.mxu1 %v9444_v3  ;;  %v9686_v3 = vsub.f32 %v15221_v8, %v9685_v24 }
0x1193   : > { %9384 = vmatpush.xpose.msra.mxu0 %v15110_v9 }
0x1196   : > { %9451 = vmatpush.xpose.msra.mxu1 %v9450_v13  ;;  %v9632_v13 = vsel %vm1582_vm1, %v9615_v44, 0  ;;  %v9607_v4 = vpop.permute.xlu1 %9606 }
0x1197   : > { %9386 = vmatpush.xpose.msra.mxu0 %v15127_v1  ;;  %v15266_v57 = vand.u32 4294901760, %v9632_v13 }
0x1198   : > { %v8800_v2 = vpop.xlane.xlu0 %8799 }
0x1199   : > { %11581 = vrcp.f32 %v8800_v2  ;;  %v9687_v2 = vand.u32 4294901760, %v9686_v3 }
0x119b   : > { %9388 = vmatpush.xpose.msra.mxu0 %v15145_v27 }
0x119f   : > { %v11582_v37 = vpop.eup %11581  ;;  %9390 = vmatpush.xpose.msra.mxu0 %v15158_v58 }
0x11a0   : > { %v8804_v38 = vmul.f32 %v11582_v37, %v14927_v33 }
0x11a2   : > { %v9094_v14 = vsel %vm6622_vm11, %v8804_v38, 0 }
0x11a3   : > { %v9120_v45 = vand.u32 4294901760, %v9094_v14 }
0x11a5   : > { %v9121_v42 = vsub.f32 %v9094_v14, %v9120_v45  ;;  %9186 = vmatmul.f32.vlgmr.msra.gmra.mxu3 %v9120_v45 }
0x11a6   : > { %9510 = vmatpush.xpose.msra.mxu3 %v15069_v28 }
0x11a7   : > { %9224 = vmatmul.f32.vlgmr.msrb.gmra.mxu0 %v9121_v42  ;;  %v9122_v63 = vand.u32 4294901760, %v9121_v42 }
0x11a9   : > { %9255 = vmatmul.f32.vlgmr.msrb.gmra.mxu1 %v9122_v63  ;;  %v9123_v33 = vsub.f32 %v9121_v42, %v9122_v63 }
0x11aa   : > { %9512 = vmatpush.xpose.msra.mxu3 %v15080_v7 }
0x11ab   : > { %v9336_v17 = vpop.permute.xlu0 %9335  ;;  %v9124_v53 = vand.u32 4294901760, %v9123_v33 }
0x11ac   : > { %v9353_v40 = vsel %vm1582_vm1, %v9336_v17, 0 }
0x11ad   : > { %v15201_v6 = vand.u32 4294901760, %v9353_v40  ;;  %9125 = vmatmul.f32.vlgmr.msra.gmra.mxu2 %v9124_v53  ;;  %9329 = vmatmul.f32.vlgmr.msrb.gmra.mxu3 %v9120_v45 }
0x11ae   : > { %9473 = vmatpush.xpose.msra.mxu2 %v15074_v49  ;;  %9514 = vmatpush.xpose.msra.mxu3 %v15086_v62  ;;  %v15223_v49 = vand.u32 4294901760, %v9638_v43 }
0x11af   : > { %v15206_v50 = vsub.f32 %v9353_v40, %v15201_v6  ;;  %9392 = vmatpush.xpose.msra.mxu0 %v15201_v6 }
0x11b0   : > { %v15232_v18 = vsub.f32 %v9638_v43, %v15223_v49 }
0x11b1   : > { %v9454_v29 = vand.u32 4294901760, %v15206_v50 }
0x11b2   : > { %9476 = vmatpush.xpose.msra.mxu2 %v15093_v61  ;;  %9516 = vmatpush.xpose.msra.mxu3 %v15110_v9  ;;  %v15237_v61 = vand.u32 4294901760, %v9636_v56 }
0x11b3   : > { %9543 = vmatpush.xpose.msrb.mxu0 %v9412_v31  ;;  %v9455_v10 = vsub.f32 %v15206_v50, %v9454_v29 }
0x11b4   : > { %9398 = vmatmul.f32.vlgmr.msra.gmra.mxu0 %v9397_v48  ;;  %v9617_v22 = vpop.permute.xlu0 %9616 }
0x11b5   : > { %9300 = vmatmul.f32.vlgmr.msrb.gmra.mxu2 %v9120_v45  ;;  %v9456_v31 = vand.u32 4294901760, %v9455_v10  ;;  %v9916_v10 = vpop.permute.xlu1 %9915 }
0x11b6   : > { %9479 = vmatpush.xpose.msra.mxu2 %v15102_v39  ;;  %9518 = vmatpush.xpose.msra.mxu3 %v15127_v1  ;;  %v9691_v39 = vand.u32 4294901760, %v15232_v18 }
0x11b7   : > { %9547 = vmatpush.xpose.msrb.mxu0 %v9418_v12  ;;  %9457 = vmatpush.xpose.msra.mxu1 %v9456_v31  ;;  %v9634_v12 = vsel %vm1582_vm1, %v9617_v22, 0 }
0x11ba   : > { %9482 = vmatpush.xpose.msra.mxu2 %v15125_v60  ;;  %9520 = vmatpush.xpose.msra.mxu3 %v15145_v27 }
0x11bb   : > { %9551 = vmatpush.xpose.msrb.mxu0 %v9424_v15  ;;  %9586 = vmatpush.xpose.msrb.mxu1 %v15069_v28  ;;  %v15251_v28 = vsub.f32 %v9636_v56, %v15237_v61  ;;  %v15253_v15 = vand.u32 4294901760, %v9634_v12  ;;  %v15352_v56 = vand.u32 4294901760, %v9916_v10 }
0x11bc   : > { %9459 = vmatmul.f32.vlgmr.msra.gmra.mxu1 %v15187_v36 }
0x11bd   : > { %v9697_v60 = vand.u32 4294901760, %v15251_v28  ;;  %v15269_v47 = vsub.f32 %v9634_v12, %v15253_v15  ;;  %v15360_v44 = vsub.f32 %v9916_v10, %v15352_v56  ;;  %v16187_v10 = vld [vmem:[#allocation34_spill] sm:$0xff] }
0x11be   : > { %9485 = vmatpush.xpose.msra.mxu2 %v15148_v59  ;;  %9522 = vmatpush.xpose.msra.mxu3 %v15158_v58  ;;  %v9611_v59 = vpop.permute.xlu0 %9610 }
0x11bf   : > { %9555 = vmatpush.xpose.msrb.mxu0 %v9430_v23  ;;  %9588 = vmatpush.xpose.msrb.mxu1 %v15080_v7  ;;  %v9692_v7 = vsub.f32 %v15232_v18, %v9691_v39  ;;  %v9630_v23 = vsel %vm1582_vm1, %v9613_v41, 0  ;;  %v9703_v37 = vand.u32 4294901760, %v15269_v47  ;;  %v9698_v14 = vsub.f32 %v15251_v28, %v9697_v60 }
0x11c0   : > { %v9628_v45 = vsel %vm1582_vm1, %v9611_v59, 0  ;;  %v9971_v41 = vand.u32 4294901760, %v15360_v44 }
0x11c1   : > { %v9693_v38 = vand.u32 4294901760, %v9692_v7  ;;  %v15296_v42 = vand.u32 4294901760, %v9628_v45  ;;  %v9699_v63 = vand.u32 4294901760, %v9698_v14  ;;  %v9704_v26 = vsub.f32 %v15269_v47, %v9703_v37 }
0x11c2   : > { %9488 = vmatpush.xpose.msra.mxu2 %v15155_v32  ;;  %9524 = vmatpush.xpose.msra.mxu3 %v15201_v6  ;;  %v9609_v32 = vpop.permute.xlu2 %9608 }
0x11c3   : > { %9559 = vmatpush.xpose.msrb.mxu0 %v9436_v55  ;;  %9590 = vmatpush.xpose.msrb.mxu1 %v15086_v62  ;;  %v15273_v62 = vand.u32 4294901760, %v9630_v23  ;;  %v15279_v55 = vsub.f32 %v9632_v13, %v15266_v57  ;;  %v9705_v33 = vand.u32 4294901760, %v9704_v26 }
0x11c5   : > { %9528 = vmatmul.f32.vlgmr.msra.gmra.mxu3 %v9395_v25  ;;  %v9626_v25 = vsel %vm1582_vm1, %v9609_v32, 0 }
0x11c6   : > { %9688 = vmatpush.xpose.msrb.mxu3 %v9687_v2  ;;  %9491 = vmatpush.xpose.msra.mxu2 %v15167_v20  ;;  %v9914_v22 = vpop.permute.xlu0 %9913 }
0x11c7   : > { %9563 = vmatpush.xpose.msrb.mxu0 %v9442_v19  ;;  %9592 = vmatpush.xpose.msrb.mxu1 %v15110_v9  ;;  %v15290_v9 = vsub.f32 %v9630_v23, %v15273_v62  ;;  %v9709_v19 = vand.u32 4294901760, %v15279_v55  ;;  %v15362_v3 = vand.u32 4294901760, %v9914_v22 }
0x11c9   : > { %v9715_v20 = vand.u32 4294901760, %v15290_v9  ;;  %v9710_v17 = vsub.f32 %v15279_v55, %v9709_v19  ;;  %v15370_v13 = vsub.f32 %v9914_v22, %v15362_v3 }
0x11ca   : > { %9694 = vmatpush.xpose.msrb.mxu3 %v9693_v38  ;;  %9494 = vmatpush.xpose.msra.mxu2 %v15206_v50 }
0x11cb   : > { %9567 = vmatpush.xpose.msrb.mxu0 %v9448_v54  ;;  %9594 = vmatpush.xpose.msrb.mxu1 %v15127_v1  ;;  %v15308_v1 = vand.u32 4294901760, %v9626_v25  ;;  %v15311_v54 = vsub.f32 %v9628_v45, %v15296_v42  ;;  %v9716_v40 = vsub.f32 %v15290_v9, %v9715_v20  ;;  %v9977_v2 = vand.u32 4294901760, %v15370_v13 }
0x11cd   : > { %9497 = vmatmul.f32.vlgmr.msra.gmra.mxu2 %v15191_v52  ;;  %v9721_v53 = vand.u32 4294901760, %v15311_v54  ;;  %v9711_v52 = vand.u32 4294901760, %v9710_v17  ;;  %v9717_v50 = vand.u32 4294901760, %v9716_v40 }
0x11ce   : > { %9651 = vmatpush.xpose.msrb.mxu2 %v15209_v46  ;;  %9700 = vmatpush.xpose.msrb.mxu3 %v9699_v63 }
0x11cf   : > { %9571 = vmatpush.xpose.msrb.mxu0 %v9454_v29  ;;  %9596 = vmatpush.xpose.msrb.mxu1 %v15145_v27  ;;  %v15322_v27 = vsub.f32 %v9626_v25, %v15308_v1  ;;  %v9722_v43 = vsub.f32 %v15311_v54, %v9721_v53 }
0x11d1   : > { %v9727_v0 = vand.u32 4294901760, %v15322_v27 }
0x11d2   : > { %9653 = vmatpush.xpose.msrb.mxu2 %v15223_v49  ;;  %9706 = vmatpush.xpose.msrb.mxu3 %v9705_v33 }
0x11d3   : > { %9746 = vmatpush.xpose.msra.mxu0 %v15221_v8  ;;  %9598 = vmatpush.xpose.msrb.mxu1 %v15158_v58  ;;  %v9624_v58 = vsel %vm1582_vm1, %v9607_v4, 0  ;;  %v9728_v29 = vsub.f32 %v15322_v27, %v9727_v0 }
0x11d4   : > { %9573 = vmatmul.f32.vlgmr.msrb.gmra.mxu0 %v15187_v36  ;;  %v15339_v48 = vand.u32 4294901760, %v9624_v58 }
0x11d6   : > { %9655 = vmatpush.xpose.msrb.mxu2 %v15237_v61  ;;  %9712 = vmatpush.xpose.msrb.mxu3 %v9711_v52  ;;  %v9667_v34 = vsub.f32 %v9624_v58, %v15339_v48 }
0x11d7   : > { %9749 = vmatpush.xpose.msra.mxu0 %v15232_v18  ;;  %9600 = vmatpush.xpose.msrb.mxu1 %v15201_v6  ;;  %v9723_v6 = vand.u32 4294901760, %v9722_v43 }
0x11d8   : > { %v9668_v31 = vand.u32 4294901760, %v9667_v34 }
0x11da   : > { %9657 = vmatpush.xpose.msrb.mxu2 %v15253_v15  ;;  %9718 = vmatpush.xpose.msrb.mxu3 %v9717_v50  ;;  %v9669_v12 = vsub.f32 %v9667_v34, %v9668_v31 }
0x11db   : > { %9752 = vmatpush.xpose.msra.mxu0 %v15251_v28  ;;  %9783 = vmatpush.xpose.msra.mxu1 %v15209_v46 }
0x11dc   : > { %9602 = vmatmul.f32.vlgmr.msrb.gmra.mxu1 %v15187_v36  ;;  %v9729_v36 = vand.u32 4294901760, %v9728_v29 }
0x11de   : > { %9659 = vmatpush.xpose.msrb.mxu2 %v15266_v57  ;;  %9724 = vmatpush.xpose.msrb.mxu3 %v9723_v6 }
0x11df   : > { %9755 = vmatpush.xpose.msra.mxu0 %v15269_v47  ;;  %9785 = vmatpush.xpose.msra.mxu1 %v15223_v49 }
0x11e2   : > { %9661 = vmatpush.xpose.msrb.mxu2 %v15273_v62  ;;  %9730 = vmatpush.xpose.msrb.mxu3 %v9729_v36 }
0x11e3   : > { %9758 = vmatpush.xpose.msra.mxu0 %v15279_v55  ;;  %9787 = vmatpush.xpose.msra.mxu1 %v15237_v61 }
0x11e5   : > { %9732 = vmatmul.f32.vlgmr.msrb.gmra.mxu3 %v15339_v48 }
0x11e6   : > { %9859 = vmatpush.xpose.msra.mxu3 %v15209_v46  ;;  %9663 = vmatpush.xpose.msrb.mxu2 %v15296_v42  ;;  %v9670_v46 = vand.u32 4294901760, %v9669_v12 }
0x11e7   : > { %9761 = vmatpush.xpose.msra.mxu0 %v15290_v9  ;;  %9789 = vmatpush.xpose.msra.mxu1 %v15253_v15 }
0x11e9   : > { %v8923_v18 = vpop.f32.mrf.mxu1 }
0x11ea   : > { %9861 = vmatpush.xpose.msra.mxu3 %v15223_v49  ;;  %9665 = vmatpush.xpose.msrb.mxu2 %v15308_v1  ;;  %v9972_v49 = vsub.f32 %v15360_v44, %v9971_v41 }
0x11eb   : > { %9764 = vmatpush.xpose.msra.mxu0 %v15311_v54  ;;  %9791 = vmatpush.xpose.msra.mxu1 %v15266_v57 }
0x11ec   : > { %v9973_v8 = vand.u32 4294901760, %v9972_v49  ;;  %v16188_v49 = vld [vmem:[#allocation37_spill] sm:$0xff] }
0x11ed   : > { %9671 = vmatmul.f32.vlgmr.msrb.gmra.mxu2 %v9670_v46 }
0x11ee   : > { %9816 = vmatpush.xpose.msra.mxu2 %v9685_v24  ;;  %9863 = vmatpush.xpose.msra.mxu3 %v15237_v61  ;;  %v9978_v24 = vsub.f32 %v15370_v13, %v9977_v2 }
0x11ef   : > { %9767 = vmatpush.xpose.msra.mxu0 %v15322_v27  ;;  %9793 = vmatpush.xpose.msra.mxu1 %v15273_v62 }
0x11f1   : > { %v8862_v61 = vpop.f32.mrf.mxu0  ;;  %v8961_v28 = vpop.f32.mrf.mxu2 }
0x11f2   : > { %9820 = vmatpush.xpose.msra.mxu2 %v9691_v39  ;;  %9865 = vmatpush.xpose.msra.mxu3 %v15253_v15  ;;  %v8924_v39 = vadd.f32 %v8923_v18, %v8862_v61  ;;  %v9979_v15 = vand.u32 4294901760, %v9978_v24  ;;  %v9066_v59 = vpop.f32.mrf.mxu1 }
0x11f3   : > { %9937 = vmatpush.msrb.mxu0 %v15352_v56  ;;  %9795 = vmatpush.xpose.msra.mxu1 %v15296_v42 }
0x11f4   : > { %9770 = vmatmul.f32.vlgmr.msra.gmra.mxu0 %v9667_v34  ;;  %v8962_v7 = vadd.f32 %v8961_v28, %v8924_v39 }
0x11f5   : > { %9939 = vmatpush.msrb.mxu0 %v15362_v3 }
0x11f6   : > { %9824 = vmatpush.xpose.msra.mxu2 %v9697_v60  ;;  %9867 = vmatpush.xpose.msra.mxu3 %v15266_v57  ;;  %v8992_v60 = vpop.f32.mrf.mxu3 }
0x11f7   : > { %9797 = vmatpush.xpose.msra.mxu1 %v15308_v1  ;;  %v8993_v23 = vadd.f32 %v8992_v60, %v8962_v7  ;;  %v9910_v7 = vpop.permute.xlu1 %9909 }
0x11fa   : > { %9828 = vmatpush.xpose.msra.mxu2 %v9703_v37  ;;  %9869 = vmatpush.xpose.msra.mxu3 %v15273_v62  ;;  %v9037_v57 = vpop.f32.mrf.mxu0 }
0x11fb   : > { %9974 = vmatpush.msrb.mxu1 %v9973_v8  ;;  %v9038_v47 = vadd.f32 %v9037_v57, %v8993_v23  ;;  %v16191_v8 = vld [vmem:[#allocation20_spill] sm:$0xff] }
0x11fc   : > { %9801 = vmatmul.f32.vlgmr.msra.gmra.mxu1 %v9668_v31 }
0x11fd   : > { %9980 = vmatpush.msrb.mxu1 %v9979_v15  ;;  %v9067_v62 = vadd.f32 %v9066_v59, %v9038_v47 }
0x11fe   : > { %9832 = vmatpush.xpose.msra.mxu2 %v9709_v19  ;;  %9871 = vmatpush.xpose.msra.mxu3 %v15296_v42 }
0x11ff   : > { %v9906_v23 = vpop.permute.xlu1 %9905 }
0x1202   : > { %9836 = vmatpush.xpose.msra.mxu2 %v9715_v20  ;;  %9873 = vmatpush.xpose.msra.mxu3 %v15308_v1 }
0x1205   : > { %9875 = vmatmul.f32.vlgmr.msra.gmra.mxu3 %v15339_v48 }
0x1206   : > { %10069 = vmatpush.msrb.mxu3 %v15352_v56  ;;  %9840 = vmatpush.xpose.msra.mxu2 %v9721_v53 }
0x1208   : > { %10071 = vmatpush.msrb.mxu3 %v15362_v3 }
0x120a   : > { %9844 = vmatpush.xpose.msra.mxu2 %v9727_v0  ;;  %v16186_v0 = vld [vmem:[#allocation39_spill] sm:$0xff] }
0x120d   : > { %9846 = vmatmul.f32.vlgmr.msra.gmra.mxu2 %v15339_v48 }
0x120e   : > { %10032 = vmatpush.msrb.mxu2 %v15360_v44 }
0x1210   : > { %10035 = vmatpush.msrb.mxu2 %v15370_v13 }
0x1224   : > { %v9225_v14 = vpop.f32.mrf.mxu0 }
0x1226   : > { %v9256_v32 = vpop.f32.mrf.mxu1 }
0x1228   : > { %v9187_v55 = vpop.f32.mrf.mxu3 }
0x1230   : > { %v9126_v37 = vpop.f32.mrf.mxu2  ;;  %v9330_v63 = vpop.f32.mrf.mxu3 }
0x1231   : > { %v9188_v38 = vadd.f32 %v9187_v55, %v9126_v37  ;;  %v9399_v25 = vpop.f32.mrf.mxu0  ;;  %v15444_v55 = vand.u32 4294901760, %v9910_v7 }
0x1233   : > { %v9226_v45 = vadd.f32 %v9225_v14, %v9188_v38 }
0x1235   : > { %v9257_v9 = vadd.f32 %v9256_v32, %v9226_v45  ;;  %v15451_v45 = vsub.f32 %v9910_v7, %v15444_v55 }
0x1238   : > { %v9301_v19 = vpop.f32.mrf.mxu2 }
0x1239   : > { %v9302_v42 = vadd.f32 %v9301_v19, %v9257_v9  ;;  %v9460_v20 = vpop.f32.mrf.mxu1 }
0x123a   : > { %v9461_v1 = vadd.f32 %v9460_v20, %v9399_v25 }
0x123b   : > { %v15413_v26 = vadd.f32 %v9330_v63, %v9302_v42 }
0x1248   : > { %v9529_v17 = vpop.f32.mrf.mxu3 }
0x1250   : > { %v9498_v54 = vpop.f32.mrf.mxu2 }
0x1251   : > { %v9499_v33 = vadd.f32 %v9498_v54, %v9461_v1  ;;  %v9574_v53 = vpop.f32.mrf.mxu0  ;;  %v9989_v54 = vand.u32 4294901760, %v15451_v45 }
0x1253   : > { %v9530_v27 = vadd.f32 %v9529_v17, %v9499_v33 }
0x1255   : > { %v9575_v52 = vadd.f32 %v9574_v53, %v9530_v27 }
0x1259   : > { %v9603_v40 = vpop.f32.mrf.mxu1 }
0x125a   : > { %v9604_v4 = vadd.f32 %v9603_v40, %v9575_v52 }
0x125c   : > { %v9879_v58 = vsel %vm6622_vm11, %v9604_v4, -inf }
0x125d   : > { %9880 = vmax.xlane.f32.xlu0 %v9879_v58 }
0x1268   : > { %v9733_v43 = vpop.f32.mrf.mxu3 }
0x1270   : > { %v9672_v50 = vpop.f32.mrf.mxu2 }
0x1271   : > { %10179 = vrot.lane.b32.xlu0 %v16186_v0, %s16168_s2  ;;  %v9734_v48 = vadd.f32 %v9733_v43, %v9672_v50  ;;  %v9771_v6 = vpop.f32.mrf.mxu0 }
0x1273   : > { %v9772_v29 = vadd.f32 %v9771_v6, %v9734_v48 }
0x1279   : > { %9907 = vrot.lane.b32.xlu0 %v13502_v5, %s16168_s2  ;;  %v9802_v34 = vpop.f32.mrf.mxu1 }
0x127a   : > { %v9803_v36 = vadd.f32 %v9802_v34, %v9772_v29  ;;  %v9990_v34 = vsub.f32 %v15451_v45, %v9989_v54 }
0x1281   : > { %10177 = vrot.lane.b32.xlu0 %v13649_v35, %s16168_s2  ;;  %v16189_v35 = vld [vmem:[#allocation38_spill] sm:$0xff] }
0x1288   : > { %v9876_v12 = vpop.f32.mrf.mxu3 }
0x1289   : > { %10175 = vrot.lane.b32.xlu0 %v16187_v10, %s16168_s2 }
0x1290   : > { %v9847_v31 = vpop.f32.mrf.mxu2 }
0x1291   : > { %v9848_v22 = vadd.f32 %v9847_v31, %v9803_v36  ;;  %10173 = vrot.lane.b32.xlu0 %v16188_v49, %s16168_s2 }
0x1293   : > { %v9877_v46 = vadd.f32 %v9876_v12, %v9848_v22 }
0x1295   : > { %v9882_v5 = vsel %vm6622_vm11, %v9877_v46, -inf }
0x1296   : > { %9883 = vmax.xlane.f32.xlu2 %v9882_v5 }
0x1299   : > { %10171 = vrot.lane.b32.xlu0 %v16189_v35, %s16168_s2 }
0x12a1   : > { %10165 = vrot.lane.b32.xlu0 %v13698_v16, %s16168_s2 }
0x12a9   : > { %10439 = vrot.lane.b32.xlu0 %v9067_v62, %s16190_s6 }
0x12ae   : > { %9911 = vrot.lane.b32.xlu2 %v16191_v8, %s16168_s2 }
0x12b1   : > { %10433 = vrot.lane.b32.xlu0 %v14881_v21, %s16192_s5  ;;  %v9904_v21 = vpop.permute.xlu1 %9903 }
0x12b2   : > { %v15462_v63 = vand.u32 4294901760, %v9904_v21 }
0x12b4   : > { %v15493_v50 = vsub.f32 %v9904_v21, %v15462_v63 }
0x12b6   : > { %v10007_v49 = vand.u32 4294901760, %v15493_v50 }
0x12b9   : > { %v9902_v9 = vpop.permute.xlu1 %9901 }
0x12ba   : > { %v15480_v53 = vand.u32 4294901760, %v9902_v9 }
0x12bc   : > { %v15510_v36 = vsub.f32 %v9902_v9, %v15480_v53 }
0x12d0   : > { %v9881_v24 = vpop.xlane.xlu0 %9880 }
0x12d1   : > { %v9885_v18 = vsub.f32 %v9604_v4, %v9881_v24  ;;  %v9991_v24 = vand.u32 4294901760, %v9990_v34 }
0x12d3   : > { %v9887_v61 = vmul.f32 1.442695, %v9885_v18  ;;  %v10013_v18 = vand.u32 4294901760, %v15510_v36 }
0x12d5   : > { %11583 = vpow2.f32 %v9887_v61 }
0x12db   : > { %v15436_v39 = vpop.eup %11583 }
0x12dc   : > { %v9891_v15 = vsel %vm6622_vm11, %v15436_v39, 0.0 }
0x12dd   : > { %9892 = vadd.xlane.f32.xlu1 %v9891_v15 }
0x12e3   : > { %v10180_v28 = vpop.permute.xlu0 %10179 }
0x12e4   : > { %v15446_v38 = vand.u32 4294901760, %v10180_v28 }
0x12e6   : > { %v15458_v19 = vsub.f32 %v10180_v28, %v15446_v38 }
0x12e8   : > { %v10235_v58 = vand.u32 4294901760, %v15458_v19 }
0x12ea   : > { %v10236_v12 = vsub.f32 %v15458_v19, %v10235_v58 }
0x12eb   : > { %v9908_v16 = vpop.permute.xlu0 %9907 }
0x12ec   : > { %v15448_v14 = vand.u32 4294901760, %v9908_v16 }
0x12ee   : > { %v15465_v25 = vsub.f32 %v9908_v16, %v15448_v14  ;;  %v10237_v16 = vand.u32 4294901760, %v10236_v12 }
0x12f0   : > { %v9995_v43 = vand.u32 4294901760, %v15465_v25 }
0x12f2   : > { %v9996_v8 = vsub.f32 %v15465_v25, %v9995_v43 }
0x12f3   : > { %v10178_v60 = vpop.permute.xlu0 %10177 }
0x12f4   : > { %v15455_v32 = vand.u32 4294901760, %v10178_v60 }
0x12f6   : > { %10169 = vrot.lane.b32.xlu1 %v13673_v51, %s16168_s2  ;;  %v15453_v51 = vand.u32 4294901760, %v9906_v23  ;;  %v15483_v52 = vsub.f32 %v10178_v60, %v15455_v32  ;;  %v9997_v60 = vand.u32 4294901760, %v9996_v8 }
0x12f8   : > { %v15473_v33 = vsub.f32 %v9906_v23, %v15453_v51  ;;  %v10241_v31 = vand.u32 4294901760, %v15483_v52 }
0x12fa   : > { %v10001_v10 = vand.u32 4294901760, %v15473_v33  ;;  %v10242_v15 = vsub.f32 %v15483_v52, %v10241_v31 }
0x12fb   : > { %v10176_v57 = vpop.permute.xlu0 %10175 }
0x12fc   : > { %v15467_v20 = vand.u32 4294901760, %v10176_v57  ;;  %v10002_v28 = vsub.f32 %v15473_v33, %v10001_v10  ;;  %v10243_v21 = vand.u32 4294901760, %v10242_v15 }
0x12fe   : > { %10431 = vrot.lane.b32.xlu1 %v14861_v11, %s16192_s5  ;;  %v15497_v48 = vsub.f32 %v10176_v57, %v15467_v20  ;;  %v10008_v57 = vsub.f32 %v15493_v50, %v10007_v49 }
0x1300   : > { %v10247_v5 = vand.u32 4294901760, %v15497_v48 }
0x1302   : > { %v10248_v23 = vsub.f32 %v15497_v48, %v10247_v5 }
0x1303   : > { %v10174_v59 = vpop.permute.xlu0 %10173 }
0x1304   : > { %v15485_v40 = vand.u32 4294901760, %v10174_v59  ;;  %v10249_v44 = vand.u32 4294901760, %v10248_v23 }
0x1306   : > { %v15514_v22 = vsub.f32 %v10174_v59, %v15485_v40 }
0x1308   : > { %v10253_v61 = vand.u32 4294901760, %v15514_v22 }
0x1309   : > { %v9884_v47 = vpop.xlane.xlu2 %9883 }
0x130a   : > { %v9886_v62 = vsub.f32 %v9877_v46, %v9884_v47  ;;  %v10003_v47 = vand.u32 4294901760, %v10002_v28  ;;  %v10254_v59 = vsub.f32 %v15514_v22, %v10253_v61 }
0x130b   : > { %v10172_v17 = vpop.permute.xlu0 %10171 }
0x130c   : > { %v9889_v37 = vmul.f32 1.442695, %v9886_v62  ;;  %v15499_v6 = vand.u32 4294901760, %v10172_v17  ;;  %v10014_v62 = vsub.f32 %v15510_v36, %v10013_v18 }
0x130e   : > { %11585 = vpow2.f32 %v9889_v37  ;;  %v15525_v35 = vsub.f32 %v10172_v17, %v15499_v6  ;;  %v10015_v9 = vand.u32 4294901760, %v10014_v62 }
0x1310   : > { %v10259_v7 = vand.u32 4294901760, %v15525_v35 }
0x1311   : > { %v9912_v11 = vpop.permute.xlu2 %9911 }
0x1312   : > { %v15460_v42 = vand.u32 4294901760, %v9912_v11  ;;  %v10260_v37 = vsub.f32 %v15525_v35, %v10259_v7 }
0x1314   : > { %v15469_v1 = vpop.eup %11585  ;;  %v15476_v27 = vsub.f32 %v9912_v11, %v15460_v42  ;;  %9941 = vmatpush.msrb.mxu0 %v15460_v42  ;;  %10073 = vmatpush.msrb.mxu3 %v15460_v42  ;;  %v10255_v11 = vand.u32 4294901760, %v10254_v59  ;;  %v10261_v13 = vand.u32 4294901760, %v10260_v37 }
0x1315   : > { %v9894_v4 = vsel %vm6622_vm11, %v15469_v1, 0.0 }
0x1316   : > { %v9983_v0 = vand.u32 4294901760, %v15476_v27  ;;  %9895 = vadd.xlane.f32.xlu2 %v9894_v4  ;;  %9943 = vmatpush.msrb.mxu0 %v15444_v55 }
0x1317   : > { %10038 = vmatpush.msrb.mxu2 %v15476_v27  ;;  %10075 = vmatpush.msrb.mxu3 %v15444_v55 }
0x1318   : > { %9945 = vmatpush.msrb.mxu0 %v15448_v14  ;;  %v9984_v29 = vsub.f32 %v15476_v27, %v9983_v0  ;;  %v10166_v27 = vpop.permute.xlu0 %10165 }
0x1319   : > { %10041 = vmatpush.msrb.mxu2 %v15451_v45  ;;  %10077 = vmatpush.msrb.mxu3 %v15448_v14  ;;  %v10214_v4 = vand.u32 4294901760, %v10166_v27 }
0x131a   : > { %9947 = vmatpush.msrb.mxu0 %v15453_v51  ;;  %v9985_v46 = vand.u32 4294901760, %v9984_v29 }
0x131b   : > { %10044 = vmatpush.msrb.mxu2 %v15465_v25  ;;  %10079 = vmatpush.msrb.mxu3 %v15453_v51 }
0x131c   : > { %9949 = vmatpush.msrb.mxu0 %v15462_v63  ;;  %9986 = vmatpush.msrb.mxu1 %v9985_v46 }
0x131d   : > { %10047 = vmatpush.msrb.mxu2 %v15473_v33  ;;  %10081 = vmatpush.msrb.mxu3 %v15462_v63 }
0x131e   : > { %9951 = vmatpush.msrb.mxu0 %v15480_v53  ;;  %9992 = vmatpush.msrb.mxu1 %v9991_v24 }
0x131f   : > { %10050 = vmatpush.msrb.mxu2 %v15493_v50  ;;  %10083 = vmatpush.msrb.mxu3 %v15480_v53  ;;  %v10276_v50 = vsub.f32 %v10166_v27, %v10214_v4 }
0x1320   : > { %10102 = vmatpush.msra.mxu0 %v9971_v41  ;;  %9998 = vmatpush.msrb.mxu1 %v9997_v60  ;;  %v10009_v41 = vand.u32 4294901760, %v10008_v57 }
0x1321   : > { %10238 = vmatpush.msra.mxu3 %v10237_v16  ;;  %10053 = vmatpush.msrb.mxu2 %v15510_v36  ;;  %v10277_v36 = vand.u32 4294901760, %v10276_v50 }
0x1322   : > { %10106 = vmatpush.msra.mxu0 %v9977_v2  ;;  %10004 = vmatpush.msrb.mxu1 %v10003_v47 }
0x1323   : > { %10201 = vmatpush.msra.mxu2 %v15446_v38  ;;  %10244 = vmatpush.msra.mxu3 %v10243_v21 }
0x1324   : > { %10110 = vmatpush.msra.mxu0 %v9983_v0  ;;  %10010 = vmatpush.msrb.mxu1 %v10009_v41 }
0x1325   : > { %10203 = vmatpush.msra.mxu2 %v15455_v32  ;;  %10250 = vmatpush.msra.mxu3 %v10249_v44 }
0x1326   : > { %10114 = vmatpush.msra.mxu0 %v9989_v54  ;;  %10016 = vmatpush.msrb.mxu1 %v10015_v9 }
0x1327   : > { %10205 = vmatpush.msra.mxu2 %v15467_v20  ;;  %10256 = vmatpush.msra.mxu3 %v10255_v11 }
0x1328   : > { %10118 = vmatpush.msra.mxu0 %v9995_v43  ;;  %10145 = vmatpush.msra.mxu1 %v15352_v56 }
0x1329   : > { %10207 = vmatpush.msra.mxu2 %v15485_v40  ;;  %10262 = vmatpush.msra.mxu3 %v10261_v13 }
0x132a   : > { %10122 = vmatpush.msra.mxu0 %v10001_v10  ;;  %10147 = vmatpush.msra.mxu1 %v15362_v3 }
0x132b   : > { %10209 = vmatpush.msra.mxu2 %v15499_v6 }
0x132c   : > { %10126 = vmatpush.msra.mxu0 %v10007_v49  ;;  %10149 = vmatpush.msra.mxu1 %v15460_v42 }
0x132e   : > { %10130 = vmatpush.msra.mxu0 %v10013_v18  ;;  %10151 = vmatpush.msra.mxu1 %v15444_v55  ;;  %v10278_v18 = vsub.f32 %v10276_v50, %v10277_v36 }
0x132f   : > { %10167 = vrot.lane.b32.xlu2 %v13685_v30, %s16168_s2  ;;  %s11329_s2 = scalar_lea.hbm %s15852_s26, %s12292_s30 }
0x1330   : > { %10153 = vmatpush.msra.mxu1 %v15448_v14  ;;  %v10279_v60 = vand.u32 4294901760, %v10278_v18  ;;  %v10440_v18 = vpop.permute.xlu0 %10439  ;;  %s11332_s10 = sshll.u32 %s11329_s2, 4  ;;  %s11333_s10 = int_to_ptr.hbm [resolvable:$true] %s11332_s10 }
0x1331   : > { %s11618_s29 = sshra.s32 %s11333_s10, 4  ;;  %s11619_s29 = int_to_ptr.hbm [resolvable:$true] %s11618_s29 }
0x1332   : > { %10155 = vmatpush.msra.mxu1 %v15453_v51  ;;  %p11625_p1 = scmp.lt.s32.totalorder %s11619_s29, %s15852_s26 }
0x1334   : > { %10157 = vmatpush.msra.mxu1 %v15462_v63 }
0x1336   : > { %10159 = vmatpush.msra.mxu1 %v15480_v53 }
0x1350   : > { %v9893_v56 = vpop.xlane.xlu1 %9892 }
0x1351   : > { %11587 = vrcp.f32 %v9893_v56 }
0x1357   : > { %v11588_v3 = vpop.eup %11587 }
0x1358   : > { %v9899_v2 = vmul.f32 %v11588_v3, %v15436_v39 }
0x135a   : > { %v9926_v45 = vsel %vm6622_vm11, %v9899_v2, 0 }
0x135b   : > { %v9952_v42 = vand.u32 4294901760, %v9926_v45 }
0x135d   : > { %v9953_v55 = vsub.f32 %v9926_v45, %v9952_v42  ;;  %10018 = vmatmul.f32.vlgmr.msrb.gmra.mxu1 %v9952_v42 }
0x135e   : > { %10333 = vmatpush.msrb.mxu1 %v15446_v38 }
0x135f   : > { %10056 = vmatmul.f32.vlgmr.msrb.gmra.mxu2 %v9953_v55  ;;  %v9954_v30 = vand.u32 4294901760, %v9953_v55 }
0x1360   : > { %10335 = vmatpush.msrb.mxu1 %v15455_v32 }
0x1361   : > { %10087 = vmatmul.f32.vlgmr.msrb.gmra.mxu3 %v9954_v30  ;;  %v9955_v14 = vsub.f32 %v9953_v55, %v9954_v30  ;;  %v10460_v30 = vld [vmem:[%s15841_s15 + $0x8] sm:$0xff] }
0x1362   : > { %10337 = vmatpush.msrb.mxu1 %v15467_v20 }
0x1363   : > { %v9956_v51 = vand.u32 4294901760, %v9955_v14  ;;  %v10489_v14 = vand.u32 4294901760, %v10460_v30 }
0x1364   : > { %10339 = vmatpush.msrb.mxu1 %v15485_v40 }
0x1365   : > { %9957 = vmatmul.f32.vlgmr.msrb.gmra.mxu0 %v9956_v51  ;;  %10161 = vmatmul.f32.vlgmr.msra.gmra.mxu1 %v9952_v42  ;;  %v10459_v51 = vld [vmem:[%s15841_s15] sm:$0xff] }
0x1366   : > { %10296 = vmatpush.msrb.mxu0 %v15458_v19  ;;  %10341 = vmatpush.msrb.mxu1 %v15499_v6 }
0x1368   : > { %10299 = vmatpush.msrb.mxu0 %v15483_v52  ;;  %v10170_v39 = vpop.permute.xlu1 %10169 }
0x1369   : > { %v10210_v63 = vand.u32 4294901760, %v10170_v39 }
0x136a   : > { %10302 = vmatpush.msrb.mxu0 %v15497_v48 }
0x136b   : > { %v10264_v25 = vsub.f32 %v10170_v39, %v10210_v63  ;;  %10211 = vmatpush.msra.mxu2 %v10210_v63  ;;  %10343 = vmatpush.msrb.mxu1 %v10210_v63  ;;  %v10535_v39 = vsub.f32 %v10460_v30, %v10489_v14 }
0x136c   : > { %10305 = vmatpush.msrb.mxu0 %v15514_v22 }
0x136d   : > { %v10265_v54 = vand.u32 4294901760, %v10264_v25  ;;  %10132 = vmatmul.f32.vlgmr.msra.gmra.mxu0 %v9952_v42 }
0x136e   : > { %10308 = vmatpush.msrb.mxu0 %v15525_v35 }
0x136f   : > { %v10266_v33 = vsub.f32 %v10264_v25, %v10265_v54 }
0x1370   : > { %10311 = vmatpush.msrb.mxu0 %v10264_v25  ;;  %v10536_v25 = vand.u32 4294901760, %v10535_v39 }
0x1371   : > { %v10267_v17 = vand.u32 4294901760, %v10266_v33 }
0x1372   : > { %v10537_v33 = vsub.f32 %v10535_v39, %v10536_v25 }
0x1373   : > { %10268 = vmatpush.msra.mxu3 %v10267_v17 }
0x1374   : > { %v10538_v27 = vand.u32 4294901760, %v10537_v33 }
0x1389   : > { %v9896_v53 = vpop.xlane.xlu2 %9895 }
0x138a   : > { %11589 = vrcp.f32 %v9896_v53 }
0x1390   : > { %v11590_v0 = vpop.eup %11589 }
0x1391   : > { %v9900_v43 = vmul.f32 %v11590_v0, %v15469_v1  ;;  %v10168_v29 = vpop.permute.xlu2 %10167  ;;  %v16194_v0 = vld [vmem:[#allocation23_spill] sm:$0xff] }
0x1392   : > { %v10212_v34 = vand.u32 4294901760, %v10168_v29 }
0x1393   : > { %v10190_v10 = vsel %vm6622_vm11, %v9900_v43, 0 }
0x1394   : > { %v10216_v12 = vand.u32 4294901760, %v10190_v10  ;;  %v10270_v46 = vsub.f32 %v10168_v29, %v10212_v34  ;;  %10213 = vmatpush.msra.mxu2 %v10212_v34  ;;  %10345 = vmatpush.msrb.mxu1 %v10212_v34  ;;  %v16196_v29 = vld [vmem:[#allocation31_spill] sm:$0xff] }
0x1396   : > { %v10217_v49 = vsub.f32 %v10190_v10, %v10216_v12  ;;  %v10271_v8 = vand.u32 4294901760, %v10270_v46  ;;  %10215 = vmatpush.msra.mxu2 %v10214_v4  ;;  %10314 = vmatpush.msrb.mxu0 %v10270_v46  ;;  %v16197_v10 = vld [vmem:[#allocation24_spill] sm:$0xff] }
0x1397   : > { %10347 = vmatpush.msrb.mxu1 %v10214_v4 }
0x1398   : > { %10366 = vmatpush.msrb.mxu2 %v10235_v58  ;;  %10317 = vmatpush.msrb.mxu0 %v10276_v50  ;;  %v10218_v24 = vand.u32 4294901760, %v10217_v49  ;;  %v10272_v1 = vsub.f32 %v10270_v46, %v10271_v8  ;;  %v16195_v50 = vld [vmem:[#allocation22_spill] sm:$0xff] }
0x1399   : > { %10320 = vmatmul.f32.vlgmr.msrb.gmra.mxu0 %v10217_v49  ;;  %v6740_v43 = vadd.f32 %v16195_v50, %v16194_v0  ;;  %v16206_v50 = vld [vmem:[#allocation13_spill] sm:$0xff] }
0x139a   : > { %10370 = vmatpush.msrb.mxu2 %v10241_v31  ;;  %10351 = vmatmul.f32.vlgmr.msrb.gmra.mxu1 %v10218_v24  ;;  %v10273_v15 = vand.u32 4294901760, %v10272_v1  ;;  %v10219_v28 = vsub.f32 %v10217_v49, %v10218_v24  ;;  %v10432_v49 = vpop.permute.xlu1 %10431 }
0x139c   : > { %10374 = vmatpush.msrb.mxu2 %v10247_v5  ;;  %10274 = vmatpush.msra.mxu3 %v10273_v15  ;;  %v10220_v16 = vand.u32 4294901760, %v10219_v28 }
0x139e   : > { %10378 = vmatpush.msrb.mxu2 %v10253_v61  ;;  %10280 = vmatpush.msra.mxu3 %v10279_v60 }
0x139f   : > { %10221 = vmatmul.f32.vlgmr.msra.gmra.mxu2 %v10220_v16  ;;  %10282 = vmatmul.f32.vlgmr.msra.gmra.mxu3 %v10216_v12 }
0x13a0   : > { %10382 = vmatpush.msrb.mxu2 %v10259_v7  ;;  %10409 = vmatpush.msrb.mxu3 %v15446_v38 }
0x13a2   : > { %10386 = vmatpush.msrb.mxu2 %v10265_v54  ;;  %10411 = vmatpush.msrb.mxu3 %v15455_v32 }
0x13a4   : > { %10390 = vmatpush.msrb.mxu2 %v10271_v8  ;;  %10413 = vmatpush.msrb.mxu3 %v15467_v20  ;;  %v16199_v8 = vld [vmem:[#allocation26_spill] sm:$0xff] }
0x13a6   : > { %10394 = vmatpush.msrb.mxu2 %v10277_v36  ;;  %10415 = vmatpush.msrb.mxu3 %v15485_v40  ;;  %v10462_v40 = vld [vmem:[%s15841_s15 + $0x18] sm:$0xff] }
0x13a7   : > { %10396 = vmatmul.f32.vlgmr.msrb.gmra.mxu2 %v10216_v12  ;;  %v10485_v61 = vand.u32 4294901760, %v10462_v40 }
0x13a8   : > { %10417 = vmatpush.msrb.mxu3 %v15499_v6  ;;  %v10461_v6 = vld [vmem:[%s15841_s15 + $0x10] sm:$0xff] }
0x13a9   : > { %v10487_v7 = vand.u32 4294901760, %v10461_v6  ;;  %v10523_v23 = vsub.f32 %v10462_v40, %v10485_v61  ;;  %10486 = vmatpush.msra.mxu0 %v10485_v61 }
0x13aa   : > { %10419 = vmatpush.msrb.mxu3 %v10210_v63  ;;  %v10491_v63 = vand.u32 4294901760, %v10459_v51 }
0x13ab   : > { %v10529_v57 = vsub.f32 %v10461_v6, %v10487_v7  ;;  %v10524_v21 = vand.u32 4294901760, %v10523_v23  ;;  %10569 = vmatpush.msra.mxu2 %v10523_v23  ;;  %10488 = vmatpush.msra.mxu0 %v10487_v7  ;;  %v16204_v6 = vld [vmem:[#allocation32_spill] sm:$0xff] }
0x13ac   : > { %10421 = vmatpush.msrb.mxu3 %v10212_v34  ;;  %v10541_v54 = vsub.f32 %v10459_v51, %v10491_v63  ;;  %v6778_v34 = vadd.f32 %v16196_v29, %v6740_v43 }
0x13ad   : > { %v10530_v47 = vand.u32 4294901760, %v10529_v57  ;;  %10572 = vmatpush.msra.mxu2 %v10529_v57  ;;  %10490 = vmatpush.msra.mxu0 %v10489_v14 }
0x13ae   : > { %10423 = vmatpush.msrb.mxu3 %v10214_v4  ;;  %v10542_v17 = vand.u32 4294901760, %v10541_v54  ;;  %v6809_v36 = vadd.f32 %v16197_v10, %v6778_v34 }
0x13af   : > { %10425 = vmatmul.f32.vlgmr.msrb.gmra.mxu3 %v10216_v12  ;;  %v10531_v59 = vsub.f32 %v10529_v57, %v10530_v47  ;;  %10575 = vmatpush.msra.mxu2 %v10535_v39  ;;  %v16198_v12 = vld [vmem:[#allocation29_spill] sm:$0xff] }
0x13b0   : > { %10603 = vmatpush.msra.mxu3 %v10485_v61  ;;  %10492 = vmatpush.msra.mxu0 %v10491_v63  ;;  %v10543_v53 = vsub.f32 %v10541_v54, %v10542_v17  ;;  %v6854_v46 = vadd.f32 %v16198_v12, %v6809_v36 }
0x13b1   : > { %v10532_v44 = vand.u32 4294901760, %v10531_v59  ;;  %10578 = vmatpush.msra.mxu2 %v10541_v54 }
0x13b2   : > { %10605 = vmatpush.msra.mxu3 %v10487_v7  ;;  %10638 = vmatpush.msrb.mxu0 %v10524_v21  ;;  %v10544_v4 = vand.u32 4294901760, %v10543_v53  ;;  %v6883_v24 = vadd.f32 %v16199_v8, %v6854_v46  ;;  %v16207_v8 = vld [vmem:[#allocation14_spill] sm:$0xff] }
0x13b4   : > { %10607 = vmatpush.msra.mxu3 %v10489_v14  ;;  %10642 = vmatpush.msrb.mxu0 %v10530_v47  ;;  %v10453_v1 = vsel %vm1582_vm1, %v6883_v24, %v10432_v49 }
0x13b5   : > { %v10455_v15 = vsel %vm4137_vm2, %v10453_v1, %v10440_v18 }
0x13b6   : > { %10609 = vmatpush.msra.mxu3 %v10491_v63  ;;  %10646 = vmatpush.msrb.mxu0 %v10536_v25 }
0x13b8   : > { %10650 = vmatpush.msrb.mxu0 %v10542_v17 }
0x13da   : > { %v10019_v19 = vpop.f32.mrf.mxu1 }
0x13e2   : > { %v9958_v52 = vpop.f32.mrf.mxu0  ;;  %v10057_v38 = vpop.f32.mrf.mxu2 }
0x13e3   : > { %v10020_v58 = vadd.f32 %v10019_v19, %v9958_v52  ;;  %v10162_v20 = vpop.f32.mrf.mxu1 }
0x13e4   : > { %v10088_v31 = vpop.f32.mrf.mxu3 }
0x13e5   : > { %v10058_v48 = vadd.f32 %v10057_v38, %v10020_v58 }
0x13e7   : > { %v10089_v32 = vadd.f32 %v10088_v31, %v10058_v48  ;;  %v16200_v31 = vld [vmem:[#allocation30_spill] sm:$0xff] }
0x13ea   : > { %v10133_v22 = vpop.f32.mrf.mxu0 }
0x13eb   : > { %v10134_v5 = vadd.f32 %v10133_v22, %v10089_v32  ;;  %v16201_v32 = vld [vmem:[#allocation18_spill] sm:$0xff] }
0x13ec   : > { %v6980_v22 = vadd.f32 %v16201_v32, %v16200_v31  ;;  %v10746_v32 = vld [vmem:[%s15846_s20 + $0x18] sm:$0xff] }
0x13ed   : > { %v10163_v35 = vadd.f32 %v10162_v20, %v10134_v5  ;;  %v16202_v5 = vld [vmem:[#allocation16_spill] sm:$0xff] }
0x13ee   : > { %v7018_v20 = vadd.f32 %v16202_v5, %v6980_v22  ;;  %v10769_v22 = vand.u32 4294901760, %v10746_v32  ;;  %v10745_v5 = vld [vmem:[%s15846_s20 + $0x10] sm:$0xff] }
0x13ef   : > { %10447 = vrot.lane.b32.xlu1 %v10163_v35, %s16193_s9  ;;  %v16203_v35 = vld [vmem:[#allocation28_spill] sm:$0xff] }
0x13f0   : > { %v7049_v40 = vadd.f32 %v16203_v35, %v7018_v20  ;;  %10770 = vmatpush.msrb.mxu2 %v10769_v22  ;;  %v10807_v20 = vsub.f32 %v10746_v32, %v10769_v22  ;;  %v10771_v35 = vand.u32 4294901760, %v10745_v5 }
0x13f2   : > { %10772 = vmatpush.msrb.mxu2 %v10771_v35 }
0x13f7   : > { %10441 = vrot.lane.b32.xlu1 %v15413_v26, %s16190_s6  ;;  %v10525_v26 = vsub.f32 %v10523_v23, %v10524_v21  ;;  %v16205_v23 = vld [vmem:[#allocation40_spill] sm:$0xff]  ;;  %s831_s6 = sand.u32 1, %s11658_s3  }
0x13f8   : > { %s11435_s1 = sshll.u32 %s831_s6, 4  ;;  %s11318_s7 = scalar_lea.sflag [#allocation3], %s831_s6 }
0x13f9   : > { %v10526_v62 = vand.u32 4294901760, %v10525_v26  ;;  %s833_s0 = scalar_lea.vmem [#allocation2], %s11435_s1  ;;  %s11620_s1 = scalar_lea.hbm %s11619_s29, 16 }
0x13fa   : > { %p11621_p12 = scmp.ne.s32.totalorder %s11619_s29, %s11620_s1  ;;  %p11626_p2 = scmp.lt.s32.totalorder %s11624_s28, %s11620_s1 }
0x13fb   : > { %10527 = vmatpush.msra.mxu1 %v10526_v62 }
0x13fc   : > { %p11622_p13 = pnand %p11621_p12, %p11849_p5  ;;  %p11627_p3 = por %p11626_p2, %p11625_p1 }
0x13fd   : > { %10533 = vmatpush.msra.mxu1 %v10532_v44 }
0x13fe   : > { %p11623_p0 = pneg %p11622_p13 }
0x13ff   : > { %10539 = vmatpush.msra.mxu1 %v10538_v27 }
0x1400   : > { %p11628_p4 = pnand %p11627_p3, %p11623_p0 }
0x1401   : > { %10545 = vmatpush.msra.mxu1 %v10544_v4 }
0x1403   : > { %10673 = vmatpush.msrb.mxu1 %v10485_v61  ;;  %v7094_v61 = vadd.f32 %v16204_v6, %v7049_v40  ;;  %v10744_v40 = vld [vmem:[%s15846_s20 + $0x8] sm:$0xff]  ;;  %v10808_v6 = vand.u32 4294901760, %v10807_v20 }
0x1405   : > { %10675 = vmatpush.msrb.mxu1 %v10487_v7  ;;  %v10434_v7 = vpop.permute.xlu0 %10433  ;;  %v7123_v57 = vadd.f32 %v16205_v23, %v7094_v61  ;;  %v10813_v61 = vsub.f32 %v10745_v5, %v10771_v35  ;;  %v10743_v23 = vld [vmem:[%s15846_s20] sm:$0xff] }
0x1407   : > { %10677 = vmatpush.msrb.mxu1 %v10489_v14  ;;  %v10454_v47 = vsel %vm1582_vm1, %v7123_v57, %v10434_v7  ;;  %v10773_v7 = vand.u32 4294901760, %v10744_v40  ;;  %v10809_v57 = vsub.f32 %v10807_v20, %v10808_v6 }
0x1409   : > { %10679 = vmatpush.msrb.mxu1 %v10491_v63  ;;  %10774 = vmatpush.msrb.mxu2 %v10773_v7 }
0x1416   : > { %v10321_v9 = vpop.f32.mrf.mxu0 }
0x1417   : > { %v10352_v56 = vpop.f32.mrf.mxu1 }
0x1422   : > { %v10222_v41 = vpop.f32.mrf.mxu2  ;;  %v10283_v37 = vpop.f32.mrf.mxu3 }
0x1423   : > { %v10284_v11 = vadd.f32 %v10283_v37, %v10222_v41 }
0x1425   : > { %v10322_v13 = vadd.f32 %v10321_v9, %v10284_v11 }
0x1427   : > { %v10353_v3 = vadd.f32 %v10352_v56, %v10322_v13 }
0x142a   : > { %v10397_v2 = vpop.f32.mrf.mxu2 }
0x142b   : > { %v10398_v45 = vadd.f32 %v10397_v2, %v10353_v3  ;;  %v11514_v3 = vld [vmem:[%s15845_s19] ss:$0 sm:$0xff] }
0x1432   : > { %v10426_v42 = vpop.f32.mrf.mxu3 }
0x1433   : > { %v10427_v55 = vadd.f32 %v10426_v42, %v10398_v45 }
0x1435   : > { %10449 = vrot.lane.b32.xlu2 %v10427_v55, %s16193_s9  ;;  %s11330_s9 = sshll.u32 %s833_s0, 4  ;;  %s11331_s9 = int_to_ptr.vmem [resolvable:$true] %s11330_s9 }
0x1461   : > { %v10448_v28 = vpop.permute.xlu1 %10447 }
0x1462   : > { %v10457_v16 = vsel %vm4140_vm3, %v10455_v15, %v10448_v28  ;;  %v16208_v15 = vld [vmem:[#allocation12_spill] sm:$0xff] }
0x1463   : > { %v10468_v60 = vsel %vm905_vm0, %v10457_v16, 0 }
0x1464   : > { %v10493_v19 = vand.u32 4294901760, %v10468_v60 }
0x1466   : > { %v10494_v52 = vsub.f32 %v10468_v60, %v10493_v19  ;;  %10547 = vmatmul.f32.vlgmr.msra.gmra.mxu1 %v10493_v19 }
0x1467   : > { %10887 = vmatpush.msra.mxu1 %v10769_v22 }
0x1468   : > { %v10495_v58 = vand.u32 4294901760, %v10494_v52  ;;  %10581 = vmatmul.f32.vlgmr.msra.gmra.mxu2 %v10494_v52 }
0x1469   : > { %v10442_v21 = vpop.permute.xlu1 %10441  ;;  %10889 = vmatpush.msra.mxu1 %v10771_v35 }
0x146a   : > { %v10496_v38 = vsub.f32 %v10494_v52, %v10495_v58  ;;  %10613 = vmatmul.f32.vlgmr.msra.gmra.mxu3 %v10495_v58  ;;  %v10456_v26 = vsel %vm4137_vm2, %v10454_v47, %v10442_v21  ;;  %v10814_v21 = vand.u32 4294901760, %v10813_v61  ;;  %v10819_v47 = vsub.f32 %v10744_v40, %v10773_v7 }
0x146b   : > { %10891 = vmatpush.msra.mxu1 %v10773_v7 }
0x146c   : > { %v10497_v48 = vand.u32 4294901760, %v10496_v38 }
0x146e   : > { %10498 = vmatmul.f32.vlgmr.msra.gmra.mxu0 %v10497_v48 }
0x146f   : > { %10853 = vmatpush.msra.mxu0 %v10807_v20  ;;  %v10981_v20 = vld [vmem:[%s15848_s22 + $0x30] sm:$0xff] }
0x1470   : > { %v15705_v40 = vand.u32 4294901760, %v10981_v20 }
0x1471   : > { %10856 = vmatpush.msra.mxu0 %v10813_v61 }
0x1473   : > { %10859 = vmatpush.msra.mxu0 %v10819_v47 }
0x148f   : > { %v10450_v59 = vpop.permute.xlu2 %10449 }
0x1490   : > { %v10458_v62 = vsel %vm4140_vm3, %v10456_v26, %v10450_v59  ;;  %v10775_v26 = vand.u32 4294901760, %v10743_v23  ;;  %v10810_v59 = vand.u32 4294901760, %v10809_v57  ;;  %v10979_v57 = vld [vmem:[%s15848_s22 + $0x20] sm:$0xff] }
0x1491   : > { %v10471_v44 = vsel %vm905_vm0, %v10458_v62, 0  ;;  %v10815_v62 = vsub.f32 %v10813_v61, %v10814_v21 }
0x1492   : > { %v10501_v41 = vand.u32 4294901760, %v10471_v44  ;;  %10776 = vmatpush.msrb.mxu2 %v10775_v26  ;;  %10893 = vmatpush.msra.mxu1 %v10775_v26 }
0x1493   : > { %10811 = vmatpush.msrb.mxu3 %v10810_v59  ;;  %v15732_v59 = vand.u32 4294901760, %v10979_v57 }
0x1494   : > { %v10502_v37 = vsub.f32 %v10471_v44, %v10501_v41  ;;  %10551 = vmatmul.f32.gmra.mxu1 %v10501_v41  ;;  %v10820_v44 = vand.u32 4294901760, %v10819_v47  ;;  %10922 = vmatpush.msra.mxu2 %v10808_v6  ;;  %v10980_v6 = vld [vmem:[%s15848_s22 + $0x28] sm:$0xff] }
0x1496   : > { %10586 = vmatmul.f32.gmra.mxu2 %v10502_v37  ;;  %v10503_v11 = vand.u32 4294901760, %v10502_v37 }
0x1497   : > { %10926 = vmatpush.msra.mxu2 %v10814_v21 }
0x1498   : > { %10619 = vmatmul.f32.gmra.mxu3 %v10503_v11  ;;  %v10504_v9 = vsub.f32 %v10502_v37, %v10503_v11  ;;  %v10816_v37 = vand.u32 4294901760, %v10815_v62  ;;  %v10821_v11 = vsub.f32 %v10819_v47, %v10820_v44  ;;  %v10978_v62 = vld [vmem:[%s15848_s22 + $0x18] sm:$0xff] }
0x1499   : > { %10930 = vmatpush.msra.mxu2 %v10820_v44 }
0x149a   : > { %v10505_v13 = vand.u32 4294901760, %v10504_v9  ;;  %10817 = vmatpush.msrb.mxu3 %v10816_v37 }
0x149c   : > { %10506 = vmatmul.f32.gmra.mxu0 %v10505_v13  ;;  %10681 = vmatmul.f32.vlgmr.msrb.gmra.mxu1 %v10493_v19  ;;  %v10822_v13 = vand.u32 4294901760, %v10821_v11  ;;  %v11061_v11 = vsub.f32 %v10979_v57, %v15732_v59 }
0x149e   : > { %10823 = vmatpush.msrb.mxu3 %v10822_v13  ;;  %v10977_v13 = vld [vmem:[%s15848_s22 + $0x10] sm:$0xff] }
0x14a4   : > { %10652 = vmatmul.f32.vlgmr.msrb.gmra.mxu0 %v10493_v19  ;;  %10685 = vmatmul.f32.gmra.mxu1 %v10501_v41 }
0x14ac   : > { %10656 = vmatmul.f32.gmra.mxu0 %v10501_v41  ;;  %v10825_v41 = vsub.f32 %v10743_v23, %v10775_v26  ;;  %v15717_v23 = vand.u32 4294901760, %v10980_v6 }
0x14ae   : > { %v10826_v9 = vand.u32 4294901760, %v10825_v41  ;;  %10862 = vmatpush.msra.mxu0 %v10825_v41 }
0x14b0   : > { %10934 = vmatpush.msra.mxu2 %v10826_v9 }
0x14e3   : > { %v10548_v56 = vpop.f32.mrf.mxu1 }
0x14eb   : > { %v10499_v2 = vpop.f32.mrf.mxu0  ;;  %v10582_v14 = vpop.f32.mrf.mxu2 }
0x14ec   : > { %v10500_v45 = vadd.f32 %v11514_v3, %v10499_v2 }
0x14ed   : > { %v10614_v63 = vpop.f32.mrf.mxu3 }
0x14ee   : > { %v10549_v55 = vadd.f32 %v10548_v56, %v10500_v45  ;;  %v10827_v56 = vsub.f32 %v10825_v41, %v10826_v9  ;;  %v15744_v9 = vand.u32 4294901760, %v10978_v62 }
0x14f0   : > { %v10583_v51 = vadd.f32 %v10582_v14, %v10549_v55 }
0x14f2   : > { %v10615_v25 = vadd.f32 %v10614_v63, %v10583_v51 }
0x1511   : > { %v10552_v42 = vpop.f32.mrf.mxu1 }
0x1519   : > { %v10507_v30 = vpop.f32.mrf.mxu0  ;;  %v10682_v33 = vpop.f32.mrf.mxu1 }
0x151a   : > { %v10508_v39 = vadd.f32 %v11514_v3, %v10507_v30  ;;  %v10587_v53 = vpop.f32.mrf.mxu2  ;;  %v10828_v3 = vand.u32 4294901760, %v10827_v56 }
0x151b   : > { %v10620_v29 = vpop.f32.mrf.mxu3 }
0x151c   : > { %v10553_v54 = vadd.f32 %v10552_v42, %v10508_v39  ;;  %10829 = vmatpush.msrb.mxu3 %v10828_v3 }
0x151e   : > { %v10588_v4 = vadd.f32 %v10587_v53, %v10553_v54  ;;  %10957 = vmatpush.msra.mxu3 %v10769_v22  ;;  %v11515_v53 = vld [vmem:[%s15850_s24 + $0x1] ss:$0 sm:$0xff]  ;;  %v10982_v22 = vld [vmem:[%s15848_s22 + $0x38] sm:$0xff] }
0x151f   : > { %v15697_v5 = vand.u32 4294901760, %v10982_v22 }
0x1520   : > { %v10621_v34 = vadd.f32 %v10620_v29, %v10588_v4  ;;  %10959 = vmatpush.msra.mxu3 %v10771_v35 }
0x1521   : > { %v10653_v17 = vpop.f32.mrf.mxu0  ;;  %v10686_v46 = vpop.f32.mrf.mxu1  ;;  %v15703_v35 = vsub.f32 %v10982_v22, %v15697_v5  ;;  %11002 = vmatpush.msrb.mxu0 %v15697_v5 }
0x1522   : > { %v10654_v27 = vadd.f32 %v10653_v17, %v10615_v25  ;;  %10961 = vmatpush.msra.mxu3 %v10773_v7  ;;  %v15714_v7 = vsub.f32 %v10981_v20, %v15705_v40 }
0x1523   : > { %v11044_v61 = vand.u32 4294901760, %v15703_v35  ;;  %11004 = vmatpush.msrb.mxu0 %v15705_v40 }
0x1524   : > { %v10683_v0 = vadd.f32 %v10682_v33, %v10654_v27  ;;  %10963 = vmatpush.msra.mxu3 %v10775_v26  ;;  %v11050_v47 = vand.u32 4294901760, %v15714_v7  ;;  %v15729_v26 = vsub.f32 %v10980_v6, %v15717_v23 }
0x1525   : > { %v11045_v21 = vsub.f32 %v15703_v35, %v11044_v61  ;;  %11006 = vmatpush.msrb.mxu0 %v15717_v23 }
0x1526   : > { %v10689_v43 = vadd.f32 %v10683_v0, %v16206_v50  ;;  %v11516_v50 = vld [vmem:[%s15851_s25 + $0x1] ss:$0 sm:$0xff]  ;;  %v11051_v41 = vsub.f32 %v15714_v7, %v11050_v47  ;;  %v11056_v37 = vand.u32 4294901760, %v15729_v26 }
0x1527   : > { %v11046_v44 = vand.u32 4294901760, %v11045_v21  ;;  %11008 = vmatpush.msrb.mxu0 %v15732_v59 }
0x1528   : > { %v10693_v10 = vsel %vm905_vm0, %v10689_v43, 0.0  ;;  %v11052_v56 = vand.u32 4294901760, %v11051_v41  ;;  %v11057_v3 = vsub.f32 %v15729_v26, %v11056_v37 }
0x1529   : > { %v10657_v36 = vpop.f32.mrf.mxu0  ;;  %10694 = vadd.xlane.f32.xlu0 %v10693_v10  ;;  %11047 = vmatpush.msrb.mxu1 %v11046_v44 }
0x152a   : > { %v10658_v12 = vadd.f32 %v10657_v36, %v10621_v34  ;;  %11010 = vmatpush.msrb.mxu0 %v15744_v9 }
0x152b   : > { %11053 = vmatpush.msrb.mxu1 %v11052_v56 }
0x152c   : > { %v10687_v49 = vadd.f32 %v10686_v46, %v10658_v12 }
0x152e   : > { %v10690_v24 = vadd.f32 %v10687_v49, %v16207_v8 }
0x1530   : > { %v10696_v1 = vsel %vm905_vm0, %v10690_v24, 0.0 }
0x1531   : > { %10697 = vadd.xlane.f32.xlu1 %v10696_v1 }
0x159c   : > { %v10695_v18 = vpop.xlane.xlu0 %10694 }
0x159d   : > { %v10699_v28 = vmul.f32 %v10695_v18, %v16208_v15 }
0x159f   : > { %v15653_v16 = vsub.f32 %v10689_v43, %v10699_v28 }
0x15a1   : > { %v10703_v60 = vmul.f32 %v15653_v16, %v15653_v16 }
0x15a3   : > { %v10705_v19 = vsel %vm905_vm0, %v10703_v60, 0.0 }
0x15a4   : > { %10706 = vadd.xlane.f32.xlu2 %v10705_v19  ;;  %v10698_v52 = vpop.xlane.xlu1 %10697 }
0x15a5   : > { %v10700_v58 = vmul.f32 %v10698_v52, %v16208_v15 }
0x15a7   : > { %v15659_v38 = vsub.f32 %v10690_v24, %v10700_v58 }
0x15a9   : > { %v10704_v48 = vmul.f32 %v15659_v38, %v15659_v38 }
0x15ab   : > { %v10708_v31 = vsel %vm905_vm0, %v10704_v48, 0.0 }
0x15ac   : > { %10709 = vadd.xlane.f32.xlu0 %v10708_v31 }
0x1617   : > { %v10707_v2 = vpop.xlane.xlu2 %10706 }
0x1618   : > { %v10711_v45 = vmul.f32 %v10707_v2, %v16208_v15  ;;  %v11062_v2 = vand.u32 4294901760, %v11061_v11 }
0x161a   : > { %v10713_v42 = vadd.f32 1e-05, %v10711_v45  ;;  %v11011_v45 = vand.u32 4294901760, %v10977_v13 }
0x161c   : > { %11591 = vrsqrt.f32 %v10713_v42  ;;  %vm10721_vm13 = vweird.f32 %v10713_v42  ;;  %11012 = vmatpush.msrb.mxu0 %v11011_v45 }
0x161f   : > { %v10710_v55 = vpop.xlane.xlu0 %10709 }
0x1620   : > { %v10712_v30 = vmul.f32 %v10710_v55, %v16208_v15  ;;  %v10976_v55 = vld [vmem:[%s15848_s22 + $0x8] sm:$0xff] }
0x1622   : > { %v11592_v14 = vpop.eup %11591  ;;  %v10714_v51 = vadd.f32 1e-05, %v10712_v30  ;;  %v11058_v30 = vand.u32 4294901760, %v11057_v3 }
0x1623   : > { %v10716_v39 = vmul.f32 %v11592_v14, %v10713_v42  ;;  %vm10722_vm12 = vweird.f32 %v11592_v14  ;;  %v11067_v42 = vsub.f32 %v10978_v62, %v15744_v9 }
0x1624   : > { %11593 = vrsqrt.f32 %v10714_v51  ;;  %vm10723_vm14 = vmor %vm10721_vm13, %vm10722_vm12  ;;  %vm10731_vm1 = vweird.f32 %v10714_v51  ;;  %11059 = vmatpush.msrb.mxu1 %v11058_v30  ;;  %v11518_v30 = vld [vmem:[%s15849_s23] ss:$0 sm:$0xff] }
0x1625   : > { %v10717_v63 = vmul.f32 %v11592_v14, %v10716_v39  ;;  %v11013_v39 = vand.u32 4294901760, %v10976_v55 }
0x1627   : > { %v10718_v25 = vmul.f32 0.5, %v10717_v63  ;;  %v11068_v63 = vand.u32 4294901760, %v11067_v42  ;;  %11014 = vmatpush.msrb.mxu0 %v11013_v39 }
0x1629   : > { %v10719_v54 = vsub.f32 1.5, %v10718_v25  ;;  %v10975_v25 = vld [vmem:[%s15848_s22] sm:$0xff] }
0x162a   : > { %v11594_v33 = vpop.eup %11593 }
0x162b   : > { %v10720_v17 = vmul.f32 %v11592_v14, %v10719_v54  ;;  %v10726_v27 = vmul.f32 %v11594_v33, %v10714_v51  ;;  %vm10732_vm15 = vweird.f32 %v11594_v33  ;;  %v11073_v51 = vsub.f32 %v10977_v13, %v11011_v45 }
0x162c   : > { %vm10733_vm2 = vmor %vm10731_vm1, %vm10732_vm15 }
0x162d   : > { %v10724_v4 = vsel %vm10723_vm14, %v11592_v14, %v10720_v17  ;;  %v10727_v0 = vmul.f32 %v11594_v33, %v10726_v27  ;;  %v11063_v14 = vsub.f32 %v11061_v11, %v11062_v2  ;;  %v11079_v17 = vsub.f32 %v10976_v55, %v11013_v39 }
0x162e   : > { %v10735_v43 = vmul.f32 %v10724_v4, %v15653_v16  ;;  %v11015_v27 = vand.u32 4294901760, %v10975_v25 }
0x162f   : > { %v10728_v29 = vmul.f32 0.5, %v10727_v0  ;;  %v11064_v54 = vand.u32 4294901760, %v11063_v14  ;;  %v11080_v0 = vand.u32 4294901760, %v11079_v17 }
0x1630   : > { %v10738_v34 = vmul.f32 %v11515_v53, %v10735_v43  ;;  %11016 = vmatpush.msrb.mxu0 %v11015_v27 }
0x1631   : > { %v10729_v10 = vsub.f32 1.5, %v10728_v29  ;;  %11065 = vmatpush.msrb.mxu1 %v11064_v54 }
0x1632   : > { %v15685_v36 = vadd.f32 %v11516_v50, %v10738_v34  ;;  %v11081_v34 = vsub.f32 %v11079_v17, %v11080_v0 }
0x1633   : > { %v10730_v12 = vmul.f32 %v11594_v33, %v10729_v10 }
0x1634   : > { %v10752_v46 = vsel %vm905_vm0, %v15685_v36, 0 }
0x1635   : > { %v10734_v49 = vsel %vm10733_vm2, %v11594_v33, %v10730_v12  ;;  %v10777_v8 = vand.u32 4294901760, %v10752_v46  ;;  %v11074_v33 = vand.u32 4294901760, %v11073_v51  ;;  %v11082_v12 = vand.u32 4294901760, %v11081_v34 }
0x1636   : > { %v10736_v24 = vmul.f32 %v10734_v49, %v15659_v38 }
0x1637   : > { %10831 = vmatmul.f32.vlgmr.msrb.gmra.mxu3 %v10777_v8  ;;  %v10778_v1 = vsub.f32 %v10752_v46, %v10777_v8  ;;  %v11075_v4 = vsub.f32 %v11073_v51, %v11074_v33 }
0x1638   : > { %v10739_v18 = vmul.f32 %v11515_v53, %v10736_v24  ;;  %11151 = vmatpush.msrb.mxu3 %v15697_v5  ;;  %v11069_v53 = vsub.f32 %v11067_v42, %v11068_v63  ;;  %v11517_v24 = vld [vmem:[%s15847_s21] ss:$0 sm:$0xff] }
0x1639   : > { %10865 = vmatmul.f32.vlgmr.msra.gmra.mxu0 %v10778_v1  ;;  %v10779_v28 = vand.u32 4294901760, %v10778_v1  ;;  %v11076_v29 = vand.u32 4294901760, %v11075_v4 }
0x163a   : > { %v15690_v16 = vadd.f32 %v11516_v50, %v10739_v18  ;;  %11153 = vmatpush.msrb.mxu3 %v15705_v40  ;;  %v11085_v50 = vsub.f32 %v10975_v25, %v11015_v27  ;;  %v11070_v43 = vand.u32 4294901760, %v11069_v53  ;;  %11190 = vmatpush.msra.mxu0 %v11044_v61 }
0x163b   : > { %10897 = vmatmul.f32.vlgmr.msra.gmra.mxu1 %v10779_v28  ;;  %v10780_v60 = vsub.f32 %v10778_v1, %v10779_v28 }
0x163c   : > { %v10755_v19 = vsel %vm905_vm0, %v15690_v16, 0  ;;  %11155 = vmatpush.msrb.mxu3 %v15717_v23  ;;  %v11086_v10 = vand.u32 4294901760, %v11085_v50  ;;  %11071 = vmatpush.msrb.mxu1 %v11070_v43 }
0x163d   : > { %v10781_v52 = vand.u32 4294901760, %v10780_v60  ;;  %v10785_v58 = vand.u32 4294901760, %v10755_v19  ;;  %11194 = vmatpush.msra.mxu0 %v11050_v47 }
0x163e   : > { %11157 = vmatpush.msrb.mxu3 %v15732_v59  ;;  %v11087_v46 = vsub.f32 %v11085_v50, %v11086_v10  ;;  %11077 = vmatpush.msrb.mxu1 %v11076_v29 }
0x163f   : > { %10782 = vmatmul.f32.vlgmr.msrb.gmra.mxu2 %v10781_v52  ;;  %10835 = vmatmul.f32.gmra.mxu3 %v10785_v58  ;;  %v10786_v48 = vsub.f32 %v10755_v19, %v10785_v58 }
0x1640   : > { %11109 = vmatpush.msrb.mxu2 %v15703_v35  ;;  %11159 = vmatpush.msrb.mxu3 %v15744_v9  ;;  %v11088_v49 = vand.u32 4294901760, %v11087_v46 }
0x1641   : > { %10870 = vmatmul.f32.gmra.mxu0 %v10786_v48  ;;  %v10787_v31 = vand.u32 4294901760, %v10786_v48  ;;  %11083 = vmatpush.msrb.mxu1 %v11082_v12 }
0x1642   : > { %11112 = vmatpush.msrb.mxu2 %v15714_v7  ;;  %11161 = vmatpush.msrb.mxu3 %v11011_v45 }
0x1643   : > { %10903 = vmatmul.f32.gmra.mxu1 %v10787_v31  ;;  %v10788_v38 = vsub.f32 %v10786_v48, %v10787_v31  ;;  %11198 = vmatpush.msra.mxu0 %v11056_v37 }
0x1644   : > { %11115 = vmatpush.msrb.mxu2 %v15729_v26  ;;  %11163 = vmatpush.msrb.mxu3 %v11013_v39 }
0x1645   : > { %v10789_v32 = vand.u32 4294901760, %v10788_v38  ;;  %11089 = vmatpush.msrb.mxu1 %v11088_v49  ;;  %11202 = vmatpush.msra.mxu0 %v11062_v2 }
0x1646   : > { %11118 = vmatpush.msrb.mxu2 %v11061_v11  ;;  %11165 = vmatpush.msrb.mxu3 %v11015_v27 }
0x1647   : > { %10790 = vmatmul.f32.gmra.mxu2 %v10789_v32  ;;  %10965 = vmatmul.f32.vlgmr.msra.gmra.mxu3 %v10777_v8 }
0x1648   : > { %11121 = vmatpush.msrb.mxu2 %v11067_v42  ;;  %11237 = vmatpush.msra.mxu1 %v15697_v5 }
0x1649   : > { %11206 = vmatpush.msra.mxu0 %v11068_v63 }
0x164a   : > { %11124 = vmatpush.msrb.mxu2 %v11073_v51  ;;  %11239 = vmatpush.msra.mxu1 %v15705_v40 }
0x164b   : > { %11210 = vmatpush.msra.mxu0 %v11074_v33 }
0x164c   : > { %11127 = vmatpush.msrb.mxu2 %v11079_v17  ;;  %11241 = vmatpush.msra.mxu1 %v15717_v23 }
0x164d   : > { %11214 = vmatpush.msra.mxu0 %v11080_v0 }
0x164e   : > { %11130 = vmatpush.msrb.mxu2 %v11085_v50  ;;  %11243 = vmatpush.msra.mxu1 %v15732_v59 }
0x164f   : > { %10936 = vmatmul.f32.vlgmr.msra.gmra.mxu2 %v10777_v8  ;;  %10969 = vmatmul.f32.gmra.mxu3 %v10785_v58 }
0x1650   : > { %11245 = vmatpush.msra.mxu1 %v15744_v9  ;;  %11218 = vmatpush.msra.mxu0 %v11086_v10 }
0x1652   : > { %11247 = vmatpush.msra.mxu1 %v11011_v45 }
0x1654   : > { %11249 = vmatpush.msra.mxu1 %v11013_v39 }
0x1656   : > { %11251 = vmatpush.msra.mxu1 %v11015_v27 }
0x1657   : > { %10940 = vmatmul.f32.gmra.mxu2 %v10785_v58 }
0x16b6   : > { %v10866_v19 = vpop.f32.mrf.mxu0 }
0x16b8   : > { %v10898_v31 = vpop.f32.mrf.mxu1 }
0x16ba   : > { %v10832_v8 = vpop.f32.mrf.mxu3 }
0x16be   : > { %v10871_v35 = vpop.f32.mrf.mxu0 }
0x16c0   : > { %v10904_v7 = vpop.f32.mrf.mxu1 }
0x16c2   : > { %v10783_v1 = vpop.f32.mrf.mxu2  ;;  %v10836_v28 = vpop.f32.mrf.mxu3 }
0x16c3   : > { %v10784_v18 = vadd.f32 %v11517_v24, %v10783_v1 }
0x16c5   : > { %v10833_v60 = vadd.f32 %v10832_v8, %v10784_v18 }
0x16c7   : > { %v10867_v48 = vadd.f32 %v10866_v19, %v10833_v60 }
0x16c9   : > { %v10899_v32 = vadd.f32 %v10898_v31, %v10867_v48 }
0x16ca   : > { %v10791_v52 = vpop.f32.mrf.mxu2  ;;  %v10966_v22 = vpop.f32.mrf.mxu3 }
0x16cb   : > { %v10792_v58 = vadd.f32 %v11517_v24, %v10791_v52 }
0x16cd   : > { %v10837_v38 = vadd.f32 %v10836_v28, %v10792_v58 }
0x16cf   : > { %v10872_v6 = vadd.f32 %v10871_v35, %v10837_v38 }
0x16d1   : > { %v10905_v57 = vadd.f32 %v10904_v7, %v10872_v6 }
0x16d2   : > { %v10937_v5 = vpop.f32.mrf.mxu2  ;;  %v10970_v62 = vpop.f32.mrf.mxu3 }
0x16d3   : > { %v10938_v20 = vadd.f32 %v10937_v5, %v10899_v32 }
0x16d5   : > { %v10967_v40 = vadd.f32 %v10966_v22, %v10938_v20 }
0x16d7   : > { %v10973_v61 = vmax.f32 %v10967_v40, 0.0 }
0x16d9   : > { %v10988_v23 = vsel %vm6622_vm11, %v10973_v61, 0 }
0x16da   : > { %v11017_v21 = vand.u32 4294901760, %v10988_v23  ;;  %v10941_v47 = vpop.f32.mrf.mxu2 }
0x16db   : > { %v10942_v26 = vadd.f32 %v10941_v47, %v10905_v57 }
0x16dc   : > { %v11018_v59 = vsub.f32 %v10988_v23, %v11017_v21  ;;  %11091 = vmatmul.f32.vlgmr.msrb.gmra.mxu1 %v11017_v21 }
0x16dd   : > { %v10971_v44 = vadd.f32 %v10970_v62, %v10942_v26 }
0x16de   : > { %v11019_v41 = vand.u32 4294901760, %v11018_v59  ;;  %11133 = vmatmul.f32.vlgmr.msrb.gmra.mxu2 %v11018_v59 }
0x16df   : > { %v10974_v37 = vmax.f32 %v10971_v44, 0.0 }
0x16e0   : > { %v11020_v11 = vsub.f32 %v11018_v59, %v11019_v41  ;;  %11169 = vmatmul.f32.vlgmr.msrb.gmra.mxu3 %v11019_v41  ;;  %v11519_v41 = vld [vmem:[%s15850_s24 + $0x2] ss:$0 sm:$0xff] }
0x16e1   : > { %v10991_v9 = vsel %vm6622_vm11, %v10974_v37, 0 }
0x16e2   : > { %v11021_v13 = vand.u32 4294901760, %v11020_v11  ;;  %v11025_v56 = vand.u32 4294901760, %v10991_v9  ;;  %v11520_v11 = vld [vmem:[%s15851_s25 + $0x2] ss:$0 sm:$0xff] }
0x16e4   : > { %11022 = vmatmul.f32.vlgmr.msrb.gmra.mxu0 %v11021_v13  ;;  %11095 = vmatmul.f32.gmra.mxu1 %v11025_v56  ;;  %v11026_v3 = vsub.f32 %v10991_v9, %v11025_v56 }
0x16e6   : > { %11138 = vmatmul.f32.gmra.mxu2 %v11026_v3  ;;  %v11027_v2 = vand.u32 4294901760, %v11026_v3 }
0x16e8   : > { %11175 = vmatmul.f32.gmra.mxu3 %v11027_v2  ;;  %v11028_v45 = vsub.f32 %v11026_v3, %v11027_v2 }
0x16ea   : > { %v11029_v42 = vand.u32 4294901760, %v11028_v45 }
0x16ec   : > { %11030 = vmatmul.f32.gmra.mxu0 %v11029_v42  ;;  %11253 = vmatmul.f32.vlgmr.msra.gmra.mxu1 %v11017_v21 }
0x16f4   : > { %11220 = vmatmul.f32.vlgmr.msra.gmra.mxu0 %v11017_v21  ;;  %11257 = vmatmul.f32.gmra.mxu1 %v11025_v56 }
0x16fc   : > { %11224 = vmatmul.f32.gmra.mxu0 %v11025_v56 }
0x1759   : > { %v11092_v55 = vpop.f32.mrf.mxu1 }
0x1761   : > { %v11023_v14 = vpop.f32.mrf.mxu0  ;;  %v11096_v39 = vpop.f32.mrf.mxu1 }
0x1762   : > { %v11024_v51 = vadd.f32 %v11518_v30, %v11023_v14  ;;  %v11134_v25 = vpop.f32.mrf.mxu2 }
0x1763   : > { %v11170_v27 = vpop.f32.mrf.mxu3 }
0x1764   : > { %v11093_v63 = vadd.f32 %v11092_v55, %v11024_v51 }
0x1766   : > { %v11135_v33 = vadd.f32 %v11134_v25, %v11093_v63 }
0x1768   : > { %v11171_v53 = vadd.f32 %v11170_v27, %v11135_v33 }
0x1769   : > { %v11031_v54 = vpop.f32.mrf.mxu0  ;;  %v11254_v0 = vpop.f32.mrf.mxu1 }
0x176a   : > { %v11032_v17 = vadd.f32 %v11518_v30, %v11031_v54  ;;  %v11139_v29 = vpop.f32.mrf.mxu2 }
0x176b   : > { %v11176_v46 = vpop.f32.mrf.mxu3 }
0x176c   : > { %v11097_v4 = vadd.f32 %v11096_v39, %v11032_v17 }
0x176e   : > { %v11140_v34 = vadd.f32 %v11139_v29, %v11097_v4 }
0x1770   : > { %v11177_v49 = vadd.f32 %v11176_v46, %v11140_v34 }
0x1771   : > { %v11221_v50 = vpop.f32.mrf.mxu0  ;;  %v11258_v18 = vpop.f32.mrf.mxu1 }
0x1772   : > { %v11222_v43 = vadd.f32 %v11221_v50, %v11171_v53 }
0x1774   : > { %v11255_v10 = vadd.f32 %v11254_v0, %v11222_v43 }
0x1776   : > { %v11261_v12 = vadd.f32 %v11255_v10, %v15685_v36 }
0x1778   : > { %v11265_v8 = vsel %vm905_vm0, %v11261_v12, 0.0 }
0x1779   : > { %v11225_v24 = vpop.f32.mrf.mxu0  ;;  %11266 = vadd.xlane.f32.xlu1 %v11265_v8 }
0x177a   : > { %v11226_v1 = vadd.f32 %v11225_v24, %v11177_v49 }
0x177c   : > { %v11259_v28 = vadd.f32 %v11258_v18, %v11226_v1 }
0x177e   : > { %v11262_v60 = vadd.f32 %v11259_v28, %v15690_v16 }
0x1780   : > { %v11268_v19 = vsel %vm905_vm0, %v11262_v60, 0.0 }
0x1781   : > { %11269 = vadd.xlane.f32.xlu2 %v11268_v19 }
0x17ec   : > { %v11267_v52 = vpop.xlane.xlu1 %11266 }
0x17ed   : > { %v11271_v58 = vmul.f32 %v11267_v52, %v16208_v15 }
0x17ef   : > { %v11273_v48 = vsub.f32 %v11261_v12, %v11271_v58 }
0x17f1   : > { %v11275_v31 = vmul.f32 %v11273_v48, %v11273_v48 }
0x17f3   : > { %v11277_v36 = vsel %vm905_vm0, %v11275_v31, 0.0 }
0x17f4   : > { %11278 = vadd.xlane.f32.xlu0 %v11277_v36  ;;  %v11270_v38 = vpop.xlane.xlu2 %11269 }
0x17f5   : > { %v11272_v32 = vmul.f32 %v11270_v38, %v16208_v15 }
0x17f7   : > { %v11274_v22 = vsub.f32 %v11262_v60, %v11272_v32 }
0x17f9   : > { %v11276_v5 = vmul.f32 %v11274_v22, %v11274_v22 }
0x17fb   : > { %v11280_v20 = vsel %vm905_vm0, %v11276_v5, 0.0 }
0x17fc   : > { %11281 = vadd.xlane.f32.xlu1 %v11280_v20 }
0x1867   : > { %v11279_v16 = vpop.xlane.xlu0 %11278 }
0x1868   : > { %v11283_v35 = vmul.f32 %v11279_v16, %v16208_v15 }
0x186a   : > { %v11285_v40 = vadd.f32 1e-05, %v11283_v35 }
0x186c   : > { %11595 = vrsqrt.f32 %v11285_v40  ;;  %vm11293_vm4 = vweird.f32 %v11285_v40 }
0x186f   : > { %v11282_v6 = vpop.xlane.xlu1 %11281 }
0x1870   : > { %v11284_v61 = vmul.f32 %v11282_v6, %v16208_v15 }
0x1872   : > { %v11596_v7 = vpop.eup %11595  ;;  %v11286_v23 = vadd.f32 1e-05, %v11284_v61 }
0x1873   : > { %v11288_v57 = vmul.f32 %v11596_v7, %v11285_v40  ;;  %vm11294_vm3 = vweird.f32 %v11596_v7 }
0x1874   : > { %11597 = vrsqrt.f32 %v11286_v23  ;;  %vm11295_vm5 = vmor %vm11293_vm4, %vm11294_vm3  ;;  %vm11303_vm7 = vweird.f32 %v11286_v23 }
0x1875   : > { %v11289_v21 = vmul.f32 %v11596_v7, %v11288_v57 }
0x1877   : > { %v11290_v47 = vmul.f32 0.5, %v11289_v21 }
0x1879   : > { %v11291_v26 = vsub.f32 1.5, %v11290_v47 }
0x187a   : > { %v11598_v59 = vpop.eup %11597 }
0x187b   : > { %v11292_v62 = vmul.f32 %v11596_v7, %v11291_v26  ;;  %v11298_v44 = vmul.f32 %v11598_v59, %v11286_v23  ;;  %vm11304_vm6 = vweird.f32 %v11598_v59 }
0x187c   : > { %vm11305_vm8 = vmor %vm11303_vm7, %vm11304_vm6 }
0x187d   : > { %v11296_v15 = vsel %vm11295_vm5, %v11596_v7, %v11292_v62  ;;  %v11299_v37 = vmul.f32 %v11598_v59, %v11298_v44 }
0x187e   : > { %v11307_v9 = vmul.f32 %v11296_v15, %v11273_v48 }
0x187f   : > { %v11300_v13 = vmul.f32 0.5, %v11299_v37 }
0x1880   : > { %v11310_v56 = vmul.f32 %v11519_v41, %v11307_v9 }
0x1881   : > { %v11301_v3 = vsub.f32 1.5, %v11300_v13 }
0x1882   : > { %v11313_v2 = vadd.f32 %v11520_v11, %v11310_v56 }
0x1883   : > { %v11302_v45 = vmul.f32 %v11598_v59, %v11301_v3 }
0x1884   : > { %11315 = vst.msk [vmem:[%s833_s0] sm:$0xff] %vm905_vm0, %v11313_v2 }
0x1885   : > { %v11306_v42 = vsel %vm11305_vm8, %v11598_v59, %v11302_v45 }
0x1886   : > { %v11308_v55 = vmul.f32 %v11306_v42, %v11274_v22 }
0x1888   : > { %v11311_v30 = vmul.f32 %v11519_v41, %v11308_v55 }
0x188a   : > { %v11314_v14 = vadd.f32 %v11520_v11, %v11311_v30 }
0x188c   : > { %11316 = vst.msk [vmem:[%s833_s0 + $0x8] sm:$0xff] %vm905_vm0, %v11314_v14 }
0x188d   : > { %11631 = shalt.err (!%p11628_p4)
}
0x188e   : > { %s11675_s6 = smov 128  }
0x188f   : > { %11458 = dma.vmem_to_hbm [thread:$0]  (%p11849_p5), %s11331_s9, 256, %s11333_s10, %s11318_s7, %s11675_s6, %s11675_s6, %s16192_s5  }
0x1890 PF: > { %s16210_s0 = sld [smem:[#allocation7_spill]] }
0x1891   : > { %s16211_s11 = sld [smem:[#allocation5_spill]] }
0x1896   : > { %p11464_p7 = scmp.ge.s32.totalorder %s16210_s0, 2 }
0x1897   : > { %s11347_s27 = sand.u32 1, %s16211_s11  }
0x1898   : > { %p11461_p8 = pnand %p11464_p7, %p11853_p6  ;;  %s11348_s4 = scalar_lea.sflag [#allocation3], %s11347_s27 }
0x189a   : > { %p11462_p9 = pneg %p11461_p8 }
0x189c   : > { %11649 = dma.done.wait (%p11462_p9), %s11348_s4, 256  }
0x189d   : > { %11651 = vsyncadd (%p11462_p9), %s11348_s4, 4294967040  ;;  %s16213_s28 = sld [smem:[#allocation8_spill]]  ;;  %s16216_s27 = smov %s11658_s3 }
0x189e   : > { %s16214_s29 = sld [smem:[#allocation6_spill]] }
0x189f   : > { %s16215_s7 = sld [smem:[#allocation9_spill]] }
0x18a3   : > { %p36_p10 = scmp.ge.s32.totalorder %s16213_s28, 4  }
0x18a4   : > { %s16217_s3 = smov %s16214_s29 }
0x18a5   :  { %38 = sbr.rel (!%p36_p10) target bundleno = 17 (0x11), region = 168 }
0x18aa   :  { %11354 = vsyncpa [#allocation3], 1 }
0x18ab   :  { %11356 = vsyncpa [#allocation3 + $0x1], 1 }

</bundles_post_ra>
